<compile_context>
chip_gen: v5e
topology: v5e:2x2
jax: 0.10.0
libtpu: 0.0.40
codegen_flags: <defaults>
</compile_context>

<pallas_src>
import jax
import jax.numpy as jnp
from jax.experimental import pallas as pl
from jax.experimental.pallas import tpu as pltpu


# ---------------------------------------------------------------------------
# In-kernel helpers
# ---------------------------------------------------------------------------
def _same_conv_block(buf, src, k, pad, w_ref, sc_ref, bs_ref, rows):
    """Conv1d(stride=1, padding='same') + folded BN + ReLU for one sample.

    buf   : (rows_src + 2*pad, cin) f32 VMEM scratch (zero-padded line buffer)
    src   : (rows_src, cin) f32 value (previous layer output)
    w_ref : (k, cin, cout) bf16 weight ref
    rows  : number of output rows actually needed (<= rows_src)
    """
    rows_src, _ = src.shape
    buf[...] = jnp.zeros_like(buf)
    buf[pad:pad + rows_src, :] = src
    acc = jnp.dot(buf[0:rows, :].astype(jnp.bfloat16), w_ref[0],
                  preferred_element_type=jnp.float32)
    for t in range(1, k):
        acc = acc + jnp.dot(buf[t:t + rows, :].astype(jnp.bfloat16), w_ref[t],
                            preferred_element_type=jnp.float32)
    return jnp.maximum(acc * sc_ref[...] + bs_ref[...], 0.0)


# ---------------------------------------------------------------------------
# Pallas kernels
# ---------------------------------------------------------------------------
def small_branch_kernel(x_ref, w0_ref, w1_ref, ssc_ref, sbs_ref,
                        w2_ref, sc2_ref, bs2_ref,
                        w3_ref, sc3_ref, bs3_ref,
                        w4_ref, sc4_ref, bs4_ref,
                        o_ref, pad32, pad64a, pad64b):
    # ---- stem Conv1d(1->32, k=49, stride=6) + BN + ReLU (phase-blocked) ----
    xr = x_ref[0]                                          # (63, 96) f32
    a0 = xr[0:62, :].astype(jnp.bfloat16)
    a1 = xr[1:63, :].astype(jnp.bfloat16)
    y = jnp.dot(a0, w0_ref[...], preferred_element_type=jnp.float32)
    y = y + jnp.dot(a1, w1_ref[...], preferred_element_type=jnp.float32)
    y = jnp.maximum(y * ssc_ref[...] + sbs_ref[...], 0.0)  # (62, 16*32)
    # ---- MaxPool1d(16): max over the 16 phase lane-blocks ----
    pooled = y[:, 0:32]
    for p in range(1, 16):
        pooled = jnp.maximum(pooled, y[:, p * 32:(p + 1) * 32])  # (62, 32)
    # Dropout(0.5): inference-mode identity
    # ---- three Conv1d(k=7, padding='same') + BN + ReLU ----
    h = _same_conv_block(pad32, pooled, 7, 3, w2_ref, sc2_ref, bs2_ref, 62)
    h = _same_conv_block(pad64a, h, 7, 3, w3_ref, sc3_ref, bs3_ref, 62)
    # only the first 56 rows survive MaxPool1d(8) -> compute just those
    h = _same_conv_block(pad64b, h, 7, 3, w4_ref, sc4_ref, bs4_ref, 56)
    # ---- MaxPool1d(8): 7 windows of 8 consecutive rows ----
    for o in range(7):
        o_ref[0, o:o + 1, :] = jnp.max(h[8 * o:8 * o + 8, :], axis=0,
                                       keepdims=True)


def large_branch_kernel(x_ref, v0_ref, v1_ref, lsc_ref, lbs_ref,
                        w2_ref, sc2_ref, bs2_ref,
                        w3_ref, sc3_ref, bs3_ref,
                        w4_ref, sc4_ref, bs4_ref,
                        o_ref, pad_a, pad_b):
    # ---- stem Conv1d(1->64, k=399, stride=50) + BN + ReLU (phase-blocked) ----
    xr = x_ref[0]                                          # (15, 400) f32
    a0 = xr[0:14, :].astype(jnp.bfloat16)
    a1 = xr[1:15, :].astype(jnp.bfloat16)
    y = jnp.dot(a0, v0_ref[...], preferred_element_type=jnp.float32)
    y = y + jnp.dot(a1, v1_ref[...], preferred_element_type=jnp.float32)
    y = jnp.maximum(y * lsc_ref[...] + lbs_ref[...], 0.0)  # (14, 8*64)
    # ---- MaxPool1d(8): max over the 8 phase lane-blocks ----
    pooled = y[:, 0:64]
    for p in range(1, 8):
        pooled = jnp.maximum(pooled, y[:, p * 64:(p + 1) * 64])  # (14, 64)
    # Dropout(0.5): inference-mode identity
    # ---- three Conv1d(k=5, padding='same') + BN + ReLU ----
    h = _same_conv_block(pad_a, pooled, 5, 2, w2_ref, sc2_ref, bs2_ref, 14)
    h = _same_conv_block(pad_b, h, 5, 2, w3_ref, sc3_ref, bs3_ref, 14)
    # only the first 12 rows survive MaxPool1d(4)
    h = _same_conv_block(pad_a, h, 5, 2, w4_ref, sc4_ref, bs4_ref, 12)
    # ---- MaxPool1d(4) ----
    for o in range(3):
        o_ref[0, o:o + 1, :] = jnp.max(h[4 * o:4 * o + 4, :], axis=0,
                                       keepdims=True)


def fc_kernel(x_ref, w1_ref, b1_ref, w2_ref, b2_ref, o_ref, acc_ref):
    # fc1 (K split over the grid) + ReLU + fc2, all in one kernel.
    k = pl.program_id(0)

    @pl.when(k == 0)
    def _init():
        acc_ref[...] = jnp.zeros_like(acc_ref)

    acc_ref[...] += jnp.dot(x_ref[...], w1_ref[...],
                            preferred_element_type=jnp.float32)

    @pl.when(k == pl.num_programs(0) - 1)
    def _finalize():
        h = jnp.maximum(acc_ref[...] + b1_ref[...], 0.0)          # fc1 + ReLU
        o_ref[...] = (jnp.dot(h.astype(jnp.bfloat16), w2_ref[...],
                              preferred_element_type=jnp.float32)
                      + b2_ref[...])


# ---------------------------------------------------------------------------
# pallas_call wrappers
# ---------------------------------------------------------------------------
def _const_spec(a):
    zeros = (0,) * a.ndim
    return pl.BlockSpec(a.shape, lambda *_: zeros)


def small_branch(x96, p):
    n = x96.shape[0]
    w0, w1, ssc, sbs = p["s_stem"]
    w2, sc2, bs2 = p["s2"]
    w3, sc3, bs3 = p["s3"]
    w4, sc4, bs4 = p["s4"]
    consts = [w0, w1, ssc, sbs, w2, sc2, bs2, w3, sc3, bs3, w4, sc4, bs4]
    return pl.pallas_call(
        small_branch_kernel,
        out_shape=jax.ShapeDtypeStruct((n, 7, 64), jnp.float32),
        grid=(n,),
        in_specs=[pl.BlockSpec((1, 63, 96), lambda i: (i, 0, 0))]
                 + [_const_spec(a) for a in consts],
        out_specs=pl.BlockSpec((1, 7, 64), lambda i: (i, 0, 0)),
        scratch_shapes=[pltpu.VMEM((68, 32), jnp.float32),
                        pltpu.VMEM((68, 64), jnp.float32),
                        pltpu.VMEM((68, 64), jnp.float32)],
        compiler_params=pltpu.CompilerParams(
            dimension_semantics=("parallel",)),
    )(x96, *consts)


def large_branch(x400, p):
    n = x400.shape[0]
    v0, v1, lsc, lbs = p["l_stem"]
    w2, sc2, bs2 = p["l2"]
    w3, sc3, bs3 = p["l3"]
    w4, sc4, bs4 = p["l4"]
    consts = [v0, v1, lsc, lbs, w2, sc2, bs2, w3, sc3, bs3, w4, sc4, bs4]
    return pl.pallas_call(
        large_branch_kernel,
        out_shape=jax.ShapeDtypeStruct((n, 3, 64), jnp.float32),
        grid=(n,),
        in_specs=[pl.BlockSpec((1, 15, 400), lambda i: (i, 0, 0))]
                 + [_const_spec(a) for a in consts],
        out_specs=pl.BlockSpec((1, 3, 64), lambda i: (i, 0, 0)),
        scratch_shapes=[pltpu.VMEM((18, 64), jnp.float32),
                        pltpu.VMEM((18, 64), jnp.float32)],
        compiler_params=pltpu.CompilerParams(
            dimension_semantics=("parallel",)),
    )(x400, *consts)


def fc_head(feats, p):
    b = feats.shape[0]
    w1, b1 = p["fc1"]                 # (12160, 128) bf16, (1, 128) f32
    w2, b2 = p["fc2"]                 # (128, 1) bf16, (1, 1) f32
    k_total, n1 = w1.shape
    ksplit = 5                        # 12160 = 5 * 2432, 2432 = 19 * 128
    kt = k_total // ksplit
    x_bf = feats.astype(jnp.bfloat16)
    return pl.pallas_call(
        fc_kernel,
        out_shape=jax.ShapeDtypeStruct((b, w2.shape[1]), jnp.float32),
        grid=(ksplit,),
        in_specs=[
            pl.BlockSpec((b, kt), lambda k: (0, k)),
            pl.BlockSpec((kt, n1), lambda k: (k, 0)),
            _const_spec(b1),
            _const_spec(w2),
            _const_spec(b2),
        ],
        out_specs=pl.BlockSpec((b, w2.shape[1]), lambda k: (0, 0)),
        scratch_shapes=[pltpu.VMEM((b, n1), jnp.float32)],
        compiler_params=pltpu.CompilerParams(
            dimension_semantics=("arbitrary",)),
    )(x_bf, w1, b1, w2, b2)


# ---------------------------------------------------------------------------
# Parameter init (deterministic, synthetic), BN folding, stem re-arrangement
# ---------------------------------------------------------------------------
def init_params(key):
    keys = jax.random.split(key, 64)
    kit = iter(keys)

    def nrm(shape, s):
        return s * jax.random.normal(next(kit), shape, dtype=jnp.float32)

    def conv_bn(cin, cout, k):
        # torch Conv1d weight (cout, cin, k) + bias, BatchNorm1d running stats
        fan_in = cin * k
        w = nrm((cout, cin, k), fan_in ** -0.5)
        b = nrm((cout,), 0.05)
        gamma = 1.0 + nrm((cout,), 0.1)
        beta = nrm((cout,), 0.1)
        mean = nrm((cout,), 0.1)
        var = 1.0 + 0.1 * jax.random.uniform(next(kit), (cout,),
                                             dtype=jnp.float32)
        scale = gamma / jnp.sqrt(var + 1e-5)          # eval-mode BN fold
        bias = beta + scale * (b - mean)              # conv bias folded in
        return w, scale, bias

    def stem_params(cout, k, stride, phases):
        # Phase-blocked stem:  conv_out[phases*m + p, c] =
        #   sum_r X[m, r] * W0[r, p*cout + c] + X[m+1, r] * W1[r, p*cout + c]
        # with X[m, r] = x[block*m + r], block = stride * phases.
        w, scale, bias = conv_bn(1, cout, k)
        wk = jnp.transpose(w[:, 0, :])                # (k, cout)
        block = stride * phases
        r = jnp.arange(block)[:, None]
        pp = jnp.arange(phases)[None, :]

        def build(offset):
            j = r + offset - stride * pp              # tap index (block, phases)
            valid = (j >= 0) & (j < k)
            wt = wk[jnp.clip(j, 0, k - 1)]            # (block, phases, cout)
            wt = jnp.where(valid[:, :, None], wt, 0.0)
            return wt.reshape(block, phases * cout).astype(jnp.bfloat16)

        scale_t = jnp.tile(scale, phases).reshape(1, phases * cout)
        bias_t = jnp.tile(bias, phases).reshape(1, phases * cout)
        return build(0), build(block), scale_t, bias_t

    def same_conv_params(cin, cout, k):
        w, scale, bias = conv_bn(cin, cout, k)
        wt = jnp.transpose(w, (2, 1, 0)).astype(jnp.bfloat16)   # (k, cin, cout)
        return wt, scale.reshape(1, cout), bias.reshape(1, cout)

    p = {}
    p["s_stem"] = stem_params(32, 49, 6, 16)     # Conv1d(1,32,49,s=6) + pool16
    p["s2"] = same_conv_params(32, 64, 7)
    p["s3"] = same_conv_params(64, 64, 7)
    p["s4"] = same_conv_params(64, 64, 7)
    p["l_stem"] = stem_params(64, 399, 50, 8)    # Conv1d(1,64,399,s=50) + pool8
    p["l2"] = same_conv_params(64, 64, 5)
    p["l3"] = same_conv_params(64, 64, 5)
    p["l4"] = same_conv_params(64, 64, 5)

    fc1_w = nrm((128, 12160), 12160 ** -0.5)     # torch Linear stores (out, in)
    fc1_b = nrm((128,), 0.05)
    fc2_w = nrm((1, 128), 128 ** -0.5)
    fc2_b = nrm((1,), 0.05)
    p["fc1"] = (jnp.transpose(fc1_w).astype(jnp.bfloat16),
                fc1_b.reshape(1, 128))
    p["fc2"] = (jnp.transpose(fc2_w).astype(jnp.bfloat16),
                fc2_b.reshape(1, 1))
    return p


# ---------------------------------------------------------------------------
# FeatureNet forward
# ---------------------------------------------------------------------------
def feature_net_forward(x, p):
    B, T, C, F = x.shape
    L = T * F
    assert L == 6000 and C * 640 == 12160, "FeatureNet defaults: C=19, T*F=6000"
    # torch: x.view(B*C, 1, F*T) on the contiguous (B,T,C,F) tensor -- a plain
    # row-major reshape (the reference does NOT permute before viewing).
    xs = x.reshape(B * C, L)
    # Free re-layouts feeding the phase-blocked stem matmuls.
    x96 = jnp.pad(xs, ((0, 0), (0, 63 * 96 - L))).reshape(B * C, 63, 96)
    x400 = xs.reshape(B * C, 15, 400)

    s = small_branch(x96, p)                     # (B*C, 7, 64)
    lg = large_branch(x400, p)                   # (B*C, 3, 64)

    # torch flattens (N, 64, Lp) channel-major before .view(B, C, -1)
    feat_s = jnp.transpose(s, (0, 2, 1)).reshape(B, C, 64 * 7)
    feat_l = jnp.transpose(lg, (0, 2, 1)).reshape(B, C, 64 * 3)
    feats = jnp.concatenate([feat_s, feat_l], axis=2).reshape(B, C * 640)
    # Dropout(0.5): inference-mode identity
    return fc_head(feats, p)                     # (B, num_class=1)


if __name__ == "__main__":
    key = jax.random.PRNGKey(0)
    kx, kp = jax.random.split(key)
    # FeatureNet defaults: channels=19, time_second=60, freq=100 (required so
    # the flattened feature size equals fc1's 12160 inputs). Small batch B=2.
    B, T, C, F = 2, 60, 19, 100
    x = jax.random.normal(kx, (B, T, C, F), dtype=jnp.float32)

    params = init_params(kp)
    out = jax.jit(feature_net_forward)(x, params)
    out = jax.block_until_ready(out)
    assert out.shape == (B, 1), out.shape
    print("KERNEL_OK")
</pallas_src>

<mosaic_0001>
module attributes {stable_mosaic.version = 11 : i64} {
  func.func @large_branch_kernel(%arg0: i32, %arg1: memref<1x15x400xf32, #tpu.memory_space<vmem>>, %arg2: memref<400x512xbf16, #tpu.memory_space<vmem>>, %arg3: memref<400x512xbf16, #tpu.memory_space<vmem>>, %arg4: memref<1x512xf32, #tpu.memory_space<vmem>>, %arg5: memref<1x512xf32, #tpu.memory_space<vmem>>, %arg6: memref<5x64x64xbf16, #tpu.memory_space<vmem>>, %arg7: memref<1x64xf32, #tpu.memory_space<vmem>>, %arg8: memref<1x64xf32, #tpu.memory_space<vmem>>, %arg9: memref<5x64x64xbf16, #tpu.memory_space<vmem>>, %arg10: memref<1x64xf32, #tpu.memory_space<vmem>>, %arg11: memref<1x64xf32, #tpu.memory_space<vmem>>, %arg12: memref<5x64x64xbf16, #tpu.memory_space<vmem>>, %arg13: memref<1x64xf32, #tpu.memory_space<vmem>>, %arg14: memref<1x64xf32, #tpu.memory_space<vmem>>, %arg15: memref<1x3x64xf32, #tpu.memory_space<vmem>>, %arg16: memref<18x64xf32, #tpu.memory_space<vmem>>, %arg17: memref<18x64xf32, #tpu.memory_space<vmem>>) attributes {dimension_semantics = [#tpu.dimension_semantics<parallel>], iteration_bounds = array<i64: 38>, scalar_prefetch = 0 : i64, scratch_operands = 2 : i64, tpu.core_type = #tpu.core_type<tc>, window_params = [{transform_indices = @transform_0, window_bounds = array<i64: 1, 15, 400>}, {pipeline_mode = #tpu.pipeline_mode<synchronous>, transform_indices = @transform_1, window_bounds = array<i64: 400, 512>}, {pipeline_mode = #tpu.pipeline_mode<synchronous>, transform_indices = @transform_2, window_bounds = array<i64: 400, 512>}, {pipeline_mode = #tpu.pipeline_mode<synchronous>, transform_indices = @transform_3, window_bounds = array<i64: 1, 512>}, {pipeline_mode = #tpu.pipeline_mode<synchronous>, transform_indices = @transform_4, window_bounds = array<i64: 1, 512>}, {pipeline_mode = #tpu.pipeline_mode<synchronous>, transform_indices = @transform_5, window_bounds = array<i64: 5, 64, 64>}, {pipeline_mode = #tpu.pipeline_mode<synchronous>, transform_indices = @transform_6, window_bounds = array<i64: 1, 64>}, {pipeline_mode = #tpu.pipeline_mode<synchronous>, transform_indices = @transform_7, window_bounds = array<i64: 1, 64>}, {pipeline_mode = #tpu.pipeline_mode<synchronous>, transform_indices = @transform_8, window_bounds = array<i64: 5, 64, 64>}, {pipeline_mode = #tpu.pipeline_mode<synchronous>, transform_indices = @transform_9, window_bounds = array<i64: 1, 64>}, {pipeline_mode = #tpu.pipeline_mode<synchronous>, transform_indices = @transform_10, window_bounds = array<i64: 1, 64>}, {pipeline_mode = #tpu.pipeline_mode<synchronous>, transform_indices = @transform_11, window_bounds = array<i64: 5, 64, 64>}, {pipeline_mode = #tpu.pipeline_mode<synchronous>, transform_indices = @transform_12, window_bounds = array<i64: 1, 64>}, {pipeline_mode = #tpu.pipeline_mode<synchronous>, transform_indices = @transform_13, window_bounds = array<i64: 1, 64>}, {transform_indices = @transform_14, window_bounds = array<i64: 1, 3, 64>}]} {
    %c0 = arith.constant 0 : index
    %c0_0 = arith.constant 0 : index
    %c0_1 = arith.constant 0 : index
    %0 = vector.load %arg1[%c0, %c0_0, %c0_1] : memref<1x15x400xf32, #tpu.memory_space<vmem>>, vector<1x15x400xf32>
    %1 = vector.shape_cast %0 : vector<1x15x400xf32> to vector<15x400xf32>
    %2 = vector.extract_strided_slice %1 {offsets = [0, 0], sizes = [14, 400], strides = [1, 1]} : vector<15x400xf32> to vector<14x400xf32>
    %3 = arith.truncf %2 : vector<14x400xf32> to vector<14x400xbf16>
    %4 = vector.extract_strided_slice %1 {offsets = [1, 0], sizes = [14, 400], strides = [1, 1]} : vector<15x400xf32> to vector<14x400xf32>
    %5 = arith.truncf %4 : vector<14x400xf32> to vector<14x400xbf16>
    %c0_2 = arith.constant 0 : index
    %c0_3 = arith.constant 0 : index
    %6 = vector.load %arg2[%c0_2, %c0_3] : memref<400x512xbf16, #tpu.memory_space<vmem>>, vector<400x512xbf16>
    %cst = arith.constant dense<0.000000e+00> : vector<14x512xf32>
    %7 = tpu.matmul %3, %6, %cst {dimension_numbers = #tpu.dot_dimension_numbers<[1], [0], [0], [1], [0, 0, 1, 1], [], []>} : vector<14x400xbf16>, vector<400x512xbf16>, vector<14x512xf32> -> vector<14x512xf32>
    %c0_4 = arith.constant 0 : index
    %c0_5 = arith.constant 0 : index
    %8 = vector.load %arg3[%c0_4, %c0_5] : memref<400x512xbf16, #tpu.memory_space<vmem>>, vector<400x512xbf16>
    %cst_6 = arith.constant dense<0.000000e+00> : vector<14x512xf32>
    %9 = tpu.matmul %5, %8, %cst_6 {dimension_numbers = #tpu.dot_dimension_numbers<[1], [0], [0], [1], [0, 0, 1, 1], [], []>} : vector<14x400xbf16>, vector<400x512xbf16>, vector<14x512xf32> -> vector<14x512xf32>
    %10 = arith.addf %7, %9 : vector<14x512xf32>
    %c0_7 = arith.constant 0 : index
    %c0_8 = arith.constant 0 : index
    %11 = vector.load %arg4[%c0_7, %c0_8] : memref<1x512xf32, #tpu.memory_space<vmem>>, vector<1x512xf32>
    %12 = vector.broadcast %11 : vector<1x512xf32> to vector<14x512xf32>
    %13 = arith.mulf %10, %12 : vector<14x512xf32>
    %c0_9 = arith.constant 0 : index
    %c0_10 = arith.constant 0 : index
    %14 = vector.load %arg5[%c0_9, %c0_10] : memref<1x512xf32, #tpu.memory_space<vmem>>, vector<1x512xf32>
    %15 = vector.broadcast %14 : vector<1x512xf32> to vector<14x512xf32>
    %16 = arith.addf %13, %15 : vector<14x512xf32>
    %cst_11 = arith.constant 0.000000e+00 : f32
    %17 = vector.broadcast %cst_11 : f32 to vector<14x512xf32>
    %18 = arith.maximumf %16, %17 : vector<14x512xf32>
    %19 = vector.extract_strided_slice %18 {offsets = [0, 0], sizes = [14, 64], strides = [1, 1]} : vector<14x512xf32> to vector<14x64xf32>
    %20 = vector.extract_strided_slice %18 {offsets = [0, 64], sizes = [14, 64], strides = [1, 1]} : vector<14x512xf32> to vector<14x64xf32>
    %21 = arith.maximumf %19, %20 : vector<14x64xf32>
    %22 = vector.extract_strided_slice %18 {offsets = [0, 128], sizes = [14, 64], strides = [1, 1]} : vector<14x512xf32> to vector<14x64xf32>
    %23 = arith.maximumf %21, %22 : vector<14x64xf32>
    %24 = vector.extract_strided_slice %18 {offsets = [0, 192], sizes = [14, 64], strides = [1, 1]} : vector<14x512xf32> to vector<14x64xf32>
    %25 = arith.maximumf %23, %24 : vector<14x64xf32>
    %26 = vector.extract_strided_slice %18 {offsets = [0, 256], sizes = [14, 64], strides = [1, 1]} : vector<14x512xf32> to vector<14x64xf32>
    %27 = arith.maximumf %25, %26 : vector<14x64xf32>
    %28 = vector.extract_strided_slice %18 {offsets = [0, 320], sizes = [14, 64], strides = [1, 1]} : vector<14x512xf32> to vector<14x64xf32>
    %29 = arith.maximumf %27, %28 : vector<14x64xf32>
    %30 = vector.extract_strided_slice %18 {offsets = [0, 384], sizes = [14, 64], strides = [1, 1]} : vector<14x512xf32> to vector<14x64xf32>
    %31 = arith.maximumf %29, %30 : vector<14x64xf32>
    %32 = vector.extract_strided_slice %18 {offsets = [0, 448], sizes = [14, 64], strides = [1, 1]} : vector<14x512xf32> to vector<14x64xf32>
    %33 = arith.maximumf %31, %32 : vector<14x64xf32>
    %cst_12 = arith.constant 0.000000e+00 : f32
    %34 = vector.broadcast %cst_12 : f32 to vector<18x64xf32>
    %c0_13 = arith.constant 0 : index
    %c0_14 = arith.constant 0 : index
    %35 = vector.load %arg16[%c0_13, %c0_14] : memref<18x64xf32, #tpu.memory_space<vmem>>, vector<18x64xf32>
    tpu.vector_store %arg16[%c0_13, %c0_14], %34 {strides = array<i32>} : memref<18x64xf32, #tpu.memory_space<vmem>>, vector<18x64xf32>,
    %c2 = arith.constant 2 : index
    %c0_15 = arith.constant 0 : index
    %36 = vector.load %arg16[%c2, %c0_15] : memref<18x64xf32, #tpu.memory_space<vmem>>, vector<14x64xf32>
    tpu.vector_store %arg16[%c2, %c0_15], %33 {strides = array<i32>} : memref<18x64xf32, #tpu.memory_space<vmem>>, vector<14x64xf32>,
    %c0_16 = arith.constant 0 : index
    %c0_17 = arith.constant 0 : index
    %37 = vector.load %arg16[%c0_16, %c0_17] : memref<18x64xf32, #tpu.memory_space<vmem>>, vector<14x64xf32>
    %38 = arith.truncf %37 : vector<14x64xf32> to vector<14x64xbf16>
    %c0_18 = arith.constant 0 : index
    %c0_19 = arith.constant 0 : index
    %c0_20 = arith.constant 0 : index
    %39 = vector.load %arg6[%c0_18, %c0_19, %c0_20] : memref<5x64x64xbf16, #tpu.memory_space<vmem>>, vector<1x64x64xbf16>
    %40 = vector.shape_cast %39 : vector<1x64x64xbf16> to vector<64x64xbf16>
    %cst_21 = arith.constant dense<0.000000e+00> : vector<14x64xf32>
    %41 = tpu.matmul %38, %40, %cst_21 {dimension_numbers = #tpu.dot_dimension_numbers<[1], [0], [0], [1], [0, 0, 1, 1], [], []>} : vector<14x64xbf16>, vector<64x64xbf16>, vector<14x64xf32> -> vector<14x64xf32>
    %c1 = arith.constant 1 : index
    %c0_22 = arith.constant 0 : index
    %42 = vector.load %arg16[%c1, %c0_22] : memref<18x64xf32, #tpu.memory_space<vmem>>, vector<14x64xf32>
    %43 = arith.truncf %42 : vector<14x64xf32> to vector<14x64xbf16>
    %c1_23 = arith.constant 1 : index
    %c0_24 = arith.constant 0 : index
    %c0_25 = arith.constant 0 : index
    %44 = vector.load %arg6[%c1_23, %c0_24, %c0_25] : memref<5x64x64xbf16, #tpu.memory_space<vmem>>, vector<1x64x64xbf16>
    %45 = vector.shape_cast %44 : vector<1x64x64xbf16> to vector<64x64xbf16>
    %cst_26 = arith.constant dense<0.000000e+00> : vector<14x64xf32>
    %46 = tpu.matmul %43, %45, %cst_26 {dimension_numbers = #tpu.dot_dimension_numbers<[1], [0], [0], [1], [0, 0, 1, 1], [], []>} : vector<14x64xbf16>, vector<64x64xbf16>, vector<14x64xf32> -> vector<14x64xf32>
    %47 = arith.addf %41, %46 : vector<14x64xf32>
    %c2_27 = arith.constant 2 : index
    %c0_28 = arith.constant 0 : index
    %48 = vector.load %arg16[%c2_27, %c0_28] : memref<18x64xf32, #tpu.memory_space<vmem>>, vector<14x64xf32>
    %49 = arith.truncf %48 : vector<14x64xf32> to vector<14x64xbf16>
    %c2_29 = arith.constant 2 : index
    %c0_30 = arith.constant 0 : index
    %c0_31 = arith.constant 0 : index
    %50 = vector.load %arg6[%c2_29, %c0_30, %c0_31] : memref<5x64x64xbf16, #tpu.memory_space<vmem>>, vector<1x64x64xbf16>
    %51 = vector.shape_cast %50 : vector<1x64x64xbf16> to vector<64x64xbf16>
    %cst_32 = arith.constant dense<0.000000e+00> : vector<14x64xf32>
    %52 = tpu.matmul %49, %51, %cst_32 {dimension_numbers = #tpu.dot_dimension_numbers<[1], [0], [0], [1], [0, 0, 1, 1], [], []>} : vector<14x64xbf16>, vector<64x64xbf16>, vector<14x64xf32> -> vector<14x64xf32>
    %53 = arith.addf %47, %52 : vector<14x64xf32>
    %c3 = arith.constant 3 : index
    %c0_33 = arith.constant 0 : index
    %54 = vector.load %arg16[%c3, %c0_33] : memref<18x64xf32, #tpu.memory_space<vmem>>, vector<14x64xf32>
    %55 = arith.truncf %54 : vector<14x64xf32> to vector<14x64xbf16>
    %c3_34 = arith.constant 3 : index
    %c0_35 = arith.constant 0 : index
    %c0_36 = arith.constant 0 : index
    %56 = vector.load %arg6[%c3_34, %c0_35, %c0_36] : memref<5x64x64xbf16, #tpu.memory_space<vmem>>, vector<1x64x64xbf16>
    %57 = vector.shape_cast %56 : vector<1x64x64xbf16> to vector<64x64xbf16>
    %cst_37 = arith.constant dense<0.000000e+00> : vector<14x64xf32>
    %58 = tpu.matmul %55, %57, %cst_37 {dimension_numbers = #tpu.dot_dimension_numbers<[1], [0], [0], [1], [0, 0, 1, 1], [], []>} : vector<14x64xbf16>, vector<64x64xbf16>, vector<14x64xf32> -> vector<14x64xf32>
    %59 = arith.addf %53, %58 : vector<14x64xf32>
    %c4 = arith.constant 4 : index
    %c0_38 = arith.constant 0 : index
    %60 = vector.load %arg16[%c4, %c0_38] : memref<18x64xf32, #tpu.memory_space<vmem>>, vector<14x64xf32>
    %61 = arith.truncf %60 : vector<14x64xf32> to vector<14x64xbf16>
    %c4_39 = arith.constant 4 : index
    %c0_40 = arith.constant 0 : index
    %c0_41 = arith.constant 0 : index
    %62 = vector.load %arg6[%c4_39, %c0_40, %c0_41] : memref<5x64x64xbf16, #tpu.memory_space<vmem>>, vector<1x64x64xbf16>
    %63 = vector.shape_cast %62 : vector<1x64x64xbf16> to vector<64x64xbf16>
    %cst_42 = arith.constant dense<0.000000e+00> : vector<14x64xf32>
    %64 = tpu.matmul %61, %63, %cst_42 {dimension_numbers = #tpu.dot_dimension_numbers<[1], [0], [0], [1], [0, 0, 1, 1], [], []>} : vector<14x64xbf16>, vector<64x64xbf16>, vector<14x64xf32> -> vector<14x64xf32>
    %65 = arith.addf %59, %64 : vector<14x64xf32>
    %c0_43 = arith.constant 0 : index
    %c0_44 = arith.constant 0 : index
    %66 = vector.load %arg7[%c0_43, %c0_44] : memref<1x64xf32, #tpu.memory_space<vmem>>, vector<1x64xf32>
    %67 = vector.broadcast %66 : vector<1x64xf32> to vector<14x64xf32>
    %68 = arith.mulf %65, %67 : vector<14x64xf32>
    %c0_45 = arith.constant 0 : index
    %c0_46 = arith.constant 0 : index
    %69 = vector.load %arg8[%c0_45, %c0_46] : memref<1x64xf32, #tpu.memory_space<vmem>>, vector<1x64xf32>
    %70 = vector.broadcast %69 : vector<1x64xf32> to vector<14x64xf32>
    %71 = arith.addf %68, %70 : vector<14x64xf32>
    %cst_47 = arith.constant 0.000000e+00 : f32
    %72 = vector.broadcast %cst_47 : f32 to vector<14x64xf32>
    %73 = arith.maximumf %71, %72 : vector<14x64xf32>
    %cst_48 = arith.constant 0.000000e+00 : f32
    %74 = vector.broadcast %cst_48 : f32 to vector<18x64xf32>
    %c0_49 = arith.constant 0 : index
    %c0_50 = arith.constant 0 : index
    %75 = vector.load %arg17[%c0_49, %c0_50] : memref<18x64xf32, #tpu.memory_space<vmem>>, vector<18x64xf32>
    tpu.vector_store %arg17[%c0_49, %c0_50], %74 {strides = array<i32>} : memref<18x64xf32, #tpu.memory_space<vmem>>, vector<18x64xf32>,
    %c2_51 = arith.constant 2 : index
    %c0_52 = arith.constant 0 : index
    %76 = vector.load %arg17[%c2_51, %c0_52] : memref<18x64xf32, #tpu.memory_space<vmem>>, vector<14x64xf32>
    tpu.vector_store %arg17[%c2_51, %c0_52], %73 {strides = array<i32>} : memref<18x64xf32, #tpu.memory_space<vmem>>, vector<14x64xf32>,
    %c0_53 = arith.constant 0 : index
    %c0_54 = arith.constant 0 : index
    %77 = vector.load %arg17[%c0_53, %c0_54] : memref<18x64xf32, #tpu.memory_space<vmem>>, vector<14x64xf32>
    %78 = arith.truncf %77 : vector<14x64xf32> to vector<14x64xbf16>
    %c0_55 = arith.constant 0 : index
    %c0_56 = arith.constant 0 : index
    %c0_57 = arith.constant 0 : index
    %79 = vector.load %arg9[%c0_55, %c0_56, %c0_57] : memref<5x64x64xbf16, #tpu.memory_space<vmem>>, vector<1x64x64xbf16>
    %80 = vector.shape_cast %79 : vector<1x64x64xbf16> to vector<64x64xbf16>
    %cst_58 = arith.constant dense<0.000000e+00> : vector<14x64xf32>
    %81 = tpu.matmul %78, %80, %cst_58 {dimension_numbers = #tpu.dot_dimension_numbers<[1], [0], [0], [1], [0, 0, 1, 1], [], []>} : vector<14x64xbf16>, vector<64x64xbf16>, vector<14x64xf32> -> vector<14x64xf32>
    %c1_59 = arith.constant 1 : index
    %c0_60 = arith.constant 0 : index
    %82 = vector.load %arg17[%c1_59, %c0_60] : memref<18x64xf32, #tpu.memory_space<vmem>>, vector<14x64xf32>
    %83 = arith.truncf %82 : vector<14x64xf32> to vector<14x64xbf16>
    %c1_61 = arith.constant 1 : index
    %c0_62 = arith.constant 0 : index
    %c0_63 = arith.constant 0 : index
    %84 = vector.load %arg9[%c1_61, %c0_62, %c0_63] : memref<5x64x64xbf16, #tpu.memory_space<vmem>>, vector<1x64x64xbf16>
    %85 = vector.shape_cast %84 : vector<1x64x64xbf16> to vector<64x64xbf16>
    %cst_64 = arith.constant dense<0.000000e+00> : vector<14x64xf32>
    %86 = tpu.matmul %83, %85, %cst_64 {dimension_numbers = #tpu.dot_dimension_numbers<[1], [0], [0], [1], [0, 0, 1, 1], [], []>} : vector<14x64xbf16>, vector<64x64xbf16>, vector<14x64xf32> -> vector<14x64xf32>
    %87 = arith.addf %81, %86 : vector<14x64xf32>
    %c2_65 = arith.constant 2 : index
    %c0_66 = arith.constant 0 : index
    %88 = vector.load %arg17[%c2_65, %c0_66] : memref<18x64xf32, #tpu.memory_space<vmem>>, vector<14x64xf32>
    %89 = arith.truncf %88 : vector<14x64xf32> to vector<14x64xbf16>
    %c2_67 = arith.constant 2 : index
    %c0_68 = arith.constant 0 : index
    %c0_69 = arith.constant 0 : index
    %90 = vector.load %arg9[%c2_67, %c0_68, %c0_69] : memref<5x64x64xbf16, #tpu.memory_space<vmem>>, vector<1x64x64xbf16>
    %91 = vector.shape_cast %90 : vector<1x64x64xbf16> to vector<64x64xbf16>
    %cst_70 = arith.constant dense<0.000000e+00> : vector<14x64xf32>
    %92 = tpu.matmul %89, %91, %cst_70 {dimension_numbers = #tpu.dot_dimension_numbers<[1], [0], [0], [1], [0, 0, 1, 1], [], []>} : vector<14x64xbf16>, vector<64x64xbf16>, vector<14x64xf32> -> vector<14x64xf32>
    %93 = arith.addf %87, %92 : vector<14x64xf32>
    %c3_71 = arith.constant 3 : index
    %c0_72 = arith.constant 0 : index
    %94 = vector.load %arg17[%c3_71, %c0_72] : memref<18x64xf32, #tpu.memory_space<vmem>>, vector<14x64xf32>
    %95 = arith.truncf %94 : vector<14x64xf32> to vector<14x64xbf16>
    %c3_73 = arith.constant 3 : index
    %c0_74 = arith.constant 0 : index
    %c0_75 = arith.constant 0 : index
    %96 = vector.load %arg9[%c3_73, %c0_74, %c0_75] : memref<5x64x64xbf16, #tpu.memory_space<vmem>>, vector<1x64x64xbf16>
    %97 = vector.shape_cast %96 : vector<1x64x64xbf16> to vector<64x64xbf16>
    %cst_76 = arith.constant dense<0.000000e+00> : vector<14x64xf32>
    %98 = tpu.matmul %95, %97, %cst_76 {dimension_numbers = #tpu.dot_dimension_numbers<[1], [0], [0], [1], [0, 0, 1, 1], [], []>} : vector<14x64xbf16>, vector<64x64xbf16>, vector<14x64xf32> -> vector<14x64xf32>
    %99 = arith.addf %93, %98 : vector<14x64xf32>
    %c4_77 = arith.constant 4 : index
    %c0_78 = arith.constant 0 : index
    %100 = vector.load %arg17[%c4_77, %c0_78] : memref<18x64xf32, #tpu.memory_space<vmem>>, vector<14x64xf32>
    %101 = arith.truncf %100 : vector<14x64xf32> to vector<14x64xbf16>
    %c4_79 = arith.constant 4 : index
    %c0_80 = arith.constant 0 : index
    %c0_81 = arith.constant 0 : index
    %102 = vector.load %arg9[%c4_79, %c0_80, %c0_81] : memref<5x64x64xbf16, #tpu.memory_space<vmem>>, vector<1x64x64xbf16>
    %103 = vector.shape_cast %102 : vector<1x64x64xbf16> to vector<64x64xbf16>
    %cst_82 = arith.constant dense<0.000000e+00> : vector<14x64xf32>
    %104 = tpu.matmul %101, %103, %cst_82 {dimension_numbers = #tpu.dot_dimension_numbers<[1], [0], [0], [1], [0, 0, 1, 1], [], []>} : vector<14x64xbf16>, vector<64x64xbf16>, vector<14x64xf32> -> vector<14x64xf32>
    %105 = arith.addf %99, %104 : vector<14x64xf32>
    %c0_83 = arith.constant 0 : index
    %c0_84 = arith.constant 0 : index
    %106 = vector.load %arg10[%c0_83, %c0_84] : memref<1x64xf32, #tpu.memory_space<vmem>>, vector<1x64xf32>
    %107 = vector.broadcast %106 : vector<1x64xf32> to vector<14x64xf32>
    %108 = arith.mulf %105, %107 : vector<14x64xf32>
    %c0_85 = arith.constant 0 : index
    %c0_86 = arith.constant 0 : index
    %109 = vector.load %arg11[%c0_85, %c0_86] : memref<1x64xf32, #tpu.memory_space<vmem>>, vector<1x64xf32>
    %110 = vector.broadcast %109 : vector<1x64xf32> to vector<14x64xf32>
    %111 = arith.addf %108, %110 : vector<14x64xf32>
    %cst_87 = arith.constant 0.000000e+00 : f32
    %112 = vector.broadcast %cst_87 : f32 to vector<14x64xf32>
    %113 = arith.maximumf %111, %112 : vector<14x64xf32>
    %cst_88 = arith.constant 0.000000e+00 : f32
    %114 = vector.broadcast %cst_88 : f32 to vector<18x64xf32>
    %c0_89 = arith.constant 0 : index
    %c0_90 = arith.constant 0 : index
    %115 = vector.load %arg16[%c0_89, %c0_90] : memref<18x64xf32, #tpu.memory_space<vmem>>, vector<18x64xf32>
    tpu.vector_store %arg16[%c0_89, %c0_90], %114 {strides = array<i32>} : memref<18x64xf32, #tpu.memory_space<vmem>>, vector<18x64xf32>,
    %c2_91 = arith.constant 2 : index
    %c0_92 = arith.constant 0 : index
    %116 = vector.load %arg16[%c2_91, %c0_92] : memref<18x64xf32, #tpu.memory_space<vmem>>, vector<14x64xf32>
    tpu.vector_store %arg16[%c2_91, %c0_92], %113 {strides = array<i32>} : memref<18x64xf32, #tpu.memory_space<vmem>>, vector<14x64xf32>,
    %c0_93 = arith.constant 0 : index
    %c0_94 = arith.constant 0 : index
    %117 = vector.load %arg16[%c0_93, %c0_94] : memref<18x64xf32, #tpu.memory_space<vmem>>, vector<12x64xf32>
    %118 = arith.truncf %117 : vector<12x64xf32> to vector<12x64xbf16>
    %c0_95 = arith.constant 0 : index
    %c0_96 = arith.constant 0 : index
    %c0_97 = arith.constant 0 : index
    %119 = vector.load %arg12[%c0_95, %c0_96, %c0_97] : memref<5x64x64xbf16, #tpu.memory_space<vmem>>, vector<1x64x64xbf16>
    %120 = vector.shape_cast %119 : vector<1x64x64xbf16> to vector<64x64xbf16>
    %cst_98 = arith.constant dense<0.000000e+00> : vector<12x64xf32>
    %121 = tpu.matmul %118, %120, %cst_98 {dimension_numbers = #tpu.dot_dimension_numbers<[1], [0], [0], [1], [0, 0, 1, 1], [], []>} : vector<12x64xbf16>, vector<64x64xbf16>, vector<12x64xf32> -> vector<12x64xf32>
    %c1_99 = arith.constant 1 : index
    %c0_100 = arith.constant 0 : index
    %122 = vector.load %arg16[%c1_99, %c0_100] : memref<18x64xf32, #tpu.memory_space<vmem>>, vector<12x64xf32>
    %123 = arith.truncf %122 : vector<12x64xf32> to vector<12x64xbf16>
    %c1_101 = arith.constant 1 : index
    %c0_102 = arith.constant 0 : index
    %c0_103 = arith.constant 0 : index
    %124 = vector.load %arg12[%c1_101, %c0_102, %c0_103] : memref<5x64x64xbf16, #tpu.memory_space<vmem>>, vector<1x64x64xbf16>
    %125 = vector.shape_cast %124 : vector<1x64x64xbf16> to vector<64x64xbf16>
    %cst_104 = arith.constant dense<0.000000e+00> : vector<12x64xf32>
    %126 = tpu.matmul %123, %125, %cst_104 {dimension_numbers = #tpu.dot_dimension_numbers<[1], [0], [0], [1], [0, 0, 1, 1], [], []>} : vector<12x64xbf16>, vector<64x64xbf16>, vector<12x64xf32> -> vector<12x64xf32>
    %127 = arith.addf %121, %126 : vector<12x64xf32>
    %c2_105 = arith.constant 2 : index
    %c0_106 = arith.constant 0 : index
    %128 = vector.load %arg16[%c2_105, %c0_106] : memref<18x64xf32, #tpu.memory_space<vmem>>, vector<12x64xf32>
    %129 = arith.truncf %128 : vector<12x64xf32> to vector<12x64xbf16>
    %c2_107 = arith.constant 2 : index
    %c0_108 = arith.constant 0 : index
    %c0_109 = arith.constant 0 : index
    %130 = vector.load %arg12[%c2_107, %c0_108, %c0_109] : memref<5x64x64xbf16, #tpu.memory_space<vmem>>, vector<1x64x64xbf16>
    %131 = vector.shape_cast %130 : vector<1x64x64xbf16> to vector<64x64xbf16>
    %cst_110 = arith.constant dense<0.000000e+00> : vector<12x64xf32>
    %132 = tpu.matmul %129, %131, %cst_110 {dimension_numbers = #tpu.dot_dimension_numbers<[1], [0], [0], [1], [0, 0, 1, 1], [], []>} : vector<12x64xbf16>, vector<64x64xbf16>, vector<12x64xf32> -> vector<12x64xf32>
    %133 = arith.addf %127, %132 : vector<12x64xf32>
    %c3_111 = arith.constant 3 : index
    %c0_112 = arith.constant 0 : index
    %134 = vector.load %arg16[%c3_111, %c0_112] : memref<18x64xf32, #tpu.memory_space<vmem>>, vector<12x64xf32>
    %135 = arith.truncf %134 : vector<12x64xf32> to vector<12x64xbf16>
    %c3_113 = arith.constant 3 : index
    %c0_114 = arith.constant 0 : index
    %c0_115 = arith.constant 0 : index
    %136 = vector.load %arg12[%c3_113, %c0_114, %c0_115] : memref<5x64x64xbf16, #tpu.memory_space<vmem>>, vector<1x64x64xbf16>
    %137 = vector.shape_cast %136 : vector<1x64x64xbf16> to vector<64x64xbf16>
    %cst_116 = arith.constant dense<0.000000e+00> : vector<12x64xf32>
    %138 = tpu.matmul %135, %137, %cst_116 {dimension_numbers = #tpu.dot_dimension_numbers<[1], [0], [0], [1], [0, 0, 1, 1], [], []>} : vector<12x64xbf16>, vector<64x64xbf16>, vector<12x64xf32> -> vector<12x64xf32>
    %139 = arith.addf %133, %138 : vector<12x64xf32>
    %c4_117 = arith.constant 4 : index
    %c0_118 = arith.constant 0 : index
    %140 = vector.load %arg16[%c4_117, %c0_118] : memref<18x64xf32, #tpu.memory_space<vmem>>, vector<12x64xf32>
    %141 = arith.truncf %140 : vector<12x64xf32> to vector<12x64xbf16>
    %c4_119 = arith.constant 4 : index
    %c0_120 = arith.constant 0 : index
    %c0_121 = arith.constant 0 : index
    %142 = vector.load %arg12[%c4_119, %c0_120, %c0_121] : memref<5x64x64xbf16, #tpu.memory_space<vmem>>, vector<1x64x64xbf16>
    %143 = vector.shape_cast %142 : vector<1x64x64xbf16> to vector<64x64xbf16>
    %cst_122 = arith.constant dense<0.000000e+00> : vector<12x64xf32>
    %144 = tpu.matmul %141, %143, %cst_122 {dimension_numbers = #tpu.dot_dimension_numbers<[1], [0], [0], [1], [0, 0, 1, 1], [], []>} : vector<12x64xbf16>, vector<64x64xbf16>, vector<12x64xf32> -> vector<12x64xf32>
    %145 = arith.addf %139, %144 : vector<12x64xf32>
    %c0_123 = arith.constant 0 : index
    %c0_124 = arith.constant 0 : index
    %146 = vector.load %arg13[%c0_123, %c0_124] : memref<1x64xf32, #tpu.memory_space<vmem>>, vector<1x64xf32>
    %147 = vector.broadcast %146 : vector<1x64xf32> to vector<12x64xf32>
    %148 = arith.mulf %145, %147 : vector<12x64xf32>
    %c0_125 = arith.constant 0 : index
    %c0_126 = arith.constant 0 : index
    %149 = vector.load %arg14[%c0_125, %c0_126] : memref<1x64xf32, #tpu.memory_space<vmem>>, vector<1x64xf32>
    %150 = vector.broadcast %149 : vector<1x64xf32> to vector<12x64xf32>
    %151 = arith.addf %148, %150 : vector<12x64xf32>
    %cst_127 = arith.constant 0.000000e+00 : f32
    %152 = vector.broadcast %cst_127 : f32 to vector<12x64xf32>
    %153 = arith.maximumf %151, %152 : vector<12x64xf32>
    %154 = vector.extract_strided_slice %153 {offsets = [0, 0], sizes = [4, 64], strides = [1, 1]} : vector<12x64xf32> to vector<4x64xf32>
    %cst_128 = arith.constant dense<0xFF800000> : vector<64xf32>
    %155 = vector.multi_reduction <maximumf>, %154, %cst_128 [0] : vector<4x64xf32> to vector<64xf32>
    %156 = vector.shape_cast %155 : vector<64xf32> to vector<1x64xf32>
    %c0_129 = arith.constant 0 : index
    %c0_130 = arith.constant 0 : index
    %c0_131 = arith.constant 0 : index
    %157 = vector.load %arg15[%c0_129, %c0_130, %c0_131] : memref<1x3x64xf32, #tpu.memory_space<vmem>>, vector<1x1x64xf32>
    %158 = vector.shape_cast %157 : vector<1x1x64xf32> to vector<1x64xf32>
    %159 = vector.shape_cast %156 : vector<1x64xf32> to vector<1x1x64xf32>
    tpu.vector_store %arg15[%c0_129, %c0_130, %c0_131], %159 {strides = array<i32>} : memref<1x3x64xf32, #tpu.memory_space<vmem>>, vector<1x1x64xf32>,
    %160 = vector.extract_strided_slice %153 {offsets = [4, 0], sizes = [4, 64], strides = [1, 1]} : vector<12x64xf32> to vector<4x64xf32>
    %cst_132 = arith.constant dense<0xFF800000> : vector<64xf32>
    %161 = vector.multi_reduction <maximumf>, %160, %cst_132 [0] : vector<4x64xf32> to vector<64xf32>
    %162 = vector.shape_cast %161 : vector<64xf32> to vector<1x64xf32>
    %c0_133 = arith.constant 0 : index
    %c1_134 = arith.constant 1 : index
    %c0_135 = arith.constant 0 : index
    %163 = vector.load %arg15[%c0_133, %c1_134, %c0_135] : memref<1x3x64xf32, #tpu.memory_space<vmem>>, vector<1x1x64xf32>
    %164 = vector.shape_cast %163 : vector<1x1x64xf32> to vector<1x64xf32>
    %165 = vector.shape_cast %162 : vector<1x64xf32> to vector<1x1x64xf32>
    tpu.vector_store %arg15[%c0_133, %c1_134, %c0_135], %165 {strides = array<i32>} : memref<1x3x64xf32, #tpu.memory_space<vmem>>, vector<1x1x64xf32>,
    %166 = vector.extract_strided_slice %153 {offsets = [8, 0], sizes = [4, 64], strides = [1, 1]} : vector<12x64xf32> to vector<4x64xf32>
    %cst_136 = arith.constant dense<0xFF800000> : vector<64xf32>
    %167 = vector.multi_reduction <maximumf>, %166, %cst_136 [0] : vector<4x64xf32> to vector<64xf32>
    %168 = vector.shape_cast %167 : vector<64xf32> to vector<1x64xf32>
    %c0_137 = arith.constant 0 : index
    %c2_138 = arith.constant 2 : index
    %c0_139 = arith.constant 0 : index
    %169 = vector.load %arg15[%c0_137, %c2_138, %c0_139] : memref<1x3x64xf32, #tpu.memory_space<vmem>>, vector<1x1x64xf32>
    %170 = vector.shape_cast %169 : vector<1x1x64xf32> to vector<1x64xf32>
    %171 = vector.shape_cast %168 : vector<1x64xf32> to vector<1x1x64xf32>
    tpu.vector_store %arg15[%c0_137, %c2_138, %c0_139], %171 {strides = array<i32>} : memref<1x3x64xf32, #tpu.memory_space<vmem>>, vector<1x1x64xf32>,
    return
  }
  func.func @transform_0(%arg0: i32) -> (i32, i32, i32) {
    %c0_i32 = arith.constant 0 : i32
    %c0_i32_0 = arith.constant 0 : i32
    %c0_i32_1 = arith.constant 0 : i32
    return %arg0, %c0_i32, %c0_i32_0 : i32, i32, i32
  }
  func.func @transform_1(%arg0: i32) -> (i32, i32) {
    %c0_i32 = arith.constant 0 : i32
    %c0_i32_0 = arith.constant 0 : i32
    %c0_i32_1 = arith.constant 0 : i32
    return %c0_i32, %c0_i32_0 : i32, i32
  }
  func.func @transform_2(%arg0: i32) -> (i32, i32) {
    %c0_i32 = arith.constant 0 : i32
    %c0_i32_0 = arith.constant 0 : i32
    %c0_i32_1 = arith.constant 0 : i32
    return %c0_i32, %c0_i32_0 : i32, i32
  }
  func.func @transform_3(%arg0: i32) -> (i32, i32) {
    %c0_i32 = arith.constant 0 : i32
    %c0_i32_0 = arith.constant 0 : i32
    %c0_i32_1 = arith.constant 0 : i32
    return %c0_i32, %c0_i32_0 : i32, i32
  }
  func.func @transform_4(%arg0: i32) -> (i32, i32) {
    %c0_i32 = arith.constant 0 : i32
    %c0_i32_0 = arith.constant 0 : i32
    %c0_i32_1 = arith.constant 0 : i32
    return %c0_i32, %c0_i32_0 : i32, i32
  }
  func.func @transform_5(%arg0: i32) -> (i32, i32, i32) {
    %c0_i32 = arith.constant 0 : i32
    %c0_i32_0 = arith.constant 0 : i32
    %c0_i32_1 = arith.constant 0 : i32
    %c0_i32_2 = arith.constant 0 : i32
    return %c0_i32, %c0_i32_0, %c0_i32_1 : i32, i32, i32
  }
  func.func @transform_6(%arg0: i32) -> (i32, i32) {
    %c0_i32 = arith.constant 0 : i32
    %c0_i32_0 = arith.constant 0 : i32
    %c0_i32_1 = arith.constant 0 : i32
    return %c0_i32, %c0_i32_0 : i32, i32
  }
  func.func @transform_7(%arg0: i32) -> (i32, i32) {
    %c0_i32 = arith.constant 0 : i32
    %c0_i32_0 = arith.constant 0 : i32
    %c0_i32_1 = arith.constant 0 : i32
    return %c0_i32, %c0_i32_0 : i32, i32
  }
  func.func @transform_8(%arg0: i32) -> (i32, i32, i32) {
    %c0_i32 = arith.constant 0 : i32
    %c0_i32_0 = arith.constant 0 : i32
    %c0_i32_1 = arith.constant 0 : i32
    %c0_i32_2 = arith.constant 0 : i32
    return %c0_i32, %c0_i32_0, %c0_i32_1 : i32, i32, i32
  }
  func.func @transform_9(%arg0: i32) -> (i32, i32) {
    %c0_i32 = arith.constant 0 : i32
    %c0_i32_0 = arith.constant 0 : i32
    %c0_i32_1 = arith.constant 0 : i32
    return %c0_i32, %c0_i32_0 : i32, i32
  }
  func.func @transform_10(%arg0: i32) -> (i32, i32) {
    %c0_i32 = arith.constant 0 : i32
    %c0_i32_0 = arith.constant 0 : i32
    %c0_i32_1 = arith.constant 0 : i32
    return %c0_i32, %c0_i32_0 : i32, i32
  }
  func.func @transform_11(%arg0: i32) -> (i32, i32, i32) {
    %c0_i32 = arith.constant 0 : i32
    %c0_i32_0 = arith.constant 0 : i32
    %c0_i32_1 = arith.constant 0 : i32
    %c0_i32_2 = arith.constant 0 : i32
    return %c0_i32, %c0_i32_0, %c0_i32_1 : i32, i32, i32
  }
  func.func @transform_12(%arg0: i32) -> (i32, i32) {
    %c0_i32 = arith.constant 0 : i32
    %c0_i32_0 = arith.constant 0 : i32
    %c0_i32_1 = arith.constant 0 : i32
    return %c0_i32, %c0_i32_0 : i32, i32
  }
  func.func @transform_13(%arg0: i32) -> (i32, i32) {
    %c0_i32 = arith.constant 0 : i32
    %c0_i32_0 = arith.constant 0 : i32
    %c0_i32_1 = arith.constant 0 : i32
    return %c0_i32, %c0_i32_0 : i32, i32
  }
  func.func @transform_14(%arg0: i32) -> (i32, i32, i32) {
    %c0_i32 = arith.constant 0 : i32
    %c0_i32_0 = arith.constant 0 : i32
    %c0_i32_1 = arith.constant 0 : i32
    return %arg0, %c0_i32, %c0_i32_0 : i32, i32, i32
  }
}

module attributes {stable_mosaic.version = 11 : i64} {
  func.func @small_branch_kernel(%arg0: i32, %arg1: memref<1x63x96xf32, #tpu.memory_space<vmem>>, %arg2: memref<96x512xbf16, #tpu.memory_space<vmem>>, %arg3: memref<96x512xbf16, #tpu.memory_space<vmem>>, %arg4: memref<1x512xf32, #tpu.memory_space<vmem>>, %arg5: memref<1x512xf32, #tpu.memory_space<vmem>>, %arg6: memref<7x32x64xbf16, #tpu.memory_space<vmem>>, %arg7: memref<1x64xf32, #tpu.memory_space<vmem>>, %arg8: memref<1x64xf32, #tpu.memory_space<vmem>>, %arg9: memref<7x64x64xbf16, #tpu.memory_space<vmem>>, %arg10: memref<1x64xf32, #tpu.memory_space<vmem>>, %arg11: memref<1x64xf32, #tpu.memory_space<vmem>>, %arg12: memref<7x64x64xbf16, #tpu.memory_space<vmem>>, %arg13: memref<1x64xf32, #tpu.memory_space<vmem>>, %arg14: memref<1x64xf32, #tpu.memory_space<vmem>>, %arg15: memref<1x7x64xf32, #tpu.memory_space<vmem>>, %arg16: memref<68x32xf32, #tpu.memory_space<vmem>>, %arg17: memref<68x64xf32, #tpu.memory_space<vmem>>, %arg18: memref<68x64xf32, #tpu.memory_space<vmem>>) attributes {dimension_semantics = [#tpu.dimension_semantics<parallel>], iteration_bounds = array<i64: 38>, scalar_prefetch = 0 : i64, scratch_operands = 3 : i64, tpu.core_type = #tpu.core_type<tc>, window_params = [{transform_indices = @transform_0, window_bounds = array<i64: 1, 63, 96>}, {pipeline_mode = #tpu.pipeline_mode<synchronous>, transform_indices = @transform_1, window_bounds = array<i64: 96, 512>}, {pipeline_mode = #tpu.pipeline_mode<synchronous>, transform_indices = @transform_2, window_bounds = array<i64: 96, 512>}, {pipeline_mode = #tpu.pipeline_mode<synchronous>, transform_indices = @transform_3, window_bounds = array<i64: 1, 512>}, {pipeline_mode = #tpu.pipeline_mode<synchronous>, transform_indices = @transform_4, window_bounds = array<i64: 1, 512>}, {pipeline_mode = #tpu.pipeline_mode<synchronous>, transform_indices = @transform_5, window_bounds = array<i64: 7, 32, 64>}, {pipeline_mode = #tpu.pipeline_mode<synchronous>, transform_indices = @transform_6, window_bounds = array<i64: 1, 64>}, {pipeline_mode = #tpu.pipeline_mode<synchronous>, transform_indices = @transform_7, window_bounds = array<i64: 1, 64>}, {pipeline_mode = #tpu.pipeline_mode<synchronous>, transform_indices = @transform_8, window_bounds = array<i64: 7, 64, 64>}, {pipeline_mode = #tpu.pipeline_mode<synchronous>, transform_indices = @transform_9, window_bounds = array<i64: 1, 64>}, {pipeline_mode = #tpu.pipeline_mode<synchronous>, transform_indices = @transform_10, window_bounds = array<i64: 1, 64>}, {pipeline_mode = #tpu.pipeline_mode<synchronous>, transform_indices = @transform_11, window_bounds = array<i64: 7, 64, 64>}, {pipeline_mode = #tpu.pipeline_mode<synchronous>, transform_indices = @transform_12, window_bounds = array<i64: 1, 64>}, {pipeline_mode = #tpu.pipeline_mode<synchronous>, transform_indices = @transform_13, window_bounds = array<i64: 1, 64>}, {transform_indices = @transform_14, window_bounds = array<i64: 1, 7, 64>}]} {
    %c0 = arith.constant 0 : index
    %c0_0 = arith.constant 0 : index
    %c0_1 = arith.constant 0 : index
    %0 = vector.load %arg1[%c0, %c0_0, %c0_1] : memref<1x63x96xf32, #tpu.memory_space<vmem>>, vector<1x63x96xf32>
    %1 = vector.shape_cast %0 : vector<1x63x96xf32> to vector<63x96xf32>
    %2 = vector.extract_strided_slice %1 {offsets = [0, 0], sizes = [62, 96], strides = [1, 1]} : vector<63x96xf32> to vector<62x96xf32>
    %3 = arith.truncf %2 : vector<62x96xf32> to vector<62x96xbf16>
    %4 = vector.extract_strided_slice %1 {offsets = [1, 0], sizes = [62, 96], strides = [1, 1]} : vector<63x96xf32> to vector<62x96xf32>
    %5 = arith.truncf %4 : vector<62x96xf32> to vector<62x96xbf16>
    %c0_2 = arith.constant 0 : index
    %c0_3 = arith.constant 0 : index
    %6 = vector.load %arg2[%c0_2, %c0_3] : memref<96x512xbf16, #tpu.memory_space<vmem>>, vector<96x512xbf16>
    %cst = arith.constant dense<0.000000e+00> : vector<62x512xf32>
    %7 = tpu.matmul %3, %6, %cst {dimension_numbers = #tpu.dot_dimension_numbers<[1], [0], [0], [1], [0, 0, 1, 1], [], []>} : vector<62x96xbf16>, vector<96x512xbf16>, vector<62x512xf32> -> vector<62x512xf32>
    %c0_4 = arith.constant 0 : index
    %c0_5 = arith.constant 0 : index
    %8 = vector.load %arg3[%c0_4, %c0_5] : memref<96x512xbf16, #tpu.memory_space<vmem>>, vector<96x512xbf16>
    %cst_6 = arith.constant dense<0.000000e+00> : vector<62x512xf32>
    %9 = tpu.matmul %5, %8, %cst_6 {dimension_numbers = #tpu.dot_dimension_numbers<[1], [0], [0], [1], [0, 0, 1, 1], [], []>} : vector<62x96xbf16>, vector<96x512xbf16>, vector<62x512xf32> -> vector<62x512xf32>
    %10 = arith.addf %7, %9 : vector<62x512xf32>
    %c0_7 = arith.constant 0 : index
    %c0_8 = arith.constant 0 : index
    %11 = vector.load %arg4[%c0_7, %c0_8] : memref<1x512xf32, #tpu.memory_space<vmem>>, vector<1x512xf32>
    %12 = vector.broadcast %11 : vector<1x512xf32> to vector<62x512xf32>
    %13 = arith.mulf %10, %12 : vector<62x512xf32>
    %c0_9 = arith.constant 0 : index
    %c0_10 = arith.constant 0 : index
    %14 = vector.load %arg5[%c0_9, %c0_10] : memref<1x512xf32, #tpu.memory_space<vmem>>, vector<1x512xf32>
    %15 = vector.broadcast %14 : vector<1x512xf32> to vector<62x512xf32>
    %16 = arith.addf %13, %15 : vector<62x512xf32>
    %cst_11 = arith.constant 0.000000e+00 : f32
    %17 = vector.broadcast %cst_11 : f32 to vector<62x512xf32>
    %18 = arith.maximumf %16, %17 : vector<62x512xf32>
    %19 = vector.extract_strided_slice %18 {offsets = [0, 0], sizes = [62, 32], strides = [1, 1]} : vector<62x512xf32> to vector<62x32xf32>
    %20 = vector.extract_strided_slice %18 {offsets = [0, 32], sizes = [62, 32], strides = [1, 1]} : vector<62x512xf32> to vector<62x32xf32>
    %21 = arith.maximumf %19, %20 : vector<62x32xf32>
    %22 = vector.extract_strided_slice %18 {offsets = [0, 64], sizes = [62, 32], strides = [1, 1]} : vector<62x512xf32> to vector<62x32xf32>
    %23 = arith.maximumf %21, %22 : vector<62x32xf32>
    %24 = vector.extract_strided_slice %18 {offsets = [0, 96], sizes = [62, 32], strides = [1, 1]} : vector<62x512xf32> to vector<62x32xf32>
    %25 = arith.maximumf %23, %24 : vector<62x32xf32>
    %26 = vector.extract_strided_slice %18 {offsets = [0, 128], sizes = [62, 32], strides = [1, 1]} : vector<62x512xf32> to vector<62x32xf32>
    %27 = arith.maximumf %25, %26 : vector<62x32xf32>
    %28 = vector.extract_strided_slice %18 {offsets = [0, 160], sizes = [62, 32], strides = [1, 1]} : vector<62x512xf32> to vector<62x32xf32>
    %29 = arith.maximumf %27, %28 : vector<62x32xf32>
    %30 = vector.extract_strided_slice %18 {offsets = [0, 192], sizes = [62, 32], strides = [1, 1]} : vector<62x512xf32> to vector<62x32xf32>
    %31 = arith.maximumf %29, %30 : vector<62x32xf32>
    %32 = vector.extract_strided_slice %18 {offsets = [0, 224], sizes = [62, 32], strides = [1, 1]} : vector<62x512xf32> to vector<62x32xf32>
    %33 = arith.maximumf %31, %32 : vector<62x32xf32>
    %34 = vector.extract_strided_slice %18 {offsets = [0, 256], sizes = [62, 32], strides = [1, 1]} : vector<62x512xf32> to vector<62x32xf32>
    %35 = arith.maximumf %33, %34 : vector<62x32xf32>
    %36 = vector.extract_strided_slice %18 {offsets = [0, 288], sizes = [62, 32], strides = [1, 1]} : vector<62x512xf32> to vector<62x32xf32>
    %37 = arith.maximumf %35, %36 : vector<62x32xf32>
    %38 = vector.extract_strided_slice %18 {offsets = [0, 320], sizes = [62, 32], strides = [1, 1]} : vector<62x512xf32> to vector<62x32xf32>
    %39 = arith.maximumf %37, %38 : vector<62x32xf32>
    %40 = vector.extract_strided_slice %18 {offsets = [0, 352], sizes = [62, 32], strides = [1, 1]} : vector<62x512xf32> to vector<62x32xf32>
    %41 = arith.maximumf %39, %40 : vector<62x32xf32>
    %42 = vector.extract_strided_slice %18 {offsets = [0, 384], sizes = [62, 32], strides = [1, 1]} : vector<62x512xf32> to vector<62x32xf32>
    %43 = arith.maximumf %41, %42 : vector<62x32xf32>
    %44 = vector.extract_strided_slice %18 {offsets = [0, 416], sizes = [62, 32], strides = [1, 1]} : vector<62x512xf32> to vector<62x32xf32>
    %45 = arith.maximumf %43, %44 : vector<62x32xf32>
    %46 = vector.extract_strided_slice %18 {offsets = [0, 448], sizes = [62, 32], strides = [1, 1]} : vector<62x512xf32> to vector<62x32xf32>
    %47 = arith.maximumf %45, %46 : vector<62x32xf32>
    %48 = vector.extract_strided_slice %18 {offsets = [0, 480], sizes = [62, 32], strides = [1, 1]} : vector<62x512xf32> to vector<62x32xf32>
    %49 = arith.maximumf %47, %48 : vector<62x32xf32>
    %cst_12 = arith.constant 0.000000e+00 : f32
    %50 = vector.broadcast %cst_12 : f32 to vector<68x32xf32>
    %c0_13 = arith.constant 0 : index
    %c0_14 = arith.constant 0 : index
    %51 = vector.load %arg16[%c0_13, %c0_14] : memref<68x32xf32, #tpu.memory_space<vmem>>, vector<68x32xf32>
    tpu.vector_store %arg16[%c0_13, %c0_14], %50 {strides = array<i32>} : memref<68x32xf32, #tpu.memory_space<vmem>>, vector<68x32xf32>,
    %c3 = arith.constant 3 : index
    %c0_15 = arith.constant 0 : index
    %52 = vector.load %arg16[%c3, %c0_15] : memref<68x32xf32, #tpu.memory_space<vmem>>, vector<62x32xf32>
    tpu.vector_store %arg16[%c3, %c0_15], %49 {strides = array<i32>} : memref<68x32xf32, #tpu.memory_space<vmem>>, vector<62x32xf32>,
    %c0_16 = arith.constant 0 : index
    %c0_17 = arith.constant 0 : index
    %53 = vector.load %arg16[%c0_16, %c0_17] : memref<68x32xf32, #tpu.memory_space<vmem>>, vector<62x32xf32>
    %54 = arith.truncf %53 : vector<62x32xf32> to vector<62x32xbf16>
    %c0_18 = arith.constant 0 : index
    %c0_19 = arith.constant 0 : index
    %c0_20 = arith.constant 0 : index
    %55 = vector.load %arg6[%c0_18, %c0_19, %c0_20] : memref<7x32x64xbf16, #tpu.memory_space<vmem>>, vector<1x32x64xbf16>
    %56 = vector.shape_cast %55 : vector<1x32x64xbf16> to vector<32x64xbf16>
    %cst_21 = arith.constant dense<0.000000e+00> : vector<62x64xf32>
    %57 = tpu.matmul %54, %56, %cst_21 {dimension_numbers = #tpu.dot_dimension_numbers<[1], [0], [0], [1], [0, 0, 1, 1], [], []>} : vector<62x32xbf16>, vector<32x64xbf16>, vector<62x64xf32> -> vector<62x64xf32>
    %c1 = arith.constant 1 : index
    %c0_22 = arith.constant 0 : index
    %58 = vector.load %arg16[%c1, %c0_22] : memref<68x32xf32, #tpu.memory_space<vmem>>, vector<62x32xf32>
    %59 = arith.truncf %58 : vector<62x32xf32> to vector<62x32xbf16>
    %c1_23 = arith.constant 1 : index
    %c0_24 = arith.constant 0 : index
    %c0_25 = arith.constant 0 : index
    %60 = vector.load %arg6[%c1_23, %c0_24, %c0_25] : memref<7x32x64xbf16, #tpu.memory_space<vmem>>, vector<1x32x64xbf16>
    %61 = vector.shape_cast %60 : vector<1x32x64xbf16> to vector<32x64xbf16>
    %cst_26 = arith.constant dense<0.000000e+00> : vector<62x64xf32>
    %62 = tpu.matmul %59, %61, %cst_26 {dimension_numbers = #tpu.dot_dimension_numbers<[1], [0], [0], [1], [0, 0, 1, 1], [], []>} : vector<62x32xbf16>, vector<32x64xbf16>, vector<62x64xf32> -> vector<62x64xf32>
    %63 = arith.addf %57, %62 : vector<62x64xf32>
    %c2 = arith.constant 2 : index
    %c0_27 = arith.constant 0 : index
    %64 = vector.load %arg16[%c2, %c0_27] : memref<68x32xf32, #tpu.memory_space<vmem>>, vector<62x32xf32>
    %65 = arith.truncf %64 : vector<62x32xf32> to vector<62x32xbf16>
    %c2_28 = arith.constant 2 : index
    %c0_29 = arith.constant 0 : index
    %c0_30 = arith.constant 0 : index
    %66 = vector.load %arg6[%c2_28, %c0_29, %c0_30] : memref<7x32x64xbf16, #tpu.memory_space<vmem>>, vector<1x32x64xbf16>
    %67 = vector.shape_cast %66 : vector<1x32x64xbf16> to vector<32x64xbf16>
    %cst_31 = arith.constant dense<0.000000e+00> : vector<62x64xf32>
    %68 = tpu.matmul %65, %67, %cst_31 {dimension_numbers = #tpu.dot_dimension_numbers<[1], [0], [0], [1], [0, 0, 1, 1], [], []>} : vector<62x32xbf16>, vector<32x64xbf16>, vector<62x64xf32> -> vector<62x64xf32>
    %69 = arith.addf %63, %68 : vector<62x64xf32>
    %c3_32 = arith.constant 3 : index
    %c0_33 = arith.constant 0 : index
    %70 = vector.load %arg16[%c3_32, %c0_33] : memref<68x32xf32, #tpu.memory_space<vmem>>, vector<62x32xf32>
    %71 = arith.truncf %70 : vector<62x32xf32> to vector<62x32xbf16>
    %c3_34 = arith.constant 3 : index
    %c0_35 = arith.constant 0 : index
    %c0_36 = arith.constant 0 : index
    %72 = vector.load %arg6[%c3_34, %c0_35, %c0_36] : memref<7x32x64xbf16, #tpu.memory_space<vmem>>, vector<1x32x64xbf16>
    %73 = vector.shape_cast %72 : vector<1x32x64xbf16> to vector<32x64xbf16>
    %cst_37 = arith.constant dense<0.000000e+00> : vector<62x64xf32>
    %74 = tpu.matmul %71, %73, %cst_37 {dimension_numbers = #tpu.dot_dimension_numbers<[1], [0], [0], [1], [0, 0, 1, 1], [], []>} : vector<62x32xbf16>, vector<32x64xbf16>, vector<62x64xf32> -> vector<62x64xf32>
    %75 = arith.addf %69, %74 : vector<62x64xf32>
    %c4 = arith.constant 4 : index
    %c0_38 = arith.constant 0 : index
    %76 = vector.load %arg16[%c4, %c0_38] : memref<68x32xf32, #tpu.memory_space<vmem>>, vector<62x32xf32>
    %77 = arith.truncf %76 : vector<62x32xf32> to vector<62x32xbf16>
    %c4_39 = arith.constant 4 : index
    %c0_40 = arith.constant 0 : index
    %c0_41 = arith.constant 0 : index
    %78 = vector.load %arg6[%c4_39, %c0_40, %c0_41] : memref<7x32x64xbf16, #tpu.memory_space<vmem>>, vector<1x32x64xbf16>
    %79 = vector.shape_cast %78 : vector<1x32x64xbf16> to vector<32x64xbf16>
    %cst_42 = arith.constant dense<0.000000e+00> : vector<62x64xf32>
    %80 = tpu.matmul %77, %79, %cst_42 {dimension_numbers = #tpu.dot_dimension_numbers<[1], [0], [0], [1], [0, 0, 1, 1], [], []>} : vector<62x32xbf16>, vector<32x64xbf16>, vector<62x64xf32> -> vector<62x64xf32>
    %81 = arith.addf %75, %80 : vector<62x64xf32>
    %c5 = arith.constant 5 : index
    %c0_43 = arith.constant 0 : index
    %82 = vector.load %arg16[%c5, %c0_43] : memref<68x32xf32, #tpu.memory_space<vmem>>, vector<62x32xf32>
    %83 = arith.truncf %82 : vector<62x32xf32> to vector<62x32xbf16>
    %c5_44 = arith.constant 5 : index
    %c0_45 = arith.constant 0 : index
    %c0_46 = arith.constant 0 : index
    %84 = vector.load %arg6[%c5_44, %c0_45, %c0_46] : memref<7x32x64xbf16, #tpu.memory_space<vmem>>, vector<1x32x64xbf16>
    %85 = vector.shape_cast %84 : vector<1x32x64xbf16> to vector<32x64xbf16>
    %cst_47 = arith.constant dense<0.000000e+00> : vector<62x64xf32>
    %86 = tpu.matmul %83, %85, %cst_47 {dimension_numbers = #tpu.dot_dimension_numbers<[1], [0], [0], [1], [0, 0, 1, 1], [], []>} : vector<62x32xbf16>, vector<32x64xbf16>, vector<62x64xf32> -> vector<62x64xf32>
    %87 = arith.addf %81, %86 : vector<62x64xf32>
    %c6 = arith.constant 6 : index
    %c0_48 = arith.constant 0 : index
    %88 = vector.load %arg16[%c6, %c0_48] : memref<68x32xf32, #tpu.memory_space<vmem>>, vector<62x32xf32>
    %89 = arith.truncf %88 : vector<62x32xf32> to vector<62x32xbf16>
    %c6_49 = arith.constant 6 : index
    %c0_50 = arith.constant 0 : index
    %c0_51 = arith.constant 0 : index
    %90 = vector.load %arg6[%c6_49, %c0_50, %c0_51] : memref<7x32x64xbf16, #tpu.memory_space<vmem>>, vector<1x32x64xbf16>
    %91 = vector.shape_cast %90 : vector<1x32x64xbf16> to vector<32x64xbf16>
    %cst_52 = arith.constant dense<0.000000e+00> : vector<62x64xf32>
    %92 = tpu.matmul %89, %91, %cst_52 {dimension_numbers = #tpu.dot_dimension_numbers<[1], [0], [0], [1], [0, 0, 1, 1], [], []>} : vector<62x32xbf16>, vector<32x64xbf16>, vector<62x64xf32> -> vector<62x64xf32>
    %93 = arith.addf %87, %92 : vector<62x64xf32>
    %c0_53 = arith.constant 0 : index
    %c0_54 = arith.constant 0 : index
    %94 = vector.load %arg7[%c0_53, %c0_54] : memref<1x64xf32, #tpu.memory_space<vmem>>, vector<1x64xf32>
    %95 = vector.broadcast %94 : vector<1x64xf32> to vector<62x64xf32>
    %96 = arith.mulf %93, %95 : vector<62x64xf32>
    %c0_55 = arith.constant 0 : index
    %c0_56 = arith.constant 0 : index
    %97 = vector.load %arg8[%c0_55, %c0_56] : memref<1x64xf32, #tpu.memory_space<vmem>>, vector<1x64xf32>
    %98 = vector.broadcast %97 : vector<1x64xf32> to vector<62x64xf32>
    %99 = arith.addf %96, %98 : vector<62x64xf32>
    %cst_57 = arith.constant 0.000000e+00 : f32
    %100 = vector.broadcast %cst_57 : f32 to vector<62x64xf32>
    %101 = arith.maximumf %99, %100 : vector<62x64xf32>
    %cst_58 = arith.constant 0.000000e+00 : f32
    %102 = vector.broadcast %cst_58 : f32 to vector<68x64xf32>
    %c0_59 = arith.constant 0 : index
    %c0_60 = arith.constant 0 : index
    %103 = vector.load %arg17[%c0_59, %c0_60] : memref<68x64xf32, #tpu.memory_space<vmem>>, vector<68x64xf32>
    tpu.vector_store %arg17[%c0_59, %c0_60], %102 {strides = array<i32>} : memref<68x64xf32, #tpu.memory_space<vmem>>, vector<68x64xf32>,
    %c3_61 = arith.constant 3 : index
    %c0_62 = arith.constant 0 : index
    %104 = vector.load %arg17[%c3_61, %c0_62] : memref<68x64xf32, #tpu.memory_space<vmem>>, vector<62x64xf32>
    tpu.vector_store %arg17[%c3_61, %c0_62], %101 {strides = array<i32>} : memref<68x64xf32, #tpu.memory_space<vmem>>, vector<62x64xf32>,
    %c0_63 = arith.constant 0 : index
    %c0_64 = arith.constant 0 : index
    %105 = vector.load %arg17[%c0_63, %c0_64] : memref<68x64xf32, #tpu.memory_space<vmem>>, vector<62x64xf32>
    %106 = arith.truncf %105 : vector<62x64xf32> to vector<62x64xbf16>
    %c0_65 = arith.constant 0 : index
    %c0_66 = arith.constant 0 : index
    %c0_67 = arith.constant 0 : index
    %107 = vector.load %arg9[%c0_65, %c0_66, %c0_67] : memref<7x64x64xbf16, #tpu.memory_space<vmem>>, vector<1x64x64xbf16>
    %108 = vector.shape_cast %107 : vector<1x64x64xbf16> to vector<64x64xbf16>
    %cst_68 = arith.constant dense<0.000000e+00> : vector<62x64xf32>
    %109 = tpu.matmul %106, %108, %cst_68 {dimension_numbers = #tpu.dot_dimension_numbers<[1], [0], [0], [1], [0, 0, 1, 1], [], []>} : vector<62x64xbf16>, vector<64x64xbf16>, vector<62x64xf32> -> vector<62x64xf32>
    %c1_69 = arith.constant 1 : index
    %c0_70 = arith.constant 0 : index
    %110 = vector.load %arg17[%c1_69, %c0_70] : memref<68x64xf32, #tpu.memory_space<vmem>>, vector<62x64xf32>
    %111 = arith.truncf %110 : vector<62x64xf32> to vector<62x64xbf16>
    %c1_71 = arith.constant 1 : index
    %c0_72 = arith.constant 0 : index
    %c0_73 = arith.constant 0 : index
    %112 = vector.load %arg9[%c1_71, %c0_72, %c0_73] : memref<7x64x64xbf16, #tpu.memory_space<vmem>>, vector<1x64x64xbf16>
    %113 = vector.shape_cast %112 : vector<1x64x64xbf16> to vector<64x64xbf16>
    %cst_74 = arith.constant dense<0.000000e+00> : vector<62x64xf32>
    %114 = tpu.matmul %111, %113, %cst_74 {dimension_numbers = #tpu.dot_dimension_numbers<[1], [0], [0], [1], [0, 0, 1, 1], [], []>} : vector<62x64xbf16>, vector<64x64xbf16>, vector<62x64xf32> -> vector<62x64xf32>
    %115 = arith.addf %109, %114 : vector<62x64xf32>
    %c2_75 = arith.constant 2 : index
    %c0_76 = arith.constant 0 : index
    %116 = vector.load %arg17[%c2_75, %c0_76] : memref<68x64xf32, #tpu.memory_space<vmem>>, vector<62x64xf32>
    %117 = arith.truncf %116 : vector<62x64xf32> to vector<62x64xbf16>
    %c2_77 = arith.constant 2 : index
    %c0_78 = arith.constant 0 : index
    %c0_79 = arith.constant 0 : index
    %118 = vector.load %arg9[%c2_77, %c0_78, %c0_79] : memref<7x64x64xbf16, #tpu.memory_space<vmem>>, vector<1x64x64xbf16>
    %119 = vector.shape_cast %118 : vector<1x64x64xbf16> to vector<64x64xbf16>
    %cst_80 = arith.constant dense<0.000000e+00> : vector<62x64xf32>
    %120 = tpu.matmul %117, %119, %cst_80 {dimension_numbers = #tpu.dot_dimension_numbers<[1], [0], [0], [1], [0, 0, 1, 1], [], []>} : vector<62x64xbf16>, vector<64x64xbf16>, vector<62x64xf32> -> vector<62x64xf32>
    %121 = arith.addf %115, %120 : vector<62x64xf32>
    %c3_81 = arith.constant 3 : index
    %c0_82 = arith.constant 0 : index
    %122 = vector.load %arg17[%c3_81, %c0_82] : memref<68x64xf32, #tpu.memory_space<vmem>>, vector<62x64xf32>
    %123 = arith.truncf %122 : vector<62x64xf32> to vector<62x64xbf16>
    %c3_83 = arith.constant 3 : index
    %c0_84 = arith.constant 0 : index
    %c0_85 = arith.constant 0 : index
    %124 = vector.load %arg9[%c3_83, %c0_84, %c0_85] : memref<7x64x64xbf16, #tpu.memory_space<vmem>>, vector<1x64x64xbf16>
    %125 = vector.shape_cast %124 : vector<1x64x64xbf16> to vector<64x64xbf16>
    %cst_86 = arith.constant dense<0.000000e+00> : vector<62x64xf32>
    %126 = tpu.matmul %123, %125, %cst_86 {dimension_numbers = #tpu.dot_dimension_numbers<[1], [0], [0], [1], [0, 0, 1, 1], [], []>} : vector<62x64xbf16>, vector<64x64xbf16>, vector<62x64xf32> -> vector<62x64xf32>
    %127 = arith.addf %121, %126 : vector<62x64xf32>
    %c4_87 = arith.constant 4 : index
    %c0_88 = arith.constant 0 : index
    %128 = vector.load %arg17[%c4_87, %c0_88] : memref<68x64xf32, #tpu.memory_space<vmem>>, vector<62x64xf32>
    %129 = arith.truncf %128 : vector<62x64xf32> to vector<62x64xbf16>
    %c4_89 = arith.constant 4 : index
    %c0_90 = arith.constant 0 : index
    %c0_91 = arith.constant 0 : index
    %130 = vector.load %arg9[%c4_89, %c0_90, %c0_91] : memref<7x64x64xbf16, #tpu.memory_space<vmem>>, vector<1x64x64xbf16>
    %131 = vector.shape_cast %130 : vector<1x64x64xbf16> to vector<64x64xbf16>
    %cst_92 = arith.constant dense<0.000000e+00> : vector<62x64xf32>
    %132 = tpu.matmul %129, %131, %cst_92 {dimension_numbers = #tpu.dot_dimension_numbers<[1], [0], [0], [1], [0, 0, 1, 1], [], []>} : vector<62x64xbf16>, vector<64x64xbf16>, vector<62x64xf32> -> vector<62x64xf32>
    %133 = arith.addf %127, %132 : vector<62x64xf32>
    %c5_93 = arith.constant 5 : index
    %c0_94 = arith.constant 0 : index
    %134 = vector.load %arg17[%c5_93, %c0_94] : memref<68x64xf32, #tpu.memory_space<vmem>>, vector<62x64xf32>
    %135 = arith.truncf %134 : vector<62x64xf32> to vector<62x64xbf16>
    %c5_95 = arith.constant 5 : index
    %c0_96 = arith.constant 0 : index
    %c0_97 = arith.constant 0 : index
    %136 = vector.load %arg9[%c5_95, %c0_96, %c0_97] : memref<7x64x64xbf16, #tpu.memory_space<vmem>>, vector<1x64x64xbf16>
    %137 = vector.shape_cast %136 : vector<1x64x64xbf16> to vector<64x64xbf16>
    %cst_98 = arith.constant dense<0.000000e+00> : vector<62x64xf32>
    %138 = tpu.matmul %135, %137, %cst_98 {dimension_numbers = #tpu.dot_dimension_numbers<[1], [0], [0], [1], [0, 0, 1, 1], [], []>} : vector<62x64xbf16>, vector<64x64xbf16>, vector<62x64xf32> -> vector<62x64xf32>
    %139 = arith.addf %133, %138 : vector<62x64xf32>
    %c6_99 = arith.constant 6 : index
    %c0_100 = arith.constant 0 : index
    %140 = vector.load %arg17[%c6_99, %c0_100] : memref<68x64xf32, #tpu.memory_space<vmem>>, vector<62x64xf32>
    %141 = arith.truncf %140 : vector<62x64xf32> to vector<62x64xbf16>
    %c6_101 = arith.constant 6 : index
    %c0_102 = arith.constant 0 : index
    %c0_103 = arith.constant 0 : index
    %142 = vector.load %arg9[%c6_101, %c0_102, %c0_103] : memref<7x64x64xbf16, #tpu.memory_space<vmem>>, vector<1x64x64xbf16>
    %143 = vector.shape_cast %142 : vector<1x64x64xbf16> to vector<64x64xbf16>
    %cst_104 = arith.constant dense<0.000000e+00> : vector<62x64xf32>
    %144 = tpu.matmul %141, %143, %cst_104 {dimension_numbers = #tpu.dot_dimension_numbers<[1], [0], [0], [1], [0, 0, 1, 1], [], []>} : vector<62x64xbf16>, vector<64x64xbf16>, vector<62x64xf32> -> vector<62x64xf32>
    %145 = arith.addf %139, %144 : vector<62x64xf32>
    %c0_105 = arith.constant 0 : index
    %c0_106 = arith.constant 0 : index
    %146 = vector.load %arg10[%c0_105, %c0_106] : memref<1x64xf32, #tpu.memory_space<vmem>>, vector<1x64xf32>
    %147 = vector.broadcast %146 : vector<1x64xf32> to vector<62x64xf32>
    %148 = arith.mulf %145, %147 : vector<62x64xf32>
    %c0_107 = arith.constant 0 : index
    %c0_108 = arith.constant 0 : index
    %149 = vector.load %arg11[%c0_107, %c0_108] : memref<1x64xf32, #tpu.memory_space<vmem>>, vector<1x64xf32>
    %150 = vector.broadcast %149 : vector<1x64xf32> to vector<62x64xf32>
    %151 = arith.addf %148, %150 : vector<62x64xf32>
    %cst_109 = arith.constant 0.000000e+00 : f32
    %152 = vector.broadcast %cst_109 : f32 to vector<62x64xf32>
    %153 = arith.maximumf %151, %152 : vector<62x64xf32>
    %cst_110 = arith.constant 0.000000e+00 : f32
    %154 = vector.broadcast %cst_110 : f32 to vector<68x64xf32>
    %c0_111 = arith.constant 0 : index
    %c0_112 = arith.constant 0 : index
    %155 = vector.load %arg18[%c0_111, %c0_112] : memref<68x64xf32, #tpu.memory_space<vmem>>, vector<68x64xf32>
    tpu.vector_store %arg18[%c0_111, %c0_112], %154 {strides = array<i32>} : memref<68x64xf32, #tpu.memory_space<vmem>>, vector<68x64xf32>,
    %c3_113 = arith.constant 3 : index
    %c0_114 = arith.constant 0 : index
    %156 = vector.load %arg18[%c3_113, %c0_114] : memref<68x64xf32, #tpu.memory_space<vmem>>, vector<62x64xf32>
    tpu.vector_store %arg18[%c3_113, %c0_114], %153 {strides = array<i32>} : memref<68x64xf32, #tpu.memory_space<vmem>>, vector<62x64xf32>,
    %c0_115 = arith.constant 0 : index
    %c0_116 = arith.constant 0 : index
    %157 = vector.load %arg18[%c0_115, %c0_116] : memref<68x64xf32, #tpu.memory_space<vmem>>, vector<56x64xf32>
    %158 = arith.truncf %157 : vector<56x64xf32> to vector<56x64xbf16>
    %c0_117 = arith.constant 0 : index
    %c0_118 = arith.constant 0 : index
    %c0_119 = arith.constant 0 : index
    %159 = vector.load %arg12[%c0_117, %c0_118, %c0_119] : memref<7x64x64xbf16, #tpu.memory_space<vmem>>, vector<1x64x64xbf16>
    %160 = vector.shape_cast %159 : vector<1x64x64xbf16> to vector<64x64xbf16>
    %cst_120 = arith.constant dense<0.000000e+00> : vector<56x64xf32>
    %161 = tpu.matmul %158, %160, %cst_120 {dimension_numbers = #tpu.dot_dimension_numbers<[1], [0], [0], [1], [0, 0, 1, 1], [], []>} : vector<56x64xbf16>, vector<64x64xbf16>, vector<56x64xf32> -> vector<56x64xf32>
    %c1_121 = arith.constant 1 : index
    %c0_122 = arith.constant 0 : index
    %162 = vector.load %arg18[%c1_121, %c0_122] : memref<68x64xf32, #tpu.memory_space<vmem>>, vector<56x64xf32>
    %163 = arith.truncf %162 : vector<56x64xf32> to vector<56x64xbf16>
    %c1_123 = arith.constant 1 : index
    %c0_124 = arith.constant 0 : index
    %c0_125 = arith.constant 0 : index
    %164 = vector.load %arg12[%c1_123, %c0_124, %c0_125] : memref<7x64x64xbf16, #tpu.memory_space<vmem>>, vector<1x64x64xbf16>
    %165 = vector.shape_cast %164 : vector<1x64x64xbf16> to vector<64x64xbf16>
    %cst_126 = arith.constant dense<0.000000e+00> : vector<56x64xf32>
    %166 = tpu.matmul %163, %165, %cst_126 {dimension_numbers = #tpu.dot_dimension_numbers<[1], [0], [0], [1], [0, 0, 1, 1], [], []>} : vector<56x64xbf16>, vector<64x64xbf16>, vector<56x64xf32> -> vector<56x64xf32>
    %167 = arith.addf %161, %166 : vector<56x64xf32>
    %c2_127 = arith.constant 2 : index
    %c0_128 = arith.constant 0 : index
    %168 = vector.load %arg18[%c2_127, %c0_128] : memref<68x64xf32, #tpu.memory_space<vmem>>, vector<56x64xf32>
    %169 = arith.truncf %168 : vector<56x64xf32> to vector<56x64xbf16>
    %c2_129 = arith.constant 2 : index
    %c0_130 = arith.constant 0 : index
    %c0_131 = arith.constant 0 : index
    %170 = vector.load %arg12[%c2_129, %c0_130, %c0_131] : memref<7x64x64xbf16, #tpu.memory_space<vmem>>, vector<1x64x64xbf16>
    %171 = vector.shape_cast %170 : vector<1x64x64xbf16> to vector<64x64xbf16>
    %cst_132 = arith.constant dense<0.000000e+00> : vector<56x64xf32>
    %172 = tpu.matmul %169, %171, %cst_132 {dimension_numbers = #tpu.dot_dimension_numbers<[1], [0], [0], [1], [0, 0, 1, 1], [], []>} : vector<56x64xbf16>, vector<64x64xbf16>, vector<56x64xf32> -> vector<56x64xf32>
    %173 = arith.addf %167, %172 : vector<56x64xf32>
    %c3_133 = arith.constant 3 : index
    %c0_134 = arith.constant 0 : index
    %174 = vector.load %arg18[%c3_133, %c0_134] : memref<68x64xf32, #tpu.memory_space<vmem>>, vector<56x64xf32>
    %175 = arith.truncf %174 : vector<56x64xf32> to vector<56x64xbf16>
    %c3_135 = arith.constant 3 : index
    %c0_136 = arith.constant 0 : index
    %c0_137 = arith.constant 0 : index
    %176 = vector.load %arg12[%c3_135, %c0_136, %c0_137] : memref<7x64x64xbf16, #tpu.memory_space<vmem>>, vector<1x64x64xbf16>
    %177 = vector.shape_cast %176 : vector<1x64x64xbf16> to vector<64x64xbf16>
    %cst_138 = arith.constant dense<0.000000e+00> : vector<56x64xf32>
    %178 = tpu.matmul %175, %177, %cst_138 {dimension_numbers = #tpu.dot_dimension_numbers<[1], [0], [0], [1], [0, 0, 1, 1], [], []>} : vector<56x64xbf16>, vector<64x64xbf16>, vector<56x64xf32> -> vector<56x64xf32>
    %179 = arith.addf %173, %178 : vector<56x64xf32>
    %c4_139 = arith.constant 4 : index
    %c0_140 = arith.constant 0 : index
    %180 = vector.load %arg18[%c4_139, %c0_140] : memref<68x64xf32, #tpu.memory_space<vmem>>, vector<56x64xf32>
    %181 = arith.truncf %180 : vector<56x64xf32> to vector<56x64xbf16>
    %c4_141 = arith.constant 4 : index
    %c0_142 = arith.constant 0 : index
    %c0_143 = arith.constant 0 : index
    %182 = vector.load %arg12[%c4_141, %c0_142, %c0_143] : memref<7x64x64xbf16, #tpu.memory_space<vmem>>, vector<1x64x64xbf16>
    %183 = vector.shape_cast %182 : vector<1x64x64xbf16> to vector<64x64xbf16>
    %cst_144 = arith.constant dense<0.000000e+00> : vector<56x64xf32>
    %184 = tpu.matmul %181, %183, %cst_144 {dimension_numbers = #tpu.dot_dimension_numbers<[1], [0], [0], [1], [0, 0, 1, 1], [], []>} : vector<56x64xbf16>, vector<64x64xbf16>, vector<56x64xf32> -> vector<56x64xf32>
    %185 = arith.addf %179, %184 : vector<56x64xf32>
    %c5_145 = arith.constant 5 : index
    %c0_146 = arith.constant 0 : index
    %186 = vector.load %arg18[%c5_145, %c0_146] : memref<68x64xf32, #tpu.memory_space<vmem>>, vector<56x64xf32>
    %187 = arith.truncf %186 : vector<56x64xf32> to vector<56x64xbf16>
    %c5_147 = arith.constant 5 : index
    %c0_148 = arith.constant 0 : index
    %c0_149 = arith.constant 0 : index
    %188 = vector.load %arg12[%c5_147, %c0_148, %c0_149] : memref<7x64x64xbf16, #tpu.memory_space<vmem>>, vector<1x64x64xbf16>
    %189 = vector.shape_cast %188 : vector<1x64x64xbf16> to vector<64x64xbf16>
    %cst_150 = arith.constant dense<0.000000e+00> : vector<56x64xf32>
    %190 = tpu.matmul %187, %189, %cst_150 {dimension_numbers = #tpu.dot_dimension_numbers<[1], [0], [0], [1], [0, 0, 1, 1], [], []>} : vector<56x64xbf16>, vector<64x64xbf16>, vector<56x64xf32> -> vector<56x64xf32>
    %191 = arith.addf %185, %190 : vector<56x64xf32>
    %c6_151 = arith.constant 6 : index
    %c0_152 = arith.constant 0 : index
    %192 = vector.load %arg18[%c6_151, %c0_152] : memref<68x64xf32, #tpu.memory_space<vmem>>, vector<56x64xf32>
    %193 = arith.truncf %192 : vector<56x64xf32> to vector<56x64xbf16>
    %c6_153 = arith.constant 6 : index
    %c0_154 = arith.constant 0 : index
    %c0_155 = arith.constant 0 : index
    %194 = vector.load %arg12[%c6_153, %c0_154, %c0_155] : memref<7x64x64xbf16, #tpu.memory_space<vmem>>, vector<1x64x64xbf16>
    %195 = vector.shape_cast %194 : vector<1x64x64xbf16> to vector<64x64xbf16>
    %cst_156 = arith.constant dense<0.000000e+00> : vector<56x64xf32>
    %196 = tpu.matmul %193, %195, %cst_156 {dimension_numbers = #tpu.dot_dimension_numbers<[1], [0], [0], [1], [0, 0, 1, 1], [], []>} : vector<56x64xbf16>, vector<64x64xbf16>, vector<56x64xf32> -> vector<56x64xf32>
    %197 = arith.addf %191, %196 : vector<56x64xf32>
    %c0_157 = arith.constant 0 : index
    %c0_158 = arith.constant 0 : index
    %198 = vector.load %arg13[%c0_157, %c0_158] : memref<1x64xf32, #tpu.memory_space<vmem>>, vector<1x64xf32>
    %199 = vector.broadcast %198 : vector<1x64xf32> to vector<56x64xf32>
    %200 = arith.mulf %197, %199 : vector<56x64xf32>
    %c0_159 = arith.constant 0 : index
    %c0_160 = arith.constant 0 : index
    %201 = vector.load %arg14[%c0_159, %c0_160] : memref<1x64xf32, #tpu.memory_space<vmem>>, vector<1x64xf32>
    %202 = vector.broadcast %201 : vector<1x64xf32> to vector<56x64xf32>
    %203 = arith.addf %200, %202 : vector<56x64xf32>
    %cst_161 = arith.constant 0.000000e+00 : f32
    %204 = vector.broadcast %cst_161 : f32 to vector<56x64xf32>
    %205 = arith.maximumf %203, %204 : vector<56x64xf32>
    %206 = vector.extract_strided_slice %205 {offsets = [0, 0], sizes = [8, 64], strides = [1, 1]} : vector<56x64xf32> to vector<8x64xf32>
    %cst_162 = arith.constant dense<0xFF800000> : vector<64xf32>
    %207 = vector.multi_reduction <maximumf>, %206, %cst_162 [0] : vector<8x64xf32> to vector<64xf32>
    %208 = vector.shape_cast %207 : vector<64xf32> to vector<1x64xf32>
    %c0_163 = arith.constant 0 : index
    %c0_164 = arith.constant 0 : index
    %c0_165 = arith.constant 0 : index
    %209 = vector.load %arg15[%c0_163, %c0_164, %c0_165] : memref<1x7x64xf32, #tpu.memory_space<vmem>>, vector<1x1x64xf32>
    %210 = vector.shape_cast %209 : vector<1x1x64xf32> to vector<1x64xf32>
    %211 = vector.shape_cast %208 : vector<1x64xf32> to vector<1x1x64xf32>
    tpu.vector_store %arg15[%c0_163, %c0_164, %c0_165], %211 {strides = array<i32>} : memref<1x7x64xf32, #tpu.memory_space<vmem>>, vector<1x1x64xf32>,
    %212 = vector.extract_strided_slice %205 {offsets = [8, 0], sizes = [8, 64], strides = [1, 1]} : vector<56x64xf32> to vector<8x64xf32>
    %cst_166 = arith.constant dense<0xFF800000> : vector<64xf32>
    %213 = vector.multi_reduction <maximumf>, %212, %cst_166 [0] : vector<8x64xf32> to vector<64xf32>
    %214 = vector.shape_cast %213 : vector<64xf32> to vector<1x64xf32>
    %c0_167 = arith.constant 0 : index
    %c1_168 = arith.constant 1 : index
    %c0_169 = arith.constant 0 : index
    %215 = vector.load %arg15[%c0_167, %c1_168, %c0_169] : memref<1x7x64xf32, #tpu.memory_space<vmem>>, vector<1x1x64xf32>
    %216 = vector.shape_cast %215 : vector<1x1x64xf32> to vector<1x64xf32>
    %217 = vector.shape_cast %214 : vector<1x64xf32> to vector<1x1x64xf32>
    tpu.vector_store %arg15[%c0_167, %c1_168, %c0_169], %217 {strides = array<i32>} : memref<1x7x64xf32, #tpu.memory_space<vmem>>, vector<1x1x64xf32>,
    %218 = vector.extract_strided_slice %205 {offsets = [16, 0], sizes = [8, 64], strides = [1, 1]} : vector<56x64xf32> to vector<8x64xf32>
    %cst_170 = arith.constant dense<0xFF800000> : vector<64xf32>
    %219 = vector.multi_reduction <maximumf>, %218, %cst_170 [0] : vector<8x64xf32> to vector<64xf32>
    %220 = vector.shape_cast %219 : vector<64xf32> to vector<1x64xf32>
    %c0_171 = arith.constant 0 : index
    %c2_172 = arith.constant 2 : index
    %c0_173 = arith.constant 0 : index
    %221 = vector.load %arg15[%c0_171, %c2_172, %c0_173] : memref<1x7x64xf32, #tpu.memory_space<vmem>>, vector<1x1x64xf32>
    %222 = vector.shape_cast %221 : vector<1x1x64xf32> to vector<1x64xf32>
    %223 = vector.shape_cast %220 : vector<1x64xf32> to vector<1x1x64xf32>
    tpu.vector_store %arg15[%c0_171, %c2_172, %c0_173], %223 {strides = array<i32>} : memref<1x7x64xf32, #tpu.memory_space<vmem>>, vector<1x1x64xf32>,
    %224 = vector.extract_strided_slice %205 {offsets = [24, 0], sizes = [8, 64], strides = [1, 1]} : vector<56x64xf32> to vector<8x64xf32>
    %cst_174 = arith.constant dense<0xFF800000> : vector<64xf32>
    %225 = vector.multi_reduction <maximumf>, %224, %cst_174 [0] : vector<8x64xf32> to vector<64xf32>
    %226 = vector.shape_cast %225 : vector<64xf32> to vector<1x64xf32>
    %c0_175 = arith.constant 0 : index
    %c3_176 = arith.constant 3 : index
    %c0_177 = arith.constant 0 : index
    %227 = vector.load %arg15[%c0_175, %c3_176, %c0_177] : memref<1x7x64xf32, #tpu.memory_space<vmem>>, vector<1x1x64xf32>
    %228 = vector.shape_cast %227 : vector<1x1x64xf32> to vector<1x64xf32>
    %229 = vector.shape_cast %226 : vector<1x64xf32> to vector<1x1x64xf32>
    tpu.vector_store %arg15[%c0_175, %c3_176, %c0_177], %229 {strides = array<i32>} : memref<1x7x64xf32, #tpu.memory_space<vmem>>, vector<1x1x64xf32>,
    %230 = vector.extract_strided_slice %205 {offsets = [32, 0], sizes = [8, 64], strides = [1, 1]} : vector<56x64xf32> to vector<8x64xf32>
    %cst_178 = arith.constant dense<0xFF800000> : vector<64xf32>
    %231 = vector.multi_reduction <maximumf>, %230, %cst_178 [0] : vector<8x64xf32> to vector<64xf32>
    %232 = vector.shape_cast %231 : vector<64xf32> to vector<1x64xf32>
    %c0_179 = arith.constant 0 : index
    %c4_180 = arith.constant 4 : index
    %c0_181 = arith.constant 0 : index
    %233 = vector.load %arg15[%c0_179, %c4_180, %c0_181] : memref<1x7x64xf32, #tpu.memory_space<vmem>>, vector<1x1x64xf32>
    %234 = vector.shape_cast %233 : vector<1x1x64xf32> to vector<1x64xf32>
    %235 = vector.shape_cast %232 : vector<1x64xf32> to vector<1x1x64xf32>
    tpu.vector_store %arg15[%c0_179, %c4_180, %c0_181], %235 {strides = array<i32>} : memref<1x7x64xf32, #tpu.memory_space<vmem>>, vector<1x1x64xf32>,
    %236 = vector.extract_strided_slice %205 {offsets = [40, 0], sizes = [8, 64], strides = [1, 1]} : vector<56x64xf32> to vector<8x64xf32>
    %cst_182 = arith.constant dense<0xFF800000> : vector<64xf32>
    %237 = vector.multi_reduction <maximumf>, %236, %cst_182 [0] : vector<8x64xf32> to vector<64xf32>
    %238 = vector.shape_cast %237 : vector<64xf32> to vector<1x64xf32>
    %c0_183 = arith.constant 0 : index
    %c5_184 = arith.constant 5 : index
    %c0_185 = arith.constant 0 : index
    %239 = vector.load %arg15[%c0_183, %c5_184, %c0_185] : memref<1x7x64xf32, #tpu.memory_space<vmem>>, vector<1x1x64xf32>
    %240 = vector.shape_cast %239 : vector<1x1x64xf32> to vector<1x64xf32>
    %241 = vector.shape_cast %238 : vector<1x64xf32> to vector<1x1x64xf32>
    tpu.vector_store %arg15[%c0_183, %c5_184, %c0_185], %241 {strides = array<i32>} : memref<1x7x64xf32, #tpu.memory_space<vmem>>, vector<1x1x64xf32>,
    %242 = vector.extract_strided_slice %205 {offsets = [48, 0], sizes = [8, 64], strides = [1, 1]} : vector<56x64xf32> to vector<8x64xf32>
    %cst_186 = arith.constant dense<0xFF800000> : vector<64xf32>
    %243 = vector.multi_reduction <maximumf>, %242, %cst_186 [0] : vector<8x64xf32> to vector<64xf32>
    %244 = vector.shape_cast %243 : vector<64xf32> to vector<1x64xf32>
    %c0_187 = arith.constant 0 : index
    %c6_188 = arith.constant 6 : index
    %c0_189 = arith.constant 0 : index
    %245 = vector.load %arg15[%c0_187, %c6_188, %c0_189] : memref<1x7x64xf32, #tpu.memory_space<vmem>>, vector<1x1x64xf32>
    %246 = vector.shape_cast %245 : vector<1x1x64xf32> to vector<1x64xf32>
    %247 = vector.shape_cast %244 : vector<1x64xf32> to vector<1x1x64xf32>
    tpu.vector_store %arg15[%c0_187, %c6_188, %c0_189], %247 {strides = array<i32>} : memref<1x7x64xf32, #tpu.memory_space<vmem>>, vector<1x1x64xf32>,
    return
  }
  func.func @transform_0(%arg0: i32) -> (i32, i32, i32) {
    %c0_i32 = arith.constant 0 : i32
    %c0_i32_0 = arith.constant 0 : i32
    %c0_i32_1 = arith.constant 0 : i32
    return %arg0, %c0_i32, %c0_i32_0 : i32, i32, i32
  }
  func.func @transform_1(%arg0: i32) -> (i32, i32) {
    %c0_i32 = arith.constant 0 : i32
    %c0_i32_0 = arith.constant 0 : i32
    %c0_i32_1 = arith.constant 0 : i32
    return %c0_i32, %c0_i32_0 : i32, i32
  }
  func.func @transform_2(%arg0: i32) -> (i32, i32) {
    %c0_i32 = arith.constant 0 : i32
    %c0_i32_0 = arith.constant 0 : i32
    %c0_i32_1 = arith.constant 0 : i32
    return %c0_i32, %c0_i32_0 : i32, i32
  }
  func.func @transform_3(%arg0: i32) -> (i32, i32) {
    %c0_i32 = arith.constant 0 : i32
    %c0_i32_0 = arith.constant 0 : i32
    %c0_i32_1 = arith.constant 0 : i32
    return %c0_i32, %c0_i32_0 : i32, i32
  }
  func.func @transform_4(%arg0: i32) -> (i32, i32) {
    %c0_i32 = arith.constant 0 : i32
    %c0_i32_0 = arith.constant 0 : i32
    %c0_i32_1 = arith.constant 0 : i32
    return %c0_i32, %c0_i32_0 : i32, i32
  }
  func.func @transform_5(%arg0: i32) -> (i32, i32, i32) {
    %c0_i32 = arith.constant 0 : i32
    %c0_i32_0 = arith.constant 0 : i32
    %c0_i32_1 = arith.constant 0 : i32
    %c0_i32_2 = arith.constant 0 : i32
    return %c0_i32, %c0_i32_0, %c0_i32_1 : i32, i32, i32
  }
  func.func @transform_6(%arg0: i32) -> (i32, i32) {
    %c0_i32 = arith.constant 0 : i32
    %c0_i32_0 = arith.constant 0 : i32
    %c0_i32_1 = arith.constant 0 : i32
    return %c0_i32, %c0_i32_0 : i32, i32
  }
  func.func @transform_7(%arg0: i32) -> (i32, i32) {
    %c0_i32 = arith.constant 0 : i32
    %c0_i32_0 = arith.constant 0 : i32
    %c0_i32_1 = arith.constant 0 : i32
    return %c0_i32, %c0_i32_0 : i32, i32
  }
  func.func @transform_8(%arg0: i32) -> (i32, i32, i32) {
    %c0_i32 = arith.constant 0 : i32
    %c0_i32_0 = arith.constant 0 : i32
    %c0_i32_1 = arith.constant 0 : i32
    %c0_i32_2 = arith.constant 0 : i32
    return %c0_i32, %c0_i32_0, %c0_i32_1 : i32, i32, i32
  }
  func.func @transform_9(%arg0: i32) -> (i32, i32) {
    %c0_i32 = arith.constant 0 : i32
    %c0_i32_0 = arith.constant 0 : i32
    %c0_i32_1 = arith.constant 0 : i32
    return %c0_i32, %c0_i32_0 : i32, i32
  }
  func.func @transform_10(%arg0: i32) -> (i32, i32) {
    %c0_i32 = arith.constant 0 : i32
    %c0_i32_0 = arith.constant 0 : i32
    %c0_i32_1 = arith.constant 0 : i32
    return %c0_i32, %c0_i32_0 : i32, i32
  }
  func.func @transform_11(%arg0: i32) -> (i32, i32, i32) {
    %c0_i32 = arith.constant 0 : i32
    %c0_i32_0 = arith.constant 0 : i32
    %c0_i32_1 = arith.constant 0 : i32
    %c0_i32_2 = arith.constant 0 : i32
    return %c0_i32, %c0_i32_0, %c0_i32_1 : i32, i32, i32
  }
  func.func @transform_12(%arg0: i32) -> (i32, i32) {
    %c0_i32 = arith.constant 0 : i32
    %c0_i32_0 = arith.constant 0 : i32
    %c0_i32_1 = arith.constant 0 : i32
    return %c0_i32, %c0_i32_0 : i32, i32
  }
  func.func @transform_13(%arg0: i32) -> (i32, i32) {
    %c0_i32 = arith.constant 0 : i32
    %c0_i32_0 = arith.constant 0 : i32
    %c0_i32_1 = arith.constant 0 : i32
    return %c0_i32, %c0_i32_0 : i32, i32
  }
  func.func @transform_14(%arg0: i32) -> (i32, i32, i32) {
    %c0_i32 = arith.constant 0 : i32
    %c0_i32_0 = arith.constant 0 : i32
    %c0_i32_1 = arith.constant 0 : i32
    return %arg0, %c0_i32, %c0_i32_0 : i32, i32, i32
  }
}

module attributes {stable_mosaic.version = 11 : i64} {
  func.func @fc_kernel(%arg0: i32, %arg1: memref<2x2432xbf16, #tpu.memory_space<vmem>>, %arg2: memref<2432x128xbf16, #tpu.memory_space<vmem>>, %arg3: memref<1x128xf32, #tpu.memory_space<vmem>>, %arg4: memref<128x1xbf16, #tpu.memory_space<vmem>>, %arg5: memref<1x1xf32, #tpu.memory_space<vmem>>, %arg6: memref<2x1xf32, #tpu.memory_space<vmem>>, %arg7: memref<2x128xf32, #tpu.memory_space<vmem>>) attributes {dimension_semantics = [#tpu.dimension_semantics<arbitrary>], iteration_bounds = array<i64: 5>, scalar_prefetch = 0 : i64, scratch_operands = 1 : i64, tpu.core_type = #tpu.core_type<tc>, window_params = [{transform_indices = @transform_0, window_bounds = array<i64: 2, 2432>}, {transform_indices = @transform_1, window_bounds = array<i64: 2432, 128>}, {pipeline_mode = #tpu.pipeline_mode<synchronous>, transform_indices = @transform_2, window_bounds = array<i64: 1, 128>}, {pipeline_mode = #tpu.pipeline_mode<synchronous>, transform_indices = @transform_3, window_bounds = array<i64: 128, 1>}, {pipeline_mode = #tpu.pipeline_mode<synchronous>, transform_indices = @transform_4, window_bounds = array<i64: 1, 1>}, {pipeline_mode = #tpu.pipeline_mode<synchronous>, transform_indices = @transform_5, window_bounds = array<i64: 2, 1>}]} {
    %c0_i32 = arith.constant 0 : i32
    %0 = arith.cmpi eq, %arg0, %c0_i32 : i32
    %1 = arith.extui %0 : i1 to i32
    %c0_i32_0 = arith.constant 0 : i32
    %2 = arith.cmpi ne, %1, %c0_i32_0 : i32
    scf.if %2 {
      %cst_9 = arith.constant 0.000000e+00 : f32
      %12 = vector.broadcast %cst_9 : f32 to vector<2x128xf32>
      %c0_10 = arith.constant 0 : index
      %c0_11 = arith.constant 0 : index
      %13 = vector.load %arg7[%c0_10, %c0_11] : memref<2x128xf32, #tpu.memory_space<vmem>>, vector<2x128xf32>
      tpu.vector_store %arg7[%c0_10, %c0_11], %12 {strides = array<i32>} : memref<2x128xf32, #tpu.memory_space<vmem>>, vector<2x128xf32>,
    } else {
    }
    %c0 = arith.constant 0 : index
    %c0_1 = arith.constant 0 : index
    %3 = vector.load %arg7[%c0, %c0_1] : memref<2x128xf32, #tpu.memory_space<vmem>>, vector<2x128xf32>
    %c0_2 = arith.constant 0 : index
    %c0_3 = arith.constant 0 : index
    %4 = vector.load %arg1[%c0_2, %c0_3] : memref<2x2432xbf16, #tpu.memory_space<vmem>>, vector<2x2432xbf16>
    %c0_4 = arith.constant 0 : index
    %c0_5 = arith.constant 0 : index
    %5 = vector.load %arg2[%c0_4, %c0_5] : memref<2432x128xbf16, #tpu.memory_space<vmem>>, vector<2432x128xbf16>
    %cst = arith.constant dense<0.000000e+00> : vector<2x128xf32>
    %6 = tpu.matmul %4, %5, %cst {dimension_numbers = #tpu.dot_dimension_numbers<[1], [0], [0], [1], [0, 0, 1, 1], [], []>} : vector<2x2432xbf16>, vector<2432x128xbf16>, vector<2x128xf32> -> vector<2x128xf32>
    %7 = arith.addf %3, %6 : vector<2x128xf32>
    %c0_6 = arith.constant 0 : index
    %c0_7 = arith.constant 0 : index
    %8 = vector.load %arg7[%c0_6, %c0_7] : memref<2x128xf32, #tpu.memory_space<vmem>>, vector<2x128xf32>
    tpu.vector_store %arg7[%c0_6, %c0_7], %7 {strides = array<i32>} : memref<2x128xf32, #tpu.memory_space<vmem>>, vector<2x128xf32>,
    %c4_i32 = arith.constant 4 : i32
    %9 = arith.cmpi eq, %arg0, %c4_i32 : i32
    %10 = arith.extui %9 : i1 to i32
    %c0_i32_8 = arith.constant 0 : i32
    %11 = arith.cmpi ne, %10, %c0_i32_8 : i32
    scf.if %11 {
      %c0_9 = arith.constant 0 : index
      %c0_10 = arith.constant 0 : index
      %12 = vector.load %arg7[%c0_9, %c0_10] : memref<2x128xf32, #tpu.memory_space<vmem>>, vector<2x128xf32>
      %c0_11 = arith.constant 0 : index
      %c0_12 = arith.constant 0 : index
      %13 = vector.load %arg3[%c0_11, %c0_12] : memref<1x128xf32, #tpu.memory_space<vmem>>, vector<1x128xf32>
      %14 = vector.broadcast %13 : vector<1x128xf32> to vector<2x128xf32>
      %15 = arith.addf %12, %14 : vector<2x128xf32>
      %cst_13 = arith.constant 0.000000e+00 : f32
      %16 = vector.broadcast %cst_13 : f32 to vector<2x128xf32>
      %17 = arith.maximumf %15, %16 : vector<2x128xf32>
      %18 = arith.truncf %17 : vector<2x128xf32> to vector<2x128xbf16>
      %c0_14 = arith.constant 0 : index
      %c0_15 = arith.constant 0 : index
      %19 = vector.load %arg4[%c0_14, %c0_15] : memref<128x1xbf16, #tpu.memory_space<vmem>>, vector<128x1xbf16>
      %cst_16 = arith.constant dense<0.000000e+00> : vector<2x1xf32>
      %20 = tpu.matmul %18, %19, %cst_16 {dimension_numbers = #tpu.dot_dimension_numbers<[1], [0], [0], [1], [0, 0, 1, 1], [], []>} : vector<2x128xbf16>, vector<128x1xbf16>, vector<2x1xf32> -> vector<2x1xf32>
      %c0_17 = arith.constant 0 : index
      %c0_18 = arith.constant 0 : index
      %21 = vector.load %arg5[%c0_17, %c0_18] : memref<1x1xf32, #tpu.memory_space<vmem>>, vector<1x1xf32>
      %22 = vector.broadcast %21 : vector<1x1xf32> to vector<2x1xf32>
      %23 = arith.addf %20, %22 : vector<2x1xf32>
      %c0_19 = arith.constant 0 : index
      %c0_20 = arith.constant 0 : index
      %24 = vector.load %arg6[%c0_19, %c0_20] : memref<2x1xf32, #tpu.memory_space<vmem>>, vector<2x1xf32>
      tpu.vector_store %arg6[%c0_19, %c0_20], %23 {strides = array<i32>} : memref<2x1xf32, #tpu.memory_space<vmem>>, vector<2x1xf32>,
    } else {
    }
    return
  }
  func.func @transform_0(%arg0: i32) -> (i32, i32) {
    %c0_i32 = arith.constant 0 : i32
    %c0_i32_0 = arith.constant 0 : i32
    return %c0_i32, %arg0 : i32, i32
  }
  func.func @transform_1(%arg0: i32) -> (i32, i32) {
    %c0_i32 = arith.constant 0 : i32
    %c0_i32_0 = arith.constant 0 : i32
    return %arg0, %c0_i32 : i32, i32
  }
  func.func @transform_2(%arg0: i32) -> (i32, i32) {
    %c0_i32 = arith.constant 0 : i32
    %c0_i32_0 = arith.constant 0 : i32
    %c0_i32_1 = arith.constant 0 : i32
    return %c0_i32, %c0_i32_0 : i32, i32
  }
  func.func @transform_3(%arg0: i32) -> (i32, i32) {
    %c0_i32 = arith.constant 0 : i32
    %c0_i32_0 = arith.constant 0 : i32
    %c0_i32_1 = arith.constant 0 : i32
    return %c0_i32, %c0_i32_0 : i32, i32
  }
  func.func @transform_4(%arg0: i32) -> (i32, i32) {
    %c0_i32 = arith.constant 0 : i32
    %c0_i32_0 = arith.constant 0 : i32
    %c0_i32_1 = arith.constant 0 : i32
    return %c0_i32, %c0_i32_0 : i32, i32
  }
  func.func @transform_5(%arg0: i32) -> (i32, i32) {
    %c0_i32 = arith.constant 0 : i32
    %c0_i32_0 = arith.constant 0 : i32
    %c0_i32_1 = arith.constant 0 : i32
    return %c0_i32, %c0_i32_0 : i32, i32
  }
}

</mosaic_0001>

<bundles_post_ra>
// kernel: feature_net_forward.4
= control target key start
LH: loop header
LB: loop body
LE: loop exit
PB: predicated region body
PF: predicated region fallthrough
CT: control target
= control target key end

     0   :  { %s4735_s29 = smov 0   ;;  %s6391_s0 = inlined_call_operand.vmem [shape: f32[38,15,400], index: 0, kind: input, shape index: {}]   ;;  %s6392_s1 = inlined_call_operand.vmem [shape: bf16[400,512], index: 1, kind: input, shape index: {}]   ;;  %s6393_s2 = inlined_call_operand.vmem [shape: bf16[400,512], index: 2, kind: input, shape index: {}]   ;;  %s6394_s3 = inlined_call_operand.vmem [shape: f32[1,512], index: 3, kind: input, shape index: {}]   ;;  %s6395_s4 = inlined_call_operand.vmem [shape: f32[1,512], index: 4, kind: input, shape index: {}]   ;;  %s6396_s5 = inlined_call_operand.vmem [shape: bf16[5,64,64], index: 5, kind: input, shape index: {}]   ;;  %s6397_s6 = inlined_call_operand.vmem [shape: f32[1,64], index: 6, kind: input, shape index: {}]   ;;  %s6398_s7 = inlined_call_operand.vmem [shape: f32[1,64], index: 7, kind: input, shape index: {}]   ;;  %s6399_s8 = inlined_call_operand.vmem [shape: bf16[5,64,64], index: 8, kind: input, shape index: {}]   ;;  %s6400_s9 = inlined_call_operand.vmem [shape: f32[1,64], index: 9, kind: input, shape index: {}]   ;;  %s6401_s10 = inlined_call_operand.vmem [shape: f32[1,64], index: 10, kind: input, shape index: {}]   ;;  %s6402_s11 = inlined_call_operand.vmem [shape: bf16[5,64,64], index: 11, kind: input, shape index: {}]   ;;  %s6403_s12 = inlined_call_operand.vmem [shape: f32[1,64], index: 12, kind: input, shape index: {}]   ;;  %s6404_s13 = inlined_call_operand.vmem [shape: f32[1,64], index: 13, kind: input, shape index: {}]   ;;  %s6405_s14 = inlined_call_operand.vmem [shape: f32[38,3,64], index: 14, kind: output, shape index: {}]  }
   0x1 LB: > { %s3204_s30 = sadd.s32 4294967295, %s4656_s29   ;;  %p3208_p0 = scmp.ge.s32.totalorder %s4656_s29, 1  ;;  %s4656_s29 = sphi %s4735_s29, %s24_s29  }
   0x2   : > { %p412_p1 = scmp.lt.s32.totalorder %s4656_s29, 39 }
   0x4   : > { %p413_p2 = pnand %p3208_p0, %p412_p1 }
   0x5   : > { %p457_p3 = scmp.lt.s32.totalorder (!%p413_p2), %s3204_s30, 37  ;;  %s4658_s28 = smov (!%p413_p2), 64  }
   0x6   : > { %416 = sbr.rel (%p413_p2) target bundleno = 1017 (0x3f9), region = 76 }
   0xb   : > { %v3326_v0 = vld [vmem:[%s6393_s2 + $0xe0] sm:$0xf]  ;;  %v4504_v1 = vld [vmem:[%s6393_s2 + $0xec] sm:$0xf0]  ;;  %v4502_v11 = vld [vmem:[%s6393_s2 + $0xe4] sm:$0xf] }
   0xc   : > { %v3454_v2 = vld [vmem:[%s6393_s2 + $0x1e0] sm:$0xf]  ;;  %v3327_v3 = vor.u32 %v4504_v1, %v3326_v0  ;;  %v4536_v4 = vld [vmem:[%s6393_s2 + $0x1ec] sm:$0xf0]  ;;  %v3328_v13 = vld [vmem:[%s6393_s2 + $0xf0] sm:$0xf0] }
   0xd   : > { %v3582_v5 = vld [vmem:[%s6393_s2 + $0x2e0] sm:$0xf]  ;;  %v4568_v6 = vld [vmem:[%s6393_s2 + $0x2ec] sm:$0xf0]  ;;  %v3455_v7 = vor.u32 %v4536_v4, %v3454_v2  ;;  %v3331_v16 = vor.u32 %v4502_v11, %v3328_v13  ;;  %v4498_v23 = vld [vmem:[%s6393_s2 + $0xc4] sm:$0xf] }
   0xe   : > { %v3583_v8 = vor.u32 %v4568_v6, %v3582_v5  ;;  %v3598_v9 = vld [vmem:[%s6393_s2 + $0x300] sm:$0xf]  ;;  %v4572_v10 = vld [vmem:[%s6393_s2 + $0x30c] sm:$0xf0]  ;;  %1214 = vmatpush.bf16.msra.mxu0 %v3327_v3  ;;  %v3312_v24 = vld [vmem:[%s6393_s2 + $0xd0] sm:$0xf0] }
   0xf   : > { %v3599_v12 = vor.u32 %v4572_v10, %v3598_v9  ;;  %v3310_v14 = vld [vmem:[%s6393_s2 + $0xc0] sm:$0xf]  ;;  %v4500_v15 = vld [vmem:[%s6393_s2 + $0xcc] sm:$0xf0]  ;;  %1228 = vmatpush.bf16.msra.mxu1 %v3455_v7  ;;  %v3315_v26 = vor.u32 %v4498_v23, %v3312_v24  ;;  %v4494_v36 = vld [vmem:[%s6393_s2 + $0xa4] sm:$0xf] }
  0x10   : > { %1242 = vmatpush.bf16.msra.mxu2 %v3583_v8  ;;  %v3311_v17 = vor.u32 %v4500_v15, %v3310_v14  ;;  %v3438_v18 = vld [vmem:[%s6393_s2 + $0x1c0] sm:$0xf]  ;;  %v4532_v19 = vld [vmem:[%s6393_s2 + $0x1cc] sm:$0xf0]  ;;  %v3296_v37 = vld [vmem:[%s6393_s2 + $0xb0] sm:$0xf0] }
  0x11   : > { %v3566_v20 = vld [vmem:[%s6393_s2 + $0x2c0] sm:$0xf]  ;;  %1263 = vmatpush.bf16.msra.mxu3 %v3599_v12  ;;  %v3439_v21 = vor.u32 %v4532_v19, %v3438_v18  ;;  %v4564_v22 = vld [vmem:[%s6393_s2 + $0x2cc] sm:$0xf0]  ;;  %v3299_v42 = vor.u32 %v4494_v36, %v3296_v37  ;;  %v4490_v46 = vld [vmem:[%s6393_s2 + $0x84] sm:$0xf] }
  0x12   : > { %v3567_v25 = vor.u32 %v4564_v22, %v3566_v20  ;;  %v3294_v27 = vld [vmem:[%s6393_s2 + $0xa0] sm:$0xf]  ;;  %v4496_v28 = vld [vmem:[%s6393_s2 + $0xac] sm:$0xf0]  ;;  %1215 = vmatpush.bf16.msra.mxu0 %v3311_v17  ;;  %v3280_v47 = vld [vmem:[%s6393_s2 + $0x90] sm:$0xf0] }
  0x13   : > { %v3422_v29 = vld [vmem:[%s6393_s2 + $0x1a0] sm:$0xf]  ;;  %v3295_v30 = vor.u32 %v4496_v28, %v3294_v27  ;;  %v4528_v31 = vld [vmem:[%s6393_s2 + $0x1ac] sm:$0xf0]  ;;  %1229 = vmatpush.bf16.msra.mxu1 %v3439_v21  ;;  %v3283_v56 = vor.u32 %v4490_v46, %v3280_v47  ;;  %v4486_v58 = vld [vmem:[%s6393_s2 + $0x64] sm:$0xf] }
  0x14   : > { %v3550_v32 = vld [vmem:[%s6393_s2 + $0x2a0] sm:$0xf]  ;;  %v4560_v33 = vld [vmem:[%s6393_s2 + $0x2ac] sm:$0xf0]  ;;  %1243 = vmatpush.bf16.msra.mxu2 %v3567_v25  ;;  %v3423_v34 = vor.u32 %v4528_v31, %v3422_v29  ;;  %v3264_v59 = vld [vmem:[%s6393_s2 + $0x70] sm:$0xf0] }
  0x15   : > { %1270 = vmatpush.bf16.msrb.mxu3 %v3331_v16  ;;  %v3551_v35 = vor.u32 %v4560_v33, %v3550_v32  ;;  %v3278_v38 = vld [vmem:[%s6393_s2 + $0x80] sm:$0xf]  ;;  %v4492_v39 = vld [vmem:[%s6393_s2 + $0x8c] sm:$0xf0]  ;;  %v3267_v4 = vor.u32 %v4486_v58, %v3264_v59  ;;  %v4482_v5 = vld [vmem:[%s6393_s2 + $0x44] sm:$0xf] }
  0x16   : > { %v3406_v40 = vld [vmem:[%s6393_s2 + $0x180] sm:$0xf]  ;;  %v4524_v41 = vld [vmem:[%s6393_s2 + $0x18c] sm:$0xf0]  ;;  %1216 = vmatpush.bf16.msra.mxu0 %v3295_v30  ;;  %v3279_v45 = vor.u32 %v4492_v39, %v3278_v38  ;;  %v3248_v6 = vld [vmem:[%s6393_s2 + $0x50] sm:$0xf0] }
  0x17   : > { %v3534_v43 = vld [vmem:[%s6393_s2 + $0x280] sm:$0xf]  ;;  %v4556_v44 = vld [vmem:[%s6393_s2 + $0x28c] sm:$0xf0]  ;;  %1230 = vmatpush.bf16.msra.mxu1 %v3423_v34  ;;  %v3407_v48 = vor.u32 %v4524_v41, %v3406_v40  ;;  %s6407_s30 = smov (!%p457_p3, %s3204_s30), 37  ;;  %v3251_v18 = vor.u32 %v4482_v5, %v3248_v6  ;;  %vm1210_vm0 = vcmask 130048  }
  0x18   : > { %1244 = vmatpush.bf16.msra.mxu2 %v3551_v35  ;;  %v3535_v49 = vor.u32 %v4556_v44, %v3534_v43  ;;  %v3262_v50 = vld [vmem:[%s6393_s2 + $0x60] sm:$0xf]  ;;  %v4488_v51 = vld [vmem:[%s6393_s2 + $0x6c] sm:$0xf0]  ;;  %s4373_s23 = sshll.u32 %s6407_s30, 6  ;;  %vm2254_vm1 = vcmask 523264  }
  0x19   : > { %1271 = vmatpush.bf16.msrb.mxu3 %v3315_v26  ;;  %v3390_v52 = vld [vmem:[%s6393_s2 + $0x160] sm:$0xf]  ;;  %v4520_v53 = vld [vmem:[%s6393_s2 + $0x16c] sm:$0xf0]  ;;  %v3263_v57 = vor.u32 %v4488_v51, %v3262_v50  ;;  %s4918_s16 = scalar_lea.vmem %s6391_s0, %s4373_s23  ;;  %v4478_v16 = vld [vmem:[%s6393_s2 + $0x24] sm:$0xf] }
  0x1a   : > { %v3518_v54 = vld [vmem:[%s6393_s2 + $0x260] sm:$0xf]  ;;  %v4552_v55 = vld [vmem:[%s6393_s2 + $0x26c] sm:$0xf0]  ;;  %1217 = vmatpush.bf16.msra.mxu0 %v3279_v45  ;;  %v3391_v61 = vor.u32 %v4520_v53, %v3390_v52  ;;  %v3232_v17 = vld [vmem:[%s6393_s2 + $0x30] sm:$0xf0] }
  0x1b   : > { %v3246_v60 = vld [vmem:[%s6393_s2 + $0x40] sm:$0xf]  ;;  %1231 = vmatpush.bf16.msra.mxu1 %v3407_v48  ;;  %v3519_v62 = vor.u32 %v4552_v55, %v3518_v54  ;;  %v4484_v63 = vld [vmem:[%s6393_s2 + $0x4c] sm:$0xf0]  ;;  %v470_v19 = vld [vmem:[%s4918_s16 + $0x18] sm:$0xff]  ;;  %v3235_v39 = vor.u32 %v4478_v16, %v3232_v17  ;;  %vm2257_vm2 = vcmask 517120  }
  0x1c   : > { %1245 = vmatpush.bf16.msra.mxu2 %v3535_v49  ;;  %v3374_v0 = vld [vmem:[%s6393_s2 + $0x140] sm:$0xf]  ;;  %v4516_v1 = vld [vmem:[%s6393_s2 + $0x14c] sm:$0xf0]  ;;  %v3247_v7 = vor.u32 %v4484_v63, %v3246_v60  ;;  %v474_v20 = vld [vmem:[%s4918_s16 + $0x38] sm:$0x7f] }
  0x1d   : > { %1272 = vmatpush.bf16.msrb.mxu3 %v3299_v42  ;;  %v3502_v2 = vld [vmem:[%s6393_s2 + $0x240] sm:$0xf]  ;;  %v4548_v3 = vld [vmem:[%s6393_s2 + $0x24c] sm:$0xf0]  ;;  %v3375_v11 = vor.u32 %v4516_v1, %v3374_v0  ;;  %v4937_v23 = vpack.c.bf16 %v474_v20, %v470_v19  ;;  %v4534_v31 = vld [vmem:[%s6393_s2 + $0x1e4] sm:$0xf] }
  0x1e   : > { %1218 = vmatpush.bf16.msra.mxu0 %v3263_v57  ;;  %v3230_v8 = vld [vmem:[%s6393_s2 + $0x20] sm:$0xf]  ;;  %v4480_v9 = vld [vmem:[%s6393_s2 + $0x2c] sm:$0xf0]  ;;  %v3503_v12 = vor.u32 %v4548_v3, %v3502_v2  ;;  %v3456_v32 = vld [vmem:[%s6393_s2 + $0x1f0] sm:$0xf0] }
  0x1f   : > { %v3358_v10 = vld [vmem:[%s6393_s2 + $0x120] sm:$0xf]  ;;  %1232 = vmatpush.bf16.msra.mxu1 %v3391_v61  ;;  %v4512_v13 = vld [vmem:[%s6393_s2 + $0x12c] sm:$0xf0]  ;;  %v3231_v24 = vor.u32 %v4480_v9, %v3230_v8  ;;  %v701_v33 = vshrl.u32 %v4937_v23, 16  ;;  %v703_v34 = vshll.u32 %v4937_v23, 16  ;;  %v3459_v51 = vor.u32 %v4534_v31, %v3456_v32 }
  0x20   : > { %1246 = vmatpush.bf16.msra.mxu2 %v3519_v62  ;;  %v3486_v14 = vld [vmem:[%s6393_s2 + $0x220] sm:$0xf]  ;;  %v4544_v15 = vld [vmem:[%s6393_s2 + $0x22c] sm:$0xf0]  ;;  %v3359_v28 = vor.u32 %v4512_v13, %v3358_v10  ;;  %v4474_v35 = vld [vmem:[%s6393_s2 + $0x4] sm:$0xf] }
  0x21   : > { %1273 = vmatpush.bf16.msrb.mxu3 %v3283_v56  ;;  %v3214_v21 = vld [vmem:[%s6393_s2] sm:$0xf]  ;;  %v4476_v22 = vld [vmem:[%s6393_s2 + $0xc] sm:$0xf0]  ;;  %v3487_v29 = vor.u32 %v4544_v15, %v3486_v14  ;;  %v3216_v36 = vld [vmem:[%s6393_s2 + $0x10] sm:$0xf0] }
  0x22   : > { %1219 = vmatpush.bf16.msra.mxu0 %v3247_v7  ;;  %v3342_v25 = vld [vmem:[%s6393_s2 + $0x100] sm:$0xf]  ;;  %v4508_v26 = vld [vmem:[%s6393_s2 + $0x10c] sm:$0xf0]  ;;  %v4566_v37 = vld [vmem:[%s6393_s2 + $0x2e4] sm:$0xf]  ;;  %v3215_v45 = vor.u32 %v4476_v22, %v3214_v21  ;;  %v3219_v61 = vor.u32 %v4474_v35, %v3216_v36 }
  0x23   : > { %v3470_v27 = vld [vmem:[%s6393_s2 + $0x200] sm:$0xf]  ;;  %1233 = vmatpush.bf16.msra.mxu1 %v3375_v11  ;;  %v4540_v30 = vld [vmem:[%s6393_s2 + $0x20c] sm:$0xf0]  ;;  %v3584_v38 = vld [vmem:[%s6393_s2 + $0x2f0] sm:$0xf0]  ;;  %v3343_v49 = vor.u32 %v4508_v26, %v3342_v25 }
  0x24   : > { %1247 = vmatpush.bf16.msra.mxu2 %v3503_v12  ;;  %v3334_v40 = vld [vmem:[%s6393_s2 + $0xe8] sm:$0xf]  ;;  %v4505_v41 = vld [vmem:[%s6393_s2 + $0xf4] sm:$0xf0]  ;;  %v469_v42 = vld [vmem:[%s4918_s16 + $0x10] sm:$0xff]  ;;  %v705_v44 = vrot.slane %v703_v34, 1  ;;  %v3471_v50 = vor.u32 %v4540_v30, %v3470_v27  ;;  %v3587_v56 = vor.u32 %v4566_v37, %v3584_v38 }
  0x25   : > { %1274 = vmatpush.bf16.msrb.mxu3 %v3267_v4  ;;  %v473_v43 = vld [vmem:[%s4918_s16 + $0x30] sm:$0x7f]  ;;  %v4570_v47 = vld [vmem:[%s6393_s2 + $0x304] sm:$0xf]  ;;  %v3462_v52 = vld [vmem:[%s6393_s2 + $0x1e8] sm:$0xf]  ;;  %v3335_v2 = vor.u32 %v4505_v41, %v3334_v40 }
  0x26   : > { %1220 = vmatpush.bf16.msra.mxu0 %v3231_v24  ;;  %v4979_v46 = vpack.c.bf16 %v473_v43, %v469_v42  ;;  %v3600_v48 = vld [vmem:[%s6393_s2 + $0x310] sm:$0xf0]  ;;  %v4537_v53 = vld [vmem:[%s6393_s2 + $0x1f4] sm:$0xf0]  ;;  %v467_v54 = vld [vmem:[%s4918_s16] sm:$0xff]  ;;  %v4994_v55 = vor.u32 %v705_v44, %v701_v33  ;;  %vm2260_vm3 = vcmask 521216  }
  0x27   : > { %1234 = vmatpush.bf16.msra.mxu1 %v3359_v28  ;;  %v4530_v59 = vld [vmem:[%s6393_s2 + $0x1c4] sm:$0xf]  ;;  %v3440_v60 = vld [vmem:[%s6393_s2 + $0x1d0] sm:$0xf0]  ;;  %v3603_v62 = vor.u32 %v4570_v47, %v3600_v48  ;;  %v3318_v4 = vld [vmem:[%s6393_s2 + $0xc8] sm:$0xf]  ;;  %v3463_v8 = vor.u32 %v4537_v53, %v3462_v52 }
  0x28   : > { %1248 = vmatpush.bf16.msra.mxu2 %v3487_v29  ;;  %v694_v57 = vshrl.u32 %v4979_v46, 16  ;;  %v696_v58 = vshll.u32 %v4979_v46, 16  ;;  %v4562_v63 = vld [vmem:[%s6393_s2 + $0x2c4] sm:$0xf]  ;;  %v3568_v0 = vld [vmem:[%s6393_s2 + $0x2d0] sm:$0xf0]  ;;  %3612 = vmatmul.msk.bf16.vlgmr.msra.gmra.mxu3 %vm1210_vm0, %v4994_v55  ;;  %v3443_v9 = vor.u32 %v4530_v59, %v3440_v60 }
  0x29   : > { %1275 = vmatpush.bf16.msrb.mxu3 %v3251_v18  ;;  %v471_v1 = vld [vmem:[%s4918_s16 + $0x20] sm:$0x7f]  ;;  %v468_v6 = vld [vmem:[%s4918_s16 + $0x8] sm:$0xff]  ;;  %v4501_v10 = vld [vmem:[%s6393_s2 + $0xd4] sm:$0xf0]  ;;  %v3571_v15 = vor.u32 %v4562_v63, %v3568_v0  ;;  %vm3124_vm4 = vcmask 519168  }
  0x2a   : > { %1221 = vmatpush.bf16.msra.mxu0 %v3215_v45  ;;  %v698_v3 = vrot.slane %v696_v58, 1  ;;  %v5016_v5 = vpack.c.bf16 %v471_v1, %v467_v54  ;;  %v472_v7 = vld [vmem:[%s4918_s16 + $0x28] sm:$0x7f]  ;;  %v4533_v13 = vld [vmem:[%s6393_s2 + $0x1d4] sm:$0xf0]  ;;  %v3319_v25 = vor.u32 %v4501_v10, %v3318_v4  ;;  %vm3134_vm5 = vcmask 523268  }
  0x2b   : > { %1235 = vmatpush.bf16.msra.mxu1 %v3343_v49  ;;  %v5023_v11 = vpack.c.bf16 %v472_v7, %v468_v6  ;;  %v3446_v12 = vld [vmem:[%s6393_s2 + $0x1c8] sm:$0xf]  ;;  %v4526_v18 = vld [vmem:[%s6393_s2 + $0x1a4] sm:$0xf]  ;;  %v3424_v19 = vld [vmem:[%s6393_s2 + $0x1b0] sm:$0xf0] }
  0x2c   : > { %1249 = vmatpush.bf16.msra.mxu2 %v3471_v50  ;;  %v5031_v14 = vor.u32 %v698_v3, %v694_v57  ;;  %v680_v16 = vshrl.u32 %v5016_v5, 16  ;;  %v682_v17 = vshll.u32 %v5016_v5, 16  ;;  %v4558_v22 = vld [vmem:[%s6393_s2 + $0x2a4] sm:$0xf]  ;;  %v3552_v24 = vld [vmem:[%s6393_s2 + $0x2b0] sm:$0xf0]  ;;  %v3447_v28 = vor.u32 %v4533_v13, %v3446_v12 }
  0x2d   : > { %1276 = vmatpush.bf16.msrb.mxu3 %v3235_v39  ;;  %v687_v20 = vshrl.u32 %v5023_v11, 16  ;;  %v689_v21 = vshll.u32 %v5023_v11, 16  ;;  %v3302_v29 = vld [vmem:[%s6393_s2 + $0xa8] sm:$0xf]  ;;  %v4497_v30 = vld [vmem:[%s6393_s2 + $0xb4] sm:$0xf0]  ;;  %v3427_v32 = vor.u32 %v4526_v18, %v3424_v19  ;;  %v3555_v33 = vor.u32 %v4558_v22, %v3552_v24 }
  0x2e   : > { %1284 = vmatpush.bf16.msrb.mxu0 %v3459_v51  ;;  %v684_v26 = vrot.slane %v682_v17, 1  ;;  %v3430_v34 = vld [vmem:[%s6393_s2 + $0x1a8] sm:$0xf]  ;;  %v4529_v35 = vld [vmem:[%s6393_s2 + $0x1b4] sm:$0xf0]  ;;  %v3303_v41 = vor.u32 %v4497_v30, %v3302_v29  ;;  %s3211_s22 = sshll.u32 %s6407_s30, 2 }
  0x2f   : > { %1298 = vmatpush.bf16.msrb.mxu1 %v3587_v56  ;;  %1250 = vmatmul.bf16.vlgmr.msra.gmra.mxu2 %v5031_v14  ;;  %v691_v27 = vrot.slane %v689_v21, 1  ;;  %v4522_v36 = vld [vmem:[%s6393_s2 + $0x184] sm:$0xf]  ;;  %v3408_v38 = vld [vmem:[%s6393_s2 + $0x190] sm:$0xf0]  ;;  %v3431_v42 = vor.u32 %v4529_v35, %v3430_v34  ;;  %s465_s24 = scalar_lea.vmem %s6405_s14, %s3211_s22  ;;  %vm3132_vm6 = vcmask 516096  }
  0x30   : > { %1319 = vmatpush.bf16.msrb.mxu2 %v3603_v62  ;;  %v5056_v31 = vor.u32 %v684_v26, %v680_v16  ;;  %v4554_v39 = vld [vmem:[%s6393_s2 + $0x284] sm:$0xf]  ;;  %v3536_v40 = vld [vmem:[%s6393_s2 + $0x290] sm:$0xf0]  ;;  %v3286_v43 = vld [vmem:[%s6393_s2 + $0x88] sm:$0xf]  ;;  %v3411_v45 = vor.u32 %v4522_v36, %v3408_v38 }
  0x31   : > { %1277 = vmatpush.bf16.msrb.mxu3 %v3219_v61  ;;  %v5067_v37 = vor.u32 %v691_v27, %v687_v20  ;;  %v4493_v44 = vld [vmem:[%s6393_s2 + $0x94] sm:$0xf0]  ;;  %v3539_v47 = vor.u32 %v4554_v39, %v3536_v40  ;;  %v3414_v48 = vld [vmem:[%s6393_s2 + $0x188] sm:$0xf]  ;;  %v4518_v50 = vld [vmem:[%s6393_s2 + $0x164] sm:$0xf] }
  0x32   : > { %1285 = vmatpush.bf16.msrb.mxu0 %v3443_v9  ;;  %v4525_v49 = vld [vmem:[%s6393_s2 + $0x194] sm:$0xf0]  ;;  %v3392_v51 = vld [vmem:[%s6393_s2 + $0x170] sm:$0xf0]  ;;  %v4550_v52 = vld [vmem:[%s6393_s2 + $0x264] sm:$0xf]  ;;  %v3287_v54 = vor.u32 %v4493_v44, %v3286_v43 }
  0x33   : > { %1299 = vmatpush.bf16.msrb.mxu1 %v3571_v15  ;;  %1222 = vmatmul.bf16.vlgmr.msra.gmra.mxu0 %v5056_v31  ;;  %v3520_v53 = vld [vmem:[%s6393_s2 + $0x270] sm:$0xf0]  ;;  %v3415_v56 = vor.u32 %v4525_v49, %v3414_v48  ;;  %v3270_v57 = vld [vmem:[%s6393_s2 + $0x68] sm:$0xf]  ;;  %v4489_v58 = vld [vmem:[%s6393_s2 + $0x74] sm:$0xf0]  ;;  %v3395_v59 = vor.u32 %v4518_v50, %v3392_v51 }
  0x34   : > { %1340 = vmatpush.bf16.msra.mxu2 %v3463_v8  ;;  %1236 = vmatmul.bf16.vlgmr.msra.gmra.mxu1 %v5067_v37  ;;  %v3523_v60 = vor.u32 %v4550_v52, %v3520_v53  ;;  %v3398_v61 = vld [vmem:[%s6393_s2 + $0x168] sm:$0xf]  ;;  %v4521_v62 = vld [vmem:[%s6393_s2 + $0x174] sm:$0xf0]  ;;  %v4514_v63 = vld [vmem:[%s6393_s2 + $0x144] sm:$0xf]  ;;  %v3271_v3 = vor.u32 %v4489_v58, %v3270_v57 }
  0x35   : > { %1326 = vmatpush.bf16.msra.mxu3 %v3335_v2  ;;  %v3376_v0 = vld [vmem:[%s6393_s2 + $0x150] sm:$0xf0]  ;;  %v4546_v1 = vld [vmem:[%s6393_s2 + $0x244] sm:$0xf]  ;;  %v3399_v4 = vor.u32 %v4521_v62, %v3398_v61  ;;  %v3254_v6 = vld [vmem:[%s6393_s2 + $0x48] sm:$0xf] }
  0x36   : > { %1286 = vmatpush.bf16.msrb.mxu0 %v3427_v32  ;;  %v3504_v2 = vld [vmem:[%s6393_s2 + $0x250] sm:$0xf0]  ;;  %v4485_v7 = vld [vmem:[%s6393_s2 + $0x54] sm:$0xf0]  ;;  %v3379_v8 = vor.u32 %v4514_v63, %v3376_v0  ;;  %v3382_v10 = vld [vmem:[%s6393_s2 + $0x148] sm:$0xf] }
  0x37   : > { %1300 = vmatpush.bf16.msrb.mxu1 %v3555_v33  ;;  %v3507_v9 = vor.u32 %v4546_v1, %v3504_v2  ;;  %v4517_v12 = vld [vmem:[%s6393_s2 + $0x154] sm:$0xf0]  ;;  %v4510_v13 = vld [vmem:[%s6393_s2 + $0x124] sm:$0xf]  ;;  %v3360_v15 = vld [vmem:[%s6393_s2 + $0x130] sm:$0xf0]  ;;  %v3255_v18 = vor.u32 %v4485_v7, %v3254_v6 }
  0x38   : > { %1341 = vmatpush.bf16.msra.mxu2 %v3447_v28  ;;  %1278 = vmatmul.bf16.vlgmr.msrb.gmra.mxu3 %v5056_v31  ;;  %v4542_v16 = vld [vmem:[%s6393_s2 + $0x224] sm:$0xf]  ;;  %v3488_v17 = vld [vmem:[%s6393_s2 + $0x230] sm:$0xf0]  ;;  %v3383_v19 = vor.u32 %v4517_v12, %v3382_v10  ;;  %v3238_v20 = vld [vmem:[%s6393_s2 + $0x28] sm:$0xf]  ;;  %v3363_v24 = vor.u32 %v4510_v13, %v3360_v15 }
  0x39   : > { %1327 = vmatpush.bf16.msra.mxu3 %v3319_v25  ;;  %v4481_v21 = vld [vmem:[%s6393_s2 + $0x34] sm:$0xf0]  ;;  %v3366_v22 = vld [vmem:[%s6393_s2 + $0x128] sm:$0xf]  ;;  %v3491_v25 = vor.u32 %v4542_v16, %v3488_v17  ;;  %v4506_v27 = vld [vmem:[%s6393_s2 + $0x104] sm:$0xf] }
  0x3a   : > { %1287 = vmatpush.bf16.msrb.mxu0 %v3411_v45  ;;  %v4513_v26 = vld [vmem:[%s6393_s2 + $0x134] sm:$0xf0]  ;;  %v3344_v28 = vld [vmem:[%s6393_s2 + $0x110] sm:$0xf0]  ;;  %v4538_v29 = vld [vmem:[%s6393_s2 + $0x204] sm:$0xf]  ;;  %v3239_v33 = vor.u32 %v4481_v21, %v3238_v20 }
  0x3b   : > { %1301 = vmatpush.bf16.msrb.mxu1 %v3539_v47  ;;  %v3472_v30 = vld [vmem:[%s6393_s2 + $0x210] sm:$0xf0]  ;;  %v3590_v32 = vld [vmem:[%s6393_s2 + $0x2e8] sm:$0xf]  ;;  %v4569_v34 = vld [vmem:[%s6393_s2 + $0x2f4] sm:$0xf0]  ;;  %v3367_v38 = vor.u32 %v4513_v26, %v3366_v22 }
  0x3c   : > { %1342 = vmatpush.bf16.msra.mxu2 %v3431_v42  ;;  %v3606_v35 = vld [vmem:[%s6393_s2 + $0x308] sm:$0xf]  ;;  %v4573_v36 = vld [vmem:[%s6393_s2 + $0x314] sm:$0xf0]  ;;  %v3475_v42 = vor.u32 %v4538_v29, %v3472_v30  ;;  %v4503_v43 = vld [vmem:[%s6393_s2 + $0xec] sm:$0xf]  ;;  %v3591_v45 = vor.u32 %v4569_v34, %v3590_v32 }
  0x3d   : > { %1328 = vmatpush.bf16.msra.mxu3 %v3303_v41  ;;  %v3222_v39 = vld [vmem:[%s6393_s2 + $0x8] sm:$0xf]  ;;  %v4477_v40 = vld [vmem:[%s6393_s2 + $0x14] sm:$0xf0]  ;;  %v3347_v41 = vor.u32 %v4506_v27, %v3344_v28  ;;  %v3336_v44 = vld [vmem:[%s6393_s2 + $0xf8] sm:$0xf0]  ;;  %v3607_v49 = vor.u32 %v4573_v36, %v3606_v35 }
  0x3e   : > { %1288 = vmatpush.bf16.msrb.mxu0 %v3395_v59  ;;  %v3350_v47 = vld [vmem:[%s6393_s2 + $0x108] sm:$0xf]  ;;  %v4509_v48 = vld [vmem:[%s6393_s2 + $0x114] sm:$0xf0]  ;;  %v4535_v50 = vld [vmem:[%s6393_s2 + $0x1ec] sm:$0xf]  ;;  %v3223_v51 = vor.u32 %v4477_v40, %v3222_v39 }
  0x3f   : > { %1302 = vmatpush.bf16.msrb.mxu1 %v3523_v60  ;;  %3613 = vmatmul.msk.bf16.vlgmr.msrb.gmra.mxu2 %vm1210_vm0, %v4994_v55  ;;  %v3464_v52 = vld [vmem:[%s6393_s2 + $0x1f8] sm:$0xf0]  ;;  %v4567_v53 = vld [vmem:[%s6393_s2 + $0x2ec] sm:$0xf]  ;;  %v3574_v57 = vld [vmem:[%s6393_s2 + $0x2c8] sm:$0xf]  ;;  %v3351_v59 = vor.u32 %v4509_v48, %v3350_v47 }
  0x40   : > { %1343 = vmatpush.bf16.msra.mxu2 %v3415_v56  ;;  %v3339_v56 = vor.u32 %v4503_v43, %v3336_v44  ;;  %v4565_v58 = vld [vmem:[%s6393_s2 + $0x2d4] sm:$0xf0]  ;;  %v4499_v60 = vld [vmem:[%s6393_s2 + $0xcc] sm:$0xf]  ;;  %v3320_v61 = vld [vmem:[%s6393_s2 + $0xd8] sm:$0xf0]  ;;  %v3467_v62 = vor.u32 %v4535_v50, %v3464_v52 }
  0x41   : > { %1329 = vmatpush.bf16.msra.mxu3 %v3287_v54  ;;  %v3592_v54 = vld [vmem:[%s6393_s2 + $0x2f8] sm:$0xf0]  ;;  %v4531_v0 = vld [vmem:[%s6393_s2 + $0x1cc] sm:$0xf]  ;;  %v3575_v1 = vor.u32 %v4565_v58, %v3574_v57  ;;  %v3323_v6 = vor.u32 %v4499_v60, %v3320_v61  ;;  %v3558_v7 = vld [vmem:[%s6393_s2 + $0x2a8] sm:$0xf] }
  0x42   : > { %1289 = vmatpush.bf16.msrb.mxu0 %v3379_v8  ;;  %v3595_v63 = vor.u32 %v4567_v53, %v3592_v54  ;;  %v3448_v2 = vld [vmem:[%s6393_s2 + $0x1d8] sm:$0xf0]  ;;  %v4561_v8 = vld [vmem:[%s6393_s2 + $0x2b4] sm:$0xf0]  ;;  %v4527_v15 = vld [vmem:[%s6393_s2 + $0x1ac] sm:$0xf] }
  0x43   : > { %1303 = vmatpush.bf16.msrb.mxu1 %v3507_v9  ;;  %v4495_v9 = vld [vmem:[%s6393_s2 + $0xac] sm:$0xf]  ;;  %v3304_v10 = vld [vmem:[%s6393_s2 + $0xb8] sm:$0xf0]  ;;  %v3451_v12 = vor.u32 %v4531_v0, %v3448_v2  ;;  %v3559_v16 = vor.u32 %v4561_v8, %v3558_v7  ;;  %v3542_v21 = vld [vmem:[%s6393_s2 + $0x288] sm:$0xf] }
  0x44   : > { %1344 = vmatpush.bf16.msra.mxu2 %v3399_v4  ;;  %v3576_v4 = vld [vmem:[%s6393_s2 + $0x2d8] sm:$0xf0]  ;;  %v3307_v20 = vor.u32 %v4495_v9, %v3304_v10  ;;  %v4557_v22 = vld [vmem:[%s6393_s2 + $0x294] sm:$0xf0]  ;;  %v4523_v28 = vld [vmem:[%s6393_s2 + $0x18c] sm:$0xf] }
  0x45   : > { %1330 = vmatpush.bf16.msra.mxu3 %v3271_v3  ;;  %v4563_v3 = vld [vmem:[%s6393_s2 + $0x2cc] sm:$0xf]  ;;  %v3432_v17 = vld [vmem:[%s6393_s2 + $0x1b8] sm:$0xf0]  ;;  %v3543_v29 = vor.u32 %v4557_v22, %v3542_v21  ;;  %v3526_v35 = vld [vmem:[%s6393_s2 + $0x268] sm:$0xf] }
  0x46   : > { %1290 = vmatpush.bf16.msrb.mxu0 %v3363_v24  ;;  %v3579_v13 = vor.u32 %v4563_v3, %v3576_v4  ;;  %v4491_v24 = vld [vmem:[%s6393_s2 + $0x8c] sm:$0xf]  ;;  %v3435_v26 = vor.u32 %v4527_v15, %v3432_v17  ;;  %v3416_v30 = vld [vmem:[%s6393_s2 + $0x198] sm:$0xf0]  ;;  %v4553_v36 = vld [vmem:[%s6393_s2 + $0x274] sm:$0xf0] }
  0x47   : > { %1304 = vmatpush.bf16.msrb.mxu1 %v3491_v25  ;;  %v3288_v25 = vld [vmem:[%s6393_s2 + $0x98] sm:$0xf0]  ;;  %v4555_v32 = vld [vmem:[%s6393_s2 + $0x28c] sm:$0xf]  ;;  %v3419_v40 = vor.u32 %v4523_v28, %v3416_v30  ;;  %v3527_v43 = vor.u32 %v4553_v36, %v3526_v35  ;;  %v4549_v50 = vld [vmem:[%s6393_s2 + $0x254] sm:$0xf0] }
  0x48   : > { %1345 = vmatpush.bf16.msra.mxu2 %v3383_v19  ;;  %v3560_v19 = vld [vmem:[%s6393_s2 + $0x2b8] sm:$0xf0]  ;;  %v3291_v34 = vor.u32 %v4491_v24, %v3288_v25  ;;  %v4479_v0 = vld [vmem:[%s6393_s2 + $0x2c] sm:$0xf]  ;;  %v3730_v21 = vld [vmem:[%s6392_s1 + $0xe0] sm:$0xf] }
  0x49   : > { %1331 = vmatpush.bf16.msra.mxu3 %v3255_v18  ;;  %v4559_v18 = vld [vmem:[%s6393_s2 + $0x2ac] sm:$0xf]  ;;  %v3272_v39 = vld [vmem:[%s6393_s2 + $0x78] sm:$0xf0]  ;;  %v4404_v22 = vld [vmem:[%s6392_s1 + $0xec] sm:$0xf0] }
  0x4a   : > { %1291 = vmatpush.bf16.msrb.mxu0 %v3347_v41  ;;  %v3563_v27 = vor.u32 %v4559_v18, %v3560_v19  ;;  %v3400_v44 = vld [vmem:[%s6393_s2 + $0x178] sm:$0xf0]  ;;  %v4511_v4 = vld [vmem:[%s6393_s2 + $0x12c] sm:$0xf]  ;;  %v3986_v35 = vld [vmem:[%s6392_s1 + $0x2e0] sm:$0xf] }
  0x4b   : > { %1305 = vmatpush.bf16.msrb.mxu1 %v3475_v42  ;;  %v4519_v42 = vld [vmem:[%s6393_s2 + $0x16c] sm:$0xf]  ;;  %v3528_v47 = vld [vmem:[%s6393_s2 + $0x278] sm:$0xf0]  ;;  %v4468_v36 = vld [vmem:[%s6392_s1 + $0x2ec] sm:$0xf0] }
  0x4c   : > { %1346 = vmatpush.bf16.msra.mxu2 %v3367_v38  ;;  %v4487_v38 = vld [vmem:[%s6393_s2 + $0x6c] sm:$0xf]  ;;  %v3256_v52 = vld [vmem:[%s6393_s2 + $0x58] sm:$0xf0]  ;;  %v3403_v53 = vor.u32 %v4519_v42, %v3400_v44  ;;  %v4472_v42 = vld [vmem:[%s6392_s1 + $0x30c] sm:$0xf0] }
  0x4d   : > { %1332 = vmatpush.bf16.msra.mxu3 %v3239_v33  ;;  %1292 = vmatmul.bf16.vlgmr.msrb.gmra.mxu0 %v5067_v37  ;;  %v3544_v33 = vld [vmem:[%s6393_s2 + $0x298] sm:$0xf0]  ;;  %v3275_v48 = vor.u32 %v4487_v38, %v3272_v39  ;;  %v4543_v8 = vld [vmem:[%s6393_s2 + $0x22c] sm:$0xf]  ;;  %v3714_v38 = vld [vmem:[%s6392_s1 + $0xc0] sm:$0xf] }
  0x4e   : > { %1354 = vmatpush.bf16.msra.mxu0 %v3591_v45  ;;  %1306 = vmatmul.bf16.vlgmr.msrb.gmra.mxu1 %v5031_v14  ;;  %v3547_v41 = vor.u32 %v4555_v32, %v3544_v33  ;;  %v4551_v45 = vld [vmem:[%s6393_s2 + $0x26c] sm:$0xf]  ;;  %v3384_v58 = vld [vmem:[%s6393_s2 + $0x158] sm:$0xf0]  ;;  %v3858_v32 = vld [vmem:[%s6392_s1 + $0x1e0] sm:$0xf] }
  0x4f   : > { %1375 = vmatpush.bf16.msra.mxu1 %v3607_v49  ;;  %v3510_v49 = vld [vmem:[%s6393_s2 + $0x248] sm:$0xf]  ;;  %v3531_v54 = vor.u32 %v4551_v45, %v3528_v47  ;;  %v3512_v60 = vld [vmem:[%s6393_s2 + $0x258] sm:$0xf0]  ;;  %v4475_v15 = vld [vmem:[%s6393_s2 + $0xc] sm:$0xf]  ;;  %v3987_v47 = vor.u32 %v4468_v36, %v3986_v35 }
  0x50   : > { %1347 = vmatpush.bf16.msra.mxu2 %v3351_v59  ;;  %v3511_v57 = vor.u32 %v4549_v50, %v3510_v49  ;;  %v4547_v59 = vld [vmem:[%s6393_s2 + $0x24c] sm:$0xf]  ;;  %v3368_v7 = vld [vmem:[%s6393_s2 + $0x138] sm:$0xf0]  ;;  %v4436_v33 = vld [vmem:[%s6392_s1 + $0x1ec] sm:$0xf0] }
  0x51   : > { %1333 = vmatpush.bf16.msra.mxu3 %v3223_v51  ;;  %v4483_v51 = vld [vmem:[%s6393_s2 + $0x4c] sm:$0xf]  ;;  %v3515_v3 = vor.u32 %v4547_v59, %v3512_v60  ;;  %v3496_v9 = vld [vmem:[%s6393_s2 + $0x238] sm:$0xf0]  ;;  %v3371_v19 = vor.u32 %v4511_v4, %v3368_v7  ;;  %v3859_v44 = vor.u32 %v4436_v33, %v3858_v32  ;;  %v4402_v45 = vld [vmem:[%s6392_s1 + $0xe4] sm:$0xf] }
  0x52   : > { %1355 = vmatpush.bf16.msra.mxu0 %v3575_v1  ;;  %v3259_v61 = vor.u32 %v4483_v51, %v3256_v52  ;;  %v3240_v1 = vld [vmem:[%s6393_s2 + $0x38] sm:$0xf0]  ;;  %v4571_v17 = vld [vmem:[%s6393_s2 + $0x30c] sm:$0xf]  ;;  %v3842_v49 = vld [vmem:[%s6392_s1 + $0x1c0] sm:$0xf] }
  0x53   : > { %1396 = vmatpush.bf16.msrb.mxu1 %v3467_v62  ;;  %1348 = vmatmul.bf16.vlgmr.msra.gmra.mxu2 %v5067_v37  ;;  %v3494_v62 = vld [vmem:[%s6393_s2 + $0x228] sm:$0xf]  ;;  %v3243_v10 = vor.u32 %v4479_v0, %v3240_v1  ;;  %v3608_v18 = vld [vmem:[%s6393_s2 + $0x318] sm:$0xf0]  ;;  %v4507_v25 = vld [vmem:[%s6393_s2 + $0x10c] sm:$0xf] }
  0x54   : > { %1410 = vmatpush.bf16.msrb.mxu2 %v3595_v63  ;;  %1334 = vmatmul.bf16.vlgmr.msra.gmra.mxu3 %v5056_v31  ;;  %v4545_v63 = vld [vmem:[%s6393_s2 + $0x234] sm:$0xf0]  ;;  %v3611_v30 = vor.u32 %v4571_v17, %v3608_v18  ;;  %v4432_v50 = vld [vmem:[%s6392_s1 + $0x1cc] sm:$0xf0]  ;;  %v4398_v60 = vld [vmem:[%s6392_s1 + $0xc4] sm:$0xf] }
  0x55   : > { %1382 = vmatpush.bf16.msrb.mxu3 %v3339_v56  ;;  %v4515_v56 = vld [vmem:[%s6393_s2 + $0x14c] sm:$0xf]  ;;  %v3843_v59 = vor.u32 %v4432_v50, %v3842_v49  ;;  %v4428_v0 = vld [vmem:[%s6392_s1 + $0x1ac] sm:$0xf0]  ;;  %v4390_v18 = vld [vmem:[%s6392_s1 + $0x84] sm:$0xf] }
  0x56   : > { %1356 = vmatpush.bf16.msra.mxu0 %v3559_v16  ;;  %v3387_v2 = vor.u32 %v4515_v56, %v3384_v58  ;;  %v3224_v16 = vld [vmem:[%s6393_s2 + $0x18] sm:$0xf0]  ;;  %v3698_v56 = vld [vmem:[%s6392_s1 + $0xa0] sm:$0xf]  ;;  %v4392_v4 = vld [vmem:[%s6392_s1 + $0x8c] sm:$0xf0] }
  0x57   : > { %1397 = vmatpush.bf16.msrb.mxu1 %v3451_v12  ;;  %v3478_v12 = vld [vmem:[%s6393_s2 + $0x208] sm:$0xf]  ;;  %v3227_v28 = vor.u32 %v4475_v15, %v3224_v16  ;;  %v4456_v15 = vld [vmem:[%s6392_s1 + $0x28c] sm:$0xf0]  ;;  %v3666_v16 = vld [vmem:[%s6392_s1 + $0x60] sm:$0xf] }
  0x58   : > { %1411 = vmatpush.bf16.msrb.mxu2 %v3579_v13  ;;  %v4541_v13 = vld [vmem:[%s6393_s2 + $0x214] sm:$0xf0]  ;;  %v4388_v17 = vld [vmem:[%s6392_s1 + $0x6c] sm:$0xf0]  ;;  %v3668_v36 = vld [vmem:[%s6392_s1 + $0x70] sm:$0xf0] }
  0x59   : > { %1383 = vmatpush.bf16.msrb.mxu3 %v3323_v6  ;;  %v3495_v6 = vor.u32 %v4545_v63, %v3494_v62  ;;  %v3479_v24 = vor.u32 %v4541_v13, %v3478_v12  ;;  %v3716_v62 = vld [vmem:[%s6392_s1 + $0xd0] sm:$0xf0]  ;;  %v3826_v63 = vld [vmem:[%s6392_s1 + $0x1a0] sm:$0xf] }
  0x5a   : > { %1357 = vmatpush.bf16.msra.mxu0 %v3543_v29  ;;  %v3480_v29 = vld [vmem:[%s6393_s2 + $0x218] sm:$0xf0]  ;;  %v3827_v7 = vor.u32 %v4428_v0, %v3826_v63  ;;  %v3938_v13 = vld [vmem:[%s6392_s1 + $0x280] sm:$0xf]  ;;  %v3636_v0 = vld [vmem:[%s6392_s1 + $0x30] sm:$0xf0] }
  0x5b   : > { %1398 = vmatpush.bf16.msrb.mxu1 %v3435_v26  ;;  %v3352_v26 = vld [vmem:[%s6393_s2 + $0x118] sm:$0xf0]  ;;  %v3762_v50 = vld [vmem:[%s6392_s1 + $0x120] sm:$0xf] }
  0x5c   : > { %1412 = vmatpush.bf16.msrb.mxu2 %v3563_v27  ;;  %v4539_v27 = vld [vmem:[%s6393_s2 + $0x20c] sm:$0xf]  ;;  %v3355_v39 = vor.u32 %v4507_v25, %v3352_v26  ;;  %v4420_v25 = vld [vmem:[%s6392_s1 + $0x16c] sm:$0xf0]  ;;  %v3667_v26 = vor.u32 %v4388_v17, %v3666_v16  ;;  %v4374_v16 = vld [vmem:[%s6392_s1 + $0x4] sm:$0xf] }
  0x5d   : > { %1384 = vmatpush.bf16.msrb.mxu3 %v3307_v20  ;;  %v3499_v20 = vor.u32 %v4543_v8, %v3496_v9  ;;  %v4394_v8 = vld [vmem:[%s6392_s1 + $0xa4] sm:$0xf]  ;;  %v3810_v9 = vld [vmem:[%s6392_s1 + $0x180] sm:$0xf]  ;;  %v3620_v17 = vld [vmem:[%s6392_s1 + $0x10] sm:$0xf0] }
  0x5e   : > { %1358 = vmatpush.bf16.msra.mxu0 %v3527_v43  ;;  %3614 = vmatmul.msk.bf16.vlgmr.msra.gmra.mxu1 %vm1210_vm0, %v4994_v55  ;;  %v3483_v43 = vor.u32 %v4539_v27, %v3480_v29  ;;  %v3922_v27 = vld [vmem:[%s6392_s1 + $0x260] sm:$0xf] }
  0x5f   : > { %1399 = vmatpush.bf16.msrb.mxu1 %v3419_v40  ;;  %v4400_v40 = vld [vmem:[%s6392_s1 + $0xcc] sm:$0xf0]  ;;  %v3650_v29 = vld [vmem:[%s6392_s1 + $0x40] sm:$0xf] }
  0x60   : > { %1413 = vmatpush.bf16.msrb.mxu2 %v3547_v41  ;;  %v4002_v41 = vld [vmem:[%s6392_s1 + $0x300] sm:$0xf]  ;;  %v3715_v51 = vor.u32 %v4400_v40, %v3714_v38 }
  0x61   : > { %1385 = vmatpush.bf16.msrb.mxu3 %v3291_v34  ;;  %v3731_v34 = vor.u32 %v4404_v22, %v3730_v21  ;;  %v4003_v52 = vor.u32 %v4472_v42, %v4002_v41  ;;  %v3939_v21 = vor.u32 %v4456_v15, %v3938_v13  ;;  %v3684_v22 = vld [vmem:[%s6392_s1 + $0x90] sm:$0xf0]  ;;  %v3778_v38 = vld [vmem:[%s6392_s1 + $0x140] sm:$0xf]  ;;  %v4448_v42 = vld [vmem:[%s6392_s1 + $0x24c] sm:$0xf0] }
  0x62   : > { %1359 = vmatpush.bf16.msra.mxu0 %v3511_v57  ;;  %v4396_v57 = vld [vmem:[%s6392_s1 + $0xac] sm:$0xf0]  ;;  %v3687_v32 = vor.u32 %v4390_v18, %v3684_v22  ;;  %v3906_v41 = vld [vmem:[%s6392_s1 + $0x240] sm:$0xf]  ;;  %v3844_v13 = vld [vmem:[%s6392_s1 + $0x1d0] sm:$0xf0] }
  0x63   : > { %1400 = vmatpush.bf16.msrb.mxu1 %v3403_v53  ;;  %v3970_v53 = vld [vmem:[%s6392_s1 + $0x2c0] sm:$0xf]  ;;  %v3699_v1 = vor.u32 %v4396_v57, %v3698_v56  ;;  %v3907_v49 = vor.u32 %v4448_v42, %v3906_v41  ;;  %v4376_v57 = vld [vmem:[%s6392_s1 + $0xc] sm:$0xf0]  ;;  %v3738_v18 = vld [vmem:[%s6392_s1 + $0xe8] sm:$0xf] }
  0x64   : > { %1414 = vmatpush.bf16.msrb.mxu2 %v3531_v54  ;;  %v4464_v54 = vld [vmem:[%s6392_s1 + $0x2cc] sm:$0xf0]  ;;  %v3618_v56 = vld [vmem:[%s6392_s1] sm:$0xf]  ;;  %v3866_v22 = vld [vmem:[%s6392_s1 + $0x1e8] sm:$0xf] }
  0x65   : > { %1386 = vmatpush.bf16.msrb.mxu3 %v3275_v48  ;;  %v3732_v48 = vld [vmem:[%s6392_s1 + $0xf0] sm:$0xf0]  ;;  %v4458_v41 = vld [vmem:[%s6392_s1 + $0x2a4] sm:$0xf] }
  0x66   : > { %1360 = vmatpush.bf16.msra.mxu0 %v3495_v6  ;;  %v3735_v58 = vor.u32 %v4402_v45, %v3732_v48  ;;  %v3719_v6 = vor.u32 %v4398_v60, %v3716_v62  ;;  %v4382_v48 = vld [vmem:[%s6392_s1 + $0x44] sm:$0xf]  ;;  %v3860_v62 = vld [vmem:[%s6392_s1 + $0x1f0] sm:$0xf0] }
  0x67   : > { %1401 = vmatpush.bf16.msrb.mxu1 %v3387_v2  ;;  %v4460_v2 = vld [vmem:[%s6392_s1 + $0x2ac] sm:$0xf0]  ;;  %v4378_v60 = vld [vmem:[%s6392_s1 + $0x24] sm:$0xf]  ;;  %v3956_v42 = vld [vmem:[%s6392_s1 + $0x2b0] sm:$0xf0] }
  0x68   : > { %1415 = vmatpush.bf16.msrb.mxu2 %v3515_v3  ;;  %v3682_v3 = vld [vmem:[%s6392_s1 + $0x80] sm:$0xf] }
  0x69   : > { %1387 = vmatpush.bf16.msrb.mxu3 %v3259_v61  ;;  %v3971_v61 = vor.u32 %v4464_v54, %v3970_v53  ;;  %v3683_v12 = vor.u32 %v4392_v4, %v3682_v3  ;;  %v3890_v53 = vld [vmem:[%s6392_s1 + $0x220] sm:$0xf]  ;;  %v4444_v54 = vld [vmem:[%s6392_s1 + $0x22c] sm:$0xf0] }
  0x6a   : > { %1361 = vmatpush.bf16.msra.mxu0 %v3479_v24  ;;  %v3794_v24 = vld [vmem:[%s6392_s1 + $0x160] sm:$0xf]  ;;  %v3891_v63 = vor.u32 %v4444_v54, %v3890_v53  ;;  %v4440_v4 = vld [vmem:[%s6392_s1 + $0x20c] sm:$0xf0]  ;;  %v4454_v53 = vld [vmem:[%s6392_s1 + $0x284] sm:$0xf] }
  0x6b   : > { %1402 = vmatpush.bf16.msrb.mxu1 %v3371_v19  ;;  %v3795_v33 = vor.u32 %v4420_v25, %v3794_v24  ;;  %v3874_v3 = vld [vmem:[%s6392_s1 + $0x200] sm:$0xf]  ;;  %v4437_v24 = vld [vmem:[%s6392_s1 + $0x1f4] sm:$0xf0]  ;;  %v3940_v54 = vld [vmem:[%s6392_s1 + $0x290] sm:$0xf0] }
  0x6c   : > { %1416 = vmatpush.bf16.msrb.mxu2 %v3499_v20  ;;  %v3875_v15 = vor.u32 %v4440_v4, %v3874_v3  ;;  %v4414_v3 = vld [vmem:[%s6392_s1 + $0x144] sm:$0xf]  ;;  %v3780_v4 = vld [vmem:[%s6392_s1 + $0x150] sm:$0xf0] }
  0x6d   : > { %1388 = vmatpush.bf16.msrb.mxu3 %v3243_v10  ;;  %1362 = vmatmul.bf16.vlgmr.msra.gmra.mxu0 %v5031_v14  ;;  %v4424_v10 = vld [vmem:[%s6392_s1 + $0x18c] sm:$0xf0] }
  0x6e   : > { %1431 = vmatpush.bf16.msrb.mxu0 %v3611_v30  ;;  %v3811_v20 = vor.u32 %v4424_v10, %v3810_v9  ;;  %v4384_v30 = vld [vmem:[%s6392_s1 + $0x4c] sm:$0xf0]  ;;  %v3639_v9 = vor.u32 %v4378_v60, %v3636_v0  ;;  %v3690_v60 = vld [vmem:[%s6392_s1 + $0x88] sm:$0xf]  ;;  %v4425_v0 = vld [vmem:[%s6392_s1 + $0x194] sm:$0xf0] }
  0x6f   : > { %1403 = vmatpush.bf16.msrb.mxu1 %v3355_v39  ;;  %v4416_v39 = vld [vmem:[%s6392_s1 + $0x14c] sm:$0xf0]  ;;  %v3651_v40 = vor.u32 %v4384_v30, %v3650_v29  ;;  %v4426_v29 = vld [vmem:[%s6392_s1 + $0x1a4] sm:$0xf]  ;;  %v3828_v30 = vld [vmem:[%s6392_s1 + $0x1b0] sm:$0xf0] }
  0x70   : > { %1417 = vmatpush.bf16.msrb.mxu2 %v3483_v43  ;;  %v3634_v43 = vld [vmem:[%s6392_s1 + $0x20] sm:$0xf] }
  0x71   : > { %1389 = vmatpush.bf16.msrb.mxu3 %v3227_v28  ;;  %v4452_v28 = vld [vmem:[%s6392_s1 + $0x26c] sm:$0xf0] }
  0x72   : > { %1954 = vmatpush.bf16.msra.mxu0 %v3859_v44  ;;  %1404 = vmatmul.bf16.vlgmr.msrb.gmra.mxu1 %v5067_v37  ;;  %v3700_v37 = vld [vmem:[%s6392_s1 + $0xb0] sm:$0xf0]  ;;  %v3923_v35 = vor.u32 %v4452_v28, %v3922_v27  ;;  %v4380_v44 = vld [vmem:[%s6392_s1 + $0x2c] sm:$0xf0]  ;;  %v3623_v28 = vor.u32 %v4374_v16, %v3620_v17  ;;  %v4410_v16 = vld [vmem:[%s6392_s1 + $0x124] sm:$0xf] }
  0x73   : > { %1968 = vmatpush.bf16.msra.mxu1 %v3987_v47  ;;  %1418 = vmatmul.bf16.vlgmr.msrb.gmra.mxu2 %v5031_v14  ;;  %v3703_v19 = vor.u32 %v4394_v8, %v3700_v37  ;;  %v3779_v47 = vor.u32 %v4416_v39, %v3778_v38  ;;  %v3988_v8 = vld [vmem:[%s6392_s1 + $0x2f0] sm:$0xf0]  ;;  %v3850_v38 = vld [vmem:[%s6392_s1 + $0x1c8] sm:$0xf]  ;;  %v4433_v39 = vld [vmem:[%s6392_s1 + $0x1d4] sm:$0xf0] }
  0x74   : > { %1390 = vmatmul.bf16.vlgmr.msrb.gmra.mxu3 %v5056_v31  ;;  %1989 = vmatpush.bf16.msra.mxu2 %v4003_v52  ;;  %v3954_v31 = vld [vmem:[%s6392_s1 + $0x2a0] sm:$0xf]  ;;  %v3635_v52 = vor.u32 %v4380_v44, %v3634_v43  ;;  %v4004_v37 = vld [vmem:[%s6392_s1 + $0x310] sm:$0xf0]  ;;  %v4422_v43 = vld [vmem:[%s6392_s1 + $0x184] sm:$0xf] }
  0x75   : > { %1940 = vmatpush.bf16.msra.mxu3 %v3731_v34  ;;  %v3955_v14 = vor.u32 %v4460_v2, %v3954_v31  ;;  %v4386_v34 = vld [vmem:[%s6392_s1 + $0x64] sm:$0xf]  ;;  %v4408_v31 = vld [vmem:[%s6392_s1 + $0x10c] sm:$0xf0]  ;;  %v3619_v2 = vor.u32 %v4376_v57, %v3618_v56  ;;  %v3972_v27 = vld [vmem:[%s6392_s1 + $0x2d0] sm:$0xf0] }
  0x76   : > { %1955 = vmatpush.bf16.msra.mxu0 %v3843_v59  ;;  %v3671_v45 = vor.u32 %v4386_v34, %v3668_v36  ;;  %v3722_v34 = vld [vmem:[%s6392_s1 + $0xc8] sm:$0xf]  ;;  %v4401_v36 = vld [vmem:[%s6392_s1 + $0xd4] sm:$0xf0]  ;;  %v3812_v44 = vld [vmem:[%s6392_s1 + $0x190] sm:$0xf0] }
  0x77   : > { %1969 = vmatpush.bf16.msra.mxu1 %v3971_v61  ;;  %v4434_v61 = vld [vmem:[%s6392_s1 + $0x1e4] sm:$0xf]  ;;  %v3796_v57 = vld [vmem:[%s6392_s1 + $0x170] sm:$0xf0] }
  0x78   : > { %1996 = vmatpush.bf16.msrb.mxu2 %v3735_v58  ;;  %v4418_v56 = vld [vmem:[%s6392_s1 + $0x164] sm:$0xf]  ;;  %v3764_v17 = vld [vmem:[%s6392_s1 + $0x130] sm:$0xf0] }
  0x79   : > { %1941 = vmatpush.bf16.msra.mxu3 %v3715_v51  ;;  %v4412_v51 = vld [vmem:[%s6392_s1 + $0x12c] sm:$0xf0] }
  0x7a   : > { %1956 = vmatpush.bf16.msra.mxu0 %v3827_v7  ;;  %v3763_v59 = vor.u32 %v4412_v51, %v3762_v50  ;;  %v3863_v7 = vor.u32 %v4434_v61, %v3860_v62  ;;  %v3834_v50 = vld [vmem:[%s6392_s1 + $0x1a8] sm:$0xf]  ;;  %v4429_v51 = vld [vmem:[%s6392_s1 + $0x1b4] sm:$0xf0]  ;;  %v3943_v61 = vor.u32 %v4454_v53, %v3940_v54 }
  0x7b   : > { %1970 = vmatpush.bf16.msra.mxu1 %v3955_v14  ;;  %v4470_v14 = vld [vmem:[%s6392_s1 + $0x304] sm:$0xf]  ;;  %v4393_v62 = vld [vmem:[%s6392_s1 + $0x94] sm:$0xf0] }
  0x7c   : > { %1997 = vmatpush.bf16.msrb.mxu2 %v3719_v6  ;;  %v4466_v6 = vld [vmem:[%s6392_s1 + $0x2e4] sm:$0xf]  ;;  %v4377_v54 = vld [vmem:[%s6392_s1 + $0x14] sm:$0xf0] }
  0x7d   : > { %1942 = vmatpush.bf16.msra.mxu3 %v3699_v1  ;;  %3615 = vmatmul.msk.bf16.vlgmr.msrb.gmra.mxu0 %vm1210_vm0, %v4994_v55  ;;  %v3652_v55 = vld [vmem:[%s6392_s1 + $0x50] sm:$0xf0]  ;;  %v3746_v1 = vld [vmem:[%s6392_s1 + $0x100] sm:$0xf] }
  0x7e   : > { %1957 = vmatpush.bf16.msra.mxu0 %v3811_v20  ;;  %v3655_v58 = vor.u32 %v4382_v48, %v3652_v55  ;;  %v3747_v10 = vor.u32 %v4408_v31, %v3746_v1  ;;  %v4007_v20 = vor.u32 %v4470_v14, %v4004_v37  ;;  %v3706_v48 = vld [vmem:[%s6392_s1 + $0xa8] sm:$0xf]  ;;  %v4397_v55 = vld [vmem:[%s6392_s1 + $0xb4] sm:$0xf0]  ;;  %v3799_v1 = vor.u32 %v4418_v56, %v3796_v57  ;;  %v4450_v31 = vld [vmem:[%s6392_s1 + $0x264] sm:$0xf] }
  0x7f   : > { %1971 = vmatpush.bf16.msra.mxu1 %v3939_v21  ;;  %v4405_v21 = vld [vmem:[%s6392_s1 + $0xf4] sm:$0xf0]  ;;  %v3754_v56 = vld [vmem:[%s6392_s1 + $0x108] sm:$0xf] }
  0x80   : > { %1998 = vmatpush.bf16.msrb.mxu2 %v3703_v19  ;;  %v3991_v19 = vor.u32 %v4466_v6, %v3988_v8  ;;  %v3691_v6 = vor.u32 %v4393_v62, %v3690_v60  ;;  %v3674_v8 = vld [vmem:[%s6392_s1 + $0x68] sm:$0xf]  ;;  %v4389_v37 = vld [vmem:[%s6392_s1 + $0x74] sm:$0xf0]  ;;  %v3740_v60 = vld [vmem:[%s6392_s1 + $0xf8] sm:$0xf0] }
  0x81   : > { %1943 = vmatpush.bf16.msra.mxu3 %v3683_v12  ;;  %v4430_v12 = vld [vmem:[%s6392_s1 + $0x1c4] sm:$0xf]  ;;  %v4409_v57 = vld [vmem:[%s6392_s1 + $0x114] sm:$0xf0] }
  0x82   : > { %1958 = vmatpush.bf16.msra.mxu0 %v3795_v33  ;;  %v3847_v25 = vor.u32 %v4430_v12, %v3844_v13  ;;  %v3867_v33 = vor.u32 %v4437_v24, %v3866_v22  ;;  %v3783_v12 = vor.u32 %v4414_v3, %v3780_v4  ;;  %v4446_v13 = vld [vmem:[%s6392_s1 + $0x244] sm:$0xf]  ;;  %v4385_v22 = vld [vmem:[%s6392_s1 + $0x54] sm:$0xf0]  ;;  %v3786_v24 = vld [vmem:[%s6392_s1 + $0x148] sm:$0xf]  ;;  %v3755_v4 = vor.u32 %v4409_v57, %v3754_v56 }
  0x83   : > { %1972 = vmatpush.bf16.msra.mxu1 %v3923_v35  ;;  %4016 = vmatmul.msk.bf16.vlgmr.msra.gmra.mxu2 %vm1210_vm0, %v4937_v23  ;;  %v4461_v3 = vld [vmem:[%s6392_s1 + $0x2b4] sm:$0xf0]  ;;  %v4419_v56 = vld [vmem:[%s6392_s1 + $0x16c] sm:$0xf]  ;;  %v3804_v57 = vld [vmem:[%s6392_s1 + $0x178] sm:$0xf0] }
  0x84   : > { %1999 = vmatpush.bf16.msrb.mxu2 %v3687_v32  ;;  %v3739_v32 = vor.u32 %v4405_v21, %v3738_v18  ;;  %v3675_v18 = vor.u32 %v4389_v37, %v3674_v8  ;;  %v3724_v37 = vld [vmem:[%s6392_s1 + $0xd8] sm:$0xf0] }
  0x85   : > { %1944 = vmatpush.bf16.msra.mxu3 %v3667_v26  ;;  %v4462_v26 = vld [vmem:[%s6392_s1 + $0x2c4] sm:$0xf] }
  0x86   : > { %1959 = vmatpush.bf16.msra.mxu0 %v3779_v47  ;;  %v3975_v35 = vor.u32 %v4462_v26, %v3972_v27  ;;  %v3851_v47 = vor.u32 %v4433_v39, %v3850_v38  ;;  %v3767_v26 = vor.u32 %v4410_v16, %v3764_v17  ;;  %v4442_v27 = vld [vmem:[%s6392_s1 + $0x224] sm:$0xf]  ;;  %v4381_v39 = vld [vmem:[%s6392_s1 + $0x34] sm:$0xf0]  ;;  %v3946_v16 = vld [vmem:[%s6392_s1 + $0x288] sm:$0xf] }
  0x87   : > { %1973 = vmatpush.bf16.msra.mxu1 %v3907_v49  ;;  %v3959_v49 = vor.u32 %v4458_v41, %v3956_v42  ;;  %v4413_v41 = vld [vmem:[%s6392_s1 + $0x134] sm:$0xf0] }
  0x88   : > { %2000 = vmatpush.bf16.msrb.mxu2 %v3671_v45  ;;  %v3723_v45 = vor.u32 %v4401_v36, %v3722_v34  ;;  %v3642_v34 = vld [vmem:[%s6392_s1 + $0x28] sm:$0xf]  ;;  %v4469_v36 = vld [vmem:[%s6392_s1 + $0x2f4] sm:$0xf0] }
  0x89   : > { %1945 = vmatpush.bf16.msra.mxu3 %v3651_v40  ;;  %v3831_v40 = vor.u32 %v4426_v29, %v3828_v30  ;;  %v4406_v29 = vld [vmem:[%s6392_s1 + $0x104] sm:$0xf]  ;;  %v3748_v30 = vld [vmem:[%s6392_s1 + $0x110] sm:$0xf0]  ;;  %v4457_v17 = vld [vmem:[%s6392_s1 + $0x294] sm:$0xf0] }
  0x8a   : > { %1960 = vmatpush.bf16.msra.mxu0 %v3763_v59  ;;  %v3835_v59 = vor.u32 %v4429_v51, %v3834_v50  ;;  %v3751_v42 = vor.u32 %v4406_v29, %v3748_v30  ;;  %v3626_v50 = vld [vmem:[%s6392_s1 + $0x8] sm:$0xf]  ;;  %v4453_v30 = vld [vmem:[%s6392_s1 + $0x274] sm:$0xf0] }
  0x8b   : > { %1974 = vmatpush.bf16.msra.mxu1 %v3891_v63  ;;  %v3818_v63 = vld [vmem:[%s6392_s1 + $0x188] sm:$0xf] }
  0x8c   : > { %2001 = vmatpush.bf16.msrb.mxu2 %v3655_v58  ;;  %v3707_v58 = vor.u32 %v4397_v55, %v3706_v48  ;;  %v4473_v48 = vld [vmem:[%s6392_s1 + $0x314] sm:$0xf0]  ;;  %v3978_v51 = vld [vmem:[%s6392_s1 + $0x2c8] sm:$0xf] }
  0x8d   : > { %1946 = vmatpush.bf16.msra.mxu3 %v3635_v52  ;;  %v3815_v52 = vor.u32 %v4422_v43, %v3812_v44  ;;  %v4438_v43 = vld [vmem:[%s6392_s1 + $0x204] sm:$0xf]  ;;  %v3876_v44 = vld [vmem:[%s6392_s1 + $0x210] sm:$0xf0]  ;;  %v3930_v29 = vld [vmem:[%s6392_s1 + $0x268] sm:$0xf] }
  0x8e   : > { %1961 = vmatpush.bf16.msra.mxu0 %v3747_v10  ;;  %v4421_v10 = vld [vmem:[%s6392_s1 + $0x174] sm:$0xf0]  ;;  %v3879_v53 = vor.u32 %v4438_v43, %v3876_v44  ;;  %v3820_v43 = vld [vmem:[%s6392_s1 + $0x198] sm:$0xf0]  ;;  %v3914_v44 = vld [vmem:[%s6392_s1 + $0x248] sm:$0xf] }
  0x8f   : > { %1975 = vmatpush.bf16.msra.mxu1 %v3875_v15  ;;  %v3908_v15 = vld [vmem:[%s6392_s1 + $0x250] sm:$0xf0] }
  0x90   : > { %2002 = vmatpush.bf16.msrb.mxu2 %v3639_v9  ;;  %v3802_v9 = vld [vmem:[%s6392_s1 + $0x168] sm:$0xf]  ;;  %v3911_v21 = vor.u32 %v4446_v13, %v3908_v15  ;;  %v4431_v13 = vld [vmem:[%s6392_s1 + $0x1cc] sm:$0xf]  ;;  %v3852_v15 = vld [vmem:[%s6392_s1 + $0x1d8] sm:$0xf0] }
  0x91   : > { %1947 = vmatpush.bf16.msra.mxu3 %v3619_v2  ;;  %1962 = vmatmul.bf16.vlgmr.msra.gmra.mxu0 %v5023_v11  ;;  %v3924_v2 = vld [vmem:[%s6392_s1 + $0x270] sm:$0xf0] }
  0x92   : > { %2024 = vmatpush.bf16.msrb.mxu0 %v3991_v19  ;;  %1976 = vmatmul.bf16.vlgmr.msra.gmra.mxu1 %v4979_v46  ;;  %v3927_v14 = vor.u32 %v4450_v31, %v3924_v2  ;;  %v3803_v19 = vor.u32 %v4421_v10, %v3802_v9  ;;  %v3627_v31 = vor.u32 %v4377_v54, %v3626_v50  ;;  %v3962_v2 = vld [vmem:[%s6392_s1 + $0x2a8] sm:$0xf]  ;;  %v4463_v9 = vld [vmem:[%s6392_s1 + $0x2cc] sm:$0xf]  ;;  %v3932_v54 = vld [vmem:[%s6392_s1 + $0x278] sm:$0xf0] }
  0x93   : > { %2045 = vmatpush.bf16.msrb.mxu1 %v4007_v20  ;;  %v3658_v20 = vld [vmem:[%s6392_s1 + $0x48] sm:$0xf]  ;;  %v3963_v10 = vor.u32 %v4461_v3, %v3962_v2  ;;  %v4387_v50 = vld [vmem:[%s6392_s1 + $0x6c] sm:$0xf]  ;;  %v3916_v3 = vld [vmem:[%s6392_s1 + $0x258] sm:$0xf0] }
  0x94   : > { %1948 = vmatmul.bf16.vlgmr.msra.gmra.mxu3 %v5016_v5  ;;  %2003 = vmatpush.bf16.msrb.mxu2 %v3623_v28  ;;  %v3892_v28 = vld [vmem:[%s6392_s1 + $0x230] sm:$0xf0] }
  0x95   : > { %2010 = vmatpush.bf16.msrb.mxu3 %v3863_v7  ;;  %v3819_v7 = vor.u32 %v4425_v0, %v3818_v63  ;;  %v3895_v38 = vor.u32 %v4442_v27, %v3892_v28  ;;  %v3996_v63 = vld [vmem:[%s6392_s1 + $0x2f8] sm:$0xf0]  ;;  %v4435_v0 = vld [vmem:[%s6392_s1 + $0x1ec] sm:$0xf] }
  0x96   : > { %2025 = vmatpush.bf16.msrb.mxu0 %v3975_v35  ;;  %v3994_v35 = vld [vmem:[%s6392_s1 + $0x2e8] sm:$0xf]  ;;  %v4427_v27 = vld [vmem:[%s6392_s1 + $0x1ac] sm:$0xf]  ;;  %v3836_v28 = vld [vmem:[%s6392_s1 + $0x1b8] sm:$0xf0] }
  0x97   : > { %2052 = vmatpush.bf16.msra.mxu1 %v3739_v32  ;;  %2004 = vmatmul.bf16.vlgmr.msrb.gmra.mxu2 %v5016_v5  ;;  %v3659_v32 = vor.u32 %v4385_v22, %v3658_v20  ;;  %v3855_v20 = vor.u32 %v4431_v13, %v3852_v15  ;;  %v3708_v22 = vld [vmem:[%s6392_s1 + $0xb8] sm:$0xf0] }
  0x98   : > { %2066 = vmatpush.bf16.msra.mxu2 %v3867_v33 }
  0x99   : > { %2011 = vmatpush.bf16.msrb.mxu3 %v3847_v25  ;;  %v4417_v25 = vld [vmem:[%s6392_s1 + $0x154] sm:$0xf0] }
  0x9a   : > { %2026 = vmatpush.bf16.msrb.mxu0 %v3959_v49  ;;  %v3787_v33 = vor.u32 %v4417_v25, %v3786_v24  ;;  %v3643_v49 = vor.u32 %v4381_v39, %v3642_v34  ;;  %v4459_v24 = vld [vmem:[%s6392_s1 + $0x2ac] sm:$0xf]  ;;  %v3947_v25 = vor.u32 %v4457_v17, %v3946_v16 }
  0x9b   : > { %2053 = vmatpush.bf16.msra.mxu1 %v3723_v45  ;;  %v3995_v45 = vor.u32 %v4469_v36, %v3994_v35  ;;  %v3839_v35 = vor.u32 %v4427_v27, %v3836_v28  ;;  %v4391_v36 = vld [vmem:[%s6392_s1 + $0x8c] sm:$0xf] }
  0x9c   : > { %2067 = vmatpush.bf16.msra.mxu2 %v3851_v47  ;;  %v4010_v47 = vld [vmem:[%s6392_s1 + $0x308] sm:$0xf]  ;;  %v4455_v39 = vld [vmem:[%s6392_s1 + $0x28c] sm:$0xf] }
  0x9d   : > { %2012 = vmatpush.bf16.msrb.mxu3 %v3831_v40  ;;  %v3770_v40 = vld [vmem:[%s6392_s1 + $0x128] sm:$0xf]  ;;  %v4379_v17 = vld [vmem:[%s6392_s1 + $0x2c] sm:$0xf] }
  0x9e   : > { %2027 = vmatpush.bf16.msrb.mxu0 %v3943_v61  ;;  %v3771_v55 = vor.u32 %v4413_v41, %v3770_v40  ;;  %v4467_v61 = vld [vmem:[%s6392_s1 + $0x2ec] sm:$0xf]  ;;  %v3931_v40 = vor.u32 %v4453_v30, %v3930_v29  ;;  %v3948_v41 = vld [vmem:[%s6392_s1 + $0x298] sm:$0xf0] }
  0x9f   : > { %2054 = vmatpush.bf16.msra.mxu1 %v3707_v58  ;;  %v4011_v58 = vor.u32 %v4473_v48, %v4010_v47  ;;  %v4375_v28 = vld [vmem:[%s6392_s1 + $0xc] sm:$0xf]  ;;  %v3628_v29 = vld [vmem:[%s6392_s1 + $0x18] sm:$0xf0] }
  0xa0   : > { %2068 = vmatpush.bf16.msra.mxu2 %v3835_v59  ;;  %v4403_v59 = vld [vmem:[%s6392_s1 + $0xec] sm:$0xf] }
  0xa1   : > { %2013 = vmatpush.bf16.msrb.mxu3 %v3815_v52  ;;  %v4465_v52 = vld [vmem:[%s6392_s1 + $0x2d4] sm:$0xf0] }
  0xa2   : > { %2028 = vmatpush.bf16.msrb.mxu0 %v3927_v14  ;;  %4017 = vmatmul.msk.bf16.vlgmr.msrb.gmra.mxu1 %vm1210_vm0, %v4937_v23  ;;  %v3979_v62 = vor.u32 %v4465_v52, %v3978_v51  ;;  %v4399_v14 = vld [vmem:[%s6392_s1 + $0xcc] sm:$0xf]  ;;  %v3676_v51 = vld [vmem:[%s6392_s1 + $0x78] sm:$0xf0] }
  0xa3   : > { %2055 = vmatpush.bf16.msra.mxu1 %v3691_v6  ;;  %v3743_v6 = vor.u32 %v4403_v59, %v3740_v60  ;;  %v4451_v52 = vld [vmem:[%s6392_s1 + $0x26c] sm:$0xf]  ;;  %v4445_v59 = vld [vmem:[%s6392_s1 + $0x234] sm:$0xf0]  ;;  %v3679_v60 = vor.u32 %v4387_v50, %v3676_v51 }
  0xa4   : > { %2069 = vmatpush.bf16.msra.mxu2 %v3819_v7  ;;  %v3999_v7 = vor.u32 %v4467_v61, %v3996_v63  ;;  %v3935_v61 = vor.u32 %v4451_v52, %v3932_v54  ;;  %v4383_v63 = vld [vmem:[%s6392_s1 + $0x4c] sm:$0xf] }
  0xa5   : > { %2014 = vmatpush.bf16.msrb.mxu3 %v3799_v1  ;;  %v3868_v1 = vld [vmem:[%s6392_s1 + $0x1f8] sm:$0xf0] }
  0xa6   : > { %2029 = vmatpush.bf16.msrb.mxu0 %v3911_v21  ;;  %v3871_v8 = vor.u32 %v4435_v0, %v3868_v1  ;;  %v4395_v21 = vld [vmem:[%s6392_s1 + $0xac] sm:$0xf]  ;;  %v3660_v0 = vld [vmem:[%s6392_s1 + $0x58] sm:$0xf0] }
  0xa7   : > { %2056 = vmatpush.bf16.msra.mxu1 %v3675_v18  ;;  %v3727_v18 = vor.u32 %v4399_v14, %v3724_v37  ;;  %v4447_v1 = vld [vmem:[%s6392_s1 + $0x24c] sm:$0xf]  ;;  %v3882_v14 = vld [vmem:[%s6392_s1 + $0x208] sm:$0xf]  ;;  %v4441_v37 = vld [vmem:[%s6392_s1 + $0x214] sm:$0xf0] }
  0xa8   : > { %2070 = vmatpush.bf16.msra.mxu2 %v3803_v19  ;;  %v3919_v15 = vor.u32 %v4447_v1, %v3916_v3 }
  0xa9   : > { %2015 = vmatpush.bf16.msrb.mxu3 %v3783_v12  ;;  %v3980_v12 = vld [vmem:[%s6392_s1 + $0x2d8] sm:$0xf0] }
  0xaa   : > { %2030 = vmatpush.bf16.msrb.mxu0 %v3895_v38  ;;  %v3983_v19 = vor.u32 %v4463_v9, %v3980_v12  ;;  %v3692_v38 = vld [vmem:[%s6392_s1 + $0x98] sm:$0xf0]  ;;  %v3663_v9 = vor.u32 %v4383_v63, %v3660_v0 }
  0xab   : > { %2057 = vmatpush.bf16.msra.mxu1 %v3659_v32  ;;  %v3711_v32 = vor.u32 %v4395_v21, %v3708_v22  ;;  %v3695_v47 = vor.u32 %v4391_v36, %v3692_v38  ;;  %v4012_v12 = vld [vmem:[%s6392_s1 + $0x318] sm:$0xf0]  ;;  %v4411_v22 = vld [vmem:[%s6392_s1 + $0x12c] sm:$0xf] }
  0xac   : > { %2071 = vmatpush.bf16.msra.mxu2 %v3787_v33  ;;  %v5905_v33 = vpop.f32.mrf.mxu3  ;;  %v3900_v21 = vld [vmem:[%s6392_s1 + $0x238] sm:$0xf0] }
  0xad   : > { %2016 = vmatpush.bf16.msrb.mxu3 %v3767_v26  ;;  %v3964_v26 = vld [vmem:[%s6392_s1 + $0x2b8] sm:$0xf0] }
  0xae   : > { %2031 = vmatpush.bf16.msrb.mxu0 %v3879_v53  ;;  %v3967_v34 = vor.u32 %v4459_v24, %v3964_v26  ;;  %v3772_v24 = vld [vmem:[%s6392_s1 + $0x138] sm:$0xf0] }
  0xaf   : > { %2058 = vmatpush.bf16.msra.mxu1 %v3643_v49  ;;  %v3951_v49 = vor.u32 %v4455_v39, %v3948_v41  ;;  %v3775_v30 = vor.u32 %v4411_v22, %v3772_v24  ;;  %v3756_v36 = vld [vmem:[%s6392_s1 + $0x118] sm:$0xf0] }
  0xb0   : > { %2072 = vmatpush.bf16.msra.mxu2 %v3771_v55 }
  0xb1   : > { %2017 = vmatpush.bf16.msrb.mxu3 %v3751_v42  ;;  %2032 = vmatmul.bf16.vlgmr.msrb.gmra.mxu0 %v4979_v46  ;;  %v4423_v42 = vld [vmem:[%s6392_s1 + $0x18c] sm:$0xf] }
  0xb2   : > { %2101 = vmatpush.bf16.msra.mxu0 %v4011_v58  ;;  %v5931_v48 = vpop.f32.mrf.mxu2  ;;  %v3823_v55 = vor.u32 %v4423_v42, %v3820_v43  ;;  %v3898_v58 = vld [vmem:[%s6392_s1 + $0x228] sm:$0xf] }
  0xb3   : > { %2059 = vmatpush.bf16.msra.mxu1 %v3627_v31  ;;  %v5966_v31 = vpop.f32.mrf.mxu0  ;;  %v3899_v2 = vor.u32 %v4445_v59, %v3898_v58 }
  0xb4   : > { %2018 = vmatmul.bf16.vlgmr.msrb.gmra.mxu3 %v5023_v11  ;;  %2073 = vmatpush.bf16.msra.mxu2 %v3755_v4  ;;  %v4415_v4 = vld [vmem:[%s6392_s1 + $0x14c] sm:$0xf] }
  0xb5   : > { %2080 = vmatpush.bf16.msra.mxu3 %v3995_v45  ;;  %v4449_v45 = vld [vmem:[%s6392_s1 + $0x254] sm:$0xf0] }
  0xb6   : > { %2108 = vmatpush.bf16.msrb.mxu0 %v3743_v6  ;;  %2060 = vmatmul.bf16.vlgmr.msra.gmra.mxu1 %v5016_v5  ;;  %v3915_v53 = vor.u32 %v4449_v45, %v3914_v44  ;;  %v3788_v6 = vld [vmem:[%s6392_s1 + $0x158] sm:$0xf0] }
  0xb7   : > { %2122 = vmatpush.bf16.msrb.mxu1 %v3871_v8  ;;  %2074 = vmatmul.bf16.vlgmr.msra.gmra.mxu2 %v5023_v11  ;;  %v5979_v8 = vpop.f32.mrf.mxu3  ;;  %v3791_v16 = vor.u32 %v4415_v4, %v3788_v6 }
  0xb8   : > { %2136 = vmatpush.bf16.msrb.mxu2 %v3999_v7  ;;  %v5977_v7 = vpop.f32.mrf.mxu1 }
  0xb9   : > { %2081 = vmatpush.bf16.msra.mxu3 %v3979_v62  ;;  %v3807_v62 = vor.u32 %v4419_v56, %v3804_v57  ;;  %v1238_v24 = vadd.f32 %v5977_v7, %v5966_v31 }
  0xba   : > { %2109 = vmatpush.bf16.msrb.mxu0 %v3727_v18  ;;  %v5995_v13 = vpop.f32.mrf.mxu2  ;;  %v3644_v18 = vld [vmem:[%s6392_s1 + $0x38] sm:$0xf0] }
  0xbb   : > { %2123 = vmatpush.bf16.msrb.mxu1 %v3855_v20  ;;  %v4443_v20 = vld [vmem:[%s6392_s1 + $0x22c] sm:$0xf]  ;;  %v3647_v26 = vor.u32 %v4379_v17, %v3644_v18  ;;  %v1225_v39 = vpop.f32.mrf.mxu0 }
  0xbc   : > { %2137 = vmatpush.bf16.msrb.mxu2 %v3983_v19  ;;  %v3883_v19 = vor.u32 %v4441_v37, %v3882_v14  ;;  %v3903_v27 = vor.u32 %v4443_v20, %v3900_v21 }
  0xbd   : > { %2082 = vmatpush.bf16.msra.mxu3 %v3963_v10  ;;  %v4471_v10 = vld [vmem:[%s6392_s1 + $0x30c] sm:$0xf] }
  0xbe   : > { %2110 = vmatpush.bf16.msrb.mxu0 %v3711_v32  ;;  %v4439_v32 = vld [vmem:[%s6392_s1 + $0x20c] sm:$0xf] }
  0xbf   : > { %2124 = vmatpush.bf16.msrb.mxu1 %v3839_v35  ;;  %v4407_v35 = vld [vmem:[%s6392_s1 + $0x10c] sm:$0xf]  ;;  %v1279_v38 = vpop.f32.mrf.mxu3 }
  0xc0   : > { %2138 = vmatpush.bf16.msrb.mxu2 %v3967_v34  ;;  %v3884_v34 = vld [vmem:[%s6392_s1 + $0x218] sm:$0xf0]  ;;  %v1239_v41 = vpop.f32.mrf.mxu1  ;;  %v3759_v44 = vor.u32 %v4407_v35, %v3756_v36 }
  0xc1   : > { %2083 = vmatpush.bf16.msra.mxu3 %v3947_v25  ;;  %4018 = vmatmul.msk.bf16.vlgmr.msra.gmra.mxu0 %vm1210_vm0, %v4937_v23  ;;  %v4015_v25 = vor.u32 %v4471_v10, %v4012_v12  ;;  %v3887_v42 = vor.u32 %v4439_v32, %v3884_v34  ;;  %v6058_v34 = vld [vmem:[%s6394_s3] sm:$0xf] }
  0xc2   : > { %2111 = vmatpush.bf16.msrb.mxu0 %v3695_v47  ;;  %v1321_v43 = vpop.f32.mrf.mxu2 }
  0xc3   : > { %2125 = vmatpush.bf16.msrb.mxu1 %v3823_v55 }
  0xc4   : > { %2139 = vmatpush.bf16.msrb.mxu2 %v3951_v49 }
  0xc5   : > { %2084 = vmatpush.bf16.msra.mxu3 %v3931_v40  ;;  %v3631_v40 = vor.u32 %v4375_v28, %v3628_v29 }
  0xc6   : > { %2112 = vmatpush.bf16.msrb.mxu0 %v3679_v60 }
  0xc7   : > { %2126 = vmatpush.bf16.msrb.mxu1 %v3807_v62  ;;  %v1281_v55 = vpop.f32.mrf.mxu3 }
  0xc8   : > { %2140 = vmatpush.bf16.msrb.mxu2 %v3935_v61 }
  0xc9   : > { %2085 = vmatpush.bf16.msra.mxu3 %v3915_v53 }
  0xca   : > { %2113 = vmatpush.bf16.msrb.mxu0 %v3663_v9  ;;  %v1293_v45 = vpop.f32.mrf.mxu0  ;;  %v1323_v50 = vpop.f32.mrf.mxu2 }
  0xcb   : > { %2127 = vmatpush.bf16.msrb.mxu1 %v3791_v16  ;;  %v1294_v47 = vadd.f32 %v1293_v45, %v1279_v38  ;;  %v1307_v49 = vpop.f32.mrf.mxu1 }
  0xcc   : > { %2141 = vmatpush.bf16.msrb.mxu2 %v3919_v15 }
  0xcd   : > { %2086 = vmatpush.bf16.msra.mxu3 %v3899_v2  ;;  %v1308_v51 = vadd.f32 %v1307_v49, %v1294_v47 }
  0xce   : > { %2114 = vmatpush.bf16.msrb.mxu0 %v3647_v26 }
  0xcf   : > { %2128 = vmatpush.bf16.msrb.mxu1 %v3775_v30  ;;  %v6037_v52 = vadd.f32 %v1321_v43, %v1308_v51 }
  0xd0   : > { %2142 = vmatpush.bf16.msrb.mxu2 %v3903_v27  ;;  %v1240_v27 = vadd.f32 %v1239_v41, %v1225_v39 }
  0xd1   : > { %2087 = vmatpush.bf16.msra.mxu3 %v3883_v19 }
  0xd2   : > { %2115 = vmatpush.bf16.msrb.mxu0 %v3631_v40  ;;  %v1295_v53 = vpop.f32.mrf.mxu0  ;;  %v1254_v35 = vadd.f32 %v5995_v13, %v1240_v27 }
  0xd3   : > { %2129 = vmatpush.bf16.msrb.mxu1 %v3759_v44  ;;  %v1296_v54 = vadd.f32 %v1295_v53, %v1281_v55  ;;  %v1309_v56 = vpop.f32.mrf.mxu1 }
  0xd4   : > { %2088 = vmatmul.bf16.vlgmr.msra.gmra.mxu3 %v4979_v46  ;;  %2143 = vmatpush.bf16.msrb.mxu2 %v3887_v42  ;;  %v1268_v39 = vadd.f32 %v5979_v8, %v1254_v35 }
  0xd5   : > { %2157 = vmatpush.bf16.msrb.mxu3 %v4015_v25  ;;  %2116 = vmatmul.bf16.vlgmr.msrb.gmra.mxu0 %v5016_v5  ;;  %v1310_v58 = vadd.f32 %v1309_v56, %v1296_v54  ;;  %v1252_v25 = vadd.f32 %v5931_v48, %v1238_v24  ;;  %v6064_v48 = vld [vmem:[%s6395_s4] sm:$0xf] }
  0xd6   : > { %2130 = vmatmul.bf16.vlgmr.msrb.gmra.mxu1 %v5023_v11  ;;  %v1349_v5 = vpop.f32.mrf.mxu2  ;;  %v2184_v40 = vperm.slane %v6064_v48, 0  ;;  %v2186_v35 = vperm.slane %v6064_v48, 2 }
  0xd7   : > { %2144 = vmatmul.bf16.vlgmr.msrb.gmra.mxu2 %v4979_v46  ;;  %v1335_v57 = vpop.f32.mrf.mxu3  ;;  %v6041_v59 = vadd.f32 %v1323_v50, %v1310_v58  ;;  %v1266_v28 = vadd.f32 %v5905_v33, %v1252_v25  ;;  %v2166_v33 = vperm.slane %v6058_v34, 0 }
  0xd8   : > { %v1350_v46 = vadd.f32 %v1349_v5, %v1335_v57 }
  0xdb   : > { %v1377_v11 = vpop.f32.mrf.mxu1 }
  0xde   : > { %v1351_v61 = vpop.f32.mrf.mxu2 }
  0xdf   : > { %v1337_v60 = vpop.f32.mrf.mxu3 }
  0xe0   : > { %v1352_v62 = vadd.f32 %v1351_v61, %v1337_v60  ;;  %v2167_v61 = vperm.slane %v6058_v34, 1 }
  0xe3   : > { %v1379_v63 = vpop.f32.mrf.mxu1 }
  0xe4   : > { %4019 = vmatmul.msk.bf16.vlgmr.msrb.gmra.mxu3 %vm1210_vm0, %v4937_v23 }
  0xea   : > { %v1363_v0 = vpop.f32.mrf.mxu0 }
  0xeb   : > { %v1364_v1 = vadd.f32 %v1363_v0, %v1350_v46 }
  0xed   : > { %v6043_v2 = vadd.f32 %v1377_v11, %v1364_v1  ;;  %v2185_v1 = vperm.slane %v6064_v48, 1 }
  0xef   : > { %v1405_v3 = vpop.f32.mrf.mxu1 }
  0xf2   : > { %v1365_v4 = vpop.f32.mrf.mxu0 }
  0xf3   : > { %v1366_v23 = vadd.f32 %v1365_v4, %v1352_v62 }
  0xf5   : > { %v6045_v10 = vadd.f32 %v1379_v63, %v1366_v23 }
  0xf6   : > { %v1419_v37 = vpop.f32.mrf.mxu2 }
  0xf7   : > { %v1391_v6 = vpop.f32.mrf.mxu3  ;;  %v1407_v12 = vpop.f32.mrf.mxu1 }
  0xf8   : > { %v1406_v14 = vadd.f32 %v1405_v3, %v1391_v6 }
  0xfa   : > { %v1420_v9 = vadd.f32 %v1419_v37, %v1406_v14  ;;  %v1433_v15 = vpop.f32.mrf.mxu0 }
  0xfc   : > { %v6047_v17 = vadd.f32 %v1433_v15, %v1420_v9 }
  0xfe   : > { %v1421_v19 = vpop.f32.mrf.mxu2 }
  0xff   : > { %v1393_v16 = vpop.f32.mrf.mxu3 }
 0x100   : > { %v1408_v18 = vadd.f32 %v1407_v12, %v1393_v16 }
 0x102   : > { %v1422_v20 = vadd.f32 %v1421_v19, %v1408_v18  ;;  %v1435_v21 = vpop.f32.mrf.mxu0 }
 0x104   : > { %v6049_v22 = vadd.f32 %v1435_v21, %v1422_v20 }
 0x106   : > { %v1991_v36 = vpop.f32.mrf.mxu2 }
 0x10e   : > { %v1963_v26 = vpop.f32.mrf.mxu0  ;;  %v1993_v49 = vpop.f32.mrf.mxu2 }
 0x10f   : > { %v1977_v32 = vpop.f32.mrf.mxu1 }
 0x116   : > { %v1965_v42 = vpop.f32.mrf.mxu0 }
 0x117   : > { %v1949_v29 = vpop.f32.mrf.mxu3  ;;  %v1979_v47 = vpop.f32.mrf.mxu1 }
 0x118   : > { %v1950_v30 = vadd.f32 %v1949_v29, %v1266_v28  ;;  %v2168_v29 = vperm.slane %v6058_v34, 2 }
 0x11a   : > { %v1964_v38 = vadd.f32 %v1963_v26, %v1950_v30  ;;  %v2005_v56 = vpop.f32.mrf.mxu2 }
 0x11b   : > { %v2006_v5 = vadd.f32 %v2005_v56, %v6037_v52 }
 0x11c   : > { %v1978_v31 = vadd.f32 %v1977_v32, %v1964_v38 }
 0x11e   : > { %v1992_v7 = vadd.f32 %v1991_v36, %v1978_v31 }
 0x11f   : > { %v1951_v41 = vpop.f32.mrf.mxu3  ;;  %v2047_v58 = vpop.f32.mrf.mxu1 }
 0x120   : > { %v1952_v43 = vadd.f32 %v1951_v41, %v1268_v39  ;;  %v2174_v44 = vmul.f32 %v2166_v33, %v1992_v7 }
 0x122   : > { %v1966_v13 = vadd.f32 %v1965_v42, %v1952_v43  ;;  %v6069_v45 = vadd.f32 %v2184_v40, %v2174_v44  ;;  %v2007_v62 = vpop.f32.mrf.mxu2 }
 0x123   : > { %v2008_v3 = vadd.f32 %v2007_v62, %v6041_v59 }
 0x124   : > { %v1980_v55 = vadd.f32 %v1979_v47, %v1966_v13  ;;  %v2200_v50 = vmax.f32 %v6069_v45, 0.0  ;;  %v4587_v45 = vld [vmem:[%s6396_s5 + $0x68] sm:$0xff] }
 0x126   : > { %v1994_v51 = vadd.f32 %v1993_v49, %v1980_v55  ;;  %2210 = vrot.lane.b32.xlu0 %v2200_v50, %s4658_s28  ;;  %v2169_v55 = vperm.slane %v6058_v34, 3 }
 0x127   : > { %v2049_v23 = vpop.f32.mrf.mxu1 }
 0x128   : > { %v2178_v8 = vmul.f32 %v2166_v33, %v1994_v51 }
 0x12a   : > { %v6075_v53 = vadd.f32 %v2184_v40, %v2178_v8 }
 0x12c   : > { %v2204_v54 = vmax.f32 %v6075_v53, 0.0 }
 0x12e   : > { %2212 = vrot.lane.b32.xlu0 %v2204_v54, %s4658_s28  ;;  %v2033_v57 = vpop.f32.mrf.mxu0 }
 0x133   : > { %v2061_v19 = vpop.f32.mrf.mxu1 }
 0x134   : > { %v2062_v24 = vadd.f32 %v2061_v19, %v6043_v2  ;;  %v4588_v19 = vld [vmem:[%s6396_s5 + $0x70] sm:$0xff] }
 0x136   : > { %v2035_v0 = vpop.f32.mrf.mxu0 }
 0x137   : > { %v2019_v46 = vpop.f32.mrf.mxu3 }
 0x138   : > { %v2020_v11 = vadd.f32 %v2019_v46, %v2006_v5  ;;  %v2187_v5 = vperm.slane %v6064_v48, 3 }
 0x13a   : > { %v2034_v60 = vadd.f32 %v2033_v57, %v2020_v11  ;;  %v2075_v20 = vpop.f32.mrf.mxu2 }
 0x13b   : > { %v2076_v25 = vadd.f32 %v2075_v20, %v2062_v24  ;;  %v2063_v26 = vpop.f32.mrf.mxu1  ;;  %v4575_v24 = vld [vmem:[%s6396_s5 + $0x8] sm:$0xff] }
 0x13c   : > { %v2048_v63 = vadd.f32 %v2047_v58, %v2034_v60  ;;  %v2064_v38 = vadd.f32 %v2063_v26, %v6045_v10  ;;  %v4583_v26 = vld [vmem:[%s6396_s5 + $0x48] sm:$0xff] }
 0x13e   : > { %v2175_v4 = vmul.f32 %v2167_v61, %v2048_v63  ;;  %v2103_v15 = vpop.f32.mrf.mxu0 }
 0x13f   : > { %v2021_v6 = vpop.f32.mrf.mxu3 }
 0x140   : > { %v2022_v14 = vadd.f32 %v2021_v6, %v2008_v3  ;;  %v6085_v37 = vadd.f32 %v2185_v1, %v2175_v4  ;;  %v4581_v3 = vld [vmem:[%s6396_s5 + $0x38] sm:$0xff] }
 0x141   : > { %v4577_v4 = vld [vmem:[%s6396_s5 + $0x18] sm:$0xff]  ;;  %2316 = vmatpush.bf16.msra.mxu3 %v4581_v3  ;;  %v4596_v3 = vld [vmem:[%s6399_s8 + $0x10] sm:$0xff] }
 0x142   : > { %v2036_v52 = vadd.f32 %v2035_v0, %v2022_v14  ;;  %v2201_v9 = vmax.f32 %v6085_v37, 0.0  ;;  %v2077_v30 = vpop.f32.mrf.mxu2  ;;  %v4585_v6 = vld [vmem:[%s6396_s5 + $0x58] sm:$0xff]  ;;  %v4659_v14 = vmov 0.0   ;;  %2357 = vmatpush.bf16.msra.mxu0 %v4577_v4  ;;  %v4586_v37 = vld [vmem:[%s6396_s5 + $0x60] sm:$0xff]  ;;  %v4604_v4 = vld [vmem:[%s6399_s8 + $0x50] sm:$0xff] }
 0x143   : > { %v2078_v33 = vadd.f32 %v2077_v30, %v2064_v38  ;;  %2255 = vst.msk [vmem:[#allocation2] sm:$0xff] %vm2254_vm1, %v4659_v14  ;;  %2410 = vmatpush.bf16.msra.mxu1 %v4585_v6  ;;  %v4582_v30 = vld [vmem:[%s6396_s5 + $0x40] sm:$0xff]  ;;  %v4608_v6 = vld [vmem:[%s6399_s8 + $0x70] sm:$0xff] }
 0x144   : > { %v2050_v12 = vadd.f32 %v2049_v23, %v2036_v52  ;;  %2222 = vrot.lane.b32.xlu1 %v2201_v9, %s4658_s28  ;;  %v4589_v23 = vld [vmem:[%s6396_s5 + $0x78] sm:$0xff]  ;;  %2256 = vst.msk [vmem:[#allocation2 + $0x8] sm:$0xff] %vm2254_vm1, %v4659_v14 }
 0x145   : > { %2465 = vmatpush.bf16.msra.mxu2 %v4589_v23  ;;  %2258 = vst.msk [vmem:[#allocation2 + $0x10] sm:$0x3] %vm2257_vm2, %v4659_v14 }
 0x146   : > { %v2179_v16 = vmul.f32 %v2167_v61, %v2050_v12  ;;  %v2105_v21 = vpop.f32.mrf.mxu0  ;;  %2546 = vst.msk [vmem:[#allocation3] sm:$0xff] %vm2254_vm1, %v4659_v14  ;;  %v4580_v12 = vld [vmem:[%s6396_s5 + $0x30] sm:$0xff] }
 0x147   : > { %2547 = vst.msk [vmem:[#allocation3 + $0x8] sm:$0xff] %vm2254_vm1, %v4659_v14  ;;  %2317 = vmatpush.bf16.msra.mxu3 %v4580_v12  ;;  %v4603_v12 = vld [vmem:[%s6399_s8 + $0x48] sm:$0xff] }
 0x148   : > { %v6091_v18 = vadd.f32 %v2185_v1, %v2179_v16  ;;  %2548 = vst.msk [vmem:[#allocation3 + $0x10] sm:$0x3] %vm2257_vm2, %v4659_v14  ;;  %v4584_v16 = vld [vmem:[%s6396_s5 + $0x50] sm:$0xff] }
 0x149   : > { %2411 = vmatpush.bf16.msra.mxu1 %v4584_v16  ;;  %2466 = vmatpush.bf16.msra.mxu2 %v4588_v19 }
 0x14a   : > { %v2205_v59 = vmax.f32 %v6091_v18, 0.0  ;;  %v4590_v18 = vld [vmem:[%s6396_s5 + $0x80] sm:$0xff] }
 0x14c   : > { %2224 = vrot.lane.b32.xlu1 %v2205_v59, %s4658_s28 }
 0x14d   : > { %2412 = vmatpush.bf16.msra.mxu1 %v4583_v26  ;;  %2467 = vmatpush.bf16.msra.mxu2 %v4587_v45  ;;  %v4606_v26 = vld [vmem:[%s6399_s8 + $0x60] sm:$0xff] }
 0x151   : > { %2413 = vmatpush.bf16.msra.mxu1 %v4582_v30  ;;  %2468 = vmatpush.bf16.msra.mxu2 %v4586_v37 }
 0x152   : > { %v2117_v36 = vpop.f32.mrf.mxu0 }
 0x153   : > { %v2131_v39 = vpop.f32.mrf.mxu1  ;;  %v2118_v2 = vadd.f32 %v2117_v36, %v6047_v17  ;;  %v4593_v36 = vld [vmem:[%s6396_s5 + $0x98] sm:$0xff] }
 0x155   : > { %v2132_v13 = vadd.f32 %v2131_v39, %v2118_v2 }
 0x157   : > { %v2089_v27 = vpop.f32.mrf.mxu3 }
 0x158   : > { %v2090_v28 = vadd.f32 %v2089_v27, %v2076_v25  ;;  %v4578_v27 = vld [vmem:[%s6396_s5 + $0x20] sm:$0xff] }
 0x15a   : > { %v2104_v32 = vadd.f32 %v2103_v15, %v2090_v28  ;;  %v2145_v43 = vpop.f32.mrf.mxu2  ;;  %v2119_v10 = vpop.f32.mrf.mxu0  ;;  %v4576_v15 = vld [vmem:[%s6396_s5 + $0x10] sm:$0xff]  ;;  %v4574_v28 = vld [vmem:[%s6396_s5] sm:$0xff] }
 0x15b   : > { %v2146_v49 = vadd.f32 %v2145_v43, %v2132_v13  ;;  %v2120_v17 = vadd.f32 %v2119_v10, %v6049_v22  ;;  %v2133_v58 = vpop.f32.mrf.mxu1  ;;  %2358 = vmatpush.bf16.msra.mxu0 %v4576_v15  ;;  %v4607_v15 = vld [vmem:[%s6399_s8 + $0x68] sm:$0xff] }
 0x15c   : > { %v2176_v31 = vmul.f32 %v2168_v29, %v2104_v32 }
 0x15d   : > { %v2134_v60 = vadd.f32 %v2133_v58, %v2120_v17 }
 0x15e   : > { %v6101_v7 = vadd.f32 %v2186_v35, %v2176_v31 }
 0x15f   : > { %v2091_v40 = vpop.f32.mrf.mxu3  ;;  %2359 = vmatpush.bf16.msra.mxu0 %v4575_v24  ;;  %v4594_v24 = vld [vmem:[%s6399_s8] sm:$0xff] }
 0x160   : > { %v2092_v41 = vadd.f32 %v2091_v40, %v2078_v33  ;;  %v2202_v42 = vmax.f32 %v6101_v7, 0.0  ;;  %v4592_v33 = vld [vmem:[%s6396_s5 + $0x90] sm:$0xff]  ;;  %v4591_v40 = vld [vmem:[%s6396_s5 + $0x88] sm:$0xff] }
 0x162   : > { %v2106_v44 = vadd.f32 %v2105_v21, %v2092_v41  ;;  %2234 = vrot.lane.b32.xlu2 %v2202_v42, %s4658_s28  ;;  %v2147_v11 = vpop.f32.mrf.mxu2  ;;  %v4579_v21 = vld [vmem:[%s6396_s5 + $0x28] sm:$0xff] }
 0x163   : > { %v2148_v34 = vadd.f32 %v2147_v11, %v2134_v60  ;;  %2318 = vmatpush.bf16.msra.mxu3 %v4579_v21  ;;  %2360 = vmatpush.bf16.msra.mxu0 %v4574_v28  ;;  %v4598_v21 = vld [vmem:[%s6399_s8 + $0x20] sm:$0xff] }
 0x164   : > { %v2180_v47 = vmul.f32 %v2168_v29, %v2106_v44 }
 0x166   : > { %v6109_v51 = vadd.f32 %v2186_v35, %v2180_v47 }
 0x167   : > { %v2159_v8 = vpop.f32.mrf.mxu3  ;;  %2319 = vmatpush.bf16.msra.mxu3 %v4578_v27  ;;  %v4613_v27 = vld [vmem:[%s6399_s8 + $0x98] sm:$0xff] }
 0x168   : > { %v2160_v56 = vadd.f32 %v2159_v8, %v2146_v49  ;;  %v2206_v57 = vmax.f32 %v6109_v51, 0.0 }
 0x16a   : > { %v2177_v46 = vmul.f32 %v2169_v55, %v2160_v56  ;;  %2236 = vrot.lane.b32.xlu2 %v2206_v57, %s4658_s28 }
 0x16b   : > { %2520 = vmatpush.bf16.msrb.mxu3 %v4593_v36  ;;  %v4645_v36 = vld [vmem:[%s6398_s7] ss:$0 sm:$0xff] }
 0x16c   : > { %v6117_v61 = vadd.f32 %v2187_v5, %v2177_v46 }
 0x16e   : > { %v2203_v62 = vmax.f32 %v6117_v61, 0.0 }
 0x16f   : > { %v2161_v63 = vpop.f32.mrf.mxu3  ;;  %2521 = vmatpush.bf16.msrb.mxu3 %v4592_v33 }
 0x170   : > { %v2162_v22 = vadd.f32 %v2161_v63, %v2148_v34  ;;  %2246 = vrot.lane.b32.xlu0 %v2203_v62, %s4658_s28  ;;  %v4597_v63 = vld [vmem:[%s6399_s8 + $0x18] sm:$0xff] }
 0x171   : > { %2646 = vmatpush.bf16.msrb.mxu1 %v4597_v63 }
 0x172   : > { %v2181_v48 = vmul.f32 %v2169_v55, %v2162_v22  ;;  %v4605_v22 = vld [vmem:[%s6399_s8 + $0x58] sm:$0xff] }
 0x173   : > { %2522 = vmatpush.bf16.msrb.mxu3 %v4591_v40  ;;  %2699 = vmatpush.bf16.msrb.mxu2 %v4605_v22  ;;  %v4610_v40 = vld [vmem:[%s6399_s8 + $0x80] sm:$0xff]  ;;  %v4620_v22 = vld [vmem:[%s6402_s11 + $0x30] sm:$0xff] }
 0x174   : > { %v6123_v0 = vadd.f32 %v2187_v5, %v2181_v48  ;;  %v4609_v48 = vld [vmem:[%s6399_s8 + $0x78] sm:$0xff] }
 0x175   : > { %2647 = vmatpush.bf16.msrb.mxu1 %v4596_v3 }
 0x176   : > { %v2207_v1 = vmax.f32 %v6123_v0, 0.0 }
 0x177   : > { %2523 = vmatpush.bf16.msrb.mxu3 %v4590_v18  ;;  %2700 = vmatpush.bf16.msrb.mxu2 %v4604_v4  ;;  %v4619_v4 = vld [vmem:[%s6402_s11 + $0x28] sm:$0xff] }
 0x178   : > { %2248 = vrot.lane.b32.xlu1 %v2207_v1, %s4658_s28 }
 0x17b   : > { %2701 = vmatpush.bf16.msrb.mxu2 %v4603_v12 }
 0x198   : > { %v2211_v52 = vpop.permute.xlu0 %2210 }
 0x199   : > { %v2216_v20 = vmax.f32 %v2200_v50, %v2211_v52  ;;  %v4595_v52 = vld [vmem:[%s6399_s8 + $0x8] sm:$0xff] }
 0x19a   : > { %2648 = vmatpush.bf16.msrb.mxu1 %v4595_v52 }
 0x19b   : > { %v2218_v50 = vmax.f32 %v2216_v20, %v2201_v9 }
 0x19e   : > { %2649 = vmatpush.bf16.msrb.mxu1 %v4594_v24 }
 0x1a0   : > { %v2213_v29 = vpop.permute.xlu0 %2212 }
 0x1a1   : > { %v2217_v32 = vmax.f32 %v2204_v54, %v2213_v29  ;;  %v4612_v29 = vld [vmem:[%s6399_s8 + $0x90] sm:$0xff] }
 0x1a3   : > { %v2219_v53 = vmax.f32 %v2217_v32, %v2205_v59 }
 0x1b6   : > { %v2223_v25 = vpop.permute.xlu1 %2222 }
 0x1b7   : > { %v2228_v9 = vmax.f32 %v2218_v50, %v2223_v25  ;;  %v4602_v25 = vld [vmem:[%s6399_s8 + $0x40] sm:$0xff] }
 0x1b8   : > { %2702 = vmatpush.bf16.msrb.mxu2 %v4602_v25 }
 0x1b9   : > { %v2230_v38 = vmax.f32 %v2228_v9, %v2202_v42  ;;  %v4644_v9 = vld [vmem:[%s6397_s6] ss:$0 sm:$0xff] }
 0x1bc   : > { %v2235_v35 = vpop.permute.xlu2 %2234 }
 0x1bd   : > { %v2240_v54 = vmax.f32 %v2230_v38, %v2235_v35 }
 0x1be   : > { %v2225_v31 = vpop.permute.xlu1 %2224 }
 0x1bf   : > { %v2229_v39 = vmax.f32 %v2219_v53, %v2225_v31  ;;  %v2242_v2 = vmax.f32 %v2240_v54, %v2203_v62  ;;  %v4601_v62 = vld [vmem:[%s6399_s8 + $0x38] sm:$0xff]  ;;  %v4611_v31 = vld [vmem:[%s6399_s8 + $0x88] sm:$0xff] }
 0x1c0   : > { %2605 = vmatpush.bf16.msrb.mxu0 %v4601_v62  ;;  %v4629_v62 = vld [vmem:[%s6402_s11 + $0x78] sm:$0xff] }
 0x1c1   : > { %v2231_v7 = vmax.f32 %v2229_v39, %v2206_v57 }
 0x1c4   : > { %v2237_v41 = vpop.permute.xlu2 %2236 }
 0x1c5   : > { %v2241_v43 = vmax.f32 %v2231_v7, %v2237_v41 }
 0x1c7   : > { %v2243_v44 = vmax.f32 %v2241_v43, %v2207_v1  ;;  %v4600_v1 = vld [vmem:[%s6399_s8 + $0x30] sm:$0xff] }
 0x1c8   : > { %2606 = vmatpush.bf16.msrb.mxu0 %v4600_v1  ;;  %v4628_v1 = vld [vmem:[%s6402_s11 + $0x70] sm:$0xff] }
 0x1e2   : > { %v2247_v42 = vpop.permute.xlu0 %2246 }
 0x1e3   : > { %v2252_v59 = vmax.f32 %v2242_v2, %v2247_v42 }
 0x1e5   : > { %2259 = vst.msk [vmem:[#allocation2 + $0x2] sm:$0xff] %vm2254_vm1, %v2252_v59 }
 0x1ea   : > { %v2249_v13 = vpop.permute.xlu1 %2248 }
 0x1eb   : > { %v2253_v47 = vmax.f32 %v2243_v44, %v2249_v13 }
 0x1ec   : > { %v2273_v10 = vld [vmem:[#allocation2 + $0x1] sm:$0xff] }
 0x1ed   : > { %2261 = vst.msk [vmem:[#allocation2 + $0xa] sm:$0x3f] %vm2260_vm3, %v2253_v47  ;;  %v2262_v49 = vld [vmem:[#allocation2] sm:$0xff] }
 0x1ee   : > { %v2367_v55 = vld [vmem:[#allocation2 + $0x2] sm:$0xff] }
 0x1f4   : > { %v2274_v51 = vld [vmem:[#allocation2 + $0x9] sm:$0x3f] }
 0x1f5   : > { %v2263_v8 = vld [vmem:[#allocation2 + $0x8] sm:$0x3f]  ;;  %v2275_v56 = vpack.c.bf16 %v2274_v51, %v2273_v10 }
 0x1f6   : > { %v2368_v17 = vld [vmem:[#allocation2 + $0xa] sm:$0x3f]  ;;  %v2264_v57 = vpack.c.bf16 %v2263_v8, %v2262_v49 }
 0x1f7   : > { %v2369_v5 = vpack.c.bf16 %v2368_v17, %v2367_v55  ;;  %v2422_v58 = vld [vmem:[#allocation2 + $0x3] sm:$0xff]  ;;  %v2423_v46 = vld [vmem:[#allocation2 + $0xb] sm:$0x3f]  ;;  %4044 = vmatmul.msk.bf16.vlgmr.msra.gmra.mxu3 %vm2254_vm1, %v2275_v56 }
 0x1f8   : > { %v2477_v11 = vld [vmem:[#allocation2 + $0x4] sm:$0xff]  ;;  %v2424_v60 = vpack.c.bf16 %v2423_v46, %v2422_v58  ;;  %v2478_v61 = vld [vmem:[#allocation2 + $0xc] sm:$0x3f]  ;;  %4061 = vmatmul.msk.bf16.vlgmr.msra.gmra.mxu0 %vm2254_vm1, %v2264_v57  ;;  %2754 = vmatpush.bf16.msra.mxu3 %v4609_v48 }
 0x1f9   : > { %2835 = vst.msk [vmem:[#allocation2] sm:$0xff] %vm2254_vm1, %v4659_v14  ;;  %4086 = vmatmul.msk.bf16.vlgmr.msra.gmra.mxu1 %vm2254_vm1, %v2369_v5  ;;  %v2479_v34 = vpack.c.bf16 %v2478_v61, %v2477_v11  ;;  %v4617_v61 = vld [vmem:[%s6402_s11 + $0x18] sm:$0xff]  ;;  %v4616_v48 = vld [vmem:[%s6402_s11 + $0x10] sm:$0xff] }
 0x1fa   : > { %2836 = vst.msk [vmem:[#allocation2 + $0x8] sm:$0xff] %vm2254_vm1, %v4659_v14  ;;  %4111 = vmatmul.msk.bf16.vlgmr.msra.gmra.mxu2 %vm2254_vm1, %v2424_v60  ;;  %v4621_v60 = vld [vmem:[%s6402_s11 + $0x38] sm:$0xff] }
 0x1fb   : > { %2837 = vst.msk [vmem:[#allocation2 + $0x10] sm:$0x3] %vm2257_vm2, %v4659_v14  ;;  %v4599_v14 = vld [vmem:[%s6399_s8 + $0x28] sm:$0xff]  ;;  %2894 = vmatpush.bf16.msra.mxu1 %v4621_v60  ;;  %2935 = vmatpush.bf16.msra.mxu2 %v4617_v61 }
 0x1fc   : > { %2755 = vmatpush.bf16.msra.mxu3 %v4608_v6  ;;  %2607 = vmatpush.bf16.msrb.mxu0 %v4599_v14  ;;  %v4615_v6 = vld [vmem:[%s6402_s11 + $0x8] sm:$0xff] }
 0x1fd   : > { %v4627_v14 = vld [vmem:[%s6402_s11 + $0x68] sm:$0xff] }
 0x1ff   : > { %2895 = vmatpush.bf16.msra.mxu1 %v4620_v22  ;;  %2936 = vmatpush.bf16.msra.mxu2 %v4616_v48 }
 0x200   : > { %2756 = vmatpush.bf16.msra.mxu3 %v4607_v15  ;;  %2608 = vmatpush.bf16.msrb.mxu0 %v4598_v21  ;;  %v4618_v15 = vld [vmem:[%s6402_s11 + $0x20] sm:$0xff] }
 0x201   : > { %v4626_v21 = vld [vmem:[%s6402_s11 + $0x60] sm:$0xff] }
 0x203   : > { %2896 = vmatpush.bf16.msra.mxu1 %v4619_v4  ;;  %2937 = vmatpush.bf16.msra.mxu2 %v4615_v6  ;;  %v4649_v4 = vld [vmem:[%s6404_s13] ss:$0 sm:$0xff] }
 0x204   : > { %2757 = vmatpush.bf16.msra.mxu3 %v4606_v26  ;;  %2809 = vmatpush.bf16.msra.mxu0 %v4613_v27  ;;  %v4633_v26 = vld [vmem:[%s6402_s11 + $0x98] sm:$0xff] }
 0x207   : > { %4136 = vmatmul.msk.bf16.vlgmr.msrb.gmra.mxu3 %vm2254_vm1, %v2479_v34  ;;  %v4625_v34 = vld [vmem:[%s6402_s11 + $0x58] sm:$0xff]  ;;  %2897 = vmatpush.bf16.msra.mxu1 %v4618_v15 }
 0x208   : > { %2810 = vmatpush.bf16.msra.mxu0 %v4612_v29  ;;  %2988 = vmatpush.bf16.msrb.mxu3 %v4625_v34 }
 0x20c   : > { %2811 = vmatpush.bf16.msra.mxu0 %v4611_v31 }
 0x210   : > { %2812 = vmatpush.bf16.msra.mxu0 %v4610_v40 }
 0x275   : > { %v2362_v23 = vpop.f32.mrf.mxu0 }
 0x276   : > { %v2415_v19 = vpop.f32.mrf.mxu1 }
 0x27a   : > { %v2321_v0 = vpop.f32.mrf.mxu3 }
 0x27b   : > { %v2363_v16 = vadd.f32 %v2362_v23, %v2321_v0  ;;  %v4624_v0 = vld [vmem:[%s6402_s11 + $0x50] sm:$0xff]  ;;  %v4623_v23 = vld [vmem:[%s6402_s11 + $0x48] sm:$0xff] }
 0x27c   : > { %2989 = vmatpush.bf16.msrb.mxu3 %v4624_v0  ;;  %v4648_v0 = vld [vmem:[%s6403_s12] ss:$0 sm:$0xff] }
 0x27d   : > { %v2420_v45 = vadd.f32 %v2415_v19, %v2363_v16  ;;  %v2470_v50 = vpop.f32.mrf.mxu2  ;;  %v2364_v28 = vpop.f32.mrf.mxu0  ;;  %v4614_v16 = vld [vmem:[%s6402_s11] sm:$0xff] }
 0x27e   : > { %v2417_v38 = vpop.f32.mrf.mxu1  ;;  %2938 = vmatpush.bf16.msra.mxu2 %v4614_v16 }
 0x27f   : > { %v2475_v30 = vadd.f32 %v2470_v50, %v2420_v45  ;;  %v4632_v50 = vld [vmem:[%s6402_s11 + $0x90] sm:$0xff] }
 0x280   : > { %2990 = vmatpush.bf16.msrb.mxu3 %v4623_v23 }
 0x282   : > { %v2323_v20 = vpop.f32.mrf.mxu3 }
 0x283   : > { %v2365_v37 = vadd.f32 %v2364_v28, %v2323_v20  ;;  %v4622_v20 = vld [vmem:[%s6402_s11 + $0x40] sm:$0xff] }
 0x284   : > { %2991 = vmatpush.bf16.msrb.mxu3 %v4622_v20  ;;  %v4646_v28 = vld [vmem:[%s6400_s9] ss:$0 sm:$0xff] }
 0x285   : > { %v2421_v33 = vadd.f32 %v2417_v38, %v2365_v37  ;;  %v2472_v39 = vpop.f32.mrf.mxu2 }
 0x287   : > { %v2476_v7 = vadd.f32 %v2472_v39, %v2421_v33 }
 0x28a   : > { %v2525_v32 = vpop.f32.mrf.mxu3 }
 0x28b   : > { %v2530_v35 = vadd.f32 %v2525_v32, %v2475_v30  ;;  %v4647_v32 = vld [vmem:[%s6401_s10] ss:$0 sm:$0xff] }
 0x28d   : > { %v2536_v53 = vmul.f32 %v4644_v9, %v2530_v35  ;;  %v4631_v35 = vld [vmem:[%s6402_s11 + $0x88] sm:$0xff] }
 0x28f   : > { %v2542_v54 = vadd.f32 %v4645_v36, %v2536_v53  ;;  %v4630_v53 = vld [vmem:[%s6402_s11 + $0x80] sm:$0xff] }
 0x291   : > { %v2544_v2 = vmax.f32 %v2542_v54, 0.0 }
 0x292   : > { %v2527_v41 = vpop.f32.mrf.mxu3 }
 0x293   : > { %2549 = vst.msk [vmem:[#allocation3 + $0x2] sm:$0xff] %vm2254_vm1, %v2544_v2  ;;  %v2531_v42 = vadd.f32 %v2527_v41, %v2476_v7 }
 0x295   : > { %v2537_v18 = vmul.f32 %v4644_v9, %v2531_v42 }
 0x297   : > { %v2543_v59 = vadd.f32 %v4645_v36, %v2537_v18 }
 0x299   : > { %v2545_v43 = vmax.f32 %v2543_v59, 0.0 }
 0x29a   : > { %v2562_v44 = vld [vmem:[#allocation3 + $0x1] sm:$0xff] }
 0x29b   : > { %2550 = vst.msk [vmem:[#allocation3 + $0xa] sm:$0x3f] %vm2260_vm3, %v2545_v43  ;;  %v2551_v13 = vld [vmem:[#allocation3] sm:$0xff] }
 0x29c   : > { %v2656_v47 = vld [vmem:[#allocation3 + $0x2] sm:$0xff] }
 0x2a2   : > { %v2563_v10 = vld [vmem:[#allocation3 + $0x9] sm:$0x3f] }
 0x2a3   : > { %v2552_v49 = vld [vmem:[#allocation3 + $0x8] sm:$0x3f]  ;;  %v2564_v51 = vpack.c.bf16 %v2563_v10, %v2562_v44 }
 0x2a4   : > { %v2657_v55 = vld [vmem:[#allocation3 + $0xa] sm:$0x3f]  ;;  %v2553_v8 = vpack.c.bf16 %v2552_v49, %v2551_v13 }
 0x2a5   : > { %v2658_v17 = vpack.c.bf16 %v2657_v55, %v2656_v47  ;;  %v2711_v56 = vld [vmem:[#allocation3 + $0x3] sm:$0xff]  ;;  %v2712_v57 = vld [vmem:[#allocation3 + $0xb] sm:$0x3f]  ;;  %4161 = vmatmul.msk.bf16.vlgmr.msrb.gmra.mxu0 %vm2254_vm1, %v2564_v51 }
 0x2a6   : > { %v2713_v5 = vpack.c.bf16 %v2712_v57, %v2711_v56  ;;  %4178 = vmatmul.msk.bf16.vlgmr.msrb.gmra.mxu1 %vm2254_vm1, %v2553_v8  ;;  %v2766_v58 = vld [vmem:[#allocation3 + $0x4] sm:$0xff]  ;;  %v2767_v46 = vld [vmem:[#allocation3 + $0xc] sm:$0x3f]  ;;  %3043 = vmatpush.bf16.msrb.mxu0 %v4629_v62 }
 0x2a7   : > { %4203 = vmatmul.msk.bf16.vlgmr.msrb.gmra.mxu2 %vm2254_vm1, %v2658_v17  ;;  %v2768_v11 = vpack.c.bf16 %v2767_v46, %v2766_v58  ;;  %3098 = vmatpush.bf16.msrb.mxu1 %v4633_v26 }
 0x2a8   : > { %4228 = vmatmul.msk.bf16.vlgmr.msra.gmra.mxu3 %vm2254_vm1, %v2713_v5 }
 0x2aa   : > { %3044 = vmatpush.bf16.msrb.mxu0 %v4628_v1 }
 0x2ab   : > { %3099 = vmatpush.bf16.msrb.mxu1 %v4632_v50 }
 0x2ae   : > { %3045 = vmatpush.bf16.msrb.mxu0 %v4627_v14 }
 0x2af   : > { %3100 = vmatpush.bf16.msrb.mxu1 %v4631_v35 }
 0x2b2   : > { %3046 = vmatpush.bf16.msrb.mxu0 %v4626_v21 }
 0x2b3   : > { %3101 = vmatpush.bf16.msrb.mxu1 %v4630_v53 }
 0x2b5   : > { %4253 = vmatmul.msk.bf16.vlgmr.msra.gmra.mxu0 %vm2254_vm1, %v2768_v11 }
 0x322   : > { %v2610_v63 = vpop.f32.mrf.mxu0 }
 0x323   : > { %v2651_v3 = vpop.f32.mrf.mxu1 }
 0x324   : > { %v2652_v19 = vadd.f32 %v2651_v3, %v2610_v63 }
 0x32a   : > { %v2704_v52 = vpop.f32.mrf.mxu2  ;;  %v2612_v12 = vpop.f32.mrf.mxu0 }
 0x32b   : > { %v2709_v24 = vadd.f32 %v2704_v52, %v2652_v19  ;;  %v2759_v25 = vpop.f32.mrf.mxu3  ;;  %v2653_v45 = vpop.f32.mrf.mxu1 }
 0x32c   : > { %v2654_v37 = vadd.f32 %v2653_v45, %v2612_v12 }
 0x32d   : > { %v2764_v27 = vadd.f32 %v2759_v25, %v2709_v24 }
 0x332   : > { %v2706_v29 = vpop.f32.mrf.mxu2  ;;  %v2814_v30 = vpop.f32.mrf.mxu0 }
 0x333   : > { %v2819_v9 = vadd.f32 %v2814_v30, %v2764_v27  ;;  %v2710_v36 = vadd.f32 %v2706_v29, %v2654_v37  ;;  %v2761_v33 = vpop.f32.mrf.mxu3 }
 0x335   : > { %v2825_v38 = vmul.f32 %v4646_v28, %v2819_v9  ;;  %v2765_v54 = vadd.f32 %v2761_v33, %v2710_v36 }
 0x337   : > { %v2831_v31 = vadd.f32 %v4647_v32, %v2825_v38 }
 0x339   : > { %v2833_v39 = vmax.f32 %v2831_v31, 0.0 }
 0x33a   : > { %v2816_v40 = vpop.f32.mrf.mxu0 }
 0x33b   : > { %2838 = vst.msk [vmem:[#allocation2 + $0x2] sm:$0xff] %vm2254_vm1, %v2833_v39  ;;  %v2820_v7 = vadd.f32 %v2816_v40, %v2765_v54 }
 0x33d   : > { %v2826_v2 = vmul.f32 %v4646_v28, %v2820_v7 }
 0x33f   : > { %v2832_v41 = vadd.f32 %v4647_v32, %v2826_v2 }
 0x341   : > { %v2834_v42 = vmax.f32 %v2832_v41, 0.0 }
 0x342   : > { %v2851_v18 = vld [vmem:[#allocation2 + $0x1] sm:$0xff] }
 0x343   : > { %2839 = vst.msk [vmem:[#allocation2 + $0xa] sm:$0x3f] %vm2260_vm3, %v2834_v42  ;;  %v2840_v59 = vld [vmem:[#allocation2] sm:$0xff] }
 0x344   : > { %v2945_v43 = vld [vmem:[#allocation2 + $0x2] sm:$0xff] }
 0x34a   : > { %v2852_v44 = vld [vmem:[#allocation2 + $0x9] sm:$0xf] }
 0x34b   : > { %v2841_v13 = vld [vmem:[#allocation2 + $0x8] sm:$0xf]  ;;  %v2853_v10 = vpack.c.bf16 %v2852_v44, %v2851_v18  ;;  %v3056_v57 = vld [vmem:[#allocation2 + $0xc] sm:$0xf] }
 0x34c   : > { %v2946_v47 = vld [vmem:[#allocation2 + $0xa] sm:$0xf]  ;;  %v2842_v49 = vpack.c.bf16 %v2841_v13, %v2840_v59 }
 0x34d   : > { %v2947_v55 = vpack.c.bf16 %v2946_v47, %v2945_v43  ;;  %v3000_v51 = vld [vmem:[#allocation2 + $0x3] sm:$0xff]  ;;  %v3001_v8 = vld [vmem:[#allocation2 + $0xb] sm:$0xf]  ;;  %4278 = vmatmul.msk.bf16.vlgmr.msra.gmra.mxu1 %vm2254_vm1, %v2853_v10 }
 0x34e   : > { %v3002_v17 = vpack.c.bf16 %v3001_v8, %v3000_v51  ;;  %4295 = vmatmul.msk.bf16.vlgmr.msra.gmra.mxu2 %vm2254_vm1, %v2842_v49  ;;  %v3055_v56 = vld [vmem:[#allocation2 + $0x4] sm:$0xff] }
 0x34f   : > { %4320 = vmatmul.msk.bf16.vlgmr.msrb.gmra.mxu3 %vm2254_vm1, %v2947_v55  ;;  %v3057_v5 = vpack.c.bf16 %v3056_v57, %v3055_v56 }
 0x350   : > { %4345 = vmatmul.msk.bf16.vlgmr.msrb.gmra.mxu0 %vm2254_vm1, %v3002_v17 }
 0x35d   : > { %4370 = vmatmul.msk.bf16.vlgmr.msrb.gmra.mxu1 %vm2254_vm1, %v3057_v5 }
 0x3ca   : > { %v2899_v58 = vpop.f32.mrf.mxu1 }
 0x3cd   : > { %v3048_v62 = vpop.f32.mrf.mxu0 }
 0x3d1   : > { %v2940_v46 = vpop.f32.mrf.mxu2 }
 0x3d2   : > { %v2941_v11 = vadd.f32 %v2940_v46, %v2899_v58  ;;  %v2993_v60 = vpop.f32.mrf.mxu3  ;;  %v2901_v61 = vpop.f32.mrf.mxu1 }
 0x3d4   : > { %v2998_v34 = vadd.f32 %v2993_v60, %v2941_v11 }
 0x3d5   : > { %v3050_v12 = vpop.f32.mrf.mxu0 }
 0x3d6   : > { %v3053_v48 = vadd.f32 %v3048_v62, %v2998_v34 }
 0x3d9   : > { %v2942_v63 = vpop.f32.mrf.mxu2 }
 0x3da   : > { %v2943_v22 = vadd.f32 %v2942_v63, %v2901_v61  ;;  %v3103_v1 = vpop.f32.mrf.mxu1  ;;  %v2995_v6 = vpop.f32.mrf.mxu3 }
 0x3db   : > { %v3108_v3 = vadd.f32 %v3103_v1, %v3053_v48 }
 0x3dc   : > { %v2999_v23 = vadd.f32 %v2995_v6, %v2943_v22 }
 0x3dd   : > { %v3114_v14 = vmul.f32 %v4648_v0, %v3108_v3 }
 0x3de   : > { %v3054_v16 = vadd.f32 %v3050_v12, %v2999_v23 }
 0x3df   : > { %v3120_v52 = vadd.f32 %v4649_v4, %v3114_v14 }
 0x3e1   : > { %v3122_v15 = vmax.f32 %v3120_v52, 0.0 }
 0x3e2   : > { %v3105_v19 = vpop.f32.mrf.mxu1 }
 0x3e3   : > { %v3125_v20 = vsel %vm3124_vm4, %v3122_v15, -inf  ;;  %v3135_v21 = vsel %vm3134_vm5, %v3122_v15, -inf  ;;  %v3109_v24 = vadd.f32 %v3105_v19, %v3054_v16 }
 0x3e4   : > { %v3126_v25 = vrot.slane %v3125_v20, 4  ;;  %v3136_v26 = vrot.slane %v3135_v21, 4 }
 0x3e5   : > { %v3115_v45 = vmul.f32 %v4648_v0, %v3109_v24 }
 0x3e6   : > { %v3127_v50 = vmax.f32 %v3125_v20, %v3126_v25  ;;  %v3137_v27 = vmax.f32 %v3135_v21, %v3136_v26 }
 0x3e7   : > { %v3121_v28 = vadd.f32 %v4649_v4, %v3115_v45 }
 0x3e8   : > { %v3128_v29 = vrot.slane %v3127_v50, 2  ;;  %v3138_v30 = vrot.slane %v3137_v27, 2 }
 0x3e9   : > { %v3123_v37 = vmax.f32 %v3121_v28, 0.0 }
 0x3ea   : > { %v3129_v9 = vmax.f32 %v3127_v50, %v3128_v29  ;;  %v3139_v32 = vmax.f32 %v3137_v27, %v3138_v30 }
 0x3eb   : > { %v3143_v35 = vsel %vm3124_vm4, %v3123_v37, -inf }
 0x3ec   : > { %v3130_v36 = vrot.slane %v3129_v9, 1  ;;  %v3140_v38 = vrot.slane %v3139_v32, 1  ;;  %v3144_v31 = vrot.slane %v3143_v35, 4 }
 0x3ee   : > { %v3131_v33 = vmax.f32 %v3129_v9, %v3130_v36  ;;  %v3141_v53 = vmax.f32 %v3139_v32, %v3140_v38  ;;  %v3145_v54 = vmax.f32 %v3143_v35, %v3144_v31 }
 0x3f0   : > { %3133 = vst.msk [vmem:[%s465_s24] sm:$0x1] %vm3132_vm6, %v3131_v33  ;;  %v3146_v39 = vrot.slane %v3145_v54, 2 }
 0x3f1   : > { %3142 = vst.msk [vmem:[%s465_s24 + $0x1] sm:$0x1] %vm3132_vm6, %v3141_v53 }
 0x3f2   : > { %v3147_v40 = vmax.f32 %v3145_v54, %v3146_v39 }
 0x3f4   : > { %v3148_v7 = vrot.slane %v3147_v40, 1 }
 0x3f6   : > { %v3149_v2 = vmax.f32 %v3147_v40, %v3148_v7 }
 0x3f8   : > { %3150 = vst.msk [vmem:[%s465_s24 + $0x2] sm:$0x1] %vm3132_vm6, %v3149_v2 }
 0x3f9 PF: > { %s24_s29 = sadd.s32 1, %s4656_s29  }
 0x3fa   : > { %p21_p4 = scmp.ge.s32.totalorder %s24_s29, 40  }
 0x3fc   :  { %23 = sbr.rel (!%p21_p4) target bundleno = 1 (0x1), region = 118 }

// kernel: feature_net_forward.3
= control target key start
LH: loop header
LB: loop body
LE: loop exit
PB: predicated region body
PF: predicated region fallthrough
CT: control target
= control target key end

     0   :  { %s4612_s29 = smov 0   ;;  %s6155_s0 = inlined_call_operand.vmem [shape: f32[38,63,96], index: 0, kind: input, shape index: {}]   ;;  %s6156_s1 = inlined_call_operand.vmem [shape: bf16[96,512], index: 1, kind: input, shape index: {}]   ;;  %s6157_s2 = inlined_call_operand.vmem [shape: bf16[96,512], index: 2, kind: input, shape index: {}]   ;;  %s6158_s3 = inlined_call_operand.vmem [shape: f32[1,512], index: 3, kind: input, shape index: {}]   ;;  %s6159_s4 = inlined_call_operand.vmem [shape: f32[1,512], index: 4, kind: input, shape index: {}]   ;;  %s6160_s5 = inlined_call_operand.vmem [shape: bf16[7,32,64], index: 5, kind: input, shape index: {}]   ;;  %s6161_s6 = inlined_call_operand.vmem [shape: f32[1,64], index: 6, kind: input, shape index: {}]   ;;  %s6162_s7 = inlined_call_operand.vmem [shape: f32[1,64], index: 7, kind: input, shape index: {}]   ;;  %s6163_s8 = inlined_call_operand.vmem [shape: bf16[7,64,64], index: 8, kind: input, shape index: {}]   ;;  %s6164_s9 = inlined_call_operand.vmem [shape: f32[1,64], index: 9, kind: input, shape index: {}]   ;;  %s6165_s10 = inlined_call_operand.vmem [shape: f32[1,64], index: 10, kind: input, shape index: {}]   ;;  %s6166_s11 = inlined_call_operand.vmem [shape: bf16[7,64,64], index: 11, kind: input, shape index: {}]   ;;  %s6167_s12 = inlined_call_operand.vmem [shape: f32[1,64], index: 12, kind: input, shape index: {}]   ;;  %s6168_s13 = inlined_call_operand.vmem [shape: f32[1,64], index: 13, kind: input, shape index: {}]   ;;  %s6169_s14 = inlined_call_operand.vmem [shape: f32[38,7,64], index: 14, kind: output, shape index: {}]  }
   0x1 LB: > { %s3660_s30 = sadd.s32 4294967295, %s4531_s29   ;;  %p3664_p0 = scmp.ge.s32.totalorder %s4531_s29, 1  ;;  %s4531_s29 = sphi %s4612_s29, %s24_s29  }
   0x2   : > { %p412_p1 = scmp.lt.s32.totalorder %s4531_s29, 39 }
   0x4   : > { %p413_p2 = pnand %p3664_p0, %p412_p1 }
   0x5   : > { %p457_p3 = scmp.lt.s32.totalorder (!%p413_p2), %s3660_s30, 37  ;;  %s4533_s19 = smov (!%p413_p2), 32  }
   0x6   : > { %416 = sbr.rel (%p413_p2) target bundleno = 1280 (0x500), region = 76  ;;  %s4534_s20 = smov (!%p413_p2), 64  }
   0x7   : > { %s4535_s21 = smov (!%p413_p2), 96  }
   0xb   : > { %v3750_v0 = vld [vmem:[%s6157_s2 + $0xa0] sm:$0xf]  ;;  %v4425_v1 = vld [vmem:[%s6157_s2 + $0xac] sm:$0xf0]  ;;  %v3758_v2 = vld [vmem:[%s6157_s2 + $0xa8] sm:$0xf] }
   0xc   : > { %v3751_v3 = vor.u32 %v4425_v1, %v3750_v0  ;;  %v4426_v4 = vld [vmem:[%s6157_s2 + $0xb4] sm:$0xf0]  ;;  %v4424_v5 = vld [vmem:[%s6157_s2 + $0xac] sm:$0xf]  ;;  %v3760_v6 = vld [vmem:[%s6157_s2 + $0xb8] sm:$0xf0] }
   0xd   : > { %v3759_v7 = vor.u32 %v4426_v4, %v3758_v2  ;;  %v3763_v8 = vor.u32 %v4424_v5, %v3760_v6  ;;  %v3734_v9 = vld [vmem:[%s6157_s2 + $0x80] sm:$0xf]  ;;  %v4421_v10 = vld [vmem:[%s6157_s2 + $0x8c] sm:$0xf0]  ;;  %v3742_v11 = vld [vmem:[%s6157_s2 + $0x88] sm:$0xf] }
   0xe   : > { %694 = vmatpush.bf16.msra.mxu0 %v3751_v3  ;;  %4497 = vmatpush.bf16.msra.mxu1 %v3751_v3  ;;  %v3735_v12 = vor.u32 %v4421_v10, %v3734_v9  ;;  %v4422_v13 = vld [vmem:[%s6157_s2 + $0x94] sm:$0xf0]  ;;  %v4420_v14 = vld [vmem:[%s6157_s2 + $0x8c] sm:$0xf]  ;;  %v3744_v15 = vld [vmem:[%s6157_s2 + $0x98] sm:$0xf0] }
   0xf   : > { %752 = vmatpush.bf16.msra.mxu2 %v3759_v7  ;;  %781 = vmatpush.bf16.msra.mxu3 %v3763_v8  ;;  %v3743_v16 = vor.u32 %v4422_v13, %v3742_v11  ;;  %v3747_v17 = vor.u32 %v4420_v14, %v3744_v15  ;;  %v3718_v18 = vld [vmem:[%s6157_s2 + $0x60] sm:$0xf]  ;;  %v4417_v19 = vld [vmem:[%s6157_s2 + $0x6c] sm:$0xf0]  ;;  %v3726_v20 = vld [vmem:[%s6157_s2 + $0x68] sm:$0xf] }
  0x10   : > { %v4418_v21 = vld [vmem:[%s6157_s2 + $0x74] sm:$0xf0]  ;;  %v4416_v22 = vld [vmem:[%s6157_s2 + $0x6c] sm:$0xf]  ;;  %v3728_v23 = vld [vmem:[%s6157_s2 + $0x78] sm:$0xf0]  ;;  %v3719_v24 = vor.u32 %v4417_v19, %v3718_v18 }
  0x11   : > { %v3727_v25 = vor.u32 %v4418_v21, %v3726_v20  ;;  %v3731_v26 = vor.u32 %v4416_v22, %v3728_v23  ;;  %v3702_v27 = vld [vmem:[%s6157_s2 + $0x40] sm:$0xf]  ;;  %v4413_v28 = vld [vmem:[%s6157_s2 + $0x4c] sm:$0xf0]  ;;  %v3710_v29 = vld [vmem:[%s6157_s2 + $0x48] sm:$0xf] }
  0x12   : > { %695 = vmatpush.bf16.msra.mxu0 %v3735_v12  ;;  %4498 = vmatpush.bf16.msra.mxu1 %v3735_v12  ;;  %v4414_v30 = vld [vmem:[%s6157_s2 + $0x54] sm:$0xf0]  ;;  %v4412_v31 = vld [vmem:[%s6157_s2 + $0x4c] sm:$0xf]  ;;  %v3712_v32 = vld [vmem:[%s6157_s2 + $0x58] sm:$0xf0]  ;;  %v3703_v34 = vor.u32 %v4413_v28, %v3702_v27 }
  0x13   : > { %753 = vmatpush.bf16.msra.mxu2 %v3743_v16  ;;  %782 = vmatpush.bf16.msra.mxu3 %v3747_v17  ;;  %v3686_v33 = vld [vmem:[%s6157_s2 + $0x20] sm:$0xf]  ;;  %v4409_v35 = vld [vmem:[%s6157_s2 + $0x2c] sm:$0xf0]  ;;  %v3694_v36 = vld [vmem:[%s6157_s2 + $0x28] sm:$0xf]  ;;  %v3711_v38 = vor.u32 %v4414_v30, %v3710_v29  ;;  %v3715_v39 = vor.u32 %v4412_v31, %v3712_v32 }
  0x14   : > { %v4410_v37 = vld [vmem:[%s6157_s2 + $0x34] sm:$0xf0]  ;;  %v4408_v40 = vld [vmem:[%s6157_s2 + $0x2c] sm:$0xf]  ;;  %v3696_v41 = vld [vmem:[%s6157_s2 + $0x38] sm:$0xf0]  ;;  %v3687_v48 = vor.u32 %v4409_v35, %v3686_v33 }
  0x15   : > { %v3670_v42 = vld [vmem:[%s6157_s2] sm:$0xf]  ;;  %v4405_v43 = vld [vmem:[%s6157_s2 + $0xc] sm:$0xf0]  ;;  %v3678_v44 = vld [vmem:[%s6157_s2 + $0x8] sm:$0xf]  ;;  %v3695_v52 = vor.u32 %v4410_v37, %v3694_v36  ;;  %v3699_v53 = vor.u32 %v4408_v40, %v3696_v41 }
  0x16   : > { %696 = vmatpush.bf16.msra.mxu0 %v3719_v24  ;;  %4499 = vmatpush.bf16.msra.mxu1 %v3719_v24  ;;  %v4406_v45 = vld [vmem:[%s6157_s2 + $0x14] sm:$0xf0]  ;;  %v4404_v46 = vld [vmem:[%s6157_s2 + $0xc] sm:$0xf]  ;;  %v3680_v47 = vld [vmem:[%s6157_s2 + $0x18] sm:$0xf0]  ;;  %v3671_v59 = vor.u32 %v4405_v43, %v3670_v42 }
  0x17   : > { %754 = vmatpush.bf16.msra.mxu2 %v3727_v25  ;;  %783 = vmatpush.bf16.msra.mxu3 %v3731_v26  ;;  %s6171_s30 = smov (!%p457_p3, %s3660_s30), 37  ;;  %v3870_v49 = vld [vmem:[%s6156_s1 + $0xa8] sm:$0xf]  ;;  %v4402_v50 = vld [vmem:[%s6156_s1 + $0xb4] sm:$0xf0]  ;;  %v3679_v60 = vor.u32 %v4406_v45, %v3678_v44  ;;  %v3683_v0 = vor.u32 %v4404_v46, %v3680_v47  ;;  %vm679_vm1 = vcmask 785408  }
  0x18   : > { %v3862_v51 = vld [vmem:[%s6156_s1 + $0xa0] sm:$0xf]  ;;  %s4378_s23 = sshll.u32 %s6171_s30, 6  ;;  %v4401_v54 = vld [vmem:[%s6156_s1 + $0xac] sm:$0xf0]  ;;  %v3871_v5 = vor.u32 %v4402_v50, %v3870_v49  ;;  %vm1608_vm2 = vcmask 261120  }
  0x19   : > { %v4400_v55 = vld [vmem:[%s6156_s1 + $0xac] sm:$0xf]  ;;  %s461_s16 = scalar_lea.vmem %s6155_s0, %s4378_s23  ;;  %v3872_v56 = vld [vmem:[%s6156_s1 + $0xb8] sm:$0xf0]  ;;  %v4423_v57 = vld [vmem:[%s6157_s2 + $0xa4] sm:$0xf]  ;;  %v3863_v10 = vor.u32 %v4401_v54, %v3862_v51 }
  0x1a   : > { %697 = vmatpush.bf16.msra.mxu0 %v3703_v34  ;;  %4500 = vmatpush.bf16.msra.mxu1 %v3703_v34  ;;  %v3752_v58 = vld [vmem:[%s6157_s2 + $0xb0] sm:$0xf0]  ;;  %v467_v61 = vld [vmem:[%s461_s16] sm:$0xff]  ;;  %v468_v62 = vld [vmem:[%s461_s16 + $0x8] sm:$0xff]  ;;  %vm527_vm0 = vsmask.f32 7424  ;;  %v3875_v14 = vor.u32 %v4400_v55, %v3872_v56 }
  0x1b   : > { %755 = vmatpush.bf16.msra.mxu2 %v3711_v38  ;;  %784 = vmatpush.bf16.msra.mxu3 %v3715_v39  ;;  %v469_v63 = vld [vmem:[%s461_s16 + $0x10] sm:$0xff]  ;;  %v470_v1 = vld [vmem:[%s461_s16 + $0x18] sm:$0xff]  ;;  %v4762_v2 = vpack.c.bf16 %v468_v62, %v467_v61  ;;  %v471_v3 = vld [vmem:[%s461_s16 + $0x20] sm:$0xff]  ;;  %v3755_v21 = vor.u32 %v4423_v57, %v3752_v58  ;;  %vm1617_vm3 = vcmask 257024   ;;  %vm1626_vm4 = vcmask 259072  }
  0x1c   : > { %v472_v4 = vld [vmem:[%s461_s16 + $0x28] sm:$0xff]  ;;  %v4764_v6 = vpack.c.bf16 %v470_v1, %v469_v63  ;;  %v473_v7 = vld [vmem:[%s461_s16 + $0x30] sm:$0xff]  ;;  %v474_v8 = vld [vmem:[%s461_s16 + $0x38] sm:$0x7f]  ;;  %vm2189_vm5 = vcmask 523264   ;;  %vm2198_vm6 = vcmask 519168  }
  0x1d   : > { %v4766_v9 = vpack.c.bf16 %v472_v4, %v471_v3  ;;  %v529_v11 = vshrl.u32 %v4762_v2, 16  ;;  %v531_v12 = vshll.u32 %v4762_v2, 16  ;;  %v4770_v13 = vpack.c.bf16 %v474_v8, %v473_v7  ;;  %v3854_v15 = vld [vmem:[%s6156_s1 + $0x88] sm:$0xf]  ;;  %v4398_v16 = vld [vmem:[%s6156_s1 + $0x94] sm:$0xf0] }
  0x1e   : > { %698 = vmatpush.bf16.msra.mxu0 %v3687_v48  ;;  %4501 = vmatpush.bf16.msra.mxu1 %v3687_v48  ;;  %v3846_v17 = vld [vmem:[%s6156_s1 + $0x80] sm:$0xf]  ;;  %v536_v18 = vshll.u32 %v4764_v6, 16  ;;  %v4397_v22 = vld [vmem:[%s6156_s1 + $0x8c] sm:$0xf0]  ;;  %v3855_v34 = vor.u32 %v4398_v16, %v3854_v15  ;;  %v540_v46 = vshrl.u32 %v4764_v6, 16 }
  0x1f   : > { %756 = vmatpush.bf16.msra.mxu2 %v3695_v52  ;;  %785 = vmatpush.bf16.msra.mxu3 %v3699_v53  ;;  %v544_v19 = vshll.u32 %v4766_v9, 16  ;;  %v548_v20 = vshrl.u32 %v4766_v9, 16  ;;  %v533_v23 = vrot.slane %v531_v12, 1  ;;  %v552_v24 = vshll.u32 %v4770_v13, 16  ;;  %v4419_v25 = vld [vmem:[%s6157_s2 + $0x84] sm:$0xf] }
  0x20   : > { %v3736_v26 = vld [vmem:[%s6157_s2 + $0x90] sm:$0xf0]  ;;  %v538_v27 = vrot.slane %v536_v18, 1  ;;  %v4396_v29 = vld [vmem:[%s6156_s1 + $0x8c] sm:$0xf]  ;;  %v3847_v35 = vor.u32 %v4397_v22, %v3846_v17  ;;  %vm2207_vm7 = vcmask 521216  }
  0x21   : > { %v4794_v28 = vrot.slane %v544_v19, 1  ;;  %v3856_v30 = vld [vmem:[%s6156_s1 + $0x98] sm:$0xf0]  ;;  %v534_v31 = vor.u32 %v533_v23, %v529_v11  ;;  %v4802_v32 = vrot.slane %v552_v24, 1  ;;  %v3830_v36 = vld [vmem:[%s6156_s1 + $0x60] sm:$0xf]  ;;  %v3739_v38 = vor.u32 %v4419_v25, %v3736_v26 }
  0x22   : > { %699 = vmatpush.bf16.msra.mxu0 %v3671_v59  ;;  %4502 = vmatpush.bf16.msra.mxu1 %v3671_v59  ;;  %v4393_v39 = vld [vmem:[%s6156_s1 + $0x6c] sm:$0xf0]  ;;  %v3859_v40 = vor.u32 %v4396_v29, %v3856_v30  ;;  %v3838_v41 = vld [vmem:[%s6156_s1 + $0x68] sm:$0xf]  ;;  %v4394_v42 = vld [vmem:[%s6156_s1 + $0x74] sm:$0xf0] }
  0x23   : > { %757 = vmatpush.bf16.msra.mxu2 %v3679_v60  ;;  %786 = vmatpush.bf16.msra.mxu3 %v3683_v0  ;;  %v550_v33 = vor.u32 %v548_v20, %v4794_v28  ;;  %v4809_v37 = vsel %vm527_vm0, %v534_v31, %v538_v27  ;;  %v4415_v44 = vld [vmem:[%s6157_s2 + $0x64] sm:$0xf]  ;;  %v3720_v45 = vld [vmem:[%s6157_s2 + $0x70] sm:$0xf0]  ;;  %v4392_v47 = vld [vmem:[%s6156_s1 + $0x6c] sm:$0xf]  ;;  %v3831_v48 = vor.u32 %v4393_v39, %v3830_v36 }
  0x24   : > { %v4411_v49 = vld [vmem:[%s6157_s2 + $0x44] sm:$0xf]  ;;  %v3704_v50 = vld [vmem:[%s6157_s2 + $0x50] sm:$0xf0]  ;;  %v3814_v51 = vld [vmem:[%s6156_s1 + $0x40] sm:$0xf]  ;;  %v3839_v53 = vor.u32 %v4394_v42, %v3838_v41  ;;  %v3723_v55 = vor.u32 %v4415_v44, %v3720_v45 }
  0x25   : > { %3764 = vmatmul.msk.bf16.vlgmr.msra.gmra.mxu0 %vm679_vm1, %v4809_v37  ;;  %v4824_v43 = vsel %vm527_vm0, %v550_v33, %v4802_v32  ;;  %v4389_v52 = vld [vmem:[%s6156_s1 + $0x4c] sm:$0xf0]  ;;  %v3840_v54 = vld [vmem:[%s6156_s1 + $0x78] sm:$0xf0]  ;;  %v3822_v57 = vld [vmem:[%s6156_s1 + $0x48] sm:$0xf]  ;;  %v3707_v0 = vor.u32 %v4411_v49, %v3704_v50 }
  0x26   : > { %938 = vmatpush.bf16.msrb.mxu0 %v3863_v10  ;;  %723 = vmatpush.bf16.msrb.mxu1 %v3755_v21  ;;  %v3843_v56 = vor.u32 %v4392_v47, %v3840_v54  ;;  %v4390_v58 = vld [vmem:[%s6156_s1 + $0x54] sm:$0xf0]  ;;  %v4388_v59 = vld [vmem:[%s6156_s1 + $0x4c] sm:$0xf]  ;;  %v3824_v60 = vld [vmem:[%s6156_s1 + $0x58] sm:$0xf0]  ;;  %v3815_v61 = vor.u32 %v4389_v52, %v3814_v51  ;;  %v542_v10 = vor.u32 %v540_v46, %v538_v27 }
  0x27   : > { %996 = vmatpush.bf16.msrb.mxu2 %v3871_v5  ;;  %1025 = vmatpush.bf16.msrb.mxu3 %v3875_v14  ;;  %v3798_v62 = vld [vmem:[%s6156_s1 + $0x20] sm:$0xf]  ;;  %v3823_v63 = vor.u32 %v4390_v58, %v3822_v57  ;;  %v4385_v1 = vld [vmem:[%s6156_s1 + $0x2c] sm:$0xf0]  ;;  %v3827_v3 = vor.u32 %v4388_v59, %v3824_v60  ;;  %v3806_v4 = vld [vmem:[%s6156_s1 + $0x28] sm:$0xf] }
  0x28   : > { %3772 = vmatmul.msk.bf16.vlgmr.msra.gmra.mxu2 %vm679_vm1, %v4809_v37  ;;  %3766 = vmatmul.msk.bf16.vlgmr.msra.gmra.mxu1 %vm679_vm1, %v4824_v43  ;;  %v4386_v5 = vld [vmem:[%s6156_s1 + $0x34] sm:$0xf0]  ;;  %v4407_v7 = vld [vmem:[%s6157_s2 + $0x24] sm:$0xf]  ;;  %v3688_v8 = vld [vmem:[%s6157_s2 + $0x30] sm:$0xf0]  ;;  %v3799_v12 = vor.u32 %v4385_v1, %v3798_v62  ;;  %v547_v20 = vsel %vm527_vm0, %v542_v10, %v4794_v28 }
  0x29   : > { %3776 = vmatmul.msk.bf16.vlgmr.msra.gmra.mxu3 %vm679_vm1, %v4809_v37  ;;  %v556_v11 = vshrl.u32 %v4770_v13, 16  ;;  %v3807_v14 = vor.u32 %v4386_v5, %v3806_v4  ;;  %v3691_v15 = vor.u32 %v4407_v7, %v3688_v8  ;;  %v3782_v16 = vld [vmem:[%s6156_s1] sm:$0xf]  ;;  %v4381_v17 = vld [vmem:[%s6156_s1 + $0xc] sm:$0xf0]  ;;  %vm3557_vm8 = vcmask 516096  }
  0x2a   : > { %939 = vmatpush.bf16.msrb.mxu0 %v3847_v35  ;;  %724 = vmatpush.bf16.msrb.mxu1 %v3739_v38  ;;  %v4403_v18 = vld [vmem:[%s6157_s2 + $0x4] sm:$0xf]  ;;  %v3672_v19 = vld [vmem:[%s6157_s2 + $0x10] sm:$0xf0]  ;;  %v3783_v22 = vor.u32 %v4381_v17, %v3782_v16  ;;  %v4384_v24 = vld [vmem:[%s6156_s1 + $0x2c] sm:$0xf] }
  0x2b   : > { %997 = vmatpush.bf16.msrb.mxu2 %v3855_v34  ;;  %1026 = vmatpush.bf16.msrb.mxu3 %v3859_v40  ;;  %v558_v21 = vor.u32 %v556_v11, %v4802_v32  ;;  %v3675_v23 = vor.u32 %v4403_v18, %v3672_v19  ;;  %v3808_v25 = vld [vmem:[%s6156_s1 + $0x38] sm:$0xf0]  ;;  %v3790_v26 = vld [vmem:[%s6156_s1 + $0x8] sm:$0xf]  ;;  %v4382_v28 = vld [vmem:[%s6156_s1 + $0x14] sm:$0xf0] }
  0x2c   : > { %v3811_v27 = vor.u32 %v4384_v24, %v3808_v25  ;;  %v4380_v29 = vld [vmem:[%s6156_s1 + $0xc] sm:$0xf]  ;;  %v3792_v30 = vld [vmem:[%s6156_s1 + $0x18] sm:$0xf0]  ;;  %v3791_v31 = vor.u32 %v4382_v28, %v3790_v26  ;;  %v4399_v32 = vld [vmem:[%s6156_s1 + $0xa4] sm:$0xf] }
  0x2d   : > { %v3864_v33 = vld [vmem:[%s6156_s1 + $0xb0] sm:$0xf0]  ;;  %v3795_v34 = vor.u32 %v4380_v29, %v3792_v30  ;;  %v4395_v36 = vld [vmem:[%s6156_s1 + $0x84] sm:$0xf]  ;;  %v5028_v62 = vld [vmem:[%s6158_s3] sm:$0xf] }
  0x2e   : > { %940 = vmatpush.bf16.msrb.mxu0 %v3831_v48  ;;  %725 = vmatpush.bf16.msrb.mxu1 %v3723_v55  ;;  %v3867_v35 = vor.u32 %v4399_v32, %v3864_v33  ;;  %v3848_v38 = vld [vmem:[%s6156_s1 + $0x90] sm:$0xf0]  ;;  %v4391_v40 = vld [vmem:[%s6156_s1 + $0x64] sm:$0xf]  ;;  %v5040_v1 = vperm.slane %v5028_v62, 0 }
  0x2f   : > { %998 = vmatpush.bf16.msrb.mxu2 %v3839_v53  ;;  %1027 = vmatpush.bf16.msrb.mxu3 %v3843_v56  ;;  %v3851_v39 = vor.u32 %v4395_v36, %v3848_v38  ;;  %v4387_v42 = vld [vmem:[%s6156_s1 + $0x44] sm:$0xf]  ;;  %v3816_v44 = vld [vmem:[%s6156_s1 + $0x50] sm:$0xf0] }
  0x30   : > { %v3819_v45 = vor.u32 %v4387_v42, %v3816_v44  ;;  %v4383_v46 = vld [vmem:[%s6156_s1 + $0x24] sm:$0xf]  ;;  %v3800_v47 = vld [vmem:[%s6156_s1 + $0x30] sm:$0xf0] }
  0x31   : > { %v3803_v48 = vor.u32 %v4383_v46, %v3800_v47  ;;  %v4379_v49 = vld [vmem:[%s6156_s1 + $0x4] sm:$0xf]  ;;  %v3784_v50 = vld [vmem:[%s6156_s1 + $0x10] sm:$0xf0] }
  0x32   : > { %941 = vmatpush.bf16.msrb.mxu0 %v3815_v61  ;;  %726 = vmatpush.bf16.msrb.mxu1 %v3707_v0  ;;  %v3787_v51 = vor.u32 %v4379_v49, %v3784_v50  ;;  %v5035_v0 = vld [vmem:[%s6159_s4] sm:$0xf] }
  0x33   : > { %999 = vmatpush.bf16.msrb.mxu2 %v3823_v63  ;;  %1028 = vmatpush.bf16.msrb.mxu3 %v3827_v3  ;;  %v5045_v7 = vperm.slane %v5035_v0, 0 }
  0x35   : > { %3765 = vmatmul.msk.bf16.gmra.mxu0 %vm679_vm1, %v547_v20 }
  0x36   : > { %942 = vmatpush.bf16.msrb.mxu0 %v3799_v12  ;;  %727 = vmatpush.bf16.msrb.mxu1 %v3691_v15 }
  0x37   : > { %1000 = vmatpush.bf16.msrb.mxu2 %v3807_v14  ;;  %1029 = vmatpush.bf16.msrb.mxu3 %v3811_v27 }
  0x38   : > { %3773 = vmatmul.msk.bf16.gmra.mxu2 %vm679_vm1, %v547_v20  ;;  %3767 = vmatmul.msk.bf16.gmra.mxu1 %vm679_vm1, %v558_v21 }
  0x39   : > { %3777 = vmatmul.msk.bf16.gmra.mxu3 %vm679_vm1, %v547_v20 }
  0x3a   : > { %943 = vmatpush.bf16.msrb.mxu0 %v3783_v22  ;;  %728 = vmatpush.bf16.msrb.mxu1 %v3675_v23 }
  0x3b   : > { %1001 = vmatpush.bf16.msrb.mxu2 %v3791_v31  ;;  %1030 = vmatpush.bf16.msrb.mxu3 %v3795_v34 }
  0x3e   : > { %967 = vmatpush.bf16.msra.mxu1 %v3867_v35 }
  0x42   : > { %968 = vmatpush.bf16.msra.mxu1 %v3851_v39 }
  0x45   : > { %3876 = vmatmul.msk.bf16.vlgmr.msrb.gmra.mxu0 %vm679_vm1, %v4762_v2 }
  0x48   : > { %3774 = vmatmul.msk.bf16.gmra.mxu2 %vm679_vm1, %v4824_v43  ;;  %3768 = vmatmul.msk.bf16.vlgmr.msrb.gmra.mxu1 %vm679_vm1, %v4809_v37  ;;  %v3832_v37 = vld [vmem:[%s6156_s1 + $0x70] sm:$0xf0] }
  0x49   : > { %3778 = vmatmul.msk.bf16.gmra.mxu3 %vm679_vm1, %v4824_v43  ;;  %v3835_v41 = vor.u32 %v4391_v40, %v3832_v37 }
  0x4b   : > { %969 = vmatpush.bf16.msra.mxu1 %v3835_v41 }
  0x4f   : > { %970 = vmatpush.bf16.msra.mxu1 %v3819_v45  ;;  %v5117_v45 = vperm.slane %v5028_v62, 2 }
  0x53   : > { %971 = vmatpush.bf16.msra.mxu1 %v3803_v48  ;;  %v5121_v48 = vperm.slane %v5035_v0, 2 }
  0x55   : > { %3877 = vmatmul.msk.bf16.gmra.mxu0 %vm679_vm1, %v4764_v6 }
  0x57   : > { %972 = vmatpush.bf16.msra.mxu1 %v3787_v51 }
  0x58   : > { %3775 = vmatmul.msk.bf16.gmra.mxu2 %vm679_vm1, %v558_v21  ;;  %3769 = vmatmul.msk.bf16.gmra.mxu1 %vm679_vm1, %v547_v20 }
  0x59   : > { %3779 = vmatmul.msk.bf16.gmra.mxu3 %vm679_vm1, %v558_v21 }
  0x65   : > { %3878 = vmatmul.msk.bf16.gmra.mxu0 %vm679_vm1, %v4766_v9 }
  0x68   : > { %3884 = vmatmul.msk.bf16.vlgmr.msrb.gmra.mxu2 %vm679_vm1, %v4762_v2  ;;  %3770 = vmatmul.msk.bf16.gmra.mxu1 %vm679_vm1, %v4824_v43 }
  0x69   : > { %3888 = vmatmul.msk.bf16.vlgmr.msrb.gmra.mxu3 %vm679_vm1, %v4762_v2 }
  0x75   : > { %3879 = vmatmul.msk.bf16.gmra.mxu0 %vm679_vm1, %v4770_v13 }
  0x78   : > { %3885 = vmatmul.msk.bf16.gmra.mxu2 %vm679_vm1, %v4764_v6  ;;  %3771 = vmatmul.msk.bf16.gmra.mxu1 %vm679_vm1, %v558_v21 }
  0x79   : > { %3889 = vmatmul.msk.bf16.gmra.mxu3 %vm679_vm1, %v4764_v6 }
  0x88   : > { %3886 = vmatmul.msk.bf16.gmra.mxu2 %vm679_vm1, %v4766_v9  ;;  %3880 = vmatmul.msk.bf16.vlgmr.msra.gmra.mxu1 %vm679_vm1, %v4762_v2 }
  0x89   : > { %3890 = vmatmul.msk.bf16.gmra.mxu3 %vm679_vm1, %v4766_v9 }
  0x98   : > { %3887 = vmatmul.msk.bf16.gmra.mxu2 %vm679_vm1, %v4770_v13  ;;  %3881 = vmatmul.msk.bf16.gmra.mxu1 %vm679_vm1, %v4764_v6 }
  0x99   : > { %3891 = vmatmul.msk.bf16.gmra.mxu3 %vm679_vm1, %v4770_v13 }
  0xa2   : > { %v701_v43 = vpop.f32.mrf.mxu0 }
  0xa5   : > { %v5001_v52 = vpop.f32.mrf.mxu1 }
  0xa8   : > { %3882 = vmatmul.msk.bf16.gmra.mxu1 %vm679_vm1, %v4766_v9 }
  0xaa   : > { %v703_v54 = vpop.f32.mrf.mxu0 }
  0xab   : > { %v5005_v53 = vpop.f32.mrf.mxu2 }
  0xac   : > { %v5007_v2 = vpop.f32.mrf.mxu3 }
  0xad   : > { %v5009_v55 = vpop.f32.mrf.mxu1 }
  0xb2   : > { %v706_v6 = vpop.f32.mrf.mxu0 }
  0xb3   : > { %v5011_v56 = vpop.f32.mrf.mxu2 }
  0xb4   : > { %v5013_v57 = vpop.f32.mrf.mxu3 }
  0xb5   : > { %v5015_v58 = vpop.f32.mrf.mxu1 }
  0xb8   : > { %3883 = vmatmul.msk.bf16.gmra.mxu1 %vm679_vm1, %v4770_v13 }
  0xba   : > { %v708_v60 = vpop.f32.mrf.mxu0 }
  0xbb   : > { %v5019_v59 = vpop.f32.mrf.mxu2 }
  0xbc   : > { %v5021_v9 = vpop.f32.mrf.mxu3 }
  0xbd   : > { %v5023_v61 = vpop.f32.mrf.mxu1 }
  0xc2   : > { %v945_v3 = vpop.f32.mrf.mxu0 }
  0xc3   : > { %v5030_v63 = vpop.f32.mrf.mxu2  ;;  %v946_v5 = vadd.f32 %v945_v3, %v701_v43  ;;  %v5135_v3 = vperm.slane %v5035_v0, 3 }
  0xc4   : > { %v5037_v13 = vpop.f32.mrf.mxu3 }
  0xc5   : > { %v5042_v4 = vpop.f32.mrf.mxu1  ;;  %v1062_v8 = vmul.f32 %v5040_v1, %v946_v5 }
  0xc7   : > { %v1104_v10 = vadd.f32 %v5045_v7, %v1062_v8 }
  0xc9   : > { %v5051_v12 = vmax.f32 %v1104_v10, 0.0 }
  0xca   : > { %v947_v15 = vpop.f32.mrf.mxu0 }
  0xcb   : > { %v5049_v11 = vpop.f32.mrf.mxu2  ;;  %v948_v17 = vadd.f32 %v947_v15, %v703_v54  ;;  %1240 = vrot.lane.b32.xlu1 %v5051_v12, %s4533_s19  ;;  %1208 = vrot.lane.b32.xlu2 %v5051_v12, %s4534_s20 }
  0xcc   : > { %v5053_v14 = vpop.f32.mrf.mxu3  ;;  %1176 = vrot.lane.b32.xlu0 %v5051_v12, %s4535_s21 }
  0xcd   : > { %v5055_v16 = vpop.f32.mrf.mxu1  ;;  %v1066_v18 = vmul.f32 %v5040_v1, %v948_v17 }
  0xcf   : > { %v1108_v19 = vadd.f32 %v5045_v7, %v1066_v18 }
  0xd1   : > { %v5067_v21 = vmax.f32 %v1108_v19, 0.0 }
  0xd2   : > { %v950_v23 = vpop.f32.mrf.mxu0 }
  0xd3   : > { %v5065_v20 = vpop.f32.mrf.mxu2  ;;  %v951_v25 = vadd.f32 %v950_v23, %v706_v6  ;;  %1178 = vrot.lane.b32.xlu1 %v5067_v21, %s4535_s21  ;;  %1242 = vrot.lane.b32.xlu2 %v5067_v21, %s4533_s19 }
  0xd4   : > { %v5069_v22 = vpop.f32.mrf.mxu3  ;;  %1210 = vrot.lane.b32.xlu0 %v5067_v21, %s4534_s20 }
  0xd5   : > { %v5071_v24 = vpop.f32.mrf.mxu1  ;;  %v1070_v26 = vmul.f32 %v5040_v1, %v951_v25 }
  0xd7   : > { %v1112_v27 = vadd.f32 %v5045_v7, %v1070_v26 }
  0xd9   : > { %v5083_v29 = vmax.f32 %v1112_v27, 0.0 }
  0xda   : > { %v952_v31 = vpop.f32.mrf.mxu0 }
  0xdb   : > { %v5081_v28 = vpop.f32.mrf.mxu2  ;;  %v953_v33 = vadd.f32 %v952_v31, %v708_v60  ;;  %1212 = vrot.lane.b32.xlu1 %v5083_v29, %s4534_s20  ;;  %1244 = vrot.lane.b32.xlu2 %v5083_v29, %s4533_s19 }
  0xdc   : > { %v5085_v30 = vpop.f32.mrf.mxu3  ;;  %1180 = vrot.lane.b32.xlu0 %v5083_v29, %s4535_s21 }
  0xdd   : > { %v5087_v32 = vpop.f32.mrf.mxu1  ;;  %v1074_v34 = vmul.f32 %v5040_v1, %v953_v33 }
  0xdf   : > { %v1116_v35 = vadd.f32 %v5045_v7, %v1074_v34 }
  0xe1   : > { %v5099_v38 = vmax.f32 %v1116_v35, 0.0 }
  0xe2   : > { %v955_v40 = vpop.f32.mrf.mxu0 }
  0xe3   : > { %v5097_v36 = vpop.f32.mrf.mxu2  ;;  %v956_v41 = vadd.f32 %v955_v40, %v5001_v52  ;;  %1182 = vrot.lane.b32.xlu1 %v5099_v38, %s4535_s21  ;;  %1214 = vrot.lane.b32.xlu2 %v5099_v38, %s4534_s20  ;;  %v5126_v52 = vperm.slane %v5028_v62, 3 }
  0xe4   : > { %v5101_v39 = vpop.f32.mrf.mxu3  ;;  %1246 = vrot.lane.b32.xlu0 %v5099_v38, %s4533_s19 }
  0xe5   : > { %v5103_v37 = vpop.f32.mrf.mxu1  ;;  %v1078_v42 = vmul.f32 %v5040_v1, %v956_v41 }
  0xe7   : > { %v5114_v44 = vadd.f32 %v5045_v7, %v1078_v42 }
  0xea   : > { %v957_v50 = vpop.f32.mrf.mxu0 }
  0xeb   : > { %v1003_v46 = vpop.f32.mrf.mxu2 }
  0xec   : > { %v1004_v47 = vadd.f32 %v1003_v46, %v5005_v53  ;;  %v1032_v49 = vpop.f32.mrf.mxu3 }
  0xed   : > { %v1033_v43 = vadd.f32 %v1032_v49, %v5007_v2  ;;  %v5128_v54 = vpop.f32.mrf.mxu1  ;;  %v958_v2 = vadd.f32 %v957_v50, %v5009_v55 }
  0xee   : > { %v1064_v51 = vmul.f32 %v5117_v45, %v1004_v47 }
  0xef   : > { %v1065_v53 = vmul.f32 %v5126_v52, %v1033_v43  ;;  %v1082_v25 = vmul.f32 %v5040_v1, %v958_v2 }
  0xf0   : > { %v1106_v6 = vadd.f32 %v5121_v48, %v1064_v51 }
  0xf1   : > { %v1107_v15 = vadd.f32 %v5135_v3, %v1065_v53 }
  0xf2   : > { %v5131_v60 = vmax.f32 %v1106_v6, 0.0  ;;  %v960_v10 = vpop.f32.mrf.mxu0 }
  0xf3   : > { %v1005_v5 = vpop.f32.mrf.mxu2  ;;  %v961_v19 = vadd.f32 %v960_v10, %v5015_v58  ;;  %v5151_v26 = vmax.f32 %v1107_v15, 0.0 }
  0xf4   : > { %v1034_v8 = vpop.f32.mrf.mxu3  ;;  %1464 = vrot.lane.b32.xlu1 %v5131_v60, %s4533_s19  ;;  %1400 = vrot.lane.b32.xlu2 %v5131_v60, %s4535_s21  ;;  %v1006_v17 = vadd.f32 %v1005_v5, %v5011_v56  ;;  %v1124_v56 = vadd.f32 %v5045_v7, %v1082_v25 }
  0xf5   : > { %1432 = vrot.lane.b32.xlu0 %v5131_v60, %s4534_s20  ;;  %v5146_v18 = vpop.f32.mrf.mxu1  ;;  %v1086_v23 = vmul.f32 %v5040_v1, %v961_v19  ;;  %v1035_v41 = vadd.f32 %v1034_v8, %v5013_v57  ;;  %v5193_v8 = vperm.slane %v5028_v62, 1 }
  0xf6   : > { %v1068_v55 = vmul.f32 %v5117_v45, %v1006_v17  ;;  %v5178_v51 = vmax.f32 %v1124_v56, 0.0  ;;  %v5200_v17 = vperm.slane %v5035_v0, 1 }
  0xf7   : > { %v1128_v27 = vadd.f32 %v5045_v7, %v1086_v23  ;;  %v1069_v57 = vmul.f32 %v5126_v52, %v1035_v41 }
  0xf8   : > { %v1110_v40 = vadd.f32 %v5121_v48, %v1068_v55 }
  0xf9   : > { %v5232_v41 = vmax.f32 %v1128_v27, 0.0 }
  0xfa   : > { %v962_v35 = vpop.f32.mrf.mxu0  ;;  %v5180_v43 = vmax.f32 %v1110_v40, 0.0 }
  0xfb   : > { %v1008_v31 = vpop.f32.mrf.mxu2  ;;  %v963_v46 = vadd.f32 %v962_v35, %v5023_v61 }
  0xfc   : > { %v1009_v33 = vadd.f32 %v1008_v31, %v5019_v59  ;;  %v1037_v34 = vpop.f32.mrf.mxu3  ;;  %1576 = vrot.lane.b32.xlu1 %v5151_v26, %s4533_s19  ;;  %1512 = vrot.lane.b32.xlu2 %v5151_v26, %s4535_s21 }
  0xfd   : > { %v1038_v58 = vadd.f32 %v1037_v34, %v5021_v9  ;;  %1544 = vrot.lane.b32.xlu0 %v5151_v26, %s4534_s20  ;;  %v5167_v42 = vpop.f32.mrf.mxu1  ;;  %v1090_v9 = vmul.f32 %v5040_v1, %v963_v46 }
  0xfe   : > { %v1072_v59 = vmul.f32 %v5117_v45, %v1009_v33 }
  0xff   : > { %v1073_v47 = vmul.f32 %v5126_v52, %v1038_v58  ;;  %v1132_v6 = vadd.f32 %v5045_v7, %v1090_v9  ;;  %v1111_v7 = vadd.f32 %v5135_v3, %v1069_v57 }
 0x100   : > { %v5172_v49 = vadd.f32 %v5121_v48, %v1072_v59 }
 0x101   : > { %v5176_v50 = vadd.f32 %v5135_v3, %v1073_v47  ;;  %v5209_v23 = vmax.f32 %v1111_v7, 0.0 }
 0x103   : > { %v1010_v53 = vpop.f32.mrf.mxu2 }
 0x104   : > { %v1011_v61 = vadd.f32 %v1010_v53, %v5030_v63  ;;  %v1039_v5 = vpop.f32.mrf.mxu3  ;;  %1218 = vrot.lane.b32.xlu1 %v5178_v51, %s4534_s20  ;;  %1466 = vrot.lane.b32.xlu2 %v5180_v43, %s4533_s19 }
 0x105   : > { %v1040_v1 = vadd.f32 %v1039_v5, %v5037_v13  ;;  %1186 = vrot.lane.b32.xlu0 %v5178_v51, %s4535_s21  ;;  %v974_v63 = vpop.f32.mrf.mxu1 }
 0x106   : > { %v1076_v2 = vmul.f32 %v5117_v45, %v1011_v61  ;;  %v975_v15 = vadd.f32 %v974_v63, %v5042_v4 }
 0x107   : > { %v1077_v10 = vmul.f32 %v5126_v52, %v1040_v1  ;;  %v5249_v1 = vmax.f32 %v1132_v6, 0.0 }
 0x108   : > { %v5203_v13 = vadd.f32 %v5121_v48, %v1076_v2  ;;  %v1063_v62 = vmul.f32 %v5193_v8, %v975_v15 }
 0x109   : > { %v5206_v19 = vadd.f32 %v5135_v3, %v1077_v10 }
 0x10a   : > { %v5212_v25 = vadd.f32 %v5200_v17, %v1063_v62 }
 0x10b   : > { %v1013_v55 = vpop.f32.mrf.mxu2 }
 0x10c   : > { %v1014_v31 = vadd.f32 %v1013_v55, %v5049_v11  ;;  %v1042_v4 = vpop.f32.mrf.mxu3  ;;  %1434 = vrot.lane.b32.xlu1 %v5180_v43, %s4534_s20  ;;  %1578 = vrot.lane.b32.xlu2 %v5209_v23, %s4533_s19 }
 0x10d   : > { %v1043_v0 = vadd.f32 %v1042_v4, %v5053_v14  ;;  %1250 = vrot.lane.b32.xlu0 %v5178_v51, %s4533_s19  ;;  %v976_v34 = vpop.f32.mrf.mxu1 }
 0x10e   : > { %v1080_v33 = vmul.f32 %v5117_v45, %v1014_v31  ;;  %v977_v58 = vadd.f32 %v976_v34, %v5055_v16 }
 0x10f   : > { %v1081_v56 = vmul.f32 %v5126_v52, %v1043_v0 }
 0x110   : > { %v5226_v11 = vadd.f32 %v5121_v48, %v1080_v33  ;;  %v1067_v40 = vmul.f32 %v5193_v8, %v977_v58 }
 0x111   : > { %v5229_v35 = vadd.f32 %v5135_v3, %v1081_v56 }
 0x112   : > { %v1109_v14 = vadd.f32 %v5200_v17, %v1067_v40 }
 0x113   : > { %v1015_v59 = vpop.f32.mrf.mxu2 }
 0x114   : > { %v1016_v46 = vadd.f32 %v1015_v59, %v5065_v20  ;;  %v1044_v47 = vpop.f32.mrf.mxu3  ;;  %1546 = vrot.lane.b32.xlu1 %v5209_v23, %s4534_s20  ;;  %1220 = vrot.lane.b32.xlu2 %v5232_v41, %s4534_s20 }
 0x115   : > { %v1045_v16 = vadd.f32 %v1044_v47, %v5069_v22  ;;  %1402 = vrot.lane.b32.xlu0 %v5180_v43, %s4535_s21  ;;  %v979_v9 = vpop.f32.mrf.mxu1 }
 0x116   : > { %v1084_v27 = vmul.f32 %v5117_v45, %v1016_v46  ;;  %v980_v53 = vadd.f32 %v979_v9, %v5071_v24 }
 0x117   : > { %v1085_v57 = vmul.f32 %v5126_v52, %v1045_v16 }
 0x118   : > { %v1126_v20 = vadd.f32 %v5121_v48, %v1084_v27  ;;  %v1071_v5 = vmul.f32 %v5193_v8, %v980_v53 }
 0x119   : > { %v1127_v61 = vadd.f32 %v5135_v3, %v1085_v57 }
 0x11a   : > { %v1158_v7 = vmax.f32 %v1126_v20, 0.0  ;;  %v5252_v22 = vadd.f32 %v5200_v17, %v1071_v5 }
 0x11b   : > { %v1018_v2 = vpop.f32.mrf.mxu2  ;;  %v1159_v10 = vmax.f32 %v1127_v61, 0.0 }
 0x11c   : > { %v1205_v63 = vmax.f32 %v5178_v51, %v1158_v7  ;;  %v1019_v15 = vadd.f32 %v1018_v2, %v5081_v28  ;;  %v1047_v62 = vpop.f32.mrf.mxu3  ;;  %1252 = vrot.lane.b32.xlu1 %v5232_v41, %s4533_s19  ;;  %1222 = vrot.lane.b32.xlu2 %v5249_v1, %s4534_s20 }
 0x11d   : > { %v1048_v24 = vadd.f32 %v1047_v62, %v5085_v30  ;;  %1514 = vrot.lane.b32.xlu0 %v5209_v23, %s4535_s21  ;;  %v981_v51 = vpop.f32.mrf.mxu1 }
 0x11e   : > { %v5263_v6 = vmax.f32 %v1205_v63, %v1159_v10  ;;  %v1088_v55 = vmul.f32 %v5117_v45, %v1019_v15  ;;  %v982_v28 = vadd.f32 %v981_v51, %v5087_v32 }
 0x11f   : > { %v1089_v31 = vmul.f32 %v5126_v52, %v1048_v24 }
 0x120   : > { %v5269_v4 = vadd.f32 %v5121_v48, %v1088_v55  ;;  %v1075_v30 = vmul.f32 %v5193_v8, %v982_v28 }
 0x121   : > { %v5272_v0 = vadd.f32 %v5135_v3, %v1089_v31 }
 0x122   : > { %v5276_v33 = vadd.f32 %v5200_v17, %v1075_v30 }
 0x123   : > { %v1020_v34 = vpop.f32.mrf.mxu2 }
 0x124   : > { %v1021_v56 = vadd.f32 %v1020_v34, %v5097_v36  ;;  %v1049_v58 = vpop.f32.mrf.mxu3  ;;  %1190 = vrot.lane.b32.xlu1 %v5249_v1, %s4535_s21  ;;  %1254 = vrot.lane.b32.xlu2 %v5249_v1, %s4533_s19 }
 0x125   : > { %v1050_v32 = vadd.f32 %v1049_v58, %v5101_v39  ;;  %1188 = vrot.lane.b32.xlu0 %v5232_v41, %s4535_s21  ;;  %v984_v59 = vpop.f32.mrf.mxu1  ;;  %v1209_v16 = vpop.permute.xlu2 %1208  ;;  %v1137_v39 = vmax.f32 %v5212_v25, 0.0 }
 0x126   : > { %v1092_v40 = vmul.f32 %v5117_v45, %v1021_v56  ;;  %v985_v47 = vadd.f32 %v984_v59, %v5103_v37 }
 0x127   : > { %v1093_v46 = vmul.f32 %v5126_v52, %v1050_v32  ;;  %v1141_v52 = vmax.f32 %v1109_v14, 0.0  ;;  %v5340_v32 = vmax.f32 %v5269_v4, 0.0 }
 0x128   : > { %v5290_v36 = vadd.f32 %v5121_v48, %v1092_v40  ;;  %v1079_v9 = vmul.f32 %v5193_v8, %v985_v47 }
 0x129   : > { %v5293_v27 = vadd.f32 %v5135_v3, %v1093_v46 }
 0x12a   : > { %v5298_v57 = vadd.f32 %v5200_v17, %v1079_v9 }
 0x12c   : > { %1352 = vrot.lane.b32.xlu1 %v1137_v39, %s4533_s19  ;;  %1320 = vrot.lane.b32.xlu2 %v1137_v39, %s4534_s20 }
 0x12d   : > { %1288 = vrot.lane.b32.xlu0 %v1137_v39, %s4535_s21  ;;  %v986_v37 = vpop.f32.mrf.mxu1  ;;  %v1243_v3 = vpop.permute.xlu2 %1242 }
 0x12e   : > { %v987_v45 = vadd.f32 %v986_v37, %v5128_v54 }
 0x130   : > { %v1083_v48 = vmul.f32 %v5193_v8, %v987_v45 }
 0x132   : > { %v5306_v53 = vadd.f32 %v5200_v17, %v1083_v48 }
 0x134   : > { %1290 = vrot.lane.b32.xlu1 %v1141_v52, %s4535_s21  ;;  %1354 = vrot.lane.b32.xlu2 %v1141_v52, %s4533_s19 }
 0x135   : > { %1322 = vrot.lane.b32.xlu0 %v1141_v52, %s4534_s20  ;;  %v989_v25 = vpop.f32.mrf.mxu1  ;;  %v1245_v5 = vpop.permute.xlu2 %1244 }
 0x136   : > { %v990_v20 = vadd.f32 %v989_v25, %v5146_v18 }
 0x138   : > { %v1087_v61 = vmul.f32 %v5193_v8, %v990_v20 }
 0x13a   : > { %v5314_v54 = vadd.f32 %v5200_v17, %v1087_v61  ;;  %v1157_v61 = vmax.f32 %v5306_v53, 0.0 }
 0x13c   : > { %1442 = vrot.lane.b32.xlu1 %v1158_v7, %s4534_s20  ;;  %1410 = vrot.lane.b32.xlu2 %v1158_v7, %s4535_s21  ;;  %v1161_v53 = vmax.f32 %v5314_v54, 0.0 }
 0x13d   : > { %1474 = vrot.lane.b32.xlu0 %v1158_v7, %s4533_s19  ;;  %v991_v14 = vpop.f32.mrf.mxu1  ;;  %v1241_v63 = vpop.permute.xlu1 %1240 }
 0x13e   : > { %v992_v2 = vadd.f32 %v991_v14, %v5167_v42  ;;  %v1177_v62 = vpop.permute.xlu0 %1176  ;;  %v1215_v7 = vpop.permute.xlu2 %1214 }
 0x13f   : > { %v1200_v18 = vmax.f32 %v5051_v12, %v1177_v62  ;;  %v1145_v12 = vmax.f32 %v5252_v22, 0.0 }
 0x140   : > { %v1091_v15 = vmul.f32 %v5193_v8, %v992_v2 }
 0x141   : > { %v1232_v55 = vmax.f32 %v1200_v18, %v1209_v16 }
 0x142   : > { %v5323_v24 = vadd.f32 %v5200_v17, %v1091_v15 }
 0x143   : > { %v1264_v51 = vmax.f32 %v1232_v55, %v1241_v63 }
 0x144   : > { %1554 = vrot.lane.b32.xlu1 %v1159_v10, %s4534_s20  ;;  %1522 = vrot.lane.b32.xlu2 %v1159_v10, %s4535_s21 }
 0x145   : > { %1586 = vrot.lane.b32.xlu0 %v1159_v10, %s4533_s19  ;;  %v1179_v31 = vpop.permute.xlu1 %1178  ;;  %v5328_v42 = vmax.f32 %v1264_v51, %v1137_v39  ;;  %v1149_v39 = vmax.f32 %v5276_v33, 0.0  ;;  %v5378_v33 = vmax.f32 %v5290_v36, 0.0  ;;  %v1269_v36 = vmax.f32 %v5263_v6, %v1157_v61 }
 0x146   : > { %v1201_v8 = vmax.f32 %v5067_v21, %v1179_v31  ;;  %v1211_v28 = vpop.permute.xlu0 %1210  ;;  %v4536_v51 = vmov 0.0  }
 0x147   : > { %1609 = vst.msk [vmem:[#allocation2] sm:$0xff] %vm1608_vm2, %v4536_v51 }
 0x148   : > { %v1233_v30 = vmax.f32 %v1201_v8, %v1211_v28  ;;  %1610 = vst.msk [vmem:[#allocation2 + $0x8] sm:$0xff] %vm1608_vm2, %v4536_v51 }
 0x149   : > { %1611 = vst.msk [vmem:[#allocation2 + $0x10] sm:$0xff] %vm1608_vm2, %v4536_v51 }
 0x14a   : > { %v1265_v17 = vmax.f32 %v1233_v30, %v1243_v3  ;;  %1612 = vst.msk [vmem:[#allocation2 + $0x18] sm:$0xff] %vm1608_vm2, %v4536_v51  ;;  %v5437_v30 = vmax.f32 %v5172_v49, 0.0 }
 0x14b   : > { %1613 = vst.msk [vmem:[#allocation2 + $0x20] sm:$0xff] %vm1608_vm2, %v4536_v51 }
 0x14c   : > { %1324 = vrot.lane.b32.xlu1 %v1145_v12, %s4534_s20  ;;  %1356 = vrot.lane.b32.xlu2 %v1145_v12, %s4533_s19  ;;  %v5337_v10 = vmax.f32 %v1265_v17, %v1141_v52  ;;  %1614 = vst.msk [vmem:[#allocation2 + $0x28] sm:$0xff] %vm1608_vm2, %v4536_v51  ;;  %v5440_v17 = vmax.f32 %v5203_v13, 0.0 }
 0x14d   : > { %1292 = vrot.lane.b32.xlu0 %v1145_v12, %s4535_s21  ;;  %v1213_v56 = vpop.permute.xlu1 %1212  ;;  %1615 = vst.msk [vmem:[#allocation2 + $0x30] sm:$0xff] %vm1608_vm2, %v4536_v51 }
 0x14e   : > { %v5335_v34 = vpop.permute.xlu2 %1400  ;;  %v1181_v58 = vpop.permute.xlu0 %1180  ;;  %1616 = vst.msk [vmem:[#allocation2 + $0x38] sm:$0xff] %vm1608_vm2, %v4536_v51 }
 0x14f   : > { %v1202_v21 = vmax.f32 %v5083_v29, %v1181_v58  ;;  %v5355_v29 = vmax.f32 %v5272_v0, 0.0  ;;  %1618 = vst.msk [vmem:[#allocation2 + $0x40] sm:$0xf] %vm1617_vm3, %v4536_v51 }
 0x150   : > { %2190 = vst.msk [vmem:[#allocation3] sm:$0xff] %vm2189_vm5, %v4536_v51 }
 0x151   : > { %v1234_v22 = vmax.f32 %v1202_v21, %v1213_v56  ;;  %v5443_v56 = vmax.f32 %v5114_v44, 0.0  ;;  %2191 = vst.msk [vmem:[#allocation3 + $0x8] sm:$0xff] %vm2189_vm5, %v4536_v51 }
 0x152   : > { %2192 = vst.msk [vmem:[#allocation3 + $0x10] sm:$0xff] %vm2189_vm5, %v4536_v51 }
 0x153   : > { %v1266_v59 = vmax.f32 %v1234_v22, %v1245_v5  ;;  %v5392_v5 = vmax.f32 %v5293_v27, 0.0  ;;  %v1165_v27 = vmax.f32 %v5323_v24, 0.0  ;;  %2193 = vst.msk [vmem:[#allocation3 + $0x18] sm:$0xff] %vm2189_vm5, %v4536_v51 }
 0x154   : > { %1476 = vrot.lane.b32.xlu1 %v5340_v32, %s4533_s19  ;;  %1444 = vrot.lane.b32.xlu2 %v5340_v32, %s4534_s20  ;;  %2194 = vst.msk [vmem:[#allocation3 + $0x20] sm:$0xff] %vm2189_vm5, %v4536_v51 }
 0x155   : > { %1412 = vrot.lane.b32.xlu0 %v5340_v32, %s4535_s21  ;;  %v1183_v46 = vpop.permute.xlu1 %1182  ;;  %v5351_v47 = vmax.f32 %v1266_v59, %v1145_v12  ;;  %2195 = vst.msk [vmem:[#allocation3 + $0x28] sm:$0xff] %vm2189_vm5, %v4536_v51 }
 0x156   : > { %v5349_v40 = vpop.permute.xlu2 %1512  ;;  %v1203_v4 = vmax.f32 %v5099_v38, %v1183_v46  ;;  %v1247_v9 = vpop.permute.xlu0 %1246  ;;  %2196 = vst.msk [vmem:[#allocation3 + $0x30] sm:$0xff] %vm2189_vm5, %v4536_v51 }
 0x157   : > { %2197 = vst.msk [vmem:[#allocation3 + $0x38] sm:$0xff] %vm2189_vm5, %v4536_v51 }
 0x158   : > { %v1235_v16 = vmax.f32 %v1203_v4, %v1215_v7  ;;  %2882 = vst.msk [vmem:[#allocation4] sm:$0xff] %vm2189_vm5, %v4536_v51 }
 0x159   : > { %2883 = vst.msk [vmem:[#allocation4 + $0x8] sm:$0xff] %vm2189_vm5, %v4536_v51 }
 0x15a   : > { %v1267_v37 = vmax.f32 %v1235_v16, %v1247_v9  ;;  %2884 = vst.msk [vmem:[#allocation4 + $0x10] sm:$0xff] %vm2189_vm5, %v4536_v51 }
 0x15b   : > { %2885 = vst.msk [vmem:[#allocation4 + $0x18] sm:$0xff] %vm2189_vm5, %v4536_v51 }
 0x15c   : > { %1588 = vrot.lane.b32.xlu1 %v5355_v29, %s4533_s19  ;;  %1556 = vrot.lane.b32.xlu2 %v5355_v29, %s4534_s20  ;;  %v5366_v38 = vmax.f32 %v1267_v37, %v1149_v39  ;;  %2886 = vst.msk [vmem:[#allocation4 + $0x20] sm:$0xff] %vm2189_vm5, %v4536_v51 }
 0x15d   : > { %1524 = vrot.lane.b32.xlu0 %v5355_v29, %s4535_s21  ;;  %2887 = vst.msk [vmem:[#allocation4 + $0x28] sm:$0xff] %vm2189_vm5, %v4536_v51 }
 0x15e   : > { %v5364_v45 = vpop.permute.xlu2 %1466  ;;  %2888 = vst.msk [vmem:[#allocation4 + $0x30] sm:$0xff] %vm2189_vm5, %v4536_v51 }
 0x15f   : > { %2889 = vst.msk [vmem:[#allocation4 + $0x38] sm:$0xff] %vm2189_vm5, %v4536_v51 }
 0x160   : > { %2199 = vst.msk [vmem:[#allocation3 + $0x40] sm:$0xf] %vm2198_vm6, %v4536_v51  ;;  %v4466_v51 = vld [vmem:[%s6163_s8 + $0xc8] sm:$0xff] }
 0x164   : > { %1294 = vrot.lane.b32.xlu1 %v1149_v39, %s4535_s21  ;;  %1326 = vrot.lane.b32.xlu2 %v1149_v39, %s4534_s20 }
 0x165   : > { %1358 = vrot.lane.b32.xlu0 %v1149_v39, %s4533_s19 }
 0x166   : > { %v5371_v0 = vpop.permute.xlu1 %1464  ;;  %v5373_v48 = vpop.permute.xlu2 %1578 }
 0x167   : > { %v5375_v52 = vpop.permute.xlu0 %1432 }
 0x16c   : > { %1414 = vrot.lane.b32.xlu1 %v5378_v33, %s4535_s21  ;;  %1478 = vrot.lane.b32.xlu2 %v5378_v33, %s4533_s19 }
 0x16d   : > { %1446 = vrot.lane.b32.xlu0 %v5378_v33, %s4534_s20 }
 0x16e   : > { %v5386_v3 = vpop.permute.xlu1 %1576  ;;  %v1221_v25 = vpop.permute.xlu2 %1220 }
 0x16f   : > { %v5388_v20 = vpop.permute.xlu0 %1544 }
 0x174   : > { %1526 = vrot.lane.b32.xlu1 %v5392_v5, %s4535_s21  ;;  %1590 = vrot.lane.b32.xlu2 %v5392_v5, %s4533_s19 }
 0x175   : > { %1558 = vrot.lane.b32.xlu0 %v5392_v5, %s4534_s20 }
 0x176   : > { %v1219_v14 = vpop.permute.xlu1 %1218  ;;  %v1223_v2 = vpop.permute.xlu2 %1222 }
 0x177   : > { %v1277_v63 = vmax.f32 %v1269_v36, %v1219_v14  ;;  %v1187_v15 = vpop.permute.xlu0 %1186  ;;  %v4428_v36 = vld [vmem:[%s6160_s5 + $0x8] sm:$0xff] }
 0x178   : > { %1744 = vmatpush.bf16.msrb.mxu1 %v4428_v36  ;;  %4505 = vmatpush.bf16.msra.mxu3 %v4428_v36 }
 0x179   : > { %v1317_v62 = vmax.f32 %v1277_v63, %v1187_v15  ;;  %v4429_v63 = vld [vmem:[%s6160_s5 + $0x10] sm:$0xff]  ;;  %v4427_v15 = vld [vmem:[%s6160_s5] sm:$0xff] }
 0x17c   : > { %1300 = vrot.lane.b32.xlu1 %v1161_v53, %s4535_s21  ;;  %1302 = vrot.lane.b32.xlu2 %v1165_v27, %s4535_s21 }
 0x17d   : > { %1298 = vrot.lane.b32.xlu0 %v1157_v61, %s4535_s21  ;;  %1745 = vmatpush.bf16.msrb.mxu1 %v4427_v15 }
 0x17e   : > { %v5406_v18 = vpop.permute.xlu1 %1434  ;;  %v1255_v6 = vpop.permute.xlu2 %1254  ;;  %4506 = vmatpush.bf16.msra.mxu3 %v4427_v15 }
 0x17f   : > { %v1251_v55 = vpop.permute.xlu0 %1250 }
 0x180   : > { %v1349_v7 = vmax.f32 %v1317_v62, %v1251_v55 }
 0x184   : > { %1332 = vrot.lane.b32.xlu1 %v1161_v53, %s4534_s20  ;;  %1334 = vrot.lane.b32.xlu2 %v1165_v27, %s4534_s20 }
 0x185   : > { %1330 = vrot.lane.b32.xlu0 %v1157_v61, %s4534_s20 }
 0x186   : > { %v5423_v54 = vpop.permute.xlu1 %1546  ;;  %v1321_v24 = vpop.permute.xlu2 %1320 }
 0x187   : > { %v5427_v31 = vpop.permute.xlu0 %1402 }
 0x18c   : > { %1364 = vrot.lane.b32.xlu1 %v1161_v53, %s4533_s19  ;;  %1366 = vrot.lane.b32.xlu2 %v1165_v27, %s4533_s19 }
 0x18d   : > { %1362 = vrot.lane.b32.xlu0 %v1157_v61, %s4533_s19 }
 0x18e   : > { %v1253_v8 = vpop.permute.xlu1 %1252  ;;  %v1355_v28 = vpop.permute.xlu2 %1354 }
 0x18f   : > { %v5434_v12 = vpop.permute.xlu0 %1514 }
 0x194   : > { %1404 = vrot.lane.b32.xlu1 %v5437_v30, %s4535_s21  ;;  %1406 = vrot.lane.b32.xlu2 %v5440_v17, %s4535_s21 }
 0x195   : > { %1184 = vrot.lane.b32.xlu0 %v5443_v56, %s4535_s21 }
 0x196   : > { %v1191_v58 = vpop.permute.xlu1 %1190  ;;  %v1411_v21 = vpop.permute.xlu2 %1410 }
 0x197   : > { %v1207_v49 = vmax.f32 %v5249_v1, %v1191_v58  ;;  %v1381_v22 = vmax.f32 %v1349_v7, %v1411_v21  ;;  %v1189_v59 = vpop.permute.xlu0 %1188  ;;  %v5491_v58 = vmax.f32 %v5206_v19, 0.0  ;;  %v5495_v21 = vmax.f32 %v5298_v57, 0.0 }
 0x198   : > { %v1206_v13 = vmax.f32 %v5232_v41, %v1189_v59 }
 0x199   : > { %v1239_v46 = vmax.f32 %v1207_v49, %v1223_v2 }
 0x19a   : > { %v1238_v44 = vmax.f32 %v1206_v13, %v1221_v25  ;;  %v4430_v25 = vld [vmem:[%s6160_s5 + $0x18] sm:$0xff] }
 0x19b   : > { %v1271_v4 = vmax.f32 %v1239_v46, %v1255_v6  ;;  %1691 = vmatpush.bf16.msra.mxu0 %v4430_v25  ;;  %4503 = vmatpush.bf16.msra.mxu2 %v4430_v25 }
 0x19c   : > { %1436 = vrot.lane.b32.xlu1 %v5437_v30, %s4534_s20  ;;  %1438 = vrot.lane.b32.xlu2 %v5440_v17, %s4534_s20  ;;  %v1270_v16 = vmax.f32 %v1238_v44, %v1253_v8  ;;  %v5488_v8 = vmax.f32 %v5176_v50, 0.0 }
 0x19d   : > { %1216 = vrot.lane.b32.xlu0 %v5443_v56, %s4534_s20  ;;  %v5459_v9 = vmax.f32 %v1271_v4, %v1165_v27 }
 0x19e   : > { %v1353_v1 = vpop.permute.xlu1 %1352  ;;  %v1523_v39 = vpop.permute.xlu2 %1522  ;;  %v5461_v37 = vmax.f32 %v1270_v16, %v1161_v53 }
 0x19f   : > { %v1389_v41 = vmax.f32 %v1381_v22, %v1523_v39  ;;  %v1289_v61 = vpop.permute.xlu0 %1288  ;;  %1692 = vmatpush.bf16.msra.mxu0 %v4429_v63  ;;  %4504 = vmatpush.bf16.msra.mxu2 %v4429_v63  ;;  %v5538_v39 = vmax.f32 %v5226_v11, 0.0 }
 0x1a0   : > { %v1312_v14 = vmax.f32 %v5328_v42, %v1289_v61 }
 0x1a2   : > { %v1344_v2 = vmax.f32 %v1312_v14, %v1321_v24 }
 0x1a4   : > { %v1376_v62 = vmax.f32 %v1344_v2, %v1353_v1  ;;  %1468 = vrot.lane.b32.xlu1 %v5437_v30, %s4533_s19  ;;  %1470 = vrot.lane.b32.xlu2 %v5440_v17, %s4533_s19 }
 0x1a5   : > { %1248 = vrot.lane.b32.xlu0 %v5443_v56, %s4533_s19 }
 0x1a6   : > { %v1384_v42 = vmax.f32 %v1376_v62, %v5131_v60  ;;  %v1291_v53 = vpop.permute.xlu1 %1290  ;;  %v5483_v27 = vpop.permute.xlu2 %1356 }
 0x1a7   : > { %v1313_v6 = vmax.f32 %v5337_v10, %v1291_v53  ;;  %v1323_v55 = vpop.permute.xlu0 %1322 }
 0x1a8   : > { %v1424_v7 = vmax.f32 %v1384_v42, %v5335_v34  ;;  %v5555_v42 = vmax.f32 %v5229_v35, 0.0 }
 0x1a9   : > { %v1345_v24 = vmax.f32 %v1313_v6, %v1323_v55 }
 0x1aa   : > { %v1456_v60 = vmax.f32 %v1424_v7, %v5375_v52 }
 0x1ab   : > { %v1377_v49 = vmax.f32 %v1345_v24, %v1355_v28 }
 0x1ac   : > { %v1488_v22 = vmax.f32 %v1456_v60, %v5371_v0  ;;  %1516 = vrot.lane.b32.xlu1 %v5488_v8, %s4535_s21  ;;  %1518 = vrot.lane.b32.xlu2 %v5491_v58, %s4535_s21 }
 0x1ad   : > { %v1385_v50 = vmax.f32 %v1377_v49, %v5180_v43  ;;  %1296 = vrot.lane.b32.xlu0 %v5495_v21, %s4535_s21 }
 0x1ae   : > { %v1496_v19 = vmax.f32 %v1488_v22, %v5151_v26  ;;  %v1443_v34 = vpop.permute.xlu1 %1442  ;;  %v5506_v10 = vpop.permute.xlu2 %1444 }
 0x1af   : > { %v1425_v57 = vmax.f32 %v1385_v50, %v5427_v31  ;;  %v1429_v52 = vmax.f32 %v1389_v41, %v1443_v34  ;;  %v1475_v0 = vpop.permute.xlu0 %1474 }
 0x1b0   : > { %v1536_v28 = vmax.f32 %v1496_v19, %v5349_v40 }
 0x1b1   : > { %v1457_v59 = vmax.f32 %v1425_v57, %v5406_v18  ;;  %v1461_v13 = vmax.f32 %v1429_v52, %v1475_v0 }
 0x1b2   : > { %v1568_v46 = vmax.f32 %v1536_v28, %v5388_v20 }
 0x1b3   : > { %v1489_v43 = vmax.f32 %v1457_v59, %v5364_v45 }
 0x1b4   : > { %v1600_v44 = vmax.f32 %v1568_v46, %v5386_v3  ;;  %1548 = vrot.lane.b32.xlu1 %v5488_v8, %s4534_s20  ;;  %1550 = vrot.lane.b32.xlu2 %v5491_v58, %s4534_s20 }
 0x1b5   : > { %v1497_v26 = vmax.f32 %v1489_v43, %v5209_v23  ;;  %1328 = vrot.lane.b32.xlu0 %v5495_v21, %s4534_s20 }
 0x1b6   : > { %1619 = vst.msk [vmem:[#allocation2 + $0x3] sm:$0xff] %vm1608_vm2, %v1600_v44  ;;  %v1555_v40 = vpop.permute.xlu1 %1554  ;;  %v5522_v18 = vpop.permute.xlu2 %1556 }
 0x1b7   : > { %v1537_v45 = vmax.f32 %v1497_v26, %v5434_v12  ;;  %v1493_v20 = vmax.f32 %v1461_v13, %v1555_v40  ;;  %v1587_v3 = vpop.permute.xlu0 %1586 }
 0x1b9   : > { %v1569_v31 = vmax.f32 %v1537_v45, %v5423_v54  ;;  %v5526_v4 = vmax.f32 %v1493_v20, %v1587_v3 }
 0x1bb   : > { %v1601_v16 = vmax.f32 %v1569_v31, %v5373_v48 }
 0x1bc   : > { %1580 = vrot.lane.b32.xlu1 %v5488_v8, %s4533_s19  ;;  %1582 = vrot.lane.b32.xlu2 %v5491_v58, %s4533_s19 }
 0x1bd   : > { %1620 = vst.msk [vmem:[#allocation2 + $0xb] sm:$0xff] %vm1608_vm2, %v1601_v16  ;;  %1360 = vrot.lane.b32.xlu0 %v5495_v21, %s4533_s19  ;;  %v1644_v41 = vld [vmem:[#allocation2 + $0x1] sm:$0xff] }
 0x1be   : > { %v1325_v23 = vpop.permute.xlu1 %1324  ;;  %v1327_v12 = vpop.permute.xlu2 %1326  ;;  %v1628_v25 = vld [vmem:[#allocation2] sm:$0xff] }
 0x1bf   : > { %v1293_v1 = vpop.permute.xlu0 %1292 }
 0x1c0   : > { %v1314_v54 = vmax.f32 %v5351_v47, %v1293_v1 }
 0x1c2   : > { %v1346_v48 = vmax.f32 %v1314_v54, %v1325_v23 }
 0x1c4   : > { %1440 = vrot.lane.b32.xlu1 %v5538_v39, %s4534_s20  ;;  %1472 = vrot.lane.b32.xlu2 %v5538_v39, %s4533_s19  ;;  %v1645_v61 = vld [vmem:[#allocation2 + $0x9] sm:$0xff]  ;;  %v1378_v14 = vmax.f32 %v1346_v48, %v5483_v27 }
 0x1c5   : > { %v1629_v36 = vld [vmem:[#allocation2 + $0x8] sm:$0xff]  ;;  %1408 = vrot.lane.b32.xlu0 %v5538_v39, %s4535_s21  ;;  %v1652_v47 = vpack.c.bf16 %v1645_v61, %v1644_v41 }
 0x1c6   : > { %v1636_v2 = vpack.c.bf16 %v1629_v36, %v1628_v25  ;;  %v5547_v11 = vpop.permute.xlu1 %1476  ;;  %v1479_v63 = vpop.permute.xlu2 %1478  ;;  %v5550_v15 = vmax.f32 %v1378_v14, %v5437_v30  ;;  %v4434_v25 = vld [vmem:[%s6160_s5 + $0x38] sm:$0xff] }
 0x1c7   : > { %v1413_v62 = vpop.permute.xlu0 %1412  ;;  %3904 = vmatmul.msk.bf16.vlgmr.msra.gmra.mxu0 %vm1608_vm2, %v1652_v47  ;;  %1892 = vmatpush.bf16.msrb.mxu3 %v4434_v25 }
 0x1c8   : > { %3916 = vmatmul.msk.bf16.vlgmr.msrb.gmra.mxu1 %vm1608_vm2, %v1636_v2 }
 0x1cc   : > { %1552 = vrot.lane.b32.xlu1 %v5555_v42, %s4534_s20  ;;  %1584 = vrot.lane.b32.xlu2 %v5555_v42, %s4533_s19  ;;  %s3667_s20 = sshll.u32 %s6171_s30, 3 }
 0x1cd   : > { %1520 = vrot.lane.b32.xlu0 %v5555_v42, %s4535_s21  ;;  %s6117_s23 = scalar_lea.vmem %s6169_s14, %s3667_s20 }
 0x1ce   : > { %v5563_v53 = vpop.permute.xlu1 %1588  ;;  %v1591_v30 = vpop.permute.xlu2 %1590 }
 0x1cf   : > { %v5565_v27 = vpop.permute.xlu0 %1524 }
 0x1d6   : > { %v1295_v6 = vpop.permute.xlu1 %1294  ;;  %v1303_v35 = vpop.permute.xlu2 %1302 }
 0x1d7   : > { %v1315_v55 = vmax.f32 %v5366_v38, %v1295_v6  ;;  %v1359_v7 = vpop.permute.xlu0 %1358  ;;  %v1319_v50 = vmax.f32 %v5459_v9, %v1303_v35  ;;  %v4431_v35 = vld [vmem:[%s6160_s5 + $0x20] sm:$0xff] }
 0x1d9   : > { %v1347_v24 = vmax.f32 %v1315_v55, %v1327_v12 }
 0x1de   : > { %v1415_v60 = vpop.permute.xlu1 %1414  ;;  %v1335_v49 = vpop.permute.xlu2 %1334 }
 0x1df   : > { %v1447_v22 = vpop.permute.xlu0 %1446  ;;  %v1351_v19 = vmax.f32 %v1319_v50, %v1335_v49 }
 0x1e6   : > { %v1527_v34 = vpop.permute.xlu1 %1526  ;;  %v1367_v57 = vpop.permute.xlu2 %1366 }
 0x1e7   : > { %v1383_v52 = vmax.f32 %v1351_v19, %v1367_v57  ;;  %v1559_v0 = vpop.permute.xlu0 %1558 }
 0x1e9   : > { %v1391_v28 = vmax.f32 %v1383_v52, %v5378_v33 }
 0x1eb   : > { %v1431_v59 = vmax.f32 %v1391_v28, %v1415_v60 }
 0x1ed   : > { %v1463_v13 = vmax.f32 %v1431_v59, %v1447_v22 }
 0x1ee   : > { %v1301_v46 = vpop.permute.xlu1 %1300  ;;  %v1407_v43 = vpop.permute.xlu2 %1406 }
 0x1ef   : > { %v1495_v44 = vmax.f32 %v1463_v13, %v1479_v63  ;;  %v1299_v38 = vpop.permute.xlu0 %1298  ;;  %v1318_v16 = vmax.f32 %v5461_v37, %v1301_v46  ;;  %v1379_v37 = vmax.f32 %v1347_v24, %v1359_v7 }
 0x1f0   : > { %v1541_v33 = vmax.f32 %v5526_v4, %v1299_v38 }
 0x1f1   : > { %v1503_v26 = vmax.f32 %v1495_v44, %v5392_v5  ;;  %v4432_v5 = vld [vmem:[%s6160_s5 + $0x28] sm:$0xff]  ;;  %v1387_v63 = vmax.f32 %v1379_v37, %v5440_v17 }
 0x1f2   : > { %1814 = vmatpush.bf16.msrb.mxu2 %v4432_v5 }
 0x1f3   : > { %v1543_v40 = vmax.f32 %v1503_v26, %v1527_v34  ;;  %v1427_v55 = vmax.f32 %v1387_v63, %v1407_v43 }
 0x1f5   : > { %v1575_v45 = vmax.f32 %v1543_v40, %v1559_v0 }
 0x1f6   : > { %v1333_v20 = vpop.permute.xlu1 %1332  ;;  %v1439_v9 = vpop.permute.xlu2 %1438  ;;  %1815 = vmatpush.bf16.msrb.mxu2 %v4431_v35 }
 0x1f7   : > { %v1607_v3 = vmax.f32 %v1575_v45, %v1591_v30  ;;  %v1331_v31 = vpop.permute.xlu0 %1330  ;;  %v1350_v23 = vmax.f32 %v1318_v16, %v1333_v20 }
 0x1f8   : > { %v1573_v12 = vmax.f32 %v1541_v33, %v1331_v31  ;;  %v4438_v31 = vld [vmem:[%s6160_s5 + $0x58] sm:$0xff]  ;;  %v1846_v33 = vld [vmem:[#allocation2 + $0xb] sm:$0xff] }
 0x1f9   : > { %1627 = vst.msk [vmem:[#allocation2 + $0x3b] sm:$0x3f] %vm1626_vm4, %v1607_v3  ;;  %v4436_v3 = vld [vmem:[%s6160_s5 + $0x48] sm:$0xff]  ;;  %2048 = vmatpush.bf16.msra.mxu1 %v4438_v31 }
 0x1fa   : > { %1970 = vmatpush.bf16.msrb.mxu0 %v4436_v3 }
 0x1fe   : > { %v1365_v1 = vpop.permute.xlu1 %1364  ;;  %v1471_v54 = vpop.permute.xlu2 %1470 }
 0x1ff   : > { %v1382_v48 = vmax.f32 %v1350_v23, %v1365_v1  ;;  %v1363_v41 = vpop.permute.xlu0 %1362  ;;  %v1845_v1 = vld [vmem:[#allocation2 + $0x3] sm:$0xff] }
 0x200   : > { %v1605_v61 = vmax.f32 %v1573_v12, %v1363_v41  ;;  %v1767_v12 = vld [vmem:[#allocation2 + $0x2] sm:$0xff] }
 0x201   : > { %v1390_v36 = vmax.f32 %v1382_v48, %v5340_v32  ;;  %v4433_v32 = vld [vmem:[%s6160_s5 + $0x30] sm:$0xff] }
 0x202   : > { %1624 = vst.msk [vmem:[#allocation2 + $0x2b] sm:$0xff] %vm1608_vm2, %v1605_v61  ;;  %1893 = vmatpush.bf16.msrb.mxu3 %v4433_v32 }
 0x203   : > { %v1430_v4 = vmax.f32 %v1390_v36, %v1413_v62 }
 0x205   : > { %v1462_v14 = vmax.f32 %v1430_v4, %v5506_v10  ;;  %v1459_v10 = vmax.f32 %v1427_v55, %v1439_v9  ;;  %v1768_v9 = vld [vmem:[#allocation2 + $0xa] sm:$0xff] }
 0x206   : > { %v1405_v47 = vpop.permute.xlu1 %1404  ;;  %v1519_v2 = vpop.permute.xlu2 %1518 }
 0x207   : > { %v1494_v30 = vmax.f32 %v1462_v14, %v5547_v11  ;;  %v1185_v6 = vpop.permute.xlu0 %1184  ;;  %v1491_v11 = vmax.f32 %v1459_v10, %v1471_v54  ;;  %v1426_v44 = vmax.f32 %v5550_v15, %v1405_v47  ;;  %v1775_v15 = vpack.c.bf16 %v1768_v9, %v1767_v12  ;;  %v4435_v47 = vld [vmem:[%s6160_s5 + $0x40] sm:$0xff] }
 0x208   : > { %v1204_v26 = vmax.f32 %v5443_v56, %v1185_v6  ;;  %v1853_v54 = vpack.c.bf16 %v1846_v33, %v1845_v1  ;;  %1971 = vmatpush.bf16.msrb.mxu0 %v4435_v47 }
 0x209   : > { %v1502_v62 = vmax.f32 %v1494_v30, %v5355_v29  ;;  %v1499_v50 = vmax.f32 %v1491_v11, %v5491_v58 }
 0x20b   : > { %v1542_v7 = vmax.f32 %v1502_v62, %v5565_v27  ;;  %v1539_v19 = vmax.f32 %v1499_v50, %v1519_v2 }
 0x20d   : > { %v1574_v17 = vmax.f32 %v1542_v7, %v5522_v18  ;;  %v4440_v18 = vld [vmem:[%s6160_s5 + $0x68] sm:$0xff] }
 0x20e   : > { %v1437_v24 = vpop.permute.xlu1 %1436  ;;  %v1551_v60 = vpop.permute.xlu2 %1550 }
 0x20f   : > { %v1606_v49 = vmax.f32 %v1574_v17, %v5563_v53  ;;  %v1217_v22 = vpop.permute.xlu0 %1216  ;;  %v1571_v34 = vmax.f32 %v1539_v19, %v1551_v60  ;;  %v1458_v38 = vmax.f32 %v1426_v44, %v1437_v24 }
 0x210   : > { %v1236_v45 = vmax.f32 %v1204_v26, %v1217_v22 }
 0x211   : > { %1625 = vst.msk [vmem:[#allocation2 + $0x33] sm:$0xff] %vm1608_vm2, %v1606_v49 }
 0x216   : > { %v1469_v29 = vpop.permute.xlu1 %1468  ;;  %v1583_v57 = vpop.permute.xlu2 %1582 }
 0x217   : > { %v1603_v52 = vmax.f32 %v1571_v34, %v1583_v57  ;;  %v1249_v0 = vpop.permute.xlu0 %1248  ;;  %v1490_v40 = vmax.f32 %v1458_v38, %v1469_v29 }
 0x218   : > { %v1650_v27 = vld [vmem:[#allocation2 + $0x31] sm:$0xff]  ;;  %v1651_v28 = vld [vmem:[#allocation2 + $0x39] sm:$0x3f]  ;;  %v1268_v23 = vmax.f32 %v1236_v45, %v1249_v0 }
 0x219   : > { %v1634_v59 = vld [vmem:[#allocation2 + $0x30] sm:$0xff]  ;;  %1622 = vst.msk [vmem:[#allocation2 + $0x1b] sm:$0xff] %vm1608_vm2, %v1603_v52  ;;  %v1655_v53 = vpack.c.bf16 %v1651_v28, %v1650_v27  ;;  %v1635_v13 = vld [vmem:[#allocation2 + $0x38] sm:$0x3f]  ;;  %v1498_v56 = vmax.f32 %v1490_v40, %v5488_v8  ;;  %v4439_v8 = vld [vmem:[%s6160_s5 + $0x60] sm:$0xff] }
 0x21a   : > { %v1639_v46 = vpack.c.bf16 %v1635_v13, %v1634_v59  ;;  %v1276_v41 = vmax.f32 %v1268_v23, %v5495_v21  ;;  %v4437_v21 = vld [vmem:[%s6160_s5 + $0x50] sm:$0xff]  ;;  %v1774_v9 = vld [vmem:[#allocation2 + $0x3a] sm:$0x3f]  ;;  %v2001_v23 = vld [vmem:[#allocation2 + $0x5] sm:$0xff] }
 0x21b   : > { %3907 = vmatmul.msk.bf16.vlgmr.msra.gmra.mxu2 %vm1608_vm2, %v1655_v53  ;;  %2049 = vmatpush.bf16.msra.mxu1 %v4437_v21  ;;  %v1850_v40 = vld [vmem:[#allocation2 + $0x2b] sm:$0xff]  ;;  %v1851_v31 = vld [vmem:[#allocation2 + $0x33] sm:$0xff] }
 0x21c   : > { %3919 = vmatmul.msk.bf16.vlgmr.msra.gmra.mxu3 %vm1608_vm2, %v1639_v46  ;;  %2126 = vmatpush.bf16.msra.mxu2 %v4440_v18  ;;  %v1928_v21 = vld [vmem:[#allocation2 + $0x2c] sm:$0xff] }
 0x21e   : > { %v1517_v58 = vpop.permute.xlu1 %1516  ;;  %v1473_v62 = vpop.permute.xlu2 %1472 }
 0x21f   : > { %v1297_v43 = vpop.permute.xlu0 %1296  ;;  %v1538_v48 = vmax.f32 %v1498_v56, %v1517_v58  ;;  %v1852_v56 = vld [vmem:[#allocation2 + $0x3b] sm:$0x3f] }
 0x220   : > { %v1316_v5 = vmax.f32 %v1276_v41, %v1297_v43  ;;  %2127 = vmatpush.bf16.msra.mxu2 %v4439_v8  ;;  %v1848_v50 = vld [vmem:[#allocation2 + $0x1b] sm:$0xff]  ;;  %v1856_v1 = vpack.c.bf16 %v1852_v56, %v1851_v31  ;;  %v4450_v56 = vld [vmem:[%s6163_s8 + $0x48] sm:$0xff] }
 0x226   : > { %v1549_v20 = vpop.permute.xlu1 %1548  ;;  %v1585_v18 = vpop.permute.xlu2 %1584 }
 0x227   : > { %v1329_v16 = vpop.permute.xlu0 %1328  ;;  %v1570_v61 = vmax.f32 %v1538_v48, %v1549_v20  ;;  %v1773_v20 = vld [vmem:[#allocation2 + $0x32] sm:$0xff] }
 0x228   : > { %v1348_v4 = vmax.f32 %v1316_v5, %v1329_v16  ;;  %v1923_v16 = vld [vmem:[#allocation2 + $0x4] sm:$0xff]  ;;  %v1778_v12 = vpack.c.bf16 %v1774_v9, %v1773_v20 }
 0x229   : > { %v4446_v9 = vld [vmem:[%s6163_s8 + $0x28] sm:$0xff] }
 0x22b   : > { %3932 = vmatmul.msk.bf16.vlgmr.msrb.gmra.mxu2 %vm1608_vm2, %v1775_v15 }
 0x22c   : > { %3948 = vmatmul.msk.bf16.vlgmr.msrb.gmra.mxu3 %vm1608_vm2, %v1853_v54 }
 0x22e   : > { %v1581_v25 = vpop.permute.xlu1 %1580 }
 0x22f   : > { %v1602_v36 = vmax.f32 %v1570_v61, %v1581_v25  ;;  %v1361_v37 = vpop.permute.xlu0 %1360 }
 0x230   : > { %v1380_v14 = vmax.f32 %v1348_v4, %v1361_v37 }
 0x231   : > { %1621 = vst.msk [vmem:[#allocation2 + $0x13] sm:$0xff] %vm1608_vm2, %v1602_v36  ;;  %v2079_v36 = vld [vmem:[#allocation2 + $0x6] sm:$0xff] }
 0x232   : > { %v1388_v2 = vmax.f32 %v1380_v14, %v5538_v39 }
 0x236   : > { %v1441_v63 = vpop.permute.xlu1 %1440 }
 0x237   : > { %v1409_v30 = vpop.permute.xlu0 %1408 }
 0x238   : > { %v1428_v6 = vmax.f32 %v1388_v2, %v1409_v30  ;;  %v1646_v35 = vld [vmem:[#allocation2 + $0x11] sm:$0xff]  ;;  %v1647_v32 = vld [vmem:[#allocation2 + $0x19] sm:$0xff] }
 0x239   : > { %v1630_v55 = vld [vmem:[#allocation2 + $0x10] sm:$0xff]  ;;  %v1653_v10 = vpack.c.bf16 %v1647_v32, %v1646_v35  ;;  %v1631_v7 = vld [vmem:[#allocation2 + $0x18] sm:$0xff] }
 0x23a   : > { %v1769_v17 = vld [vmem:[#allocation2 + $0x12] sm:$0xff]  ;;  %v1770_v11 = vld [vmem:[#allocation2 + $0x1a] sm:$0xff]  ;;  %v1460_v24 = vmax.f32 %v1428_v6, %v1441_v63  ;;  %v1637_v60 = vpack.c.bf16 %v1631_v7, %v1630_v55 }
 0x23b   : > { %v1776_v49 = vpack.c.bf16 %v1770_v11, %v1769_v17  ;;  %v1847_v22 = vld [vmem:[#allocation2 + $0x13] sm:$0xff]  ;;  %3905 = vmatmul.msk.bf16.gmra.mxu0 %vm1608_vm2, %v1653_v10  ;;  %v1930_v10 = vld [vmem:[#allocation2 + $0x3c] sm:$0x3f] }
 0x23c   : > { %v1854_v19 = vpack.c.bf16 %v1848_v50, %v1847_v22  ;;  %3917 = vmatmul.msk.bf16.gmra.mxu1 %vm1608_vm2, %v1637_v60  ;;  %v1492_v39 = vmax.f32 %v1460_v24, %v1473_v62  ;;  %v1924_v45 = vld [vmem:[#allocation2 + $0xc] sm:$0xff]  ;;  %v1925_v61 = vld [vmem:[#allocation2 + $0x14] sm:$0xff]  ;;  %v2008_v17 = vld [vmem:[#allocation2 + $0x3d] sm:$0x3f] }
 0x23d   : > { %3933 = vmatmul.msk.bf16.gmra.mxu2 %vm1608_vm2, %v1776_v49  ;;  %v2002_v3 = vld [vmem:[#allocation2 + $0xd] sm:$0xff]  ;;  %v1931_v33 = vpack.c.bf16 %v1924_v45, %v1923_v16  ;;  %v2003_v25 = vld [vmem:[#allocation2 + $0x15] sm:$0xff]  ;;  %v2086_v50 = vld [vmem:[#allocation2 + $0x3e] sm:$0x3f] }
 0x23e   : > { %3949 = vmatmul.msk.bf16.gmra.mxu3 %vm1608_vm2, %v1854_v19  ;;  %v1500_v34 = vmax.f32 %v1492_v39, %v5555_v42  ;;  %v1553_v52 = vpop.permute.xlu1 %1552  ;;  %v2009_v15 = vpack.c.bf16 %v2002_v3, %v2001_v23  ;;  %v2080_v41 = vld [vmem:[#allocation2 + $0xe] sm:$0xff]  ;;  %v2081_v30 = vld [vmem:[#allocation2 + $0x16] sm:$0xff] }
 0x23f   : > { %v1521_v29 = vpop.permute.xlu0 %1520  ;;  %v2087_v4 = vpack.c.bf16 %v2080_v41, %v2079_v36  ;;  %v2006_v63 = vld [vmem:[#allocation2 + $0x2d] sm:$0xff]  ;;  %v2007_v55 = vld [vmem:[#allocation2 + $0x35] sm:$0xff] }
 0x240   : > { %v1540_v57 = vmax.f32 %v1500_v34, %v1521_v29  ;;  %v1929_v32 = vld [vmem:[#allocation2 + $0x34] sm:$0xff]  ;;  %v2012_v24 = vpack.c.bf16 %v2008_v17, %v2007_v55 }
 0x241   : > { %v1934_v7 = vpack.c.bf16 %v1930_v10, %v1929_v32  ;;  %v2084_v11 = vld [vmem:[#allocation2 + $0x2e] sm:$0xff]  ;;  %v2085_v49 = vld [vmem:[#allocation2 + $0x36] sm:$0xff] }
 0x242   : > { %v1572_v0 = vmax.f32 %v1540_v57, %v1553_v52  ;;  %v2090_v19 = vpack.c.bf16 %v2086_v50, %v2085_v49  ;;  %v4448_v52 = vld [vmem:[%s6163_s8 + $0x38] sm:$0xff] }
 0x243   : > { %2290 = vmatpush.bf16.msra.mxu3 %v4448_v52  ;;  %v4460_v49 = vld [vmem:[%s6163_s8 + $0x98] sm:$0xff] }
 0x244   : > { %v1604_v27 = vmax.f32 %v1572_v0, %v1585_v18  ;;  %v1694_v34 = vpop.f32.mrf.mxu0 }
 0x245   : > { %v1747_v29 = vpop.f32.mrf.mxu1 }
 0x246   : > { %1623 = vst.msk [vmem:[#allocation2 + $0x23] sm:$0xff] %vm1608_vm2, %v1604_v27  ;;  %v4444_v27 = vld [vmem:[%s6163_s8 + $0x18] sm:$0xff] }
 0x247   : > { %2355 = vmatpush.bf16.msra.mxu0 %v4444_v27 }
 0x24c   : > { %v5657_v0 = vpop.f32.mrf.mxu0 }
 0x24d   : > { %v1648_v28 = vld [vmem:[#allocation2 + $0x21] sm:$0xff]  ;;  %v1649_v59 = vld [vmem:[#allocation2 + $0x29] sm:$0xff]  ;;  %v5659_v18 = vpop.f32.mrf.mxu1 }
 0x24e   : > { %v1632_v53 = vld [vmem:[#allocation2 + $0x20] sm:$0xff]  ;;  %v1654_v13 = vpack.c.bf16 %v1649_v59, %v1648_v28  ;;  %v1633_v46 = vld [vmem:[#allocation2 + $0x28] sm:$0xff]  ;;  %v4452_v28 = vld [vmem:[%s6163_s8 + $0x58] sm:$0xff] }
 0x24f   : > { %v1771_v58 = vld [vmem:[#allocation2 + $0x22] sm:$0xff]  ;;  %v1772_v43 = vld [vmem:[#allocation2 + $0x2a] sm:$0xff]  ;;  %v1638_v44 = vpack.c.bf16 %v1633_v46, %v1632_v53  ;;  %2441 = vmatpush.bf16.msrb.mxu1 %v4452_v28 }
 0x250   : > { %v1777_v38 = vpack.c.bf16 %v1772_v43, %v1771_v58  ;;  %v1849_v26 = vld [vmem:[#allocation2 + $0x23] sm:$0xff]  ;;  %3906 = vmatmul.msk.bf16.gmra.mxu0 %vm1608_vm2, %v1654_v13  ;;  %v4447_v46 = vld [vmem:[%s6163_s8 + $0x30] sm:$0xff] }
 0x251   : > { %v1855_v42 = vpack.c.bf16 %v1850_v40, %v1849_v26  ;;  %3918 = vmatmul.msk.bf16.gmra.mxu1 %vm1608_vm2, %v1638_v44  ;;  %v1926_v54 = vld [vmem:[#allocation2 + $0x1c] sm:$0xff]  ;;  %v1927_v14 = vld [vmem:[#allocation2 + $0x24] sm:$0xff]  ;;  %2291 = vmatpush.bf16.msra.mxu3 %v4447_v46  ;;  %v4451_v26 = vld [vmem:[%s6163_s8 + $0x50] sm:$0xff] }
 0x252   : > { %3934 = vmatmul.msk.bf16.gmra.mxu2 %vm1608_vm2, %v1777_v38  ;;  %v2004_v48 = vld [vmem:[#allocation2 + $0x1d] sm:$0xff]  ;;  %v1932_v5 = vpack.c.bf16 %v1926_v54, %v1925_v61  ;;  %v2005_v8 = vld [vmem:[#allocation2 + $0x25] sm:$0xff]  ;;  %v1933_v2 = vpack.c.bf16 %v1928_v21, %v1927_v14  ;;  %v4443_v38 = vld [vmem:[%s6163_s8 + $0x10] sm:$0xff] }
 0x253   : > { %3950 = vmatmul.msk.bf16.gmra.mxu3 %vm1608_vm2, %v1855_v42  ;;  %v2010_v37 = vpack.c.bf16 %v2004_v48, %v2003_v25  ;;  %v2082_v47 = vld [vmem:[#allocation2 + $0x1e] sm:$0xff]  ;;  %v2011_v6 = vpack.c.bf16 %v2006_v63, %v2005_v8  ;;  %v2083_v62 = vld [vmem:[#allocation2 + $0x26] sm:$0xff]  ;;  %2356 = vmatpush.bf16.msra.mxu0 %v4443_v38  ;;  %v1748_v25 = vadd.f32 %v1747_v29, %v1694_v34 }
 0x254   : > { %v2088_v35 = vpack.c.bf16 %v2082_v47, %v2081_v30  ;;  %v2089_v60 = vpack.c.bf16 %v2084_v11, %v2083_v62  ;;  %2442 = vmatpush.bf16.msrb.mxu1 %v4451_v26  ;;  %v4456_v54 = vld [vmem:[%s6163_s8 + $0x78] sm:$0xff]  ;;  %v4445_v61 = vld [vmem:[%s6163_s8 + $0x20] sm:$0xff]  ;;  %v4454_v14 = vld [vmem:[%s6163_s8 + $0x68] sm:$0xff] }
 0x255   : > { %2292 = vmatpush.bf16.msra.mxu3 %v4446_v9  ;;  %2535 = vmatpush.bf16.msrb.mxu2 %v4456_v54  ;;  %v4441_v21 = vld [vmem:[%s6163_s8] sm:$0xff] }
 0x256   : > { %v4453_v63 = vld [vmem:[%s6163_s8 + $0x60] sm:$0xff] }
 0x258   : > { %2443 = vmatpush.bf16.msrb.mxu1 %v4450_v56 }
 0x259   : > { %2293 = vmatpush.bf16.msra.mxu3 %v4445_v61 }
 0x25d   : > { %2629 = vmatpush.bf16.msrb.mxu3 %v4460_v49  ;;  %v4463_v49 = vld [vmem:[%s6163_s8 + $0xb0] sm:$0xff] }
 0x260   : > { %3964 = vmatmul.msk.bf16.vlgmr.msrb.gmra.mxu0 %vm1608_vm2, %v1931_v33 }
 0x261   : > { %3980 = vmatmul.msk.bf16.vlgmr.msra.gmra.mxu1 %vm1608_vm2, %v2009_v15 }
 0x262   : > { %3935 = vmatmul.msk.bf16.gmra.mxu2 %vm1608_vm2, %v1778_v12  ;;  %v4442_v12 = vld [vmem:[%s6163_s8 + $0x8] sm:$0xff] }
 0x263   : > { %3951 = vmatmul.msk.bf16.gmra.mxu3 %vm1608_vm2, %v1856_v1  ;;  %2357 = vmatpush.bf16.msra.mxu0 %v4442_v12 }
 0x267   : > { %2358 = vmatpush.bf16.msra.mxu0 %v4441_v21 }
 0x270   : > { %3965 = vmatmul.msk.bf16.gmra.mxu0 %vm1608_vm2, %v1932_v5  ;;  %v4455_v5 = vld [vmem:[%s6163_s8 + $0x70] sm:$0xff] }
 0x271   : > { %3981 = vmatmul.msk.bf16.gmra.mxu1 %vm1608_vm2, %v2010_v37  ;;  %2536 = vmatpush.bf16.msrb.mxu2 %v4455_v5 }
 0x272   : > { %3996 = vmatmul.msk.bf16.vlgmr.msra.gmra.mxu2 %vm1608_vm2, %v2087_v4 }
 0x275   : > { %2537 = vmatpush.bf16.msrb.mxu2 %v4454_v14 }
 0x279   : > { %2538 = vmatpush.bf16.msrb.mxu2 %v4453_v63 }
 0x280   : > { %3966 = vmatmul.msk.bf16.gmra.mxu0 %vm1608_vm2, %v1933_v2  ;;  %v4449_v2 = vld [vmem:[%s6163_s8 + $0x40] sm:$0xff] }
 0x281   : > { %3982 = vmatmul.msk.bf16.gmra.mxu1 %vm1608_vm2, %v2011_v6  ;;  %v1750_v6 = vadd.f32 %v5659_v18, %v5657_v0 }
 0x282   : > { %3997 = vmatmul.msk.bf16.gmra.mxu2 %vm1608_vm2, %v2088_v35  ;;  %2444 = vmatpush.bf16.msrb.mxu1 %v4449_v2 }
 0x290   : > { %3967 = vmatmul.msk.bf16.gmra.mxu0 %vm1608_vm2, %v1934_v7  ;;  %v5778_v7 = vld [vmem:[%s6161_s6] ss:$0 sm:$0xff] }
 0x291   : > { %3983 = vmatmul.msk.bf16.gmra.mxu1 %vm1608_vm2, %v2012_v24 }
 0x292   : > { %3998 = vmatmul.msk.bf16.gmra.mxu2 %vm1608_vm2, %v2089_v60  ;;  %v5783_v60 = vld [vmem:[%s6162_s7] ss:$0 sm:$0xff] }
 0x29e   : > { %v5649_v22 = vpop.f32.mrf.mxu2 }
 0x29f   : > { %v5688_v40 = vpop.f32.mrf.mxu3 }
 0x2a2   : > { %3999 = vmatmul.msk.bf16.gmra.mxu2 %vm1608_vm2, %v2090_v19 }
 0x2a6   : > { %v5652_v39 = vpop.f32.mrf.mxu2 }
 0x2a7   : > { %v5701_v31 = vpop.f32.mrf.mxu3 }
 0x2ae   : > { %v1817_v57 = vpop.f32.mrf.mxu2 }
 0x2af   : > { %v1895_v1 = vpop.f32.mrf.mxu3  ;;  %v1837_v37 = vadd.f32 %v1817_v57, %v1748_v25 }
 0x2b1   : > { %v1915_v47 = vadd.f32 %v1895_v1, %v1837_v37 }
 0x2b6   : > { %v5667_v59 = vpop.f32.mrf.mxu2 }
 0x2b7   : > { %v1897_v4 = vpop.f32.mrf.mxu3  ;;  %v1838_v32 = vadd.f32 %v5667_v59, %v1750_v6 }
 0x2b8   : > { %v5669_v53 = vpop.f32.mrf.mxu0 }
 0x2b9   : > { %v5671_v13 = vpop.f32.mrf.mxu1  ;;  %v1916_v11 = vadd.f32 %v1897_v4, %v1838_v32 }
 0x2ba   : > { %v1753_v50 = vadd.f32 %v5671_v13, %v5669_v53  ;;  %v4464_v53 = vld [vmem:[%s6163_s8 + $0xb8] sm:$0xff] }
 0x2bb   : > { %v4468_v13 = vld [vmem:[%s6163_s8 + $0xd8] sm:$0xff]  ;;  %2723 = vmatpush.bf16.msrb.mxu0 %v4464_v53  ;;  %v1763_v53 = vadd.f32 %v5688_v40, %v5649_v22 }
 0x2bc   : > { %2817 = vmatpush.bf16.msra.mxu1 %v4468_v13 }
 0x2bf   : > { %2724 = vmatpush.bf16.msrb.mxu0 %v4463_v49 }
 0x2c0   : > { %v5676_v58 = vpop.f32.mrf.mxu2  ;;  %v5678_v43 = vpop.f32.mrf.mxu0 }
 0x2c1   : > { %v5680_v44 = vpop.f32.mrf.mxu1  ;;  %v1900_v62 = vpop.f32.mrf.mxu3  ;;  %v1839_v57 = vadd.f32 %v5676_v58, %v1753_v50  ;;  %v4467_v50 = vld [vmem:[%s6163_s8 + $0xd0] sm:$0xff] }
 0x2c2   : > { %v1755_v58 = vadd.f32 %v5680_v44, %v5678_v43  ;;  %v4459_v43 = vld [vmem:[%s6163_s8 + $0x90] sm:$0xff]  ;;  %2818 = vmatpush.bf16.msra.mxu1 %v4467_v50 }
 0x2c3   : > { %v1917_v59 = vadd.f32 %v1900_v62, %v1839_v57  ;;  %2630 = vmatpush.bf16.msrb.mxu3 %v4459_v43 }
 0x2c6   : > { %2819 = vmatpush.bf16.msra.mxu1 %v4466_v51 }
 0x2c8   : > { %v5690_v42 = vpop.f32.mrf.mxu2 }
 0x2c9   : > { %v1902_v46 = vpop.f32.mrf.mxu3  ;;  %v1840_v12 = vadd.f32 %v5690_v42, %v1755_v58 }
 0x2cb   : > { %v1918_v61 = vadd.f32 %v1902_v46, %v1840_v12 }
 0x2cd   : > { %v5692_v45 = vpop.f32.mrf.mxu0 }
 0x2ce   : > { %v5694_v20 = vpop.f32.mrf.mxu1 }
 0x2cf   : > { %v1758_v44 = vadd.f32 %v5694_v20, %v5692_v45 }
 0x2d5   : > { %v5699_v3 = vpop.f32.mrf.mxu2  ;;  %v5703_v16 = vpop.f32.mrf.mxu0 }
 0x2d6   : > { %v5705_v33 = vpop.f32.mrf.mxu1  ;;  %v1905_v5 = vpop.f32.mrf.mxu3  ;;  %v1841_v4 = vadd.f32 %v5699_v3, %v1758_v44 }
 0x2dd   : > { %v5707_v23 = vpop.f32.mrf.mxu2  ;;  %v1973_v15 = vpop.f32.mrf.mxu0 }
 0x2de   : > { %v2051_v48 = vpop.f32.mrf.mxu1  ;;  %v1993_v35 = vadd.f32 %v1973_v15, %v1915_v47 }
 0x2e0   : > { %v2071_v10 = vadd.f32 %v2051_v48, %v1993_v35  ;;  %v1919_v35 = vadd.f32 %v1905_v5, %v1841_v4 }
 0x2e5   : > { %v5734_v41 = vpop.f32.mrf.mxu2  ;;  %v1975_v36 = vpop.f32.mrf.mxu0 }
 0x2e6   : > { %v2053_v30 = vpop.f32.mrf.mxu1  ;;  %v1994_v19 = vadd.f32 %v1975_v36, %v1916_v11 }
 0x2e8   : > { %v2072_v0 = vadd.f32 %v2053_v30, %v1994_v19 }
 0x2ed   : > { %v5761_v8 = vpop.f32.mrf.mxu2  ;;  %v1978_v55 = vpop.f32.mrf.mxu0 }
 0x2ee   : > { %v2056_v29 = vpop.f32.mrf.mxu1  ;;  %v1995_v26 = vadd.f32 %v1978_v55, %v1917_v59 }
 0x2f0   : > { %v2073_v1 = vadd.f32 %v2056_v29, %v1995_v26  ;;  %v1907_v29 = vpop.f32.mrf.mxu3 }
 0x2f5   : > { %v2129_v17 = vpop.f32.mrf.mxu2  ;;  %v1980_v27 = vpop.f32.mrf.mxu0 }
 0x2f6   : > { %v2149_v24 = vadd.f32 %v2129_v17, %v2071_v10  ;;  %v2058_v15 = vpop.f32.mrf.mxu1  ;;  %v1996_v42 = vadd.f32 %v1980_v27, %v1918_v61 }
 0x2f8   : > { %v2161_v34 = vmul.f32 %v5778_v7, %v2149_v24  ;;  %v2074_v21 = vadd.f32 %v2058_v15, %v1996_v42  ;;  %v1910_v12 = vpop.f32.mrf.mxu3 }
 0x2fa   : > { %v2173_v52 = vadd.f32 %v5783_v60, %v2161_v34  ;;  %v1760_v34 = vadd.f32 %v5705_v33, %v5703_v16 }
 0x2fc   : > { %v2181_v18 = vmax.f32 %v2173_v52, 0.0 }
 0x2fd   : > { %v2131_v28 = vpop.f32.mrf.mxu2  ;;  %v1983_v36 = vpop.f32.mrf.mxu0 }
 0x2fe   : > { %2200 = vst.msk [vmem:[#allocation3 + $0x3] sm:$0xff] %vm2189_vm5, %v2181_v18  ;;  %v2150_v38 = vadd.f32 %v2131_v28, %v2072_v0  ;;  %v2061_v32 = vpop.f32.mrf.mxu1  ;;  %v1997_v57 = vadd.f32 %v1983_v36, %v1919_v35  ;;  %v1842_v18 = vadd.f32 %v5707_v23, %v1760_v34  ;;  %v4462_v23 = vld [vmem:[%s6163_s8 + $0xa8] sm:$0xff] }
 0x2ff   : > { %2725 = vmatpush.bf16.msrb.mxu0 %v4462_v23 }
 0x300   : > { %v2162_v9 = vmul.f32 %v5778_v7, %v2150_v38  ;;  %v2075_v16 = vadd.f32 %v2061_v32, %v1997_v57  ;;  %v1920_v59 = vadd.f32 %v1907_v29, %v1842_v18  ;;  %v4458_v38 = vld [vmem:[%s6163_s8 + $0x88] sm:$0xff] }
 0x301   : > { %2631 = vmatpush.bf16.msrb.mxu3 %v4458_v38 }
 0x302   : > { %v2174_v56 = vadd.f32 %v5783_v60, %v2162_v9  ;;  %v1843_v9 = vadd.f32 %v5734_v41, %v1763_v53 }
 0x304   : > { %v2182_v54 = vmax.f32 %v2174_v56, 0.0  ;;  %v1921_v61 = vadd.f32 %v1910_v12, %v1843_v9 }
 0x305   : > { %v2134_v48 = vpop.f32.mrf.mxu2  ;;  %v2229_v47 = vld [vmem:[#allocation3 + $0x1] sm:$0xff]  ;;  %v1985_v0 = vpop.f32.mrf.mxu0 }
 0x306   : > { %2201 = vst.msk [vmem:[#allocation3 + $0xb] sm:$0xff] %vm2189_vm5, %v2182_v54  ;;  %v2151_v25 = vadd.f32 %v2134_v48, %v2073_v1  ;;  %v2209_v63 = vld [vmem:[#allocation3] sm:$0xff]  ;;  %v2063_v13 = vpop.f32.mrf.mxu1  ;;  %v1998_v58 = vadd.f32 %v1985_v0, %v1920_v59 }
 0x307   : > { %v2380_v30 = vld [vmem:[#allocation3 + $0x2] sm:$0xff] }
 0x308   : > { %v2163_v37 = vmul.f32 %v5778_v7, %v2151_v25  ;;  %v2474_v6 = vld [vmem:[#allocation3 + $0x3] sm:$0xff]  ;;  %v2076_v1 = vadd.f32 %v2063_v13, %v1998_v58 }
 0x30a   : > { %v2175_v14 = vadd.f32 %v5783_v60, %v2163_v37 }
 0x30c   : > { %v2183_v2 = vmax.f32 %v2175_v14, 0.0 }
 0x30d   : > { %v2136_v55 = vpop.f32.mrf.mxu2  ;;  %v2230_v62 = vld [vmem:[#allocation3 + $0x9] sm:$0xff]  ;;  %v1988_v15 = vpop.f32.mrf.mxu0 }
 0x30e   : > { %v2210_v45 = vld [vmem:[#allocation3 + $0x8] sm:$0xff]  ;;  %2202 = vst.msk [vmem:[#allocation3 + $0x13] sm:$0xff] %vm2189_vm5, %v2183_v2  ;;  %v2152_v10 = vadd.f32 %v2136_v55, %v2074_v21  ;;  %v2237_v17 = vpack.c.bf16 %v2230_v62, %v2229_v47  ;;  %v1765_v21 = vadd.f32 %v5701_v31, %v5652_v39  ;;  %v1999_v2 = vadd.f32 %v1988_v15, %v1921_v61  ;;  %v4461_v39 = vld [vmem:[%s6163_s8 + $0xa0] sm:$0xff]  ;;  %v1912_v55 = vpop.f32.mrf.mxu3 }
 0x30f   : > { %v2381_v20 = vld [vmem:[#allocation3 + $0xa] sm:$0xff]  ;;  %v2217_v11 = vpack.c.bf16 %v2210_v45, %v2209_v63  ;;  %v4465_v31 = vld [vmem:[%s6163_s8 + $0xc0] sm:$0xff]  ;;  %2726 = vmatpush.bf16.msrb.mxu0 %v4461_v39 }
 0x310   : > { %v2388_v3 = vpack.c.bf16 %v2381_v20, %v2380_v30  ;;  %v2475_v24 = vld [vmem:[#allocation3 + $0xb] sm:$0xff]  ;;  %v2164_v52 = vmul.f32 %v5778_v7, %v2152_v10  ;;  %4024 = vmatmul.msk.bf16.vlgmr.msra.gmra.mxu3 %vm2189_vm5, %v2237_v17  ;;  %v2066_v30 = vpop.f32.mrf.mxu1  ;;  %v1844_v35 = vadd.f32 %v5761_v8, %v1765_v21  ;;  %2820 = vmatpush.bf16.msra.mxu1 %v4465_v31 }
 0x311   : > { %v2482_v19 = vpack.c.bf16 %v2475_v24, %v2474_v6  ;;  %4044 = vmatmul.msk.bf16.vlgmr.msra.gmra.mxu0 %vm2189_vm5, %v2217_v11  ;;  %v4457_v6 = vld [vmem:[%s6163_s8 + $0x80] sm:$0xff]  ;;  %v2077_v62 = vadd.f32 %v2066_v30, %v1999_v2 }
 0x312   : > { %4072 = vmatmul.msk.bf16.vlgmr.msrb.gmra.mxu1 %vm2189_vm5, %v2388_v3  ;;  %v2176_v27 = vadd.f32 %v5783_v60, %v2164_v52  ;;  %2632 = vmatpush.bf16.msrb.mxu3 %v4457_v6  ;;  %v1922_v17 = vadd.f32 %v1912_v55, %v1844_v35 }
 0x313   : > { %4100 = vmatmul.msk.bf16.vlgmr.msrb.gmra.mxu2 %vm2189_vm5, %v2482_v19 }
 0x314   : > { %v2184_v33 = vmax.f32 %v2176_v27, 0.0 }
 0x315   : > { %v2139_v28 = vpop.f32.mrf.mxu2  ;;  %v2231_v22 = vld [vmem:[#allocation3 + $0x11] sm:$0xff]  ;;  %v1990_v20 = vpop.f32.mrf.mxu0 }
 0x316   : > { %2203 = vst.msk [vmem:[#allocation3 + $0x1b] sm:$0xff] %vm2189_vm5, %v2184_v33  ;;  %v2153_v46 = vadd.f32 %v2139_v28, %v2075_v16  ;;  %v2211_v40 = vld [vmem:[#allocation3 + $0x10] sm:$0xff]  ;;  %v2000_v3 = vadd.f32 %v1990_v20, %v1922_v17 }
 0x317   : > { %v2382_v48 = vld [vmem:[#allocation3 + $0x12] sm:$0xff] }
 0x318   : > { %v2165_v26 = vmul.f32 %v5778_v7, %v2153_v46  ;;  %v2476_v4 = vld [vmem:[#allocation3 + $0x13] sm:$0xff]  ;;  %v2068_v8 = vpop.f32.mrf.mxu1 }
 0x319   : > { %v2078_v50 = vadd.f32 %v2068_v8, %v2000_v3  ;;  %v2663_v61 = vld [vmem:[#allocation3 + $0xd] sm:$0xff] }
 0x31a   : > { %v2177_v56 = vadd.f32 %v5783_v60, %v2165_v26 }
 0x31c   : > { %v2185_v54 = vmax.f32 %v2177_v56, 0.0 }
 0x31d   : > { %v2141_v5 = vpop.f32.mrf.mxu2  ;;  %v2232_v25 = vld [vmem:[#allocation3 + $0x19] sm:$0xff] }
 0x31e   : > { %v2212_v43 = vld [vmem:[#allocation3 + $0x18] sm:$0xff]  ;;  %2204 = vst.msk [vmem:[#allocation3 + $0x23] sm:$0xff] %vm2189_vm5, %v2185_v54  ;;  %v2154_v36 = vadd.f32 %v2141_v5, %v2076_v1  ;;  %v2238_v42 = vpack.c.bf16 %v2232_v25, %v2231_v22  ;;  %v2757_v5 = vld [vmem:[#allocation3 + $0xe] sm:$0xff]  ;;  %v2568_v25 = vld [vmem:[#allocation3 + $0x4] sm:$0xff] }
 0x31f   : > { %v2383_v44 = vld [vmem:[#allocation3 + $0x1a] sm:$0xff]  ;;  %v2218_v41 = vpack.c.bf16 %v2212_v43, %v2211_v40  ;;  %v2662_v43 = vld [vmem:[#allocation3 + $0x5] sm:$0xff] }
 0x320   : > { %v2389_v37 = vpack.c.bf16 %v2383_v44, %v2382_v48  ;;  %v2477_v14 = vld [vmem:[#allocation3 + $0x1b] sm:$0xff]  ;;  %v2166_v63 = vmul.f32 %v5778_v7, %v2154_v36  ;;  %4025 = vmatmul.msk.bf16.gmra.mxu3 %vm2189_vm5, %v2238_v42  ;;  %v2670_v36 = vpack.c.bf16 %v2663_v61, %v2662_v43  ;;  %v2756_v42 = vld [vmem:[#allocation3 + $0x6] sm:$0xff] }
 0x321   : > { %v2483_v47 = vpack.c.bf16 %v2477_v14, %v2476_v4  ;;  %4045 = vmatmul.msk.bf16.gmra.mxu0 %vm2189_vm5, %v2218_v41  ;;  %v2764_v41 = vpack.c.bf16 %v2757_v5, %v2756_v42  ;;  %v2664_v21 = vld [vmem:[#allocation3 + $0x15] sm:$0xff]  ;;  %v4483_v42 = vld [vmem:[%s6166_s11 + $0x70] sm:$0xff] }
 0x322   : > { %4073 = vmatmul.msk.bf16.gmra.mxu1 %vm2189_vm5, %v2389_v37  ;;  %v2178_v32 = vadd.f32 %v5783_v60, %v2166_v63  ;;  %v2758_v30 = vld [vmem:[#allocation3 + $0x16] sm:$0xff] }
 0x323   : > { %4101 = vmatmul.msk.bf16.gmra.mxu2 %vm2189_vm5, %v2483_v47  ;;  %v2570_v47 = vld [vmem:[#allocation3 + $0x14] sm:$0xff] }
 0x324   : > { %v2186_v45 = vmax.f32 %v2178_v32, 0.0  ;;  %v4484_v5 = vld [vmem:[%s6166_s11 + $0x78] sm:$0xff] }
 0x325   : > { %v2144_v10 = vpop.f32.mrf.mxu2  ;;  %v2233_v34 = vld [vmem:[#allocation3 + $0x21] sm:$0xff]  ;;  %3217 = vmatpush.bf16.msrb.mxu1 %v4484_v5 }
 0x326   : > { %2205 = vst.msk [vmem:[#allocation3 + $0x2b] sm:$0xff] %vm2189_vm5, %v2186_v45  ;;  %v2155_v11 = vadd.f32 %v2144_v10, %v2077_v62  ;;  %v2213_v29 = vld [vmem:[#allocation3 + $0x20] sm:$0xff] }
 0x327   : > { %v2384_v57 = vld [vmem:[#allocation3 + $0x22] sm:$0xff] }
 0x328   : > { %v2167_v24 = vmul.f32 %v5778_v7, %v2155_v11  ;;  %v2478_v46 = vld [vmem:[#allocation3 + $0x23] sm:$0xff] }
 0x329   : > { %v2571_v37 = vld [vmem:[#allocation3 + $0x1c] sm:$0xff]  ;;  %3218 = vmatpush.bf16.msrb.mxu1 %v4483_v42 }
 0x32a   : > { %v2179_v49 = vadd.f32 %v5783_v60, %v2167_v24  ;;  %v2665_v4 = vld [vmem:[#allocation3 + $0x1d] sm:$0xff]  ;;  %v2577_v2 = vpack.c.bf16 %v2571_v37, %v2570_v47 }
 0x32b   : > { %v2759_v14 = vld [vmem:[#allocation3 + $0x1e] sm:$0xff]  ;;  %v2671_v63 = vpack.c.bf16 %v2665_v4, %v2664_v21 }
 0x32c   : > { %v2187_v19 = vmax.f32 %v2179_v49, 0.0  ;;  %v2765_v6 = vpack.c.bf16 %v2759_v14, %v2758_v30  ;;  %v4482_v4 = vld [vmem:[%s6166_s11 + $0x68] sm:$0xff]  ;;  %v4477_v30 = vld [vmem:[%s6166_s11 + $0x40] sm:$0xff] }
 0x32d   : > { %v2146_v52 = vpop.f32.mrf.mxu2  ;;  %v2234_v0 = vld [vmem:[#allocation3 + $0x29] sm:$0xff]  ;;  %3219 = vmatpush.bf16.msrb.mxu1 %v4482_v4 }
 0x32e   : > { %v2214_v18 = vld [vmem:[#allocation3 + $0x28] sm:$0xff]  ;;  %2206 = vst.msk [vmem:[#allocation3 + $0x33] sm:$0xff] %vm2189_vm5, %v2187_v19  ;;  %v2156_v16 = vadd.f32 %v2146_v52, %v2078_v50  ;;  %v2239_v33 = vpack.c.bf16 %v2234_v0, %v2233_v34  ;;  %v4476_v52 = vld [vmem:[%s6166_s11 + $0x38] sm:$0xff] }
 0x32f   : > { %v2385_v27 = vld [vmem:[#allocation3 + $0x2a] sm:$0xff]  ;;  %v2219_v28 = vpack.c.bf16 %v2214_v18, %v2213_v29  ;;  %2978 = vmatpush.bf16.msra.mxu2 %v4476_v52 }
 0x330   : > { %v2390_v59 = vpack.c.bf16 %v2385_v27, %v2384_v57  ;;  %v2479_v38 = vld [vmem:[#allocation3 + $0x2b] sm:$0xff]  ;;  %v2168_v53 = vmul.f32 %v5778_v7, %v2156_v16  ;;  %4026 = vmatmul.msk.bf16.gmra.mxu3 %vm2189_vm5, %v2239_v33 }
 0x331   : > { %v2484_v23 = vpack.c.bf16 %v2479_v38, %v2478_v46  ;;  %4046 = vmatmul.msk.bf16.gmra.mxu0 %vm2189_vm5, %v2219_v28  ;;  %v2572_v32 = vld [vmem:[#allocation3 + $0x24] sm:$0xff]  ;;  %v4472_v16 = vld [vmem:[%s6166_s11 + $0x18] sm:$0xff] }
 0x332   : > { %4074 = vmatmul.msk.bf16.gmra.mxu1 %vm2189_vm5, %v2390_v59  ;;  %v2180_v13 = vadd.f32 %v5783_v60, %v2168_v53  ;;  %v2569_v60 = vld [vmem:[#allocation3 + $0xc] sm:$0xff]  ;;  %3042 = vmatpush.bf16.msra.mxu3 %v4472_v16 }
 0x333   : > { %4102 = vmatmul.msk.bf16.gmra.mxu2 %vm2189_vm5, %v2484_v23  ;;  %v2576_v44 = vpack.c.bf16 %v2569_v60, %v2568_v25  ;;  %v2666_v55 = vld [vmem:[#allocation3 + $0x25] sm:$0xff]  ;;  %v4480_v46 = vld [vmem:[%s6166_s11 + $0x58] sm:$0xff] }
 0x334   : > { %v2188_v51 = vmax.f32 %v2180_v13, 0.0  ;;  %v2760_v20 = vld [vmem:[#allocation3 + $0x26] sm:$0xff]  ;;  %3126 = vmatpush.bf16.msra.mxu0 %v4480_v46 }
 0x335   : > { %v2235_v58 = vld [vmem:[#allocation3 + $0x31] sm:$0xff]  ;;  %v4475_v38 = vld [vmem:[%s6166_s11 + $0x30] sm:$0xff] }
 0x336   : > { %2208 = vst.msk [vmem:[#allocation3 + $0x3b] sm:$0x3f] %vm2207_vm7, %v2188_v51  ;;  %v2215_v26 = vld [vmem:[#allocation3 + $0x30] sm:$0xff]  ;;  %2979 = vmatpush.bf16.msra.mxu2 %v4475_v38  ;;  %v4471_v51 = vld [vmem:[%s6166_s11 + $0x10] sm:$0xff] }
 0x337   : > { %v2386_v9 = vld [vmem:[#allocation3 + $0x32] sm:$0xff]  ;;  %3043 = vmatpush.bf16.msra.mxu3 %v4471_v51 }
 0x338   : > { %v2480_v22 = vld [vmem:[#allocation3 + $0x33] sm:$0xff] }
 0x339   : > { %v2573_v39 = vld [vmem:[#allocation3 + $0x2c] sm:$0xff] }
 0x33a   : > { %v2667_v31 = vld [vmem:[#allocation3 + $0x2d] sm:$0xff]  ;;  %v2578_v62 = vpack.c.bf16 %v2573_v39, %v2572_v32 }
 0x33b   : > { %v2761_v35 = vld [vmem:[#allocation3 + $0x2e] sm:$0xff]  ;;  %v2672_v45 = vpack.c.bf16 %v2667_v31, %v2666_v55 }
 0x33c   : > { %v2766_v10 = vpack.c.bf16 %v2761_v35, %v2760_v20  ;;  %v5977_v20 = vld [vmem:[%s6164_s9] ss:$0 sm:$0xff] }
 0x33d   : > { %v2236_v12 = vld [vmem:[#allocation3 + $0x39] sm:$0x3f] }
 0x33e   : > { %v2216_v56 = vld [vmem:[#allocation3 + $0x38] sm:$0x3f]  ;;  %v2240_v15 = vpack.c.bf16 %v2236_v12, %v2235_v58  ;;  %v2763_v8 = vld [vmem:[#allocation3 + $0x3e] sm:$0x3f]  ;;  %v4479_v12 = vld [vmem:[%s6166_s11 + $0x50] sm:$0xff] }
 0x33f   : > { %v2387_v7 = vld [vmem:[#allocation3 + $0x3a] sm:$0x3f]  ;;  %v2220_v1 = vpack.c.bf16 %v2216_v56, %v2215_v26  ;;  %v4474_v56 = vld [vmem:[%s6166_s11 + $0x28] sm:$0xff]  ;;  %3127 = vmatpush.bf16.msra.mxu0 %v4479_v12 }
 0x340   : > { %v2391_v54 = vpack.c.bf16 %v2387_v7, %v2386_v9  ;;  %v2481_v40 = vld [vmem:[#allocation3 + $0x3b] sm:$0x3f]  ;;  %4027 = vmatmul.msk.bf16.gmra.mxu3 %vm2189_vm5, %v2240_v15  ;;  %2980 = vmatpush.bf16.msra.mxu2 %v4474_v56 }
 0x341   : > { %v2485_v48 = vpack.c.bf16 %v2481_v40, %v2480_v22  ;;  %4047 = vmatmul.msk.bf16.gmra.mxu0 %vm2189_vm5, %v2220_v1  ;;  %v2574_v17 = vld [vmem:[#allocation3 + $0x34] sm:$0xff]  ;;  %v2575_v11 = vld [vmem:[#allocation3 + $0x3c] sm:$0x3f] }
 0x342   : > { %4075 = vmatmul.msk.bf16.gmra.mxu1 %vm2189_vm5, %v2391_v54  ;;  %v2668_v3 = vld [vmem:[#allocation3 + $0x35] sm:$0xff]  ;;  %v2669_v24 = vld [vmem:[#allocation3 + $0x3d] sm:$0x3f]  ;;  %v2579_v50 = vpack.c.bf16 %v2575_v11, %v2574_v17 }
 0x343   : > { %4103 = vmatmul.msk.bf16.gmra.mxu2 %vm2189_vm5, %v2485_v48  ;;  %v2762_v49 = vld [vmem:[#allocation3 + $0x36] sm:$0xff]  ;;  %v2673_v19 = vpack.c.bf16 %v2669_v24, %v2668_v3  ;;  %v4470_v48 = vld [vmem:[%s6166_s11 + $0x8] sm:$0xff] }
 0x344   : > { %v2767_v34 = vpack.c.bf16 %v2763_v8, %v2762_v49  ;;  %3044 = vmatpush.bf16.msra.mxu3 %v4470_v48  ;;  %v5982_v3 = vld [vmem:[%s6165_s10] ss:$0 sm:$0xff]  ;;  %v4488_v24 = vld [vmem:[%s6166_s11 + $0x98] sm:$0xff] }
 0x350   : > { %4128 = vmatmul.msk.bf16.vlgmr.msrb.gmra.mxu3 %vm2189_vm5, %v2576_v44  ;;  %v4478_v44 = vld [vmem:[%s6166_s11 + $0x48] sm:$0xff] }
 0x351   : > { %4156 = vmatmul.msk.bf16.vlgmr.msrb.gmra.mxu0 %vm2189_vm5, %v2670_v36  ;;  %v4473_v36 = vld [vmem:[%s6166_s11 + $0x20] sm:$0xff] }
 0x352   : > { %4184 = vmatmul.msk.bf16.vlgmr.msra.gmra.mxu1 %vm2189_vm5, %v2764_v41  ;;  %3128 = vmatpush.bf16.msra.mxu0 %v4478_v44 }
 0x353   : > { %2981 = vmatpush.bf16.msra.mxu2 %v4473_v36 }
 0x356   : > { %3129 = vmatpush.bf16.msra.mxu0 %v4477_v30 }
 0x357   : > { %3308 = vmatpush.bf16.msrb.mxu2 %v4488_v24 }
 0x360   : > { %4129 = vmatmul.msk.bf16.gmra.mxu3 %vm2189_vm5, %v2577_v2 }
 0x361   : > { %4157 = vmatmul.msk.bf16.gmra.mxu0 %vm2189_vm5, %v2671_v63  ;;  %v4469_v63 = vld [vmem:[%s6166_s11] sm:$0xff] }
 0x362   : > { %4185 = vmatmul.msk.bf16.gmra.mxu1 %vm2189_vm5, %v2765_v6  ;;  %v4481_v6 = vld [vmem:[%s6166_s11 + $0x60] sm:$0xff]  ;;  %3045 = vmatpush.bf16.msra.mxu3 %v4469_v63 }
 0x363   : > { %3220 = vmatpush.bf16.msrb.mxu1 %v4481_v6 }
 0x370   : > { %4130 = vmatmul.msk.bf16.gmra.mxu3 %vm2189_vm5, %v2578_v62 }
 0x371   : > { %4158 = vmatmul.msk.bf16.gmra.mxu0 %vm2189_vm5, %v2672_v45 }
 0x372   : > { %4186 = vmatmul.msk.bf16.gmra.mxu1 %vm2189_vm5, %v2766_v10 }
 0x380   : > { %4131 = vmatmul.msk.bf16.gmra.mxu3 %vm2189_vm5, %v2579_v50 }
 0x381   : > { %4159 = vmatmul.msk.bf16.gmra.mxu0 %vm2189_vm5, %v2673_v19 }
 0x382   : > { %4187 = vmatmul.msk.bf16.gmra.mxu1 %vm2189_vm5, %v2767_v34 }
 0x38e   : > { %v2360_v29 = vpop.f32.mrf.mxu0 }
 0x38f   : > { %v2446_v57 = vpop.f32.mrf.mxu1 }
 0x393   : > { %v2295_v0 = vpop.f32.mrf.mxu3 }
 0x394   : > { %v2361_v41 = vadd.f32 %v2360_v29, %v2295_v0 }
 0x396   : > { %v2362_v18 = vpop.f32.mrf.mxu0  ;;  %v2540_v60 = vpop.f32.mrf.mxu2  ;;  %v2466_v21 = vadd.f32 %v2446_v57, %v2361_v41 }
 0x397   : > { %v2448_v27 = vpop.f32.mrf.mxu1 }
 0x398   : > { %v2560_v39 = vadd.f32 %v2540_v60, %v2466_v21 }
 0x39b   : > { %v2297_v33 = vpop.f32.mrf.mxu3 }
 0x39c   : > { %v2363_v31 = vadd.f32 %v2362_v18, %v2297_v33  ;;  %v4492_v33 = vld [vmem:[%s6166_s11 + $0xb8] sm:$0xff] }
 0x39d   : > { %3399 = vmatpush.bf16.msrb.mxu3 %v4492_v33 }
 0x39e   : > { %v5898_v28 = vpop.f32.mrf.mxu0  ;;  %v2542_v14 = vpop.f32.mrf.mxu2  ;;  %v2467_v62 = vadd.f32 %v2448_v27, %v2363_v31 }
 0x39f   : > { %v5900_v59 = vpop.f32.mrf.mxu1 }
 0x3a0   : > { %v2561_v49 = vadd.f32 %v2542_v14, %v2467_v62 }
 0x3a3   : > { %v2300_v23 = vpop.f32.mrf.mxu3 }
 0x3a4   : > { %v2366_v8 = vadd.f32 %v5898_v28, %v2300_v23 }
 0x3a6   : > { %v5908_v53 = vpop.f32.mrf.mxu0  ;;  %v2545_v17 = vpop.f32.mrf.mxu2  ;;  %v2468_v52 = vadd.f32 %v5900_v59, %v2366_v8 }
 0x3a7   : > { %v5910_v13 = vpop.f32.mrf.mxu1 }
 0x3a8   : > { %v2562_v46 = vadd.f32 %v2545_v17, %v2468_v52 }
 0x3ab   : > { %v5915_v58 = vpop.f32.mrf.mxu3 }
 0x3ac   : > { %v2368_v38 = vadd.f32 %v5908_v53, %v5915_v58  ;;  %v4496_v53 = vld [vmem:[%s6166_s11 + $0xd8] sm:$0xff]  ;;  %v4487_v58 = vld [vmem:[%s6166_s11 + $0x90] sm:$0xff] }
 0x3ad   : > { %3490 = vmatpush.bf16.msrb.mxu0 %v4496_v53  ;;  %3309 = vmatpush.bf16.msrb.mxu2 %v4487_v58 }
 0x3ae   : > { %v5917_v26 = vpop.f32.mrf.mxu0  ;;  %v2547_v28 = vpop.f32.mrf.mxu2  ;;  %v2469_v48 = vadd.f32 %v5910_v13, %v2368_v38 }
 0x3af   : > { %v5919_v9 = vpop.f32.mrf.mxu1 }
 0x3b0   : > { %v2563_v42 = vadd.f32 %v2547_v28, %v2469_v48  ;;  %v4490_v28 = vld [vmem:[%s6166_s11 + $0xa8] sm:$0xff] }
 0x3b3   : > { %v5927_v7 = vpop.f32.mrf.mxu3 }
 0x3b4   : > { %v2371_v41 = vadd.f32 %v5917_v26, %v5927_v7 }
 0x3b6   : > { %v5929_v15 = vpop.f32.mrf.mxu0  ;;  %v2550_v4 = vpop.f32.mrf.mxu2 }
 0x3b7   : > { %v5931_v1 = vpop.f32.mrf.mxu1 }
 0x3bb   : > { %v5933_v54 = vpop.f32.mrf.mxu3 }
 0x3be   : > { %v5935_v22 = vpop.f32.mrf.mxu0  ;;  %v2552_v52 = vpop.f32.mrf.mxu2 }
 0x3bf   : > { %v5937_v40 = vpop.f32.mrf.mxu1 }
 0x3c3   : > { %v5942_v61 = vpop.f32.mrf.mxu3 }
 0x3c6   : > { %v5947_v25 = vpop.f32.mrf.mxu0 }
 0x3c7   : > { %v5949_v43 = vpop.f32.mrf.mxu1 }
 0x3cb   : > { %v5960_v37 = vpop.f32.mrf.mxu3 }
 0x3ce   : > { %v2728_v47 = vpop.f32.mrf.mxu0 }
 0x3cf   : > { %v2822_v2 = vpop.f32.mrf.mxu1 }
 0x3d3   : > { %v2634_v35 = vpop.f32.mrf.mxu3 }
 0x3d4   : > { %v2654_v32 = vadd.f32 %v2634_v35, %v2560_v39 }
 0x3d6   : > { %v2730_v55 = vpop.f32.mrf.mxu0  ;;  %v2748_v45 = vadd.f32 %v2728_v47, %v2654_v32 }
 0x3d7   : > { %v2824_v10 = vpop.f32.mrf.mxu1 }
 0x3d8   : > { %v2842_v11 = vadd.f32 %v2822_v2, %v2748_v45  ;;  %v2470_v2 = vadd.f32 %v5919_v9, %v2371_v41  ;;  %v4491_v9 = vld [vmem:[%s6166_s11 + $0xb0] sm:$0xff] }
 0x3d9   : > { %3400 = vmatpush.bf16.msrb.mxu3 %v4491_v9 }
 0x3da   : > { %v2854_v50 = vmul.f32 %v5977_v20, %v2842_v11  ;;  %v2564_v8 = vadd.f32 %v2550_v4, %v2470_v2 }
 0x3db   : > { %v2636_v19 = vpop.f32.mrf.mxu3 }
 0x3dc   : > { %v2866_v34 = vadd.f32 %v5982_v3, %v2854_v50  ;;  %v2655_v29 = vadd.f32 %v2636_v19, %v2561_v49  ;;  %v2373_v50 = vadd.f32 %v5929_v15, %v5933_v54 }
 0x3dd   : > { %3401 = vmatpush.bf16.msrb.mxu3 %v4490_v28 }
 0x3de   : > { %v2733_v57 = vpop.f32.mrf.mxu0  ;;  %v2874_v0 = vmax.f32 %v2866_v34, 0.0  ;;  %v2749_v18 = vadd.f32 %v2730_v55, %v2655_v29 }
 0x3df   : > { %v2827_v27 = vpop.f32.mrf.mxu1 }
 0x3e0   : > { %2891 = vst.msk [vmem:[#allocation4 + $0x3] sm:$0xff] %vm2189_vm5, %v2874_v0  ;;  %v2843_v16 = vadd.f32 %v2824_v10, %v2749_v18  ;;  %v2471_v0 = vadd.f32 %v5931_v1, %v2373_v50  ;;  %v2376_v1 = vadd.f32 %v5935_v22, %v5942_v61 }
 0x3e2   : > { %v2855_v23 = vmul.f32 %v5977_v20, %v2843_v16  ;;  %v4486_v16 = vld [vmem:[%s6166_s11 + $0x88] sm:$0xff]  ;;  %v2472_v48 = vadd.f32 %v5937_v40, %v2376_v1 }
 0x3e3   : > { %v2639_v51 = vpop.f32.mrf.mxu3  ;;  %3310 = vmatpush.bf16.msrb.mxu2 %v4486_v16 }
 0x3e4   : > { %v2867_v59 = vadd.f32 %v5982_v3, %v2855_v23  ;;  %v2656_v12 = vadd.f32 %v2639_v51, %v2562_v46  ;;  %v2565_v46 = vadd.f32 %v2552_v52, %v2471_v0  ;;  %v4494_v23 = vld [vmem:[%s6166_s11 + $0xc8] sm:$0xff] }
 0x3e6   : > { %v2735_v56 = vpop.f32.mrf.mxu0  ;;  %v2875_v60 = vmax.f32 %v2867_v59, 0.0  ;;  %v2750_v5 = vadd.f32 %v2733_v57, %v2656_v12 }
 0x3e7   : > { %v2829_v44 = vpop.f32.mrf.mxu1  ;;  %v2918_v6 = vld [vmem:[#allocation4 + $0x1] sm:$0xff] }
 0x3e8   : > { %2892 = vst.msk [vmem:[#allocation4 + $0xb] sm:$0xff] %vm2189_vm5, %v2875_v60  ;;  %v2844_v36 = vadd.f32 %v2827_v27, %v2750_v5  ;;  %v2899_v39 = vld [vmem:[#allocation4] sm:$0xff] }
 0x3e9   : > { %v3066_v31 = vld [vmem:[#allocation4 + $0x2] sm:$0xff] }
 0x3ea   : > { %v2856_v13 = vmul.f32 %v5977_v20, %v2844_v36  ;;  %v3157_v17 = vld [vmem:[#allocation4 + $0x3] sm:$0xff]  ;;  %v2555_v36 = vpop.f32.mrf.mxu2 }
 0x3eb   : > { %v2641_v14 = vpop.f32.mrf.mxu3  ;;  %v4495_v27 = vld [vmem:[%s6166_s11 + $0xd0] sm:$0xff]  ;;  %v2566_v40 = vadd.f32 %v2555_v36, %v2472_v48 }
 0x3ec   : > { %v2868_v47 = vadd.f32 %v5982_v3, %v2856_v13  ;;  %v2657_v21 = vadd.f32 %v2641_v14, %v2563_v42  ;;  %3491 = vmatpush.bf16.msrb.mxu0 %v4495_v27 }
 0x3ee   : > { %v2876_v63 = vmax.f32 %v2868_v47, 0.0  ;;  %v2751_v30 = vadd.f32 %v2735_v56, %v2657_v21  ;;  %v2738_v35 = vpop.f32.mrf.mxu0 }
 0x3ef   : > { %v2919_v32 = vld [vmem:[#allocation4 + $0x9] sm:$0xff]  ;;  %v2832_v24 = vpop.f32.mrf.mxu1 }
 0x3f0   : > { %v2900_v55 = vld [vmem:[#allocation4 + $0x8] sm:$0xff]  ;;  %2893 = vst.msk [vmem:[#allocation4 + $0x13] sm:$0xff] %vm2189_vm5, %v2876_v63  ;;  %v2845_v7 = vadd.f32 %v2829_v44, %v2751_v30  ;;  %v2925_v62 = vpack.c.bf16 %v2919_v32, %v2918_v6  ;;  %3492 = vmatpush.bf16.msrb.mxu0 %v4494_v23  ;;  %v2378_v63 = vadd.f32 %v5947_v25, %v5960_v37  ;;  %v4489_v25 = vld [vmem:[%s6166_s11 + $0xa0] sm:$0xff] }
 0x3f1   : > { %v3067_v26 = vld [vmem:[#allocation4 + $0xa] sm:$0xff]  ;;  %v2906_v45 = vpack.c.bf16 %v2900_v55, %v2899_v39  ;;  %3402 = vmatpush.bf16.msrb.mxu3 %v4489_v25 }
 0x3f2   : > { %v3073_v10 = vpack.c.bf16 %v3067_v26, %v3066_v31  ;;  %v3158_v11 = vld [vmem:[#allocation4 + $0xb] sm:$0xff]  ;;  %v2857_v19 = vmul.f32 %v5977_v20, %v2845_v7  ;;  %4212 = vmatmul.msk.bf16.vlgmr.msra.gmra.mxu2 %vm2189_vm5, %v2925_v62  ;;  %v2473_v26 = vadd.f32 %v5949_v43, %v2378_v63 }
 0x3f3   : > { %v3164_v49 = vpack.c.bf16 %v3158_v11, %v3157_v17  ;;  %4232 = vmatmul.msk.bf16.vlgmr.msra.gmra.mxu3 %vm2189_vm5, %v2906_v45  ;;  %v2644_v34 = vpop.f32.mrf.mxu3  ;;  %v4485_v31 = vld [vmem:[%s6166_s11 + $0x80] sm:$0xff]  ;;  %v3339_v36 = vld [vmem:[#allocation4 + $0x5] sm:$0xff] }
 0x3f4   : > { %4260 = vmatmul.msk.bf16.vlgmr.msra.gmra.mxu0 %vm2189_vm5, %v3073_v10  ;;  %v2869_v29 = vadd.f32 %v5982_v3, %v2857_v19  ;;  %v2658_v57 = vadd.f32 %v2644_v34, %v2564_v8  ;;  %v4493_v37 = vld [vmem:[%s6166_s11 + $0xc0] sm:$0xff]  ;;  %3311 = vmatpush.bf16.msrb.mxu2 %v4485_v31  ;;  %v2557_v10 = vpop.f32.mrf.mxu2 }
 0x3f5   : > { %4288 = vmatmul.msk.bf16.vlgmr.msrb.gmra.mxu1 %vm2189_vm5, %v3164_v49  ;;  %3493 = vmatpush.bf16.msrb.mxu0 %v4493_v37  ;;  %v2567_v17 = vadd.f32 %v2557_v10, %v2473_v26 }
 0x3f6   : > { %v2877_v18 = vmax.f32 %v2869_v29, 0.0  ;;  %v2752_v15 = vadd.f32 %v2738_v35, %v2658_v57  ;;  %v2740_v33 = vpop.f32.mrf.mxu0 }
 0x3f7   : > { %v2834_v51 = vpop.f32.mrf.mxu1  ;;  %v2920_v44 = vld [vmem:[#allocation4 + $0x11] sm:$0xff] }
 0x3f8   : > { %2894 = vst.msk [vmem:[#allocation4 + $0x1b] sm:$0xff] %vm2189_vm5, %v2877_v18  ;;  %v2846_v54 = vadd.f32 %v2832_v24, %v2752_v15  ;;  %v2901_v22 = vld [vmem:[#allocation4 + $0x10] sm:$0xff] }
 0x3f9   : > { %v3068_v61 = vld [vmem:[#allocation4 + $0x12] sm:$0xff] }
 0x3fa   : > { %v2858_v38 = vmul.f32 %v5977_v20, %v2846_v54  ;;  %v3159_v47 = vld [vmem:[#allocation4 + $0x13] sm:$0xff] }
 0x3fb   : > { %v2646_v59 = vpop.f32.mrf.mxu3 }
 0x3fc   : > { %v2870_v12 = vadd.f32 %v5982_v3, %v2858_v38  ;;  %v2659_v56 = vadd.f32 %v2646_v59, %v2565_v46 }
 0x3fe   : > { %v2878_v60 = vmax.f32 %v2870_v12, 0.0  ;;  %v2753_v5 = vadd.f32 %v2740_v33, %v2659_v56  ;;  %v2743_v6 = vpop.f32.mrf.mxu0 }
 0x3ff   : > { %v2921_v53 = vld [vmem:[#allocation4 + $0x19] sm:$0xff]  ;;  %v2837_v55 = vpop.f32.mrf.mxu1 }
 0x400   : > { %v2902_v58 = vld [vmem:[#allocation4 + $0x18] sm:$0xff]  ;;  %2895 = vst.msk [vmem:[#allocation4 + $0x23] sm:$0xff] %vm2189_vm5, %v2878_v60  ;;  %v2847_v41 = vadd.f32 %v2834_v51, %v2753_v5  ;;  %v2926_v13 = vpack.c.bf16 %v2921_v53, %v2920_v44  ;;  %v3340_v44 = vld [vmem:[#allocation4 + $0xd] sm:$0xff] }
 0x401   : > { %v3069_v42 = vld [vmem:[#allocation4 + $0x1a] sm:$0xff]  ;;  %v2907_v4 = vpack.c.bf16 %v2902_v58, %v2901_v22  ;;  %v3431_v22 = vld [vmem:[#allocation4 + $0xe] sm:$0xff]  ;;  %v3346_v58 = vpack.c.bf16 %v3340_v44, %v3339_v36 }
 0x402   : > { %v3074_v14 = vpack.c.bf16 %v3069_v42, %v3068_v61  ;;  %v3160_v21 = vld [vmem:[#allocation4 + $0x1b] sm:$0xff]  ;;  %v2859_v30 = vmul.f32 %v5977_v20, %v2847_v41  ;;  %4213 = vmatmul.msk.bf16.gmra.mxu2 %vm2189_vm5, %v2926_v13  ;;  %v3248_v61 = vld [vmem:[#allocation4 + $0x4] sm:$0xff] }
 0x403   : > { %v3165_v2 = vpack.c.bf16 %v3160_v21, %v3159_v47  ;;  %4233 = vmatmul.msk.bf16.gmra.mxu3 %vm2189_vm5, %v2907_v4  ;;  %v2649_v39 = vpop.f32.mrf.mxu3  ;;  %v3430_v42 = vld [vmem:[#allocation4 + $0x6] sm:$0xff]  ;;  %v3250_v47 = vld [vmem:[#allocation4 + $0x14] sm:$0xff] }
 0x404   : > { %4261 = vmatmul.msk.bf16.gmra.mxu0 %vm2189_vm5, %v3074_v14  ;;  %v2871_v35 = vadd.f32 %v5982_v3, %v2859_v30  ;;  %v2660_v32 = vadd.f32 %v2649_v39, %v2566_v40  ;;  %v3437_v41 = vpack.c.bf16 %v3431_v22, %v3430_v42  ;;  %v3341_v21 = vld [vmem:[#allocation4 + $0x15] sm:$0xff] }
 0x405   : > { %4289 = vmatmul.msk.bf16.gmra.mxu1 %vm2189_vm5, %v3165_v2  ;;  %v3432_v63 = vld [vmem:[#allocation4 + $0x16] sm:$0xff] }
 0x406   : > { %v2879_v7 = vmax.f32 %v2871_v35, 0.0  ;;  %v2754_v62 = vadd.f32 %v2743_v6, %v2660_v32  ;;  %v2745_v8 = vpop.f32.mrf.mxu0 }
 0x407   : > { %v2922_v34 = vld [vmem:[#allocation4 + $0x21] sm:$0xff]  ;;  %v2839_v57 = vpop.f32.mrf.mxu1 }
 0x408   : > { %2896 = vst.msk [vmem:[#allocation4 + $0x2b] sm:$0xff] %vm2189_vm5, %v2879_v7  ;;  %v2848_v45 = vadd.f32 %v2837_v55, %v2754_v62  ;;  %v2903_v29 = vld [vmem:[#allocation4 + $0x20] sm:$0xff] }
 0x409   : > { %v3070_v43 = vld [vmem:[#allocation4 + $0x22] sm:$0xff] }
 0x40a   : > { %v2860_v11 = vmul.f32 %v5977_v20, %v2848_v45  ;;  %v3161_v33 = vld [vmem:[#allocation4 + $0x23] sm:$0xff] }
 0x40b   : > { %v2651_v9 = vpop.f32.mrf.mxu3  ;;  %v3251_v13 = vld [vmem:[#allocation4 + $0x1c] sm:$0xff] }
 0x40c   : > { %v2872_v24 = vadd.f32 %v5982_v3, %v2860_v11  ;;  %v2661_v49 = vadd.f32 %v2651_v9, %v2567_v17  ;;  %v3342_v4 = vld [vmem:[#allocation4 + $0x1d] sm:$0xff]  ;;  %v3256_v2 = vpack.c.bf16 %v3251_v13, %v3250_v47 }
 0x40d   : > { %v3433_v14 = vld [vmem:[#allocation4 + $0x1e] sm:$0xff]  ;;  %v3347_v40 = vpack.c.bf16 %v3342_v4, %v3341_v21 }
 0x40e   : > { %v2880_v50 = vmax.f32 %v2872_v24, 0.0  ;;  %v2755_v19 = vadd.f32 %v2745_v8, %v2661_v49  ;;  %v3438_v30 = vpack.c.bf16 %v3433_v14, %v3432_v63 }
 0x40f   : > { %v2923_v52 = vld [vmem:[#allocation4 + $0x29] sm:$0xff] }
 0x410   : > { %v2904_v0 = vld [vmem:[#allocation4 + $0x28] sm:$0xff]  ;;  %2897 = vst.msk [vmem:[#allocation4 + $0x33] sm:$0xff] %vm2189_vm5, %v2880_v50  ;;  %v2849_v15 = vadd.f32 %v2839_v57, %v2755_v19  ;;  %v2927_v54 = vpack.c.bf16 %v2923_v52, %v2922_v34 }
 0x411   : > { %v3071_v18 = vld [vmem:[#allocation4 + $0x2a] sm:$0xff]  ;;  %v2908_v27 = vpack.c.bf16 %v2904_v0, %v2903_v29 }
 0x412   : > { %v3075_v16 = vpack.c.bf16 %v3071_v18, %v3070_v43  ;;  %v3162_v28 = vld [vmem:[#allocation4 + $0x2b] sm:$0xff]  ;;  %v2861_v1 = vmul.f32 %v5977_v20, %v2849_v15  ;;  %4214 = vmatmul.msk.bf16.gmra.mxu2 %vm2189_vm5, %v2927_v54 }
 0x413   : > { %v3166_v46 = vpack.c.bf16 %v3162_v28, %v3161_v33  ;;  %4234 = vmatmul.msk.bf16.gmra.mxu3 %vm2189_vm5, %v2908_v27  ;;  %v3252_v25 = vld [vmem:[#allocation4 + $0x24] sm:$0xff] }
 0x414   : > { %4262 = vmatmul.msk.bf16.gmra.mxu0 %vm2189_vm5, %v3075_v16  ;;  %v2873_v38 = vadd.f32 %v5982_v3, %v2861_v1  ;;  %v3249_v3 = vld [vmem:[#allocation4 + $0xc] sm:$0xff] }
 0x415   : > { %4290 = vmatmul.msk.bf16.gmra.mxu1 %vm2189_vm5, %v3166_v46  ;;  %v3255_v53 = vpack.c.bf16 %v3249_v3, %v3248_v61  ;;  %v3343_v37 = vld [vmem:[#allocation4 + $0x25] sm:$0xff] }
 0x416   : > { %v2881_v23 = vmax.f32 %v2873_v38, 0.0  ;;  %v3434_v55 = vld [vmem:[#allocation4 + $0x26] sm:$0xff] }
 0x417   : > { %v2924_v51 = vld [vmem:[#allocation4 + $0x31] sm:$0xff] }
 0x418   : > { %2898 = vst.msk [vmem:[#allocation4 + $0x3b] sm:$0x3f] %vm2207_vm7, %v2881_v23  ;;  %v2905_v59 = vld [vmem:[#allocation4 + $0x30] sm:$0xff]  ;;  %v2928_v48 = vpack.c.bf16 %v2924_v51, %v2924_v51 }
 0x419   : > { %v3072_v12 = vld [vmem:[#allocation4 + $0x32] sm:$0xff]  ;;  %v2909_v60 = vpack.c.bf16 %v2905_v59, %v2905_v59 }
 0x41a   : > { %v3163_v56 = vld [vmem:[#allocation4 + $0x33] sm:$0xff]  ;;  %v3076_v20 = vpack.c.bf16 %v3072_v12, %v3072_v12 }
 0x41b   : > { %v3167_v5 = vpack.c.bf16 %v3163_v56, %v3163_v56  ;;  %v3253_v6 = vld [vmem:[#allocation4 + $0x2c] sm:$0xff] }
 0x41c   : > { %v3344_v39 = vld [vmem:[#allocation4 + $0x2d] sm:$0xff]  ;;  %v3257_v35 = vpack.c.bf16 %v3253_v6, %v3252_v25 }
 0x41d   : > { %v3435_v31 = vld [vmem:[#allocation4 + $0x2e] sm:$0xff]  ;;  %v3348_v32 = vpack.c.bf16 %v3344_v39, %v3343_v37 }
 0x41e   : > { %v3439_v26 = vpack.c.bf16 %v3435_v31, %v3434_v55 }
 0x41f   : > { %v3254_v7 = vld [vmem:[#allocation4 + $0x34] sm:$0xff] }
 0x420   : > { %v3345_v62 = vld [vmem:[#allocation4 + $0x35] sm:$0xff]  ;;  %v3258_v10 = vpack.c.bf16 %v3254_v7, %v3254_v7  ;;  %v6100_v7 = vld [vmem:[%s6167_s12] ss:$0 sm:$0xff] }
 0x421   : > { %v3436_v45 = vld [vmem:[#allocation4 + $0x36] sm:$0xff]  ;;  %v3349_v17 = vpack.c.bf16 %v3345_v62, %v3345_v62 }
 0x422   : > { %4215 = vmatmul.msk.bf16.gmra.mxu2 %vm2189_vm5, %v2928_v48  ;;  %v3440_v11 = vpack.c.bf16 %v3436_v45, %v3436_v45 }
 0x423   : > { %4235 = vmatmul.msk.bf16.gmra.mxu3 %vm2189_vm5, %v2909_v60 }
 0x424   : > { %4263 = vmatmul.msk.bf16.gmra.mxu0 %vm2189_vm5, %v3076_v20 }
 0x425   : > { %4291 = vmatmul.msk.bf16.gmra.mxu1 %vm2189_vm5, %v3167_v5 }
 0x432   : > { %4316 = vmatmul.msk.bf16.vlgmr.msrb.gmra.mxu2 %vm2189_vm5, %v3255_v53 }
 0x433   : > { %4344 = vmatmul.msk.bf16.vlgmr.msrb.gmra.mxu3 %vm2189_vm5, %v3346_v58 }
 0x434   : > { %4372 = vmatmul.msk.bf16.vlgmr.msrb.gmra.mxu0 %vm2189_vm5, %v3437_v41 }
 0x442   : > { %4317 = vmatmul.msk.bf16.gmra.mxu2 %vm2189_vm5, %v3256_v2 }
 0x443   : > { %4345 = vmatmul.msk.bf16.gmra.mxu3 %vm2189_vm5, %v3347_v40 }
 0x444   : > { %4373 = vmatmul.msk.bf16.gmra.mxu0 %vm2189_vm5, %v3438_v30 }
 0x452   : > { %4318 = vmatmul.msk.bf16.gmra.mxu2 %vm2189_vm5, %v3257_v35 }
 0x453   : > { %4346 = vmatmul.msk.bf16.gmra.mxu3 %vm2189_vm5, %v3348_v32 }
 0x454   : > { %4374 = vmatmul.msk.bf16.gmra.mxu0 %vm2189_vm5, %v3439_v26 }
 0x462   : > { %4319 = vmatmul.msk.bf16.gmra.mxu2 %vm2189_vm5, %v3258_v10  ;;  %v6105_v10 = vld [vmem:[%s6168_s13] ss:$0 sm:$0xff] }
 0x463   : > { %4347 = vmatmul.msk.bf16.gmra.mxu3 %vm2189_vm5, %v3349_v17 }
 0x464   : > { %4375 = vmatmul.msk.bf16.gmra.mxu0 %vm2189_vm5, %v3440_v11 }
 0x471   : > { %v3131_v9 = vpop.f32.mrf.mxu0 }
 0x472   : > { %v3222_v24 = vpop.f32.mrf.mxu1 }
 0x475   : > { %v2983_v49 = vpop.f32.mrf.mxu2 }
 0x476   : > { %v3047_v8 = vpop.f32.mrf.mxu3 }
 0x477   : > { %v3048_v50 = vadd.f32 %v3047_v8, %v2983_v49 }
 0x479   : > { %v3150_v19 = vadd.f32 %v3131_v9, %v3048_v50  ;;  %v3133_v34 = vpop.f32.mrf.mxu0 }
 0x47a   : > { %v3224_v29 = vpop.f32.mrf.mxu1 }
 0x47b   : > { %v3241_v43 = vadd.f32 %v3222_v24, %v3150_v19 }
 0x47d   : > { %v2985_v57 = vpop.f32.mrf.mxu2 }
 0x47e   : > { %v3049_v52 = vpop.f32.mrf.mxu3 }
 0x47f   : > { %v3050_v0 = vadd.f32 %v3049_v52, %v2985_v57 }
 0x481   : > { %v3151_v18 = vadd.f32 %v3133_v34, %v3050_v0  ;;  %v3136_v15 = vpop.f32.mrf.mxu0 }
 0x482   : > { %v3227_v54 = vpop.f32.mrf.mxu1 }
 0x483   : > { %v3242_v27 = vadd.f32 %v3224_v29, %v3151_v18 }
 0x485   : > { %v2988_v16 = vpop.f32.mrf.mxu2 }
 0x486   : > { %v3052_v33 = vpop.f32.mrf.mxu3 }
 0x487   : > { %v3053_v28 = vadd.f32 %v3052_v33, %v2988_v16 }
 0x489   : > { %v3152_v46 = vadd.f32 %v3136_v15, %v3053_v28  ;;  %v3138_v1 = vpop.f32.mrf.mxu0 }
 0x48a   : > { %v3229_v38 = vpop.f32.mrf.mxu1 }
 0x48b   : > { %v3243_v23 = vadd.f32 %v3227_v54, %v3152_v46 }
 0x48d   : > { %v2990_v51 = vpop.f32.mrf.mxu2 }
 0x48e   : > { %v3054_v59 = vpop.f32.mrf.mxu3 }
 0x48f   : > { %v3055_v12 = vadd.f32 %v3054_v59, %v2990_v51 }
 0x491   : > { %v3153_v56 = vadd.f32 %v3138_v1, %v3055_v12  ;;  %v3141_v48 = vpop.f32.mrf.mxu0 }
 0x492   : > { %v3232_v60 = vpop.f32.mrf.mxu1 }
 0x493   : > { %v6089_v20 = vadd.f32 %v3229_v38, %v3153_v56 }
 0x495   : > { %v2993_v5 = vpop.f32.mrf.mxu2 }
 0x496   : > { %v3057_v3 = vpop.f32.mrf.mxu3 }
 0x497   : > { %v3058_v44 = vadd.f32 %v3057_v3, %v2993_v5 }
 0x499   : > { %v3154_v22 = vadd.f32 %v3141_v48, %v3058_v44  ;;  %v3143_v61 = vpop.f32.mrf.mxu0 }
 0x49a   : > { %v3234_v36 = vpop.f32.mrf.mxu1 }
 0x49b   : > { %v6091_v53 = vadd.f32 %v3232_v60, %v3154_v22 }
 0x49d   : > { %v2995_v58 = vpop.f32.mrf.mxu2 }
 0x49e   : > { %v3059_v42 = vpop.f32.mrf.mxu3 }
 0x49f   : > { %v3060_v41 = vadd.f32 %v3059_v42, %v2995_v58 }
 0x4a1   : > { %v3155_v13 = vadd.f32 %v3143_v61, %v3060_v41  ;;  %v3146_v4 = vpop.f32.mrf.mxu0 }
 0x4a2   : > { %v3237_v14 = vpop.f32.mrf.mxu1 }
 0x4a3   : > { %v6093_v47 = vadd.f32 %v3234_v36, %v3155_v13 }
 0x4a5   : > { %v2998_v21 = vpop.f32.mrf.mxu2 }
 0x4a6   : > { %v3062_v2 = vpop.f32.mrf.mxu3 }
 0x4a7   : > { %v3063_v40 = vadd.f32 %v3062_v2, %v2998_v21 }
 0x4a9   : > { %v3156_v63 = vadd.f32 %v3146_v4, %v3063_v40  ;;  %v3148_v30 = vpop.f32.mrf.mxu0 }
 0x4aa   : > { %v3239_v6 = vpop.f32.mrf.mxu1 }
 0x4ab   : > { %v6095_v39 = vadd.f32 %v3237_v14, %v3156_v63 }
 0x4ad   : > { %v3000_v31 = vpop.f32.mrf.mxu2 }
 0x4ae   : > { %v3064_v25 = vpop.f32.mrf.mxu3 }
 0x4b1   : > { %v3495_v37 = vpop.f32.mrf.mxu0 }
 0x4b5   : > { %v3313_v35 = vpop.f32.mrf.mxu2 }
 0x4b6   : > { %v3404_v32 = vpop.f32.mrf.mxu3  ;;  %v3332_v55 = vadd.f32 %v3313_v35, %v3241_v43 }
 0x4b8   : > { %v3423_v26 = vadd.f32 %v3404_v32, %v3332_v55 }
 0x4b9   : > { %v3497_v62 = vpop.f32.mrf.mxu0 }
 0x4ba   : > { %v3514_v45 = vadd.f32 %v3495_v37, %v3423_v26 }
 0x4bc   : > { %v3525_v17 = vmul.f32 %v6100_v7, %v3514_v45 }
 0x4bd   : > { %v3315_v11 = vpop.f32.mrf.mxu2 }
 0x4be   : > { %v3406_v9 = vpop.f32.mrf.mxu3  ;;  %v3536_v24 = vadd.f32 %v6105_v10, %v3525_v17  ;;  %v3333_v49 = vadd.f32 %v3315_v11, %v3242_v27 }
 0x4c0   : > { %v3543_v8 = vmax.f32 %v3536_v24, 0.0  ;;  %v3424_v50 = vadd.f32 %v3406_v9, %v3333_v49 }
 0x4c1   : > { %v3500_v19 = vpop.f32.mrf.mxu0 }
 0x4c2   : > { %v3550_v34 = vsel %vm2189_vm5, %v3543_v8, -inf  ;;  %v3515_v29 = vadd.f32 %v3497_v62, %v3424_v50 }
 0x4c3   : > { %v3551_v43 = vrot.slane %v3550_v34, 4 }
 0x4c4   : > { %v3526_v57 = vmul.f32 %v6100_v7, %v3515_v29 }
 0x4c5   : > { %v3552_v52 = vmax.f32 %v3550_v34, %v3551_v43  ;;  %v3318_v0 = vpop.f32.mrf.mxu2 }
 0x4c6   : > { %v3409_v18 = vpop.f32.mrf.mxu3  ;;  %v3537_v15 = vadd.f32 %v6105_v10, %v3526_v57  ;;  %v3334_v54 = vadd.f32 %v3318_v0, %v3243_v23 }
 0x4c7   : > { %v3553_v16 = vrot.slane %v3552_v52, 2 }
 0x4c8   : > { %v3544_v33 = vmax.f32 %v3537_v15, 0.0  ;;  %v3425_v28 = vadd.f32 %v3409_v18, %v3334_v54 }
 0x4c9   : > { %v3502_v27 = vpop.f32.mrf.mxu0  ;;  %v3554_v46 = vmax.f32 %v3552_v52, %v3553_v16 }
 0x4ca   : > { %v3559_v1 = vsel %vm2189_vm5, %v3544_v33, -inf  ;;  %v3516_v38 = vadd.f32 %v3500_v19, %v3425_v28 }
 0x4cb   : > { %v3555_v51 = vrot.slane %v3554_v46, 1  ;;  %v3560_v59 = vrot.slane %v3559_v1, 4 }
 0x4cc   : > { %v3527_v23 = vmul.f32 %v6100_v7, %v3516_v38 }
 0x4cd   : > { %v3556_v12 = vmax.f32 %v3554_v46, %v3555_v51  ;;  %v3561_v56 = vmax.f32 %v3559_v1, %v3560_v59  ;;  %v3320_v48 = vpop.f32.mrf.mxu2 }
 0x4ce   : > { %v3411_v60 = vpop.f32.mrf.mxu3  ;;  %v3538_v5 = vadd.f32 %v6105_v10, %v3527_v23  ;;  %v3335_v3 = vadd.f32 %v3320_v48, %v6089_v20 }
 0x4cf   : > { %3558 = vst.msk [vmem:[%s6117_s23] sm:$0x1] %vm3557_vm8, %v3556_v12  ;;  %v3562_v44 = vrot.slane %v3561_v56, 2 }
 0x4d0   : > { %v3545_v22 = vmax.f32 %v3538_v5, 0.0  ;;  %v3426_v61 = vadd.f32 %v3411_v60, %v3335_v3 }
 0x4d1   : > { %v3505_v36 = vpop.f32.mrf.mxu0  ;;  %v3563_v58 = vmax.f32 %v3561_v56, %v3562_v44 }
 0x4d2   : > { %v3567_v42 = vsel %vm2189_vm5, %v3545_v22, -inf  ;;  %v3517_v41 = vadd.f32 %v3502_v27, %v3426_v61 }
 0x4d3   : > { %v3564_v13 = vrot.slane %v3563_v58, 1  ;;  %v3568_v4 = vrot.slane %v3567_v42, 4 }
 0x4d4   : > { %v3528_v14 = vmul.f32 %v6100_v7, %v3517_v41 }
 0x4d5   : > { %v3565_v21 = vmax.f32 %v3563_v58, %v3564_v13  ;;  %v3569_v2 = vmax.f32 %v3567_v42, %v3568_v4  ;;  %v3323_v40 = vpop.f32.mrf.mxu2 }
 0x4d6   : > { %v3414_v63 = vpop.f32.mrf.mxu3  ;;  %v3539_v20 = vadd.f32 %v6105_v10, %v3528_v14  ;;  %v3336_v30 = vadd.f32 %v3323_v40, %v6091_v53 }
 0x4d7   : > { %3566 = vst.msk [vmem:[%s6117_s23 + $0x1] sm:$0x1] %vm3557_vm8, %v3565_v21  ;;  %v3570_v6 = vrot.slane %v3569_v2, 2 }
 0x4d8   : > { %v3546_v31 = vmax.f32 %v3539_v20, 0.0  ;;  %v3427_v25 = vadd.f32 %v3414_v63, %v3336_v30 }
 0x4d9   : > { %v3507_v37 = vpop.f32.mrf.mxu0  ;;  %v3571_v35 = vmax.f32 %v3569_v2, %v3570_v6 }
 0x4da   : > { %v3575_v32 = vsel %vm2189_vm5, %v3546_v31, -inf  ;;  %v3518_v55 = vadd.f32 %v3505_v36, %v3427_v25 }
 0x4db   : > { %v3572_v26 = vrot.slane %v3571_v35, 1  ;;  %v3576_v62 = vrot.slane %v3575_v32, 4 }
 0x4dc   : > { %v3529_v45 = vmul.f32 %v6100_v7, %v3518_v55 }
 0x4dd   : > { %v3573_v17 = vmax.f32 %v3571_v35, %v3572_v26  ;;  %v3577_v11 = vmax.f32 %v3575_v32, %v3576_v62  ;;  %v3325_v9 = vpop.f32.mrf.mxu2 }
 0x4de   : > { %v3416_v24 = vpop.f32.mrf.mxu3  ;;  %v3540_v53 = vadd.f32 %v6105_v10, %v3529_v45  ;;  %v3337_v49 = vadd.f32 %v3325_v9, %v6093_v47 }
 0x4df   : > { %3574 = vst.msk [vmem:[%s6117_s23 + $0x2] sm:$0x1] %vm3557_vm8, %v3573_v17  ;;  %v3578_v8 = vrot.slane %v3577_v11, 2 }
 0x4e0   : > { %v3547_v50 = vmax.f32 %v3540_v53, 0.0  ;;  %v3428_v19 = vadd.f32 %v3416_v24, %v3337_v49 }
 0x4e1   : > { %v3510_v34 = vpop.f32.mrf.mxu0  ;;  %v3579_v29 = vmax.f32 %v3577_v11, %v3578_v8 }
 0x4e2   : > { %v3583_v43 = vsel %vm2189_vm5, %v3547_v50, -inf  ;;  %v3519_v57 = vadd.f32 %v3507_v37, %v3428_v19 }
 0x4e3   : > { %v3580_v52 = vrot.slane %v3579_v29, 1  ;;  %v3584_v0 = vrot.slane %v3583_v43, 4 }
 0x4e4   : > { %v3530_v18 = vmul.f32 %v6100_v7, %v3519_v57 }
 0x4e5   : > { %v3581_v15 = vmax.f32 %v3579_v29, %v3580_v52  ;;  %v3585_v54 = vmax.f32 %v3583_v43, %v3584_v0  ;;  %v3328_v16 = vpop.f32.mrf.mxu2 }
 0x4e6   : > { %v3419_v33 = vpop.f32.mrf.mxu3  ;;  %v3541_v47 = vadd.f32 %v6105_v10, %v3530_v18  ;;  %v3338_v28 = vadd.f32 %v3328_v16, %v6095_v39 }
 0x4e7   : > { %3582 = vst.msk [vmem:[%s6117_s23 + $0x3] sm:$0x1] %vm3557_vm8, %v3581_v15  ;;  %v3586_v27 = vrot.slane %v3585_v54, 2 }
 0x4e8   : > { %v3548_v46 = vmax.f32 %v3541_v47, 0.0  ;;  %v3429_v1 = vadd.f32 %v3419_v33, %v3338_v28 }
 0x4e9   : > { %v3512_v38 = vpop.f32.mrf.mxu0  ;;  %v3587_v51 = vmax.f32 %v3585_v54, %v3586_v27 }
 0x4ea   : > { %v3591_v59 = vsel %vm2189_vm5, %v3548_v46, -inf  ;;  %v3520_v23 = vadd.f32 %v3510_v34, %v3429_v1 }
 0x4eb   : > { %v3588_v12 = vrot.slane %v3587_v51, 1  ;;  %v3592_v56 = vrot.slane %v3591_v59, 4 }
 0x4ec   : > { %v3531_v48 = vmul.f32 %v6100_v7, %v3520_v23 }
 0x4ed   : > { %v3589_v60 = vmax.f32 %v3587_v51, %v3588_v12  ;;  %v3593_v5 = vmax.f32 %v3591_v59, %v3592_v56  ;;  %v3330_v3 = vpop.f32.mrf.mxu2 }
 0x4ee   : > { %v3421_v39 = vpop.f32.mrf.mxu3  ;;  %v3542_v44 = vadd.f32 %v6105_v10, %v3531_v48 }
 0x4ef   : > { %3590 = vst.msk [vmem:[%s6117_s23 + $0x4] sm:$0x1] %vm3557_vm8, %v3589_v60  ;;  %v3594_v22 = vrot.slane %v3593_v5, 2 }
 0x4f0   : > { %v3549_v61 = vmax.f32 %v3542_v44, 0.0 }
 0x4f1   : > { %v3595_v36 = vmax.f32 %v3593_v5, %v3594_v22 }
 0x4f2   : > { %v3599_v58 = vsel %vm2189_vm5, %v3549_v61, -inf }
 0x4f3   : > { %v3596_v42 = vrot.slane %v3595_v36, 1  ;;  %v3600_v41 = vrot.slane %v3599_v58, 4 }
 0x4f5   : > { %v3597_v13 = vmax.f32 %v3595_v36, %v3596_v42  ;;  %v3601_v4 = vmax.f32 %v3599_v58, %v3600_v41 }
 0x4f7   : > { %3598 = vst.msk [vmem:[%s6117_s23 + $0x5] sm:$0x1] %vm3557_vm8, %v3597_v13  ;;  %v3602_v7 = vrot.slane %v3601_v4, 2 }
 0x4f9   : > { %v3603_v14 = vmax.f32 %v3601_v4, %v3602_v7 }
 0x4fb   : > { %v3604_v21 = vrot.slane %v3603_v14, 1 }
 0x4fd   : > { %v3605_v2 = vmax.f32 %v3603_v14, %v3604_v21 }
 0x4ff   : > { %3606 = vst.msk [vmem:[%s6117_s23 + $0x6] sm:$0x1] %vm3557_vm8, %v3605_v2 }
 0x500 PF: > { %s24_s29 = sadd.s32 1, %s4531_s29  }
 0x501   : > { %p21_p4 = scmp.ge.s32.totalorder %s24_s29, 40  }
 0x503   :  { %23 = sbr.rel (!%p21_p4) target bundleno = 1 (0x1), region = 124 }

// kernel: feature_net_forward.5
= control target key start
LH: loop header
LB: loop body
LE: loop exit
PB: predicated region body
PF: predicated region fallthrough
CT: control target
= control target key end

     0   :  { %s2745_s20 = smov 0   ;;  %s2960_s0 = inlined_call_operand.vmem [shape: bf16[2,12160], index: 0, kind: input, shape index: {}]   ;;  %s2961_s1 = inlined_call_operand.vmem [shape: bf16[12160,128], index: 1, kind: input, shape index: {}]   ;;  %s2962_s2 = inlined_call_operand.vmem [shape: f32[1,128], index: 2, kind: input, shape index: {}]   ;;  %s2963_s3 = inlined_call_operand.vmem [shape: bf16[128,1], index: 3, kind: input, shape index: {}]   ;;  %s2964_s4 = inlined_call_operand.<no memory space> [shape: f32[1,1], index: 4, kind: input, shape index: {}]   ;;  %s2965_s5 = inlined_call_operand.vmem [shape: f32[2,1], index: 5, kind: output, shape index: {}]  }
   0x1   :  { %v10_v0 = vstv %s2964_s4 }
   0x2   :  { %11 = vst [vmem:[#allocation3] sm:$0x1] %v10_v0 }
   0x3 LB: > { %s2751_s21 = sadd.s32 4294967295, %s2709_s20   ;;  %p1886_p0 = scmp.ge.s32.totalorder %s2709_s20, 1  ;;  %s2709_s20 = sphi %s2745_s20, %s17_s20  }
   0x4   : > { %p195_p1 = scmp.lt.s32.totalorder %s2709_s20, 6 }
   0x6   : > { %p196_p2 = pnand %p1886_p0, %p195_p1 }
   0x7   : > { %s222_s4 = smul.u32 (!%p196_p2), 19, %s2751_s21  ;;  %p1888_p5 = scmp.ne.s32.totalorder (!%p196_p2), %s2751_s21, 0 }
   0x8   : > { %199 = sbr.rel (%p196_p2) target bundleno = 490 (0x1ea), region = 40 }
   0x9   : > { %s227_s22 = smul.u32 (!%p196_p2), 304, %s2751_s21  ;;  %p223_p3 = scmp.lt.s32.totalorder (!%p196_p2), %s222_s4, 94 }
   0xb   : > { %p228_p4 = scmp.lt.s32.totalorder (!%p196_p2), %s227_s22, 1519 }
   0xd   : > { %s2967_s4 = smov (!%p223_p3, %s222_s4), 94  ;;  %s2969_s22 = smov (!%p228_p4, %s227_s22), 1519 }
   0xe   : > { %s2760_s25 = scalar_lea.vmem %s2960_s0, %s2967_s4  ;;  %s1887_s26 = sshll.u32 %s2969_s22, 2 }
   0xf   : > { %s2765_s29 = scalar_lea.vmem %s2961_s1, %s1887_s26  ;;  %236 = sbr.rel (%p1888_p5) target bundleno = 22 (0x16), region = 44 }
  0x14   : > { %v2711_v1 = vmov 0.0  }
  0x15   : > { %237 = vst [vmem:[#allocation2] sm:$0x3] %v2711_v1 }
  0x16 PF: > { %v2539_v2 = vld [vmem:[%s2765_s29 + $0x38] sm:$0xff]  ;;  %v2538_v6 = vld [vmem:[%s2765_s29 + $0x30] sm:$0xff]  ;;  %v2537_v10 = vld [vmem:[%s2765_s29 + $0x28] sm:$0xff]  ;;  %p2497_p6 = scmp.ne.s32.totalorder %s2751_s21, 4 }
  0x17   : > { %v2547_v3 = vld [vmem:[%s2765_s29 + $0x78] sm:$0xff]  ;;  %1502 = vmatpush.bf16.msra.mxu0 %v2539_v2  ;;  %v2546_v7 = vld [vmem:[%s2765_s29 + $0x70] sm:$0xff]  ;;  %v2545_v11 = vld [vmem:[%s2765_s29 + $0x68] sm:$0xff] }
  0x18   : > { %v2555_v4 = vld [vmem:[%s2765_s29 + $0xb8] sm:$0xff]  ;;  %1515 = vmatpush.bf16.msra.mxu1 %v2547_v3  ;;  %v2554_v8 = vld [vmem:[%s2765_s29 + $0xb0] sm:$0xff]  ;;  %v2553_v12 = vld [vmem:[%s2765_s29 + $0xa8] sm:$0xff] }
  0x19   : > { %v2563_v5 = vld [vmem:[%s2765_s29 + $0xf8] sm:$0xff]  ;;  %1528 = vmatpush.bf16.msra.mxu2 %v2555_v4  ;;  %v2562_v9 = vld [vmem:[%s2765_s29 + $0xf0] sm:$0xff]  ;;  %v2561_v13 = vld [vmem:[%s2765_s29 + $0xe8] sm:$0xff] }
  0x1a   : > { %1541 = vmatpush.bf16.msra.mxu3 %v2563_v5  ;;  %v2536_v14 = vld [vmem:[%s2765_s29 + $0x20] sm:$0xff]  ;;  %v2535_v18 = vld [vmem:[%s2765_s29 + $0x18] sm:$0xff]  ;;  %v2534_v23 = vld [vmem:[%s2765_s29 + $0x10] sm:$0xff] }
  0x1b   : > { %1503 = vmatpush.bf16.msra.mxu0 %v2538_v6  ;;  %v2544_v15 = vld [vmem:[%s2765_s29 + $0x60] sm:$0xff]  ;;  %v2543_v19 = vld [vmem:[%s2765_s29 + $0x58] sm:$0xff]  ;;  %v2542_v24 = vld [vmem:[%s2765_s29 + $0x50] sm:$0xff] }
  0x1c   : > { %1516 = vmatpush.bf16.msra.mxu1 %v2546_v7  ;;  %v2552_v16 = vld [vmem:[%s2765_s29 + $0xa0] sm:$0xff]  ;;  %v2551_v20 = vld [vmem:[%s2765_s29 + $0x98] sm:$0xff]  ;;  %v2550_v25 = vld [vmem:[%s2765_s29 + $0x90] sm:$0xff] }
  0x1d   : > { %1529 = vmatpush.bf16.msra.mxu2 %v2554_v8  ;;  %v2560_v17 = vld [vmem:[%s2765_s29 + $0xe0] sm:$0xff]  ;;  %v2559_v21 = vld [vmem:[%s2765_s29 + $0xd8] sm:$0xff]  ;;  %v2558_v26 = vld [vmem:[%s2765_s29 + $0xd0] sm:$0xff] }
  0x1e   : > { %1542 = vmatpush.bf16.msra.mxu3 %v2562_v9  ;;  %v239_v22 = vld [vmem:[%s2760_s25] sm:$0xff]  ;;  %v2533_v27 = vld [vmem:[%s2765_s29 + $0x8] sm:$0xff]  ;;  %v2571_v34 = vld [vmem:[%s2765_s29 + $0x138] sm:$0xff] }
  0x1f   : > { %1504 = vmatpush.bf16.msra.mxu0 %v2537_v10  ;;  %547 = vst [vmem:[#allocation1] ss:$9 sm:$0xff] %v239_v22  ;;  %v2541_v28 = vld [vmem:[%s2765_s29 + $0x48] sm:$0xff]  ;;  %v2532_v31 = vld [vmem:[%s2765_s29] sm:$0xff]  ;;  %v2579_v35 = vld [vmem:[%s2765_s29 + $0x178] sm:$0xff] }
  0x20   : > { %1517 = vmatpush.bf16.msra.mxu1 %v2545_v11  ;;  %v2549_v29 = vld [vmem:[%s2765_s29 + $0x88] sm:$0xff]  ;;  %v2540_v32 = vld [vmem:[%s2765_s29 + $0x40] sm:$0xff]  ;;  %v2587_v36 = vld [vmem:[%s2765_s29 + $0x1b8] sm:$0xff] }
  0x21   : > { %1530 = vmatpush.bf16.msra.mxu2 %v2553_v12  ;;  %v2557_v30 = vld [vmem:[%s2765_s29 + $0xc8] sm:$0xff]  ;;  %v2548_v33 = vld [vmem:[%s2765_s29 + $0x80] sm:$0xff]  ;;  %v2595_v38 = vld [vmem:[%s2765_s29 + $0x1f8] sm:$0xff] }
  0x22   : > { %1543 = vmatpush.bf16.msra.mxu3 %v2561_v13  ;;  %v2556_v37 = vld [vmem:[%s2765_s29 + $0xc0] sm:$0xff]  ;;  %v2570_v40 = vld [vmem:[%s2765_s29 + $0x130] sm:$0xff]  ;;  %v2569_v47 = vld [vmem:[%s2765_s29 + $0x128] sm:$0xff] }
  0x23   : > { %1505 = vmatpush.bf16.msra.mxu0 %v2536_v14  ;;  %v2578_v42 = vld [vmem:[%s2765_s29 + $0x170] sm:$0xff]  ;;  %v2577_v48 = vld [vmem:[%s2765_s29 + $0x168] sm:$0xff]  ;;  %v2568_v51 = vld [vmem:[%s2765_s29 + $0x120] sm:$0xff] }
  0x24   : > { %1518 = vmatpush.bf16.msra.mxu1 %v2544_v15  ;;  %v2586_v43 = vld [vmem:[%s2765_s29 + $0x1b0] sm:$0xff]  ;;  %v2585_v49 = vld [vmem:[%s2765_s29 + $0x1a8] sm:$0xff]  ;;  %v2576_v57 = vld [vmem:[%s2765_s29 + $0x160] sm:$0xff] }
  0x25   : > { %1531 = vmatpush.bf16.msra.mxu2 %v2552_v16  ;;  %v2594_v45 = vld [vmem:[%s2765_s29 + $0x1f0] sm:$0xff]  ;;  %v2593_v50 = vld [vmem:[%s2765_s29 + $0x1e8] sm:$0xff]  ;;  %v2584_v58 = vld [vmem:[%s2765_s29 + $0x1a0] sm:$0xff] }
  0x26   : > { %1544 = vmatpush.bf16.msra.mxu3 %v2560_v17  ;;  %v548_v39 = vld [vmem:[#allocation1] sm:$0xff]  ;;  %v550_v41 = vld [vmem:[#allocation1 + $0x12] sm:$0xff]  ;;  %v549_v44 = vld [vmem:[#allocation1 + $0x9] sm:$0xff] }
  0x27   : > { %1506 = vmatpush.bf16.msra.mxu0 %v2535_v18  ;;  %v551_v46 = vld [vmem:[#allocation1 + $0x1b] sm:$0xff]  ;;  %v552_v53 = vld [vmem:[#allocation1 + $0x24] sm:$0xff]  ;;  %v553_v56 = vld [vmem:[#allocation1 + $0x2d] sm:$0xff] }
  0x28   : > { %1519 = vmatpush.bf16.msra.mxu1 %v2543_v19  ;;  %v554_v52 = vld [vmem:[#allocation1 + $0x36] sm:$0xff]  ;;  %v2814_v54 = vld [vmem:[#allocation1 + $0x3f] sm:$0xff]  ;;  %v240_v55 = vld [vmem:[%s2760_s25 + $0x8] sm:$0xff] }
  0x29   : > { %1532 = vmatpush.bf16.msra.mxu2 %v2551_v20  ;;  %557 = vst [vmem:[#allocation1] ss:$9 sm:$0xff] %v240_v55  ;;  %v2592_v59 = vld [vmem:[%s2765_s29 + $0x1e0] sm:$0xff]  ;;  %v2567_v60 = vld [vmem:[%s2765_s29 + $0x118] sm:$0xff]  ;;  %v2566_v0 = vld [vmem:[%s2765_s29 + $0x110] sm:$0xff] }
  0x2a   : > { %1545 = vmatpush.bf16.msra.mxu3 %v2559_v21  ;;  %v2575_v61 = vld [vmem:[%s2765_s29 + $0x158] sm:$0xff]  ;;  %v2574_v1 = vld [vmem:[%s2765_s29 + $0x150] sm:$0xff]  ;;  %v2565_v4 = vld [vmem:[%s2765_s29 + $0x108] sm:$0xff] }
  0x2b   : > { %1507 = vmatpush.bf16.msra.mxu0 %v2534_v23  ;;  %v2583_v62 = vld [vmem:[%s2765_s29 + $0x198] sm:$0xff]  ;;  %v2582_v2 = vld [vmem:[%s2765_s29 + $0x190] sm:$0xff]  ;;  %v2573_v5 = vld [vmem:[%s2765_s29 + $0x148] sm:$0xff] }
  0x2c   : > { %1520 = vmatpush.bf16.msra.mxu1 %v2542_v24  ;;  %v2591_v63 = vld [vmem:[%s2765_s29 + $0x1d8] sm:$0xff]  ;;  %v2590_v3 = vld [vmem:[%s2765_s29 + $0x1d0] sm:$0xff]  ;;  %v2581_v6 = vld [vmem:[%s2765_s29 + $0x188] sm:$0xff] }
  0x2d   : > { %1533 = vmatpush.bf16.msra.mxu2 %v2550_v25  ;;  %v2589_v7 = vld [vmem:[%s2765_s29 + $0x1c8] sm:$0xff]  ;;  %v2564_v8 = vld [vmem:[%s2765_s29 + $0x100] sm:$0xff]  ;;  %v2603_v11 = vld [vmem:[%s2765_s29 + $0x238] sm:$0xff] }
  0x2e   : > { %1546 = vmatpush.bf16.msra.mxu3 %v2558_v26  ;;  %v2572_v9 = vld [vmem:[%s2765_s29 + $0x140] sm:$0xff]  ;;  %v2611_v12 = vld [vmem:[%s2765_s29 + $0x278] sm:$0xff]  ;;  %v2602_v16 = vld [vmem:[%s2765_s29 + $0x230] sm:$0xff] }
  0x2f   : > { %1508 = vmatpush.bf16.msra.mxu0 %v2533_v27  ;;  %v2580_v10 = vld [vmem:[%s2765_s29 + $0x180] sm:$0xff]  ;;  %v2619_v13 = vld [vmem:[%s2765_s29 + $0x2b8] sm:$0xff]  ;;  %v2610_v17 = vld [vmem:[%s2765_s29 + $0x270] sm:$0xff] }
  0x30   : > { %1521 = vmatpush.bf16.msra.mxu1 %v2541_v28  ;;  %v2588_v14 = vld [vmem:[%s2765_s29 + $0x1c0] sm:$0xff]  ;;  %v2627_v15 = vld [vmem:[%s2765_s29 + $0x2f8] sm:$0xff]  ;;  %v2618_v18 = vld [vmem:[%s2765_s29 + $0x2b0] sm:$0xff] }
  0x31   : > { %1534 = vmatpush.bf16.msra.mxu2 %v2549_v29  ;;  %v2626_v19 = vld [vmem:[%s2765_s29 + $0x2f0] sm:$0xff]  ;;  %v2601_v20 = vld [vmem:[%s2765_s29 + $0x228] sm:$0xff]  ;;  %v2600_v24 = vld [vmem:[%s2765_s29 + $0x220] sm:$0xff] }
  0x32   : > { %1547 = vmatpush.bf16.msra.mxu3 %v2557_v30  ;;  %v2609_v21 = vld [vmem:[%s2765_s29 + $0x268] sm:$0xff]  ;;  %v2608_v25 = vld [vmem:[%s2765_s29 + $0x260] sm:$0xff]  ;;  %v2599_v28 = vld [vmem:[%s2765_s29 + $0x218] sm:$0xff] }
  0x33   : > { %1509 = vmatpush.bf16.msra.mxu0 %v2532_v31  ;;  %v2617_v22 = vld [vmem:[%s2765_s29 + $0x2a8] sm:$0xff]  ;;  %v2616_v26 = vld [vmem:[%s2765_s29 + $0x2a0] sm:$0xff]  ;;  %v2607_v29 = vld [vmem:[%s2765_s29 + $0x258] sm:$0xff] }
  0x34   : > { %1522 = vmatpush.bf16.msra.mxu1 %v2540_v32  ;;  %v2625_v23 = vld [vmem:[%s2765_s29 + $0x2e8] sm:$0xff]  ;;  %v2624_v27 = vld [vmem:[%s2765_s29 + $0x2e0] sm:$0xff]  ;;  %v2615_v30 = vld [vmem:[%s2765_s29 + $0x298] sm:$0xff] }
  0x35   : > { %1535 = vmatpush.bf16.msra.mxu2 %v2548_v33  ;;  %v2623_v31 = vld [vmem:[%s2765_s29 + $0x2d8] sm:$0xff]  ;;  %v2598_v32 = vld [vmem:[%s2765_s29 + $0x210] sm:$0xff] }
  0x36   : > { %1548 = vmatpush.bf16.msra.mxu3 %v2556_v37  ;;  %1510 = vmatmul.bf16.vlgmr.msra.gmra.mxu0 %v548_v39  ;;  %v2606_v33 = vld [vmem:[%s2765_s29 + $0x250] sm:$0xff]  ;;  %v2605_v37 = vld [vmem:[%s2765_s29 + $0x248] sm:$0xff] }
  0x37   : > { %1554 = vmatpush.bf16.msrb.mxu0 %v2571_v34  ;;  %1523 = vmatmul.bf16.vlgmr.msra.gmra.mxu1 %v549_v44  ;;  %v2614_v34 = vld [vmem:[%s2765_s29 + $0x290] sm:$0xff]  ;;  %v2621_v39 = vld [vmem:[%s2765_s29 + $0x2c8] sm:$0xff]  ;;  %v2643_v44 = vld [vmem:[%s2765_s29 + $0x378] sm:$0xff] }
  0x38   : > { %1567 = vmatpush.bf16.msrb.mxu1 %v2579_v35  ;;  %1536 = vmatmul.bf16.vlgmr.msra.gmra.mxu2 %v550_v41  ;;  %v2622_v35 = vld [vmem:[%s2765_s29 + $0x2d0] sm:$0xff]  ;;  %v2604_v41 = vld [vmem:[%s2765_s29 + $0x240] sm:$0xff] }
  0x39   : > { %1580 = vmatpush.bf16.msrb.mxu2 %v2587_v36  ;;  %1549 = vmatmul.bf16.vlgmr.msra.gmra.mxu3 %v551_v46  ;;  %v2597_v36 = vld [vmem:[%s2765_s29 + $0x208] sm:$0xff]  ;;  %v2620_v46 = vld [vmem:[%s2765_s29 + $0x2c0] sm:$0xff]  ;;  %v2658_v55 = vld [vmem:[%s2765_s29 + $0x3f0] sm:$0xff] }
  0x3a   : > { %1593 = vmatpush.bf16.msrb.mxu3 %v2595_v38  ;;  %v2613_v38 = vld [vmem:[%s2765_s29 + $0x288] sm:$0xff] }
  0x3b   : > { %1555 = vmatpush.bf16.msrb.mxu0 %v2570_v40  ;;  %v2596_v40 = vld [vmem:[%s2765_s29 + $0x200] sm:$0xff] }
  0x3c   : > { %1568 = vmatpush.bf16.msrb.mxu1 %v2578_v42  ;;  %v2612_v42 = vld [vmem:[%s2765_s29 + $0x280] sm:$0xff] }
  0x3d   : > { %1581 = vmatpush.bf16.msrb.mxu2 %v2586_v43  ;;  %v2635_v43 = vld [vmem:[%s2765_s29 + $0x338] sm:$0xff] }
  0x3e   : > { %1594 = vmatpush.bf16.msrb.mxu3 %v2594_v45  ;;  %v2651_v45 = vld [vmem:[%s2765_s29 + $0x3b8] sm:$0xff] }
  0x3f   : > { %1556 = vmatpush.bf16.msrb.mxu0 %v2569_v47  ;;  %v558_v47 = vld [vmem:[#allocation1] sm:$0xff] }
  0x40   : > { %1569 = vmatpush.bf16.msrb.mxu1 %v2577_v48  ;;  %v2659_v48 = vld [vmem:[%s2765_s29 + $0x3f8] sm:$0xff] }
  0x41   : > { %1582 = vmatpush.bf16.msrb.mxu2 %v2585_v49  ;;  %v560_v49 = vld [vmem:[#allocation1 + $0x12] sm:$0xff] }
  0x42   : > { %1595 = vmatpush.bf16.msrb.mxu3 %v2593_v50  ;;  %v2634_v50 = vld [vmem:[%s2765_s29 + $0x330] sm:$0xff] }
  0x43   : > { %1557 = vmatpush.bf16.msrb.mxu0 %v2568_v51  ;;  %v559_v51 = vld [vmem:[#allocation1 + $0x9] sm:$0xff] }
  0x44   : > { %1570 = vmatpush.bf16.msrb.mxu1 %v2576_v57  ;;  %v2641_v57 = vld [vmem:[%s2765_s29 + $0x368] sm:$0xff] }
  0x45   : > { %1583 = vmatpush.bf16.msrb.mxu2 %v2584_v58  ;;  %v2649_v58 = vld [vmem:[%s2765_s29 + $0x3a8] sm:$0xff] }
  0x46   : > { %1596 = vmatpush.bf16.msrb.mxu3 %v2592_v59  ;;  %v2657_v59 = vld [vmem:[%s2765_s29 + $0x3e8] sm:$0xff] }
  0x47   : > { %1558 = vmatpush.bf16.msrb.mxu0 %v2567_v60  ;;  %v2632_v60 = vld [vmem:[%s2765_s29 + $0x320] sm:$0xff] }
  0x48   : > { %1571 = vmatpush.bf16.msrb.mxu1 %v2575_v61  ;;  %v2640_v61 = vld [vmem:[%s2765_s29 + $0x360] sm:$0xff] }
  0x49   : > { %1584 = vmatpush.bf16.msrb.mxu2 %v2583_v62  ;;  %v2648_v62 = vld [vmem:[%s2765_s29 + $0x3a0] sm:$0xff] }
  0x4a   : > { %1597 = vmatpush.bf16.msrb.mxu3 %v2591_v63  ;;  %v2656_v63 = vld [vmem:[%s2765_s29 + $0x3e0] sm:$0xff] }
  0x4b   : > { %1559 = vmatpush.bf16.msrb.mxu0 %v2566_v0  ;;  %v2631_v0 = vld [vmem:[%s2765_s29 + $0x318] sm:$0xff] }
  0x4c   : > { %1572 = vmatpush.bf16.msrb.mxu1 %v2574_v1  ;;  %v2639_v1 = vld [vmem:[%s2765_s29 + $0x358] sm:$0xff] }
  0x4d   : > { %1585 = vmatpush.bf16.msrb.mxu2 %v2582_v2  ;;  %v2647_v2 = vld [vmem:[%s2765_s29 + $0x398] sm:$0xff] }
  0x4e   : > { %1598 = vmatpush.bf16.msrb.mxu3 %v2590_v3  ;;  %v2655_v3 = vld [vmem:[%s2765_s29 + $0x3d8] sm:$0xff] }
  0x4f   : > { %1560 = vmatpush.bf16.msrb.mxu0 %v2565_v4  ;;  %v2630_v4 = vld [vmem:[%s2765_s29 + $0x310] sm:$0xff] }
  0x50   : > { %1573 = vmatpush.bf16.msrb.mxu1 %v2573_v5  ;;  %v2638_v5 = vld [vmem:[%s2765_s29 + $0x350] sm:$0xff] }
  0x51   : > { %1586 = vmatpush.bf16.msrb.mxu2 %v2581_v6  ;;  %v2646_v6 = vld [vmem:[%s2765_s29 + $0x390] sm:$0xff] }
  0x52   : > { %1599 = vmatpush.bf16.msrb.mxu3 %v2589_v7  ;;  %v2654_v7 = vld [vmem:[%s2765_s29 + $0x3d0] sm:$0xff] }
  0x53   : > { %1561 = vmatpush.bf16.msrb.mxu0 %v2564_v8  ;;  %v2629_v8 = vld [vmem:[%s2765_s29 + $0x308] sm:$0xff] }
  0x54   : > { %1574 = vmatpush.bf16.msrb.mxu1 %v2572_v9  ;;  %v2637_v9 = vld [vmem:[%s2765_s29 + $0x348] sm:$0xff] }
  0x55   : > { %1587 = vmatpush.bf16.msrb.mxu2 %v2580_v10  ;;  %v562_v10 = vld [vmem:[#allocation1 + $0x24] sm:$0xff] }
  0x56   : > { %1600 = vmatpush.bf16.msrb.mxu3 %v2588_v14  ;;  %1562 = vmatmul.bf16.vlgmr.msrb.gmra.mxu0 %v552_v53  ;;  %v561_v53 = vld [vmem:[#allocation1 + $0x1b] sm:$0xff]  ;;  %v241_v14 = vld [vmem:[%s2760_s25 + $0x10] sm:$0x7] }
  0x57   : > { %1606 = vmatpush.bf16.msra.mxu0 %v2603_v11  ;;  %1575 = vmatmul.bf16.vlgmr.msrb.gmra.mxu1 %v553_v56  ;;  %v2633_v56 = vld [vmem:[%s2765_s29 + $0x328] sm:$0xff]  ;;  %v564_v11 = vld [vmem:[#allocation1 + $0x36] sm:$0xff] }
  0x58   : > { %1619 = vmatpush.bf16.msra.mxu1 %v2611_v12  ;;  %1588 = vmatmul.bf16.vlgmr.msrb.gmra.mxu2 %v554_v52  ;;  %v2642_v52 = vld [vmem:[%s2765_s29 + $0x370] sm:$0xff] }
  0x59   : > { %1632 = vmatpush.bf16.msra.mxu2 %v2619_v13  ;;  %1601 = vmatmul.bf16.vlgmr.msrb.gmra.mxu3 %v2814_v54  ;;  %v2650_v54 = vld [vmem:[%s2765_s29 + $0x3b0] sm:$0xff]  ;;  %v565_v13 = vld [vmem:[#allocation1 + $0x3f] sm:$0xff] }
  0x5a   : > { %1645 = vmatpush.bf16.msra.mxu3 %v2627_v15  ;;  %v563_v12 = vld [vmem:[#allocation1 + $0x2d] sm:$0xff] }
  0x5b   : > { %1607 = vmatpush.bf16.msra.mxu0 %v2602_v16  ;;  %v2645_v15 = vld [vmem:[%s2765_s29 + $0x388] sm:$0xff]  ;;  %567 = vst [vmem:[#allocation1] ss:$9 sm:$0xff] %v241_v14 }
  0x5c   : > { %1620 = vmatpush.bf16.msra.mxu1 %v2610_v17  ;;  %v2653_v16 = vld [vmem:[%s2765_s29 + $0x3c8] sm:$0xff]  ;;  %v2628_v17 = vld [vmem:[%s2765_s29 + $0x300] sm:$0xff] }
  0x5d   : > { %1633 = vmatpush.bf16.msra.mxu2 %v2618_v18  ;;  %v2636_v18 = vld [vmem:[%s2765_s29 + $0x340] sm:$0xff] }
  0x5e   : > { %1646 = vmatpush.bf16.msra.mxu3 %v2626_v19  ;;  %v2667_v19 = vld [vmem:[%s2765_s29 + $0x438] sm:$0xff] }
  0x5f   : > { %1608 = vmatpush.bf16.msra.mxu0 %v2601_v20  ;;  %v2644_v20 = vld [vmem:[%s2765_s29 + $0x380] sm:$0xff] }
  0x60   : > { %1621 = vmatpush.bf16.msra.mxu1 %v2609_v21  ;;  %v2675_v21 = vld [vmem:[%s2765_s29 + $0x478] sm:$0xff] }
  0x61   : > { %1634 = vmatpush.bf16.msra.mxu2 %v2617_v22  ;;  %v2683_v22 = vld [vmem:[%s2765_s29 + $0x4b8] sm:$0xff] }
  0x62   : > { %1647 = vmatpush.bf16.msra.mxu3 %v2625_v23  ;;  %v2652_v23 = vld [vmem:[%s2765_s29 + $0x3c0] sm:$0xff] }
  0x63   : > { %1609 = vmatpush.bf16.msra.mxu0 %v2600_v24  ;;  %v2666_v24 = vld [vmem:[%s2765_s29 + $0x430] sm:$0xff] }
  0x64   : > { %1622 = vmatpush.bf16.msra.mxu1 %v2608_v25  ;;  %v2674_v25 = vld [vmem:[%s2765_s29 + $0x470] sm:$0xff] }
  0x65   : > { %1635 = vmatpush.bf16.msra.mxu2 %v2616_v26  ;;  %v2682_v26 = vld [vmem:[%s2765_s29 + $0x4b0] sm:$0xff] }
  0x66   : > { %1648 = vmatpush.bf16.msra.mxu3 %v2624_v27  ;;  %v2665_v27 = vld [vmem:[%s2765_s29 + $0x428] sm:$0xff] }
  0x67   : > { %1610 = vmatpush.bf16.msra.mxu0 %v2599_v28  ;;  %v2673_v28 = vld [vmem:[%s2765_s29 + $0x468] sm:$0xff] }
  0x68   : > { %1623 = vmatpush.bf16.msra.mxu1 %v2607_v29  ;;  %v2681_v29 = vld [vmem:[%s2765_s29 + $0x4a8] sm:$0xff] }
  0x69   : > { %1636 = vmatpush.bf16.msra.mxu2 %v2615_v30  ;;  %v2664_v30 = vld [vmem:[%s2765_s29 + $0x420] sm:$0xff] }
  0x6a   : > { %1649 = vmatpush.bf16.msra.mxu3 %v2623_v31  ;;  %v2672_v31 = vld [vmem:[%s2765_s29 + $0x460] sm:$0xff] }
  0x6b   : > { %1611 = vmatpush.bf16.msra.mxu0 %v2598_v32  ;;  %v2680_v32 = vld [vmem:[%s2765_s29 + $0x4a0] sm:$0xff] }
  0x6c   : > { %1624 = vmatpush.bf16.msra.mxu1 %v2606_v33  ;;  %v2663_v33 = vld [vmem:[%s2765_s29 + $0x418] sm:$0xff] }
  0x6d   : > { %1637 = vmatpush.bf16.msra.mxu2 %v2614_v34  ;;  %v2671_v34 = vld [vmem:[%s2765_s29 + $0x458] sm:$0xff] }
  0x6e   : > { %1650 = vmatpush.bf16.msra.mxu3 %v2622_v35  ;;  %v2679_v35 = vld [vmem:[%s2765_s29 + $0x498] sm:$0xff] }
  0x6f   : > { %1612 = vmatpush.bf16.msra.mxu0 %v2597_v36  ;;  %v2662_v36 = vld [vmem:[%s2765_s29 + $0x410] sm:$0xff] }
  0x70   : > { %1625 = vmatpush.bf16.msra.mxu1 %v2605_v37  ;;  %v2670_v37 = vld [vmem:[%s2765_s29 + $0x450] sm:$0xff] }
  0x71   : > { %1638 = vmatpush.bf16.msra.mxu2 %v2613_v38  ;;  %v2678_v38 = vld [vmem:[%s2765_s29 + $0x490] sm:$0xff] }
  0x72   : > { %1651 = vmatpush.bf16.msra.mxu3 %v2621_v39  ;;  %v2661_v39 = vld [vmem:[%s2765_s29 + $0x408] sm:$0xff] }
  0x73   : > { %1613 = vmatpush.bf16.msra.mxu0 %v2596_v40  ;;  %v2669_v40 = vld [vmem:[%s2765_s29 + $0x448] sm:$0xff] }
  0x74   : > { %1626 = vmatpush.bf16.msra.mxu1 %v2604_v41  ;;  %v2677_v41 = vld [vmem:[%s2765_s29 + $0x488] sm:$0xff] }
  0x75   : > { %1639 = vmatpush.bf16.msra.mxu2 %v2612_v42  ;;  %v2660_v42 = vld [vmem:[%s2765_s29 + $0x400] sm:$0xff] }
  0x76   : > { %1652 = vmatpush.bf16.msra.mxu3 %v2620_v46  ;;  %1614 = vmatmul.bf16.vlgmr.msra.gmra.mxu0 %v558_v47  ;;  %v569_v46 = vld [vmem:[#allocation1 + $0x9] sm:$0xff]  ;;  %v570_v47 = vld [vmem:[#allocation1 + $0x12] sm:$0xff] }
  0x77   : > { %1658 = vmatpush.bf16.msrb.mxu0 %v2635_v43  ;;  %1627 = vmatmul.bf16.vlgmr.msra.gmra.mxu1 %v559_v51  ;;  %v2668_v43 = vld [vmem:[%s2765_s29 + $0x440] sm:$0xff] }
  0x78   : > { %1671 = vmatpush.bf16.msrb.mxu1 %v2643_v44  ;;  %1640 = vmatmul.bf16.vlgmr.msra.gmra.mxu2 %v560_v49  ;;  %v2676_v44 = vld [vmem:[%s2765_s29 + $0x480] sm:$0xff] }
  0x79   : > { %1684 = vmatpush.bf16.msrb.mxu2 %v2651_v45  ;;  %1653 = vmatmul.bf16.vlgmr.msra.gmra.mxu3 %v561_v53  ;;  %v568_v45 = vld [vmem:[#allocation1] sm:$0xff] }
  0x7a   : > { %1697 = vmatpush.bf16.msrb.mxu3 %v2659_v48 }
  0x7b   : > { %1659 = vmatpush.bf16.msrb.mxu0 %v2634_v50 }
  0x7c   : > { %1672 = vmatpush.bf16.msrb.mxu1 %v2642_v52 }
  0x7d   : > { %1685 = vmatpush.bf16.msrb.mxu2 %v2650_v54 }
  0x7e   : > { %1698 = vmatpush.bf16.msrb.mxu3 %v2658_v55 }
  0x7f   : > { %1660 = vmatpush.bf16.msrb.mxu0 %v2633_v56 }
  0x80   : > { %1673 = vmatpush.bf16.msrb.mxu1 %v2641_v57 }
  0x81   : > { %1686 = vmatpush.bf16.msrb.mxu2 %v2649_v58 }
  0x82   : > { %1699 = vmatpush.bf16.msrb.mxu3 %v2657_v59 }
  0x83   : > { %1661 = vmatpush.bf16.msrb.mxu0 %v2632_v60 }
  0x84   : > { %1674 = vmatpush.bf16.msrb.mxu1 %v2640_v61 }
  0x85   : > { %1687 = vmatpush.bf16.msrb.mxu2 %v2648_v62 }
  0x86   : > { %1700 = vmatpush.bf16.msrb.mxu3 %v2656_v63 }
  0x87   : > { %1662 = vmatpush.bf16.msrb.mxu0 %v2631_v0 }
  0x88   : > { %1675 = vmatpush.bf16.msrb.mxu1 %v2639_v1 }
  0x89   : > { %1688 = vmatpush.bf16.msrb.mxu2 %v2647_v2 }
  0x8a   : > { %1701 = vmatpush.bf16.msrb.mxu3 %v2655_v3 }
  0x8b   : > { %1663 = vmatpush.bf16.msrb.mxu0 %v2630_v4 }
  0x8c   : > { %1676 = vmatpush.bf16.msrb.mxu1 %v2638_v5 }
  0x8d   : > { %1689 = vmatpush.bf16.msrb.mxu2 %v2646_v6 }
  0x8e   : > { %1702 = vmatpush.bf16.msrb.mxu3 %v2654_v7 }
  0x8f   : > { %1664 = vmatpush.bf16.msrb.mxu0 %v2629_v8 }
  0x90   : > { %1677 = vmatpush.bf16.msrb.mxu1 %v2637_v9 }
  0x91   : > { %1690 = vmatpush.bf16.msrb.mxu2 %v2645_v15 }
  0x92   : > { %1703 = vmatpush.bf16.msrb.mxu3 %v2653_v16 }
  0x93   : > { %1665 = vmatpush.bf16.msrb.mxu0 %v2628_v17 }
  0x94   : > { %1678 = vmatpush.bf16.msrb.mxu1 %v2636_v18 }
  0x95   : > { %1691 = vmatpush.bf16.msrb.mxu2 %v2644_v20 }
  0x96   : > { %1704 = vmatpush.bf16.msrb.mxu3 %v2652_v23  ;;  %1666 = vmatmul.bf16.vlgmr.msrb.gmra.mxu0 %v562_v10 }
  0x97   : > { %1710 = vmatpush.bf16.msra.mxu0 %v2667_v19  ;;  %1679 = vmatmul.bf16.vlgmr.msrb.gmra.mxu1 %v563_v12 }
  0x98   : > { %1723 = vmatpush.bf16.msra.mxu1 %v2675_v21  ;;  %1692 = vmatmul.bf16.vlgmr.msrb.gmra.mxu2 %v564_v11 }
  0x99   : > { %1736 = vmatpush.bf16.msra.mxu2 %v2683_v22  ;;  %1705 = vmatmul.bf16.vlgmr.msrb.gmra.mxu3 %v565_v13 }
  0x9b   : > { %1711 = vmatpush.bf16.msra.mxu0 %v2666_v24 }
  0x9c   : > { %1724 = vmatpush.bf16.msra.mxu1 %v2674_v25 }
  0x9d   : > { %1737 = vmatpush.bf16.msra.mxu2 %v2682_v26 }
  0x9f   : > { %1712 = vmatpush.bf16.msra.mxu0 %v2665_v27 }
  0xa0   : > { %1725 = vmatpush.bf16.msra.mxu1 %v2673_v28 }
  0xa1   : > { %1738 = vmatpush.bf16.msra.mxu2 %v2681_v29 }
  0xa3   : > { %1713 = vmatpush.bf16.msra.mxu0 %v2664_v30 }
  0xa4   : > { %1726 = vmatpush.bf16.msra.mxu1 %v2672_v31 }
  0xa5   : > { %1739 = vmatpush.bf16.msra.mxu2 %v2680_v32 }
  0xa7   : > { %1714 = vmatpush.bf16.msra.mxu0 %v2663_v33 }
  0xa8   : > { %1727 = vmatpush.bf16.msra.mxu1 %v2671_v34 }
  0xa9   : > { %1740 = vmatpush.bf16.msra.mxu2 %v2679_v35  ;;  %v238_v35 = vld [vmem:[#allocation2] sm:$0x3] }
  0xab   : > { %1715 = vmatpush.bf16.msra.mxu0 %v2662_v36 }
  0xac   : > { %1728 = vmatpush.bf16.msra.mxu1 %v2670_v37 }
  0xad   : > { %1741 = vmatpush.bf16.msra.mxu2 %v2678_v38 }
  0xaf   : > { %1716 = vmatpush.bf16.msra.mxu0 %v2661_v39 }
  0xb0   : > { %1729 = vmatpush.bf16.msra.mxu1 %v2669_v40 }
  0xb1   : > { %1742 = vmatpush.bf16.msra.mxu2 %v2677_v41 }
  0xb3   : > { %1717 = vmatpush.bf16.msra.mxu0 %v2660_v42  ;;  %v1511_v48 = vpop.f32.mrf.mxu0 }
  0xb4   : > { %1730 = vmatpush.bf16.msra.mxu1 %v2668_v43  ;;  %v1524_v49 = vpop.f32.mrf.mxu1 }
  0xb5   : > { %1743 = vmatpush.bf16.msra.mxu2 %v2676_v44  ;;  %v1525_v50 = vadd.f32 %v1524_v49, %v1511_v48 }
  0xb6   : > { %1718 = vmatmul.bf16.vlgmr.msra.gmra.mxu0 %v568_v45 }
  0xb7   : > { %1731 = vmatmul.bf16.vlgmr.msra.gmra.mxu1 %v569_v46 }
  0xb8   : > { %1744 = vmatmul.bf16.vlgmr.msra.gmra.mxu2 %v570_v47 }
  0xbb   : > { %v1537_v51 = vpop.f32.mrf.mxu2  ;;  %v1513_v53 = vpop.f32.mrf.mxu0 }
  0xbc   : > { %v1538_v52 = vadd.f32 %v1537_v51, %v1525_v50  ;;  %v1550_v54 = vpop.f32.mrf.mxu3  ;;  %v1526_v55 = vpop.f32.mrf.mxu1 }
  0xbe   : > { %v1551_v56 = vadd.f32 %v1550_v54, %v1538_v52 }
  0xc3   : > { %v1539_v57 = vpop.f32.mrf.mxu2 }
  0xc4   : > { %v1552_v58 = vpop.f32.mrf.mxu3 }
  0xd3   : > { %v1563_v59 = vpop.f32.mrf.mxu0 }
  0xd4   : > { %v1576_v60 = vpop.f32.mrf.mxu1  ;;  %v1564_v61 = vadd.f32 %v1563_v59, %v1551_v56 }
  0xd6   : > { %v1577_v62 = vadd.f32 %v1576_v60, %v1564_v61 }
  0xdb   : > { %v1589_v63 = vpop.f32.mrf.mxu2  ;;  %v1565_v2 = vpop.f32.mrf.mxu0 }
  0xdc   : > { %v1590_v0 = vadd.f32 %v1589_v63, %v1577_v62  ;;  %v1602_v1 = vpop.f32.mrf.mxu3  ;;  %v1578_v4 = vpop.f32.mrf.mxu1 }
  0xde   : > { %v1603_v3 = vadd.f32 %v1602_v1, %v1590_v0 }
  0xe3   : > { %v1591_v5 = vpop.f32.mrf.mxu2 }
  0xe4   : > { %v1604_v6 = vpop.f32.mrf.mxu3 }
  0xf3   : > { %v1615_v7 = vpop.f32.mrf.mxu0 }
  0xf4   : > { %v1628_v8 = vpop.f32.mrf.mxu1  ;;  %v1616_v17 = vadd.f32 %v1615_v7, %v1603_v3 }
  0xf6   : > { %v1629_v22 = vadd.f32 %v1628_v8, %v1616_v17 }
  0xfb   : > { %v1641_v9 = vpop.f32.mrf.mxu2  ;;  %v1617_v10 = vpop.f32.mrf.mxu0 }
  0xfc   : > { %v1654_v11 = vpop.f32.mrf.mxu3  ;;  %v1630_v12 = vpop.f32.mrf.mxu1  ;;  %v1642_v23 = vadd.f32 %v1641_v9, %v1629_v22 }
  0xfe   : > { %v1655_v26 = vadd.f32 %v1654_v11, %v1642_v23 }
 0x103   : > { %v1643_v13 = vpop.f32.mrf.mxu2 }
 0x104   : > { %v1656_v14 = vpop.f32.mrf.mxu3 }
 0x113   : > { %v1667_v15 = vpop.f32.mrf.mxu0 }
 0x114   : > { %v1680_v16 = vpop.f32.mrf.mxu1  ;;  %v1668_v27 = vadd.f32 %v1667_v15, %v1655_v26 }
 0x116   : > { %v1681_v28 = vadd.f32 %v1680_v16, %v1668_v27 }
 0x11b   : > { %v1693_v18 = vpop.f32.mrf.mxu2  ;;  %v1669_v20 = vpop.f32.mrf.mxu0 }
 0x11c   : > { %v1706_v19 = vpop.f32.mrf.mxu3  ;;  %v1682_v21 = vpop.f32.mrf.mxu1  ;;  %v1694_v29 = vadd.f32 %v1693_v18, %v1681_v28 }
 0x11e   : > { %v1707_v31 = vadd.f32 %v1706_v19, %v1694_v29 }
 0x123   : > { %v1695_v24 = vpop.f32.mrf.mxu2 }
 0x124   : > { %v1708_v25 = vpop.f32.mrf.mxu3 }
 0x133   : > { %v1719_v30 = vpop.f32.mrf.mxu0 }
 0x134   : > { %v1732_v32 = vpop.f32.mrf.mxu1  ;;  %v1720_v33 = vadd.f32 %v1719_v30, %v1707_v31 }
 0x136   : > { %v1733_v34 = vadd.f32 %v1732_v32, %v1720_v33 }
 0x13b   : > { %v1745_v36 = vpop.f32.mrf.mxu2  ;;  %v1721_v37 = vpop.f32.mrf.mxu0 }
 0x13c   : > { %v1746_v38 = vadd.f32 %v1745_v36, %v1733_v34  ;;  %v1734_v39 = vpop.f32.mrf.mxu1 }
 0x13e   : > { %v1749_v40 = vadd.f32 %v1746_v38, %v238_v35 }
 0x13f   : > { %1754 = sbr.rel (%p2497_p6) target bundleno = 490 (0x1ea), region = 48 }
 0x140   : > { %1750 = vst [vmem:[#allocation2] sm:$0x3] %v1749_v40 }
 0x143   : > { %v1747_v41 = vpop.f32.mrf.mxu2 }
 0x144   : > { %v2691_v42 = vld [vmem:[%s2963_s3 + $0x38] sm:$0xff]  ;;  %v2690_v43 = vld [vmem:[%s2963_s3 + $0x30] sm:$0xff]  ;;  %v2689_v44 = vld [vmem:[%s2963_s3 + $0x28] sm:$0xff]  ;;  %vm1844_vm0 = vcmask 1024  }
 0x145   : > { %1831 = vmatpush.bf16.msra.mxu0 %v2691_v42  ;;  %v2688_v45 = vld [vmem:[%s2963_s3 + $0x20] sm:$0xff]  ;;  %v2687_v46 = vld [vmem:[%s2963_s3 + $0x18] sm:$0xff]  ;;  %v2686_v48 = vld [vmem:[%s2963_s3 + $0x10] sm:$0xff] }
 0x146   : > { %v2701_v47 = vld [vmem:[%s2962_s2] ss:$0 sm:$0xff]  ;;  %v2685_v51 = vld [vmem:[%s2963_s3 + $0x8] sm:$0xff] }
 0x147   : > { %v1755_v49 = vld [vmem:[#allocation2] sm:$0x3]  ;;  %v2684_v53 = vld [vmem:[%s2963_s3] sm:$0xff]  ;;  %v2702_v55 = vld [vmem:[#allocation3] ss:$0 sm:$0xff] }
 0x148   : > { %v1760_v50 = vadd.f32 %v2701_v47, %v1755_v49 }
 0x149   : > { %1832 = vmatpush.bf16.msra.mxu0 %v2690_v43 }
 0x14a   : > { %v1761_v52 = vmax.f32 %v1760_v50, 0.0 }
 0x14c   : > { %v1762_v54 = vpack.c.bf16 %v1761_v52, %v1761_v52 }
 0x14d   : > { %1833 = vmatpush.bf16.msra.mxu0 %v2689_v44 }
 0x151   : > { %1834 = vmatpush.bf16.msra.mxu0 %v2688_v45 }
 0x155   : > { %1835 = vmatpush.bf16.msra.mxu0 %v2687_v46 }
 0x159   : > { %1836 = vmatpush.bf16.msra.mxu0 %v2686_v48 }
 0x15d   : > { %1837 = vmatpush.bf16.msra.mxu0 %v2685_v51 }
 0x161   : > { %1838 = vmatpush.bf16.msra.mxu0 %v2684_v53 }
 0x164   : > { %1839 = vmatmul.bf16.vlgmr.msra.gmra.mxu0 %v1762_v54 }
 0x1e1   : > { %v1840_v56 = vpop.f32.mrf.mxu0 }
 0x1e2   : > { %v1841_v57 = vadd.f32 %v2702_v55, %v1840_v56 }
 0x1e4   : > { %1845 = vst.msk [vmem:[%s2965_s5] sm:$0x3] %vm1844_vm0, %v1841_v57 }
 0x1e9   : > { %v1842_v58 = vpop.f32.mrf.mxu0 }
 0x1ea PF: > { %s17_s20 = sadd.s32 1, %s2709_s20  }
 0x1eb   : > { %p14_p7 = scmp.ge.s32.totalorder %s17_s20, 7  }
 0x1ed   :  { %16 = sbr.rel (!%p14_p7) target bundleno = 3 (0x3), region = 77 }

</bundles_post_ra>
